<compile_context>
chip_gen: v7x
topology: tpu7x:2x2x1
jax: 0.10.0
libtpu: 0.0.40
codegen_flags: <defaults>
</compile_context>

<pallas_src>
import functools

import jax
import jax.numpy as jnp
import numpy as np
from jax import lax
from jax.experimental import pallas as pl
from jax.experimental.pallas import tpu as pltpu


# ------------------------------ fused kernel --------------------------------

def _bottleneck_kernel(xp_ref, mask_ref, w1_ref, b1_ref, w2_ref, b2_ref,
                       w3_ref, b3_ref, o_ref, col_ref, *, H, W, Nb, R0):
    """One grid step = Nb images.

    xp_ref  : (Nb, Np, Cin) bf16  spatially zero-padded, flattened input, Np=(H+2)*(W+2)
    mask_ref: (Np, 1)       f32   1.0 on interior positions, 0.0 on the 1-pixel border
    w1_ref  : (Cin, P)      bf16  conv1 weight with bn1 scale folded in
    b1_ref  : (1, P)        f32   bn1 bias
    w2_ref  : (9*P, P)      bf16  conv2 weight as im2col matrix ((kh,kw,cin)-major rows)
    b2_ref  : (1, P)        f32   bn2 bias
    w3_ref  : (P, Cout)     bf16  conv3 weight with bn3 scale folded in
    b3_ref  : (1, Cout)     f32   bn3 bias
    o_ref   : (Nb, H*W, Cout)
    col_ref : VMEM scratch (R0+Np, 9*P) f32 -- shifted im2col staging buffer
    """
    Wp = W + 2
    Np = (H + 2) * Wp                 # padded positions per image
    M = H * Wp                        # stage-2/3 rows (incl. 2 junk columns per row)
    P = w1_ref.shape[1]

    offs = [dh * Wp + dw for dh in range(3) for dw in range(3)]
    f32 = jnp.float32

    for b in range(Nb):                                    # unrolled at trace time
        # ---- stage 1: 1x1 conv + bn1 + relu on every padded position ----------
        y1 = jnp.dot(xp_ref[b], w1_ref[...], preferred_element_type=f32)
        y1 = jnp.maximum(y1 + b1_ref[...], 0.0)
        # Zero the 1-pixel border: the 3x3 conv pads relu(bn1(conv1(x))), not x.
        y1 = y1 * mask_ref[...]                            # (Np, P)

        # ---- build the im2col operand with 9 shifted stores --------------------
        # After the stores, col_ref[R0 + m, k*P + c] == y1[m + offs[k], c], so rows
        # [R0, R0+M) hold the (M, 9P) patch of the 3x3 conv as one aligned load.
        # Tap k=8 reads 2 rows it never writes; they only ever feed the junk columns
        # dropped below, but zero them anyway so results are deterministic.
        col_ref[R0 + M - 2:R0 + M, :] = jnp.zeros((2, 9 * P), f32)
        for k, off in enumerate(offs):
            col_ref[R0 - off:R0 - off + Np, k * P:(k + 1) * P] = y1

        # ---- stage 2: 3x3 conv as ONE matmul (K = 9P) + bn2 + relu --------------
        patch = col_ref[R0:R0 + M, :].astype(jnp.bfloat16)        # (M, 9P)
        y2 = jnp.dot(patch, w2_ref[...], preferred_element_type=f32)
        y2 = jnp.maximum(y2 + b2_ref[...], 0.0)                   # (M, P)

        # ---- stage 3: 1x1 conv + bn3 + residual add + relu ----------------------
        y3 = jnp.dot(y2.astype(jnp.bfloat16), w3_ref[...],
                     preferred_element_type=f32)                  # (M, Cout)
        resid = xp_ref[b, Wp + 1:Wp + 1 + M, :].astype(f32)       # re-read at use
        y3 = jnp.maximum(y3 + b3_ref[...] + resid, 0.0)

        # ---- drop the 2 junk columns per image row; lane-dense (Cout-wide) store
        for i in range(H):
            o_ref[b, i * W:(i + 1) * W, :] = (
                y3[i * Wp:i * Wp + W, :].astype(o_ref.dtype))


# ------------------------------ glue helpers ---------------------------------

def _bn_fold(gamma, beta, mean, var, eps=1e-5):
    scale = (gamma / jnp.sqrt(var + eps)).astype(jnp.float32)
    bias = (beta - mean * scale).astype(jnp.float32)
    return scale[None, :], bias[None, :]


def _round_up(x, m):
    return (x + m - 1) // m * m


def _pick_block_images(n, per_image_bytes, vmem_cap):
    """Largest Nb dividing n s.t. blocks stay small and each core keeps >=2 grid steps."""
    budget = vmem_cap // 4                    # double-buffered in+out blocks share VMEM
    min_steps = 4 if n >= 4 else max(n, 1)
    best = 1
    for nb in range(1, n + 1):
        if n % nb:
            continue
        if n // nb < min_steps:
            continue
        if 2 * nb * per_image_bytes > budget:
            continue
        best = nb
    return best


# ------------------------------ Bottleneck ------------------------------------

def bottleneck_forward_nhwc(x_nhwc, params, *, block_images=None):
    """Fused Bottleneck forward, NHWC in/out (stride=1, downsample=None path)."""
    N, H, W, Cin = x_nhwc.shape
    P = params["w1"].shape[1]
    Cout = params["w3"].shape[1]
    assert Cin == Cout, "stride=1 / downsample=None requires inplanes == planes * expansion"

    out_dtype = x_nhwc.dtype
    mxu_dtype = jnp.bfloat16

    s1, b1 = _bn_fold(*params["bn1"])
    s2, b2 = _bn_fold(*params["bn2"])
    s3, b3 = _bn_fold(*params["bn3"])
    # Fold BN scale into the conv weights; feed the MXU bf16, keep the f32 epilogue.
    w1f = (params["w1"] * s1).astype(mxu_dtype)
    w2f = (params["w2col"] * s2).astype(mxu_dtype)
    w3f = (params["w3"] * s3).astype(mxu_dtype)

    Wp, Np, HW = W + 2, (H + 2) * (W + 2), H * W
    R0 = _round_up(2 * Wp + 2, 8)             # aligned start row of the im2col window
    SROWS = R0 + Np

    # Spatially zero-pad + flatten + cast once in XLA (layout plumbing only); the kernel
    # then only needs full-tile / sublane-offset loads of x.
    xp = jnp.pad(x_nhwc, ((0, 0), (1, 1), (1, 1), (0, 0)))
    xp = xp.reshape(N, Np, Cin).astype(mxu_dtype)

    # Static interior mask for the conv1 output (applied post-ReLU in the kernel).
    m_np = np.zeros((H + 2, W + 2), np.float32)
    m_np[1:H + 1, 1:W + 1] = 1.0
    border_mask = jnp.asarray(m_np.reshape(Np, 1))

    # Per-chip VMEM budget (v5e/v6e: 128 MiB, v7x: 64 MiB per TensorCore).
    try:
        vmem_cap = int(pltpu.get_tpu_info().vmem_capacity_bytes)
    except Exception:
        vmem_cap = 64 << 20

    bytes_mxu = jnp.dtype(mxu_dtype).itemsize
    bytes_out = jnp.dtype(out_dtype).itemsize
    per_image_io = Np * Cin * bytes_mxu + HW * Cout * bytes_out
    Nb = block_images if block_images is not None else _pick_block_images(
        N, per_image_io, vmem_cap)
    assert N % Nb == 0

    weight_bytes = ((w1f.size + w2f.size + w3f.size) * bytes_mxu
                    + (b1.size + b2.size + b3.size + Np) * 4)
    scratch_bytes = SROWS * 9 * P * 4
    live_bytes = (H * Wp) * (9 * P + 2 * Cout + 2 * P) * 4      # in-kernel intermediates
    need = 2 * (Nb * per_image_io + weight_bytes) + scratch_bytes + live_bytes + (4 << 20)
    vmem_limit = int(min(max(need, 16 << 20), (vmem_cap * 3) // 4))

    flops = 2 * N * (Np * Cin * P + H * Wp * 9 * P * P + H * Wp * P * Cout)
    bytes_accessed = int(N * per_image_io + weight_bytes)

    kernel = functools.partial(_bottleneck_kernel, H=H, W=W, Nb=Nb, R0=R0)

    out_flat = pl.pallas_call(
        kernel,
        out_shape=jax.ShapeDtypeStruct((N, HW, Cout), out_dtype),
        grid=(N // Nb,),
        in_specs=[
            pl.BlockSpec((Nb, Np, Cin), lambda g: (g, 0, 0)),
            # Constant operands below: same block every step (stay VMEM-resident).
            pl.BlockSpec((Np, 1), lambda g: (0, 0)),
            pl.BlockSpec((Cin, P), lambda g: (0, 0)),
            pl.BlockSpec((1, P), lambda g: (0, 0)),
            pl.BlockSpec((9 * P, P), lambda g: (0, 0)),
            pl.BlockSpec((1, P), lambda g: (0, 0)),
            pl.BlockSpec((P, Cout), lambda g: (0, 0)),
            pl.BlockSpec((1, Cout), lambda g: (0, 0)),
        ],
        out_specs=pl.BlockSpec((Nb, HW, Cout), lambda g: (g, 0, 0)),
        scratch_shapes=[pltpu.VMEM((SROWS, 9 * P), jnp.float32)],
        compiler_params=pltpu.CompilerParams(
            dimension_semantics=("parallel",),
            vmem_limit_bytes=vmem_limit),
        cost_estimate=pl.CostEstimate(flops=flops, transcendentals=0,
                                      bytes_accessed=bytes_accessed),
    )(xp, border_mask, w1f, b1, w2f, b2, w3f, b3)

    return out_flat.reshape(N, H, W, Cout)


def bottleneck_forward(x_nchw, params, *, block_images=None):
    """NCHW interface matching the PyTorch module (transpose glue only; prefer the
    NHWC entry point when the surrounding graph is already channels-last)."""
    x_nhwc = jnp.transpose(x_nchw, (0, 2, 3, 1))
    out = bottleneck_forward_nhwc(x_nhwc, params, block_images=block_images)
    return jnp.transpose(out, (0, 3, 1, 2))


# ------------------------------ references ------------------------------------

def _bottleneck_reference_f32(x_nchw, params):
    """Pure-JAX NCHW reference mirroring the PyTorch module (inference BN), full f32."""
    def bn(x, gamma, beta, mean, var, eps=1e-5):
        inv = gamma / jnp.sqrt(var + eps)
        return x * inv[None, :, None, None] + (beta - mean * inv)[None, :, None, None]

    dn = ("NCHW", "OIHW", "NCHW")
    planes = params["w1"].shape[1]

    w1_pt = jnp.transpose(params["w1"], (1, 0))[:, :, None, None]
    w2_pt = jnp.transpose(params["w2col"].reshape(3, 3, planes, planes), (3, 2, 0, 1))
    w3_pt = jnp.transpose(params["w3"], (1, 0))[:, :, None, None]

    out = lax.conv_general_dilated(x_nchw, w1_pt, (1, 1), "VALID", dimension_numbers=dn)
    out = jax.nn.relu(bn(out, *params["bn1"]))
    out = lax.conv_general_dilated(out, w2_pt, (1, 1), ((1, 1), (1, 1)), dimension_numbers=dn)
    out = jax.nn.relu(bn(out, *params["bn2"]))
    out = lax.conv_general_dilated(out, w3_pt, (1, 1), "VALID", dimension_numbers=dn)
    out = bn(out, *params["bn3"])
    return jax.nn.relu(out + x_nchw)


def _bottleneck_reference_mxu(x_nchw, params):
    """Reference applying the kernel's precision policy (BN folded into bf16 weights,
    bf16 conv operands, f32 accumulation / epilogue) -- used for the tight check."""
    dn = ("NCHW", "OIHW", "NCHW")
    P = params["w1"].shape[1]
    s1, b1 = _bn_fold(*params["bn1"])
    s2, b2 = _bn_fold(*params["bn2"])
    s3, b3 = _bn_fold(*params["bn3"])
    w1 = jnp.transpose(params["w1"] * s1, (1, 0))[:, :, None, None]
    w2 = jnp.transpose((params["w2col"] * s2).reshape(3, 3, P, P), (3, 2, 0, 1))
    w3 = jnp.transpose(params["w3"] * s3, (1, 0))[:, :, None, None]

    def conv(x, w, pad):
        return lax.conv_general_dilated(
            x.astype(jnp.bfloat16), w.astype(jnp.bfloat16), (1, 1), pad,
            dimension_numbers=dn, preferred_element_type=jnp.float32)

    def bias(y, b):
        return y + b[0][None, :, None, None]

    out = jax.nn.relu(bias(conv(x_nchw, w1, "VALID"), b1))
    out = jax.nn.relu(bias(conv(out, w2, ((1, 1), (1, 1))), b2))
    out = bias(conv(out, w3, "VALID"), b3)
    resid = x_nchw.astype(jnp.bfloat16).astype(jnp.float32)
    return jax.nn.relu(out + resid)


# --------------------------------- main ----------------------------------------

if __name__ == "__main__":
    key = jax.random.PRNGKey(0)

    planes = 32
    expansion = 4
    inplanes = planes * expansion          # 128 -> lane-dense residual / output channels
    N, H, W = 8, 16, 16                    # 4 grid steps -> >=2 pipelined steps per core

    ks = jax.random.split(key, 8)
    x = jax.random.normal(ks[0], (N, inplanes, H, W), jnp.float32)

    def bn_params(k, c):
        k1, k2, k3, k4 = jax.random.split(k, 4)
        gamma = 1.0 + 0.1 * jax.random.normal(k1, (c,), jnp.float32)
        beta = 0.1 * jax.random.normal(k2, (c,), jnp.float32)
        mean = 0.1 * jax.random.normal(k3, (c,), jnp.float32)
        var = jnp.abs(jax.random.normal(k4, (c,), jnp.float32)) + 0.5
        return (gamma, beta, mean, var)

    params = {
        # matmul-layout conv weights: (Cin, Cout); (9*Cin, Cout) for the 3x3, rows in
        # (kh, kw, cin)-major order.
        "w1": 0.1 * jax.random.normal(ks[1], (inplanes, planes), jnp.float32),
        "w2col": 0.1 * jax.random.normal(ks[2], (9 * planes, planes), jnp.float32),
        "w3": 0.1 * jax.random.normal(ks[3], (planes, planes * expansion), jnp.float32),
        "bn1": bn_params(ks[4], planes),
        "bn2": bn_params(ks[5], planes),
        "bn3": bn_params(ks[6], planes * expansion),
    }

    fwd = jax.jit(lambda xx: bottleneck_forward(xx, params))
    out = jax.block_until_ready(fwd(x))
    assert out.shape == (N, inplanes, H, W)

    # Tight check: reference with the same bf16-operand / f32-accumulate precision policy.
    ref_mxu = jax.block_until_ready(_bottleneck_reference_mxu(x, params))
    np.testing.assert_allclose(np.asarray(out), np.asarray(ref_mxu), rtol=5e-3, atol=5e-3)

    # Loose sanity check against the unfused full-f32 reference (bf16 MXU rounding only).
    ref_f32 = jax.block_until_ready(_bottleneck_reference_f32(x, params))
    np.testing.assert_allclose(np.asarray(out), np.asarray(ref_f32), rtol=1.5e-1, atol=1.5e-1)

    print("KERNEL_OK")
</pallas_src>

<mosaic_0001>
module attributes {stable_mosaic.version = 11 : i64} {
  func.func @_bottleneck_kernel(%arg0: i32, %arg1: memref<2x324x128xbf16, #tpu.memory_space<vmem>>, %arg2: memref<324x1xf32, #tpu.memory_space<vmem>>, %arg3: memref<128x32xbf16, #tpu.memory_space<vmem>>, %arg4: memref<1x32xf32, #tpu.memory_space<vmem>>, %arg5: memref<288x32xbf16, #tpu.memory_space<vmem>>, %arg6: memref<1x32xf32, #tpu.memory_space<vmem>>, %arg7: memref<32x128xbf16, #tpu.memory_space<vmem>>, %arg8: memref<1x128xf32, #tpu.memory_space<vmem>>, %arg9: memref<2x256x128xf32, #tpu.memory_space<vmem>>, %arg10: memref<364x288xf32, #tpu.memory_space<vmem>>) attributes {dimension_semantics = [#tpu.dimension_semantics<parallel>], iteration_bounds = array<i64: 4>, scalar_prefetch = 0 : i64, scratch_operands = 1 : i64, tpu.core_type = #tpu.core_type<tc>, window_params = [{transform_indices = @transform_0, window_bounds = array<i64: 2, 324, 128>}, {pipeline_mode = #tpu.pipeline_mode<synchronous>, transform_indices = @transform_1, window_bounds = array<i64: 324, 1>}, {pipeline_mode = #tpu.pipeline_mode<synchronous>, transform_indices = @transform_2, window_bounds = array<i64: 128, 32>}, {pipeline_mode = #tpu.pipeline_mode<synchronous>, transform_indices = @transform_3, window_bounds = array<i64: 1, 32>}, {pipeline_mode = #tpu.pipeline_mode<synchronous>, transform_indices = @transform_4, window_bounds = array<i64: 288, 32>}, {pipeline_mode = #tpu.pipeline_mode<synchronous>, transform_indices = @transform_5, window_bounds = array<i64: 1, 32>}, {pipeline_mode = #tpu.pipeline_mode<synchronous>, transform_indices = @transform_6, window_bounds = array<i64: 32, 128>}, {pipeline_mode = #tpu.pipeline_mode<synchronous>, transform_indices = @transform_7, window_bounds = array<i64: 1, 128>}, {transform_indices = @transform_8, window_bounds = array<i64: 2, 256, 128>}]} {
    %c0 = arith.constant 0 : index
    %c0_0 = arith.constant 0 : index
    %c0_1 = arith.constant 0 : index
    %0 = vector.load %arg1[%c0, %c0_0, %c0_1] : memref<2x324x128xbf16, #tpu.memory_space<vmem>>, vector<1x324x128xbf16>
    %1 = vector.shape_cast %0 : vector<1x324x128xbf16> to vector<324x128xbf16>
    %c0_2 = arith.constant 0 : index
    %c0_3 = arith.constant 0 : index
    %2 = vector.load %arg3[%c0_2, %c0_3] : memref<128x32xbf16, #tpu.memory_space<vmem>>, vector<128x32xbf16>
    %cst = arith.constant dense<0.000000e+00> : vector<324x32xf32>
    %3 = tpu.matmul %1, %2, %cst {dimension_numbers = #tpu.dot_dimension_numbers<[1], [0], [0], [1], [0, 0, 1, 1], [], []>} : vector<324x128xbf16>, vector<128x32xbf16>, vector<324x32xf32> -> vector<324x32xf32>
    %c0_4 = arith.constant 0 : index
    %c0_5 = arith.constant 0 : index
    %4 = vector.load %arg4[%c0_4, %c0_5] : memref<1x32xf32, #tpu.memory_space<vmem>>, vector<1x32xf32>
    %5 = vector.broadcast %4 : vector<1x32xf32> to vector<324x32xf32>
    %6 = arith.addf %3, %5 : vector<324x32xf32>
    %cst_6 = arith.constant 0.000000e+00 : f32
    %7 = vector.broadcast %cst_6 : f32 to vector<324x32xf32>
    %8 = arith.maximumf %6, %7 : vector<324x32xf32>
    %c0_7 = arith.constant 0 : index
    %c0_8 = arith.constant 0 : index
    %9 = vector.load %arg2[%c0_7, %c0_8] : memref<324x1xf32, #tpu.memory_space<vmem>>, vector<324x1xf32>
    %10 = vector.broadcast %9 : vector<324x1xf32> to vector<324x32xf32>
    %11 = arith.mulf %8, %10 : vector<324x32xf32>
    %cst_9 = arith.constant 0.000000e+00 : f32
    %12 = vector.broadcast %cst_9 : f32 to vector<2x288xf32>
    %c326 = arith.constant 326 : index
    %c0_10 = arith.constant 0 : index
    %13 = vector.load %arg10[%c326, %c0_10] : memref<364x288xf32, #tpu.memory_space<vmem>>, vector<2x288xf32>
    tpu.vector_store %arg10[%c326, %c0_10], %12 {strides = array<i32>} : memref<364x288xf32, #tpu.memory_space<vmem>>, vector<2x288xf32>,
    %c40 = arith.constant 40 : index
    %c0_11 = arith.constant 0 : index
    %14 = vector.load %arg10[%c40, %c0_11] : memref<364x288xf32, #tpu.memory_space<vmem>>, vector<324x32xf32>
    tpu.vector_store %arg10[%c40, %c0_11], %11 {strides = array<i32>} : memref<364x288xf32, #tpu.memory_space<vmem>>, vector<324x32xf32>,
    %c39 = arith.constant 39 : index
    %c32 = arith.constant 32 : index
    %15 = vector.load %arg10[%c39, %c32] : memref<364x288xf32, #tpu.memory_space<vmem>>, vector<324x32xf32>
    tpu.vector_store %arg10[%c39, %c32], %11 {strides = array<i32>} : memref<364x288xf32, #tpu.memory_space<vmem>>, vector<324x32xf32>,
    %c38 = arith.constant 38 : index
    %c64 = arith.constant 64 : index
    %16 = vector.load %arg10[%c38, %c64] : memref<364x288xf32, #tpu.memory_space<vmem>>, vector<324x32xf32>
    tpu.vector_store %arg10[%c38, %c64], %11 {strides = array<i32>} : memref<364x288xf32, #tpu.memory_space<vmem>>, vector<324x32xf32>,
    %c22 = arith.constant 22 : index
    %c96 = arith.constant 96 : index
    %17 = vector.load %arg10[%c22, %c96] : memref<364x288xf32, #tpu.memory_space<vmem>>, vector<324x32xf32>
    tpu.vector_store %arg10[%c22, %c96], %11 {strides = array<i32>} : memref<364x288xf32, #tpu.memory_space<vmem>>, vector<324x32xf32>,
    %c21 = arith.constant 21 : index
    %c128 = arith.constant 128 : index
    %18 = vector.load %arg10[%c21, %c128] : memref<364x288xf32, #tpu.memory_space<vmem>>, vector<324x32xf32>
    tpu.vector_store %arg10[%c21, %c128], %11 {strides = array<i32>} : memref<364x288xf32, #tpu.memory_space<vmem>>, vector<324x32xf32>,
    %c20 = arith.constant 20 : index
    %c160 = arith.constant 160 : index
    %19 = vector.load %arg10[%c20, %c160] : memref<364x288xf32, #tpu.memory_space<vmem>>, vector<324x32xf32>
    tpu.vector_store %arg10[%c20, %c160], %11 {strides = array<i32>} : memref<364x288xf32, #tpu.memory_space<vmem>>, vector<324x32xf32>,
    %c4 = arith.constant 4 : index
    %c192 = arith.constant 192 : index
    %20 = vector.load %arg10[%c4, %c192] : memref<364x288xf32, #tpu.memory_space<vmem>>, vector<324x32xf32>
    tpu.vector_store %arg10[%c4, %c192], %11 {strides = array<i32>} : memref<364x288xf32, #tpu.memory_space<vmem>>, vector<324x32xf32>,
    %c3 = arith.constant 3 : index
    %c224 = arith.constant 224 : index
    %21 = vector.load %arg10[%c3, %c224] : memref<364x288xf32, #tpu.memory_space<vmem>>, vector<324x32xf32>
    tpu.vector_store %arg10[%c3, %c224], %11 {strides = array<i32>} : memref<364x288xf32, #tpu.memory_space<vmem>>, vector<324x32xf32>,
    %c2 = arith.constant 2 : index
    %c256 = arith.constant 256 : index
    %22 = vector.load %arg10[%c2, %c256] : memref<364x288xf32, #tpu.memory_space<vmem>>, vector<324x32xf32>
    tpu.vector_store %arg10[%c2, %c256], %11 {strides = array<i32>} : memref<364x288xf32, #tpu.memory_space<vmem>>, vector<324x32xf32>,
    %c40_12 = arith.constant 40 : index
    %c0_13 = arith.constant 0 : index
    %23 = vector.load %arg10[%c40_12, %c0_13] : memref<364x288xf32, #tpu.memory_space<vmem>>, vector<288x288xf32>
    %24 = arith.truncf %23 : vector<288x288xf32> to vector<288x288xbf16>
    %c0_14 = arith.constant 0 : index
    %c0_15 = arith.constant 0 : index
    %25 = vector.load %arg5[%c0_14, %c0_15] : memref<288x32xbf16, #tpu.memory_space<vmem>>, vector<288x32xbf16>
    %cst_16 = arith.constant dense<0.000000e+00> : vector<288x32xf32>
    %26 = tpu.matmul %24, %25, %cst_16 {dimension_numbers = #tpu.dot_dimension_numbers<[1], [0], [0], [1], [0, 0, 1, 1], [], []>} : vector<288x288xbf16>, vector<288x32xbf16>, vector<288x32xf32> -> vector<288x32xf32>
    %c0_17 = arith.constant 0 : index
    %c0_18 = arith.constant 0 : index
    %27 = vector.load %arg6[%c0_17, %c0_18] : memref<1x32xf32, #tpu.memory_space<vmem>>, vector<1x32xf32>
    %28 = vector.broadcast %27 : vector<1x32xf32> to vector<288x32xf32>
    %29 = arith.addf %26, %28 : vector<288x32xf32>
    %cst_19 = arith.constant 0.000000e+00 : f32
    %30 = vector.broadcast %cst_19 : f32 to vector<288x32xf32>
    %31 = arith.maximumf %29, %30 : vector<288x32xf32>
    %32 = arith.truncf %31 : vector<288x32xf32> to vector<288x32xbf16>
    %c0_20 = arith.constant 0 : index
    %c0_21 = arith.constant 0 : index
    %33 = vector.load %arg7[%c0_20, %c0_21] : memref<32x128xbf16, #tpu.memory_space<vmem>>, vector<32x128xbf16>
    %cst_22 = arith.constant dense<0.000000e+00> : vector<288x128xf32>
    %34 = tpu.matmul %32, %33, %cst_22 {dimension_numbers = #tpu.dot_dimension_numbers<[1], [0], [0], [1], [0, 0, 1, 1], [], []>} : vector<288x32xbf16>, vector<32x128xbf16>, vector<288x128xf32> -> vector<288x128xf32>
    %c0_23 = arith.constant 0 : index
    %c19 = arith.constant 19 : index
    %c0_24 = arith.constant 0 : index
    %35 = vector.load %arg1[%c0_23, %c19, %c0_24] : memref<2x324x128xbf16, #tpu.memory_space<vmem>>, vector<1x288x128xbf16>
    %36 = vector.shape_cast %35 : vector<1x288x128xbf16> to vector<288x128xbf16>
    %37 = arith.extf %36 : vector<288x128xbf16> to vector<288x128xf32>
    %c0_25 = arith.constant 0 : index
    %c0_26 = arith.constant 0 : index
    %38 = vector.load %arg8[%c0_25, %c0_26] : memref<1x128xf32, #tpu.memory_space<vmem>>, vector<1x128xf32>
    %39 = vector.broadcast %38 : vector<1x128xf32> to vector<288x128xf32>
    %40 = arith.addf %34, %39 : vector<288x128xf32>
    %41 = arith.addf %40, %37 : vector<288x128xf32>
    %cst_27 = arith.constant 0.000000e+00 : f32
    %42 = vector.broadcast %cst_27 : f32 to vector<288x128xf32>
    %43 = arith.maximumf %41, %42 : vector<288x128xf32>
    %44 = vector.extract_strided_slice %43 {offsets = [0, 0], sizes = [16, 128], strides = [1, 1]} : vector<288x128xf32> to vector<16x128xf32>
    %c0_28 = arith.constant 0 : index
    %c0_29 = arith.constant 0 : index
    %c0_30 = arith.constant 0 : index
    %45 = vector.load %arg9[%c0_28, %c0_29, %c0_30] : memref<2x256x128xf32, #tpu.memory_space<vmem>>, vector<1x16x128xf32>
    %46 = vector.shape_cast %45 : vector<1x16x128xf32> to vector<16x128xf32>
    %47 = vector.shape_cast %44 : vector<16x128xf32> to vector<1x16x128xf32>
    tpu.vector_store %arg9[%c0_28, %c0_29, %c0_30], %47 {strides = array<i32>} : memref<2x256x128xf32, #tpu.memory_space<vmem>>, vector<1x16x128xf32>,
    %48 = vector.extract_strided_slice %43 {offsets = [18, 0], sizes = [16, 128], strides = [1, 1]} : vector<288x128xf32> to vector<16x128xf32>
    %c0_31 = arith.constant 0 : index
    %c16 = arith.constant 16 : index
    %c0_32 = arith.constant 0 : index
    %49 = vector.load %arg9[%c0_31, %c16, %c0_32] : memref<2x256x128xf32, #tpu.memory_space<vmem>>, vector<1x16x128xf32>
    %50 = vector.shape_cast %49 : vector<1x16x128xf32> to vector<16x128xf32>
    %51 = vector.shape_cast %48 : vector<16x128xf32> to vector<1x16x128xf32>
    tpu.vector_store %arg9[%c0_31, %c16, %c0_32], %51 {strides = array<i32>} : memref<2x256x128xf32, #tpu.memory_space<vmem>>, vector<1x16x128xf32>,
    %52 = vector.extract_strided_slice %43 {offsets = [36, 0], sizes = [16, 128], strides = [1, 1]} : vector<288x128xf32> to vector<16x128xf32>
    %c0_33 = arith.constant 0 : index
    %c32_34 = arith.constant 32 : index
    %c0_35 = arith.constant 0 : index
    %53 = vector.load %arg9[%c0_33, %c32_34, %c0_35] : memref<2x256x128xf32, #tpu.memory_space<vmem>>, vector<1x16x128xf32>
    %54 = vector.shape_cast %53 : vector<1x16x128xf32> to vector<16x128xf32>
    %55 = vector.shape_cast %52 : vector<16x128xf32> to vector<1x16x128xf32>
    tpu.vector_store %arg9[%c0_33, %c32_34, %c0_35], %55 {strides = array<i32>} : memref<2x256x128xf32, #tpu.memory_space<vmem>>, vector<1x16x128xf32>,
    %56 = vector.extract_strided_slice %43 {offsets = [54, 0], sizes = [16, 128], strides = [1, 1]} : vector<288x128xf32> to vector<16x128xf32>
    %c0_36 = arith.constant 0 : index
    %c48 = arith.constant 48 : index
    %c0_37 = arith.constant 0 : index
    %57 = vector.load %arg9[%c0_36, %c48, %c0_37] : memref<2x256x128xf32, #tpu.memory_space<vmem>>, vector<1x16x128xf32>
    %58 = vector.shape_cast %57 : vector<1x16x128xf32> to vector<16x128xf32>
    %59 = vector.shape_cast %56 : vector<16x128xf32> to vector<1x16x128xf32>
    tpu.vector_store %arg9[%c0_36, %c48, %c0_37], %59 {strides = array<i32>} : memref<2x256x128xf32, #tpu.memory_space<vmem>>, vector<1x16x128xf32>,
    %60 = vector.extract_strided_slice %43 {offsets = [72, 0], sizes = [16, 128], strides = [1, 1]} : vector<288x128xf32> to vector<16x128xf32>
    %c0_38 = arith.constant 0 : index
    %c64_39 = arith.constant 64 : index
    %c0_40 = arith.constant 0 : index
    %61 = vector.load %arg9[%c0_38, %c64_39, %c0_40] : memref<2x256x128xf32, #tpu.memory_space<vmem>>, vector<1x16x128xf32>
    %62 = vector.shape_cast %61 : vector<1x16x128xf32> to vector<16x128xf32>
    %63 = vector.shape_cast %60 : vector<16x128xf32> to vector<1x16x128xf32>
    tpu.vector_store %arg9[%c0_38, %c64_39, %c0_40], %63 {strides = array<i32>} : memref<2x256x128xf32, #tpu.memory_space<vmem>>, vector<1x16x128xf32>,
    %64 = vector.extract_strided_slice %43 {offsets = [90, 0], sizes = [16, 128], strides = [1, 1]} : vector<288x128xf32> to vector<16x128xf32>
    %c0_41 = arith.constant 0 : index
    %c80 = arith.constant 80 : index
    %c0_42 = arith.constant 0 : index
    %65 = vector.load %arg9[%c0_41, %c80, %c0_42] : memref<2x256x128xf32, #tpu.memory_space<vmem>>, vector<1x16x128xf32>
    %66 = vector.shape_cast %65 : vector<1x16x128xf32> to vector<16x128xf32>
    %67 = vector.shape_cast %64 : vector<16x128xf32> to vector<1x16x128xf32>
    tpu.vector_store %arg9[%c0_41, %c80, %c0_42], %67 {strides = array<i32>} : memref<2x256x128xf32, #tpu.memory_space<vmem>>, vector<1x16x128xf32>,
    %68 = vector.extract_strided_slice %43 {offsets = [108, 0], sizes = [16, 128], strides = [1, 1]} : vector<288x128xf32> to vector<16x128xf32>
    %c0_43 = arith.constant 0 : index
    %c96_44 = arith.constant 96 : index
    %c0_45 = arith.constant 0 : index
    %69 = vector.load %arg9[%c0_43, %c96_44, %c0_45] : memref<2x256x128xf32, #tpu.memory_space<vmem>>, vector<1x16x128xf32>
    %70 = vector.shape_cast %69 : vector<1x16x128xf32> to vector<16x128xf32>
    %71 = vector.shape_cast %68 : vector<16x128xf32> to vector<1x16x128xf32>
    tpu.vector_store %arg9[%c0_43, %c96_44, %c0_45], %71 {strides = array<i32>} : memref<2x256x128xf32, #tpu.memory_space<vmem>>, vector<1x16x128xf32>,
    %72 = vector.extract_strided_slice %43 {offsets = [126, 0], sizes = [16, 128], strides = [1, 1]} : vector<288x128xf32> to vector<16x128xf32>
    %c0_46 = arith.constant 0 : index
    %c112 = arith.constant 112 : index
    %c0_47 = arith.constant 0 : index
    %73 = vector.load %arg9[%c0_46, %c112, %c0_47] : memref<2x256x128xf32, #tpu.memory_space<vmem>>, vector<1x16x128xf32>
    %74 = vector.shape_cast %73 : vector<1x16x128xf32> to vector<16x128xf32>
    %75 = vector.shape_cast %72 : vector<16x128xf32> to vector<1x16x128xf32>
    tpu.vector_store %arg9[%c0_46, %c112, %c0_47], %75 {strides = array<i32>} : memref<2x256x128xf32, #tpu.memory_space<vmem>>, vector<1x16x128xf32>,
    %76 = vector.extract_strided_slice %43 {offsets = [144, 0], sizes = [16, 128], strides = [1, 1]} : vector<288x128xf32> to vector<16x128xf32>
    %c0_48 = arith.constant 0 : index
    %c128_49 = arith.constant 128 : index
    %c0_50 = arith.constant 0 : index
    %77 = vector.load %arg9[%c0_48, %c128_49, %c0_50] : memref<2x256x128xf32, #tpu.memory_space<vmem>>, vector<1x16x128xf32>
    %78 = vector.shape_cast %77 : vector<1x16x128xf32> to vector<16x128xf32>
    %79 = vector.shape_cast %76 : vector<16x128xf32> to vector<1x16x128xf32>
    tpu.vector_store %arg9[%c0_48, %c128_49, %c0_50], %79 {strides = array<i32>} : memref<2x256x128xf32, #tpu.memory_space<vmem>>, vector<1x16x128xf32>,
    %80 = vector.extract_strided_slice %43 {offsets = [162, 0], sizes = [16, 128], strides = [1, 1]} : vector<288x128xf32> to vector<16x128xf32>
    %c0_51 = arith.constant 0 : index
    %c144 = arith.constant 144 : index
    %c0_52 = arith.constant 0 : index
    %81 = vector.load %arg9[%c0_51, %c144, %c0_52] : memref<2x256x128xf32, #tpu.memory_space<vmem>>, vector<1x16x128xf32>
    %82 = vector.shape_cast %81 : vector<1x16x128xf32> to vector<16x128xf32>
    %83 = vector.shape_cast %80 : vector<16x128xf32> to vector<1x16x128xf32>
    tpu.vector_store %arg9[%c0_51, %c144, %c0_52], %83 {strides = array<i32>} : memref<2x256x128xf32, #tpu.memory_space<vmem>>, vector<1x16x128xf32>,
    %84 = vector.extract_strided_slice %43 {offsets = [180, 0], sizes = [16, 128], strides = [1, 1]} : vector<288x128xf32> to vector<16x128xf32>
    %c0_53 = arith.constant 0 : index
    %c160_54 = arith.constant 160 : index
    %c0_55 = arith.constant 0 : index
    %85 = vector.load %arg9[%c0_53, %c160_54, %c0_55] : memref<2x256x128xf32, #tpu.memory_space<vmem>>, vector<1x16x128xf32>
    %86 = vector.shape_cast %85 : vector<1x16x128xf32> to vector<16x128xf32>
    %87 = vector.shape_cast %84 : vector<16x128xf32> to vector<1x16x128xf32>
    tpu.vector_store %arg9[%c0_53, %c160_54, %c0_55], %87 {strides = array<i32>} : memref<2x256x128xf32, #tpu.memory_space<vmem>>, vector<1x16x128xf32>,
    %88 = vector.extract_strided_slice %43 {offsets = [198, 0], sizes = [16, 128], strides = [1, 1]} : vector<288x128xf32> to vector<16x128xf32>
    %c0_56 = arith.constant 0 : index
    %c176 = arith.constant 176 : index
    %c0_57 = arith.constant 0 : index
    %89 = vector.load %arg9[%c0_56, %c176, %c0_57] : memref<2x256x128xf32, #tpu.memory_space<vmem>>, vector<1x16x128xf32>
    %90 = vector.shape_cast %89 : vector<1x16x128xf32> to vector<16x128xf32>
    %91 = vector.shape_cast %88 : vector<16x128xf32> to vector<1x16x128xf32>
    tpu.vector_store %arg9[%c0_56, %c176, %c0_57], %91 {strides = array<i32>} : memref<2x256x128xf32, #tpu.memory_space<vmem>>, vector<1x16x128xf32>,
    %92 = vector.extract_strided_slice %43 {offsets = [216, 0], sizes = [16, 128], strides = [1, 1]} : vector<288x128xf32> to vector<16x128xf32>
    %c0_58 = arith.constant 0 : index
    %c192_59 = arith.constant 192 : index
    %c0_60 = arith.constant 0 : index
    %93 = vector.load %arg9[%c0_58, %c192_59, %c0_60] : memref<2x256x128xf32, #tpu.memory_space<vmem>>, vector<1x16x128xf32>
    %94 = vector.shape_cast %93 : vector<1x16x128xf32> to vector<16x128xf32>
    %95 = vector.shape_cast %92 : vector<16x128xf32> to vector<1x16x128xf32>
    tpu.vector_store %arg9[%c0_58, %c192_59, %c0_60], %95 {strides = array<i32>} : memref<2x256x128xf32, #tpu.memory_space<vmem>>, vector<1x16x128xf32>,
    %96 = vector.extract_strided_slice %43 {offsets = [234, 0], sizes = [16, 128], strides = [1, 1]} : vector<288x128xf32> to vector<16x128xf32>
    %c0_61 = arith.constant 0 : index
    %c208 = arith.constant 208 : index
    %c0_62 = arith.constant 0 : index
    %97 = vector.load %arg9[%c0_61, %c208, %c0_62] : memref<2x256x128xf32, #tpu.memory_space<vmem>>, vector<1x16x128xf32>
    %98 = vector.shape_cast %97 : vector<1x16x128xf32> to vector<16x128xf32>
    %99 = vector.shape_cast %96 : vector<16x128xf32> to vector<1x16x128xf32>
    tpu.vector_store %arg9[%c0_61, %c208, %c0_62], %99 {strides = array<i32>} : memref<2x256x128xf32, #tpu.memory_space<vmem>>, vector<1x16x128xf32>,
    %100 = vector.extract_strided_slice %43 {offsets = [252, 0], sizes = [16, 128], strides = [1, 1]} : vector<288x128xf32> to vector<16x128xf32>
    %c0_63 = arith.constant 0 : index
    %c224_64 = arith.constant 224 : index
    %c0_65 = arith.constant 0 : index
    %101 = vector.load %arg9[%c0_63, %c224_64, %c0_65] : memref<2x256x128xf32, #tpu.memory_space<vmem>>, vector<1x16x128xf32>
    %102 = vector.shape_cast %101 : vector<1x16x128xf32> to vector<16x128xf32>
    %103 = vector.shape_cast %100 : vector<16x128xf32> to vector<1x16x128xf32>
    tpu.vector_store %arg9[%c0_63, %c224_64, %c0_65], %103 {strides = array<i32>} : memref<2x256x128xf32, #tpu.memory_space<vmem>>, vector<1x16x128xf32>,
    %104 = vector.extract_strided_slice %43 {offsets = [270, 0], sizes = [16, 128], strides = [1, 1]} : vector<288x128xf32> to vector<16x128xf32>
    %c0_66 = arith.constant 0 : index
    %c240 = arith.constant 240 : index
    %c0_67 = arith.constant 0 : index
    %105 = vector.load %arg9[%c0_66, %c240, %c0_67] : memref<2x256x128xf32, #tpu.memory_space<vmem>>, vector<1x16x128xf32>
    %106 = vector.shape_cast %105 : vector<1x16x128xf32> to vector<16x128xf32>
    %107 = vector.shape_cast %104 : vector<16x128xf32> to vector<1x16x128xf32>
    tpu.vector_store %arg9[%c0_66, %c240, %c0_67], %107 {strides = array<i32>} : memref<2x256x128xf32, #tpu.memory_space<vmem>>, vector<1x16x128xf32>,
    %c1 = arith.constant 1 : index
    %c0_68 = arith.constant 0 : index
    %c0_69 = arith.constant 0 : index
    %108 = vector.load %arg1[%c1, %c0_68, %c0_69] : memref<2x324x128xbf16, #tpu.memory_space<vmem>>, vector<1x324x128xbf16>
    %109 = vector.shape_cast %108 : vector<1x324x128xbf16> to vector<324x128xbf16>
    %c0_70 = arith.constant 0 : index
    %c0_71 = arith.constant 0 : index
    %110 = vector.load %arg3[%c0_70, %c0_71] : memref<128x32xbf16, #tpu.memory_space<vmem>>, vector<128x32xbf16>
    %cst_72 = arith.constant dense<0.000000e+00> : vector<324x32xf32>
    %111 = tpu.matmul %109, %110, %cst_72 {dimension_numbers = #tpu.dot_dimension_numbers<[1], [0], [0], [1], [0, 0, 1, 1], [], []>} : vector<324x128xbf16>, vector<128x32xbf16>, vector<324x32xf32> -> vector<324x32xf32>
    %c0_73 = arith.constant 0 : index
    %c0_74 = arith.constant 0 : index
    %112 = vector.load %arg4[%c0_73, %c0_74] : memref<1x32xf32, #tpu.memory_space<vmem>>, vector<1x32xf32>
    %113 = vector.broadcast %112 : vector<1x32xf32> to vector<324x32xf32>
    %114 = arith.addf %111, %113 : vector<324x32xf32>
    %cst_75 = arith.constant 0.000000e+00 : f32
    %115 = vector.broadcast %cst_75 : f32 to vector<324x32xf32>
    %116 = arith.maximumf %114, %115 : vector<324x32xf32>
    %c0_76 = arith.constant 0 : index
    %c0_77 = arith.constant 0 : index
    %117 = vector.load %arg2[%c0_76, %c0_77] : memref<324x1xf32, #tpu.memory_space<vmem>>, vector<324x1xf32>
    %118 = vector.broadcast %117 : vector<324x1xf32> to vector<324x32xf32>
    %119 = arith.mulf %116, %118 : vector<324x32xf32>
    %cst_78 = arith.constant 0.000000e+00 : f32
    %120 = vector.broadcast %cst_78 : f32 to vector<2x288xf32>
    %c326_79 = arith.constant 326 : index
    %c0_80 = arith.constant 0 : index
    %121 = vector.load %arg10[%c326_79, %c0_80] : memref<364x288xf32, #tpu.memory_space<vmem>>, vector<2x288xf32>
    tpu.vector_store %arg10[%c326_79, %c0_80], %120 {strides = array<i32>} : memref<364x288xf32, #tpu.memory_space<vmem>>, vector<2x288xf32>,
    %c40_81 = arith.constant 40 : index
    %c0_82 = arith.constant 0 : index
    %122 = vector.load %arg10[%c40_81, %c0_82] : memref<364x288xf32, #tpu.memory_space<vmem>>, vector<324x32xf32>
    tpu.vector_store %arg10[%c40_81, %c0_82], %119 {strides = array<i32>} : memref<364x288xf32, #tpu.memory_space<vmem>>, vector<324x32xf32>,
    %c39_83 = arith.constant 39 : index
    %c32_84 = arith.constant 32 : index
    %123 = vector.load %arg10[%c39_83, %c32_84] : memref<364x288xf32, #tpu.memory_space<vmem>>, vector<324x32xf32>
    tpu.vector_store %arg10[%c39_83, %c32_84], %119 {strides = array<i32>} : memref<364x288xf32, #tpu.memory_space<vmem>>, vector<324x32xf32>,
    %c38_85 = arith.constant 38 : index
    %c64_86 = arith.constant 64 : index
    %124 = vector.load %arg10[%c38_85, %c64_86] : memref<364x288xf32, #tpu.memory_space<vmem>>, vector<324x32xf32>
    tpu.vector_store %arg10[%c38_85, %c64_86], %119 {strides = array<i32>} : memref<364x288xf32, #tpu.memory_space<vmem>>, vector<324x32xf32>,
    %c22_87 = arith.constant 22 : index
    %c96_88 = arith.constant 96 : index
    %125 = vector.load %arg10[%c22_87, %c96_88] : memref<364x288xf32, #tpu.memory_space<vmem>>, vector<324x32xf32>
    tpu.vector_store %arg10[%c22_87, %c96_88], %119 {strides = array<i32>} : memref<364x288xf32, #tpu.memory_space<vmem>>, vector<324x32xf32>,
    %c21_89 = arith.constant 21 : index
    %c128_90 = arith.constant 128 : index
    %126 = vector.load %arg10[%c21_89, %c128_90] : memref<364x288xf32, #tpu.memory_space<vmem>>, vector<324x32xf32>
    tpu.vector_store %arg10[%c21_89, %c128_90], %119 {strides = array<i32>} : memref<364x288xf32, #tpu.memory_space<vmem>>, vector<324x32xf32>,
    %c20_91 = arith.constant 20 : index
    %c160_92 = arith.constant 160 : index
    %127 = vector.load %arg10[%c20_91, %c160_92] : memref<364x288xf32, #tpu.memory_space<vmem>>, vector<324x32xf32>
    tpu.vector_store %arg10[%c20_91, %c160_92], %119 {strides = array<i32>} : memref<364x288xf32, #tpu.memory_space<vmem>>, vector<324x32xf32>,
    %c4_93 = arith.constant 4 : index
    %c192_94 = arith.constant 192 : index
    %128 = vector.load %arg10[%c4_93, %c192_94] : memref<364x288xf32, #tpu.memory_space<vmem>>, vector<324x32xf32>
    tpu.vector_store %arg10[%c4_93, %c192_94], %119 {strides = array<i32>} : memref<364x288xf32, #tpu.memory_space<vmem>>, vector<324x32xf32>,
    %c3_95 = arith.constant 3 : index
    %c224_96 = arith.constant 224 : index
    %129 = vector.load %arg10[%c3_95, %c224_96] : memref<364x288xf32, #tpu.memory_space<vmem>>, vector<324x32xf32>
    tpu.vector_store %arg10[%c3_95, %c224_96], %119 {strides = array<i32>} : memref<364x288xf32, #tpu.memory_space<vmem>>, vector<324x32xf32>,
    %c2_97 = arith.constant 2 : index
    %c256_98 = arith.constant 256 : index
    %130 = vector.load %arg10[%c2_97, %c256_98] : memref<364x288xf32, #tpu.memory_space<vmem>>, vector<324x32xf32>
    tpu.vector_store %arg10[%c2_97, %c256_98], %119 {strides = array<i32>} : memref<364x288xf32, #tpu.memory_space<vmem>>, vector<324x32xf32>,
    %c40_99 = arith.constant 40 : index
    %c0_100 = arith.constant 0 : index
    %131 = vector.load %arg10[%c40_99, %c0_100] : memref<364x288xf32, #tpu.memory_space<vmem>>, vector<288x288xf32>
    %132 = arith.truncf %131 : vector<288x288xf32> to vector<288x288xbf16>
    %c0_101 = arith.constant 0 : index
    %c0_102 = arith.constant 0 : index
    %133 = vector.load %arg5[%c0_101, %c0_102] : memref<288x32xbf16, #tpu.memory_space<vmem>>, vector<288x32xbf16>
    %cst_103 = arith.constant dense<0.000000e+00> : vector<288x32xf32>
    %134 = tpu.matmul %132, %133, %cst_103 {dimension_numbers = #tpu.dot_dimension_numbers<[1], [0], [0], [1], [0, 0, 1, 1], [], []>} : vector<288x288xbf16>, vector<288x32xbf16>, vector<288x32xf32> -> vector<288x32xf32>
    %c0_104 = arith.constant 0 : index
    %c0_105 = arith.constant 0 : index
    %135 = vector.load %arg6[%c0_104, %c0_105] : memref<1x32xf32, #tpu.memory_space<vmem>>, vector<1x32xf32>
    %136 = vector.broadcast %135 : vector<1x32xf32> to vector<288x32xf32>
    %137 = arith.addf %134, %136 : vector<288x32xf32>
    %cst_106 = arith.constant 0.000000e+00 : f32
    %138 = vector.broadcast %cst_106 : f32 to vector<288x32xf32>
    %139 = arith.maximumf %137, %138 : vector<288x32xf32>
    %140 = arith.truncf %139 : vector<288x32xf32> to vector<288x32xbf16>
    %c0_107 = arith.constant 0 : index
    %c0_108 = arith.constant 0 : index
    %141 = vector.load %arg7[%c0_107, %c0_108] : memref<32x128xbf16, #tpu.memory_space<vmem>>, vector<32x128xbf16>
    %cst_109 = arith.constant dense<0.000000e+00> : vector<288x128xf32>
    %142 = tpu.matmul %140, %141, %cst_109 {dimension_numbers = #tpu.dot_dimension_numbers<[1], [0], [0], [1], [0, 0, 1, 1], [], []>} : vector<288x32xbf16>, vector<32x128xbf16>, vector<288x128xf32> -> vector<288x128xf32>
    %c1_110 = arith.constant 1 : index
    %c19_111 = arith.constant 19 : index
    %c0_112 = arith.constant 0 : index
    %143 = vector.load %arg1[%c1_110, %c19_111, %c0_112] : memref<2x324x128xbf16, #tpu.memory_space<vmem>>, vector<1x288x128xbf16>
    %144 = vector.shape_cast %143 : vector<1x288x128xbf16> to vector<288x128xbf16>
    %145 = arith.extf %144 : vector<288x128xbf16> to vector<288x128xf32>
    %c0_113 = arith.constant 0 : index
    %c0_114 = arith.constant 0 : index
    %146 = vector.load %arg8[%c0_113, %c0_114] : memref<1x128xf32, #tpu.memory_space<vmem>>, vector<1x128xf32>
    %147 = vector.broadcast %146 : vector<1x128xf32> to vector<288x128xf32>
    %148 = arith.addf %142, %147 : vector<288x128xf32>
    %149 = arith.addf %148, %145 : vector<288x128xf32>
    %cst_115 = arith.constant 0.000000e+00 : f32
    %150 = vector.broadcast %cst_115 : f32 to vector<288x128xf32>
    %151 = arith.maximumf %149, %150 : vector<288x128xf32>
    %152 = vector.extract_strided_slice %151 {offsets = [0, 0], sizes = [16, 128], strides = [1, 1]} : vector<288x128xf32> to vector<16x128xf32>
    %c1_116 = arith.constant 1 : index
    %c0_117 = arith.constant 0 : index
    %c0_118 = arith.constant 0 : index
    %153 = vector.load %arg9[%c1_116, %c0_117, %c0_118] : memref<2x256x128xf32, #tpu.memory_space<vmem>>, vector<1x16x128xf32>
    %154 = vector.shape_cast %153 : vector<1x16x128xf32> to vector<16x128xf32>
    %155 = vector.shape_cast %152 : vector<16x128xf32> to vector<1x16x128xf32>
    tpu.vector_store %arg9[%c1_116, %c0_117, %c0_118], %155 {strides = array<i32>} : memref<2x256x128xf32, #tpu.memory_space<vmem>>, vector<1x16x128xf32>,
    %156 = vector.extract_strided_slice %151 {offsets = [18, 0], sizes = [16, 128], strides = [1, 1]} : vector<288x128xf32> to vector<16x128xf32>
    %c1_119 = arith.constant 1 : index
    %c16_120 = arith.constant 16 : index
    %c0_121 = arith.constant 0 : index
    %157 = vector.load %arg9[%c1_119, %c16_120, %c0_121] : memref<2x256x128xf32, #tpu.memory_space<vmem>>, vector<1x16x128xf32>
    %158 = vector.shape_cast %157 : vector<1x16x128xf32> to vector<16x128xf32>
    %159 = vector.shape_cast %156 : vector<16x128xf32> to vector<1x16x128xf32>
    tpu.vector_store %arg9[%c1_119, %c16_120, %c0_121], %159 {strides = array<i32>} : memref<2x256x128xf32, #tpu.memory_space<vmem>>, vector<1x16x128xf32>,
    %160 = vector.extract_strided_slice %151 {offsets = [36, 0], sizes = [16, 128], strides = [1, 1]} : vector<288x128xf32> to vector<16x128xf32>
    %c1_122 = arith.constant 1 : index
    %c32_123 = arith.constant 32 : index
    %c0_124 = arith.constant 0 : index
    %161 = vector.load %arg9[%c1_122, %c32_123, %c0_124] : memref<2x256x128xf32, #tpu.memory_space<vmem>>, vector<1x16x128xf32>
    %162 = vector.shape_cast %161 : vector<1x16x128xf32> to vector<16x128xf32>
    %163 = vector.shape_cast %160 : vector<16x128xf32> to vector<1x16x128xf32>
    tpu.vector_store %arg9[%c1_122, %c32_123, %c0_124], %163 {strides = array<i32>} : memref<2x256x128xf32, #tpu.memory_space<vmem>>, vector<1x16x128xf32>,
    %164 = vector.extract_strided_slice %151 {offsets = [54, 0], sizes = [16, 128], strides = [1, 1]} : vector<288x128xf32> to vector<16x128xf32>
    %c1_125 = arith.constant 1 : index
    %c48_126 = arith.constant 48 : index
    %c0_127 = arith.constant 0 : index
    %165 = vector.load %arg9[%c1_125, %c48_126, %c0_127] : memref<2x256x128xf32, #tpu.memory_space<vmem>>, vector<1x16x128xf32>
    %166 = vector.shape_cast %165 : vector<1x16x128xf32> to vector<16x128xf32>
    %167 = vector.shape_cast %164 : vector<16x128xf32> to vector<1x16x128xf32>
    tpu.vector_store %arg9[%c1_125, %c48_126, %c0_127], %167 {strides = array<i32>} : memref<2x256x128xf32, #tpu.memory_space<vmem>>, vector<1x16x128xf32>,
    %168 = vector.extract_strided_slice %151 {offsets = [72, 0], sizes = [16, 128], strides = [1, 1]} : vector<288x128xf32> to vector<16x128xf32>
    %c1_128 = arith.constant 1 : index
    %c64_129 = arith.constant 64 : index
    %c0_130 = arith.constant 0 : index
    %169 = vector.load %arg9[%c1_128, %c64_129, %c0_130] : memref<2x256x128xf32, #tpu.memory_space<vmem>>, vector<1x16x128xf32>
    %170 = vector.shape_cast %169 : vector<1x16x128xf32> to vector<16x128xf32>
    %171 = vector.shape_cast %168 : vector<16x128xf32> to vector<1x16x128xf32>
    tpu.vector_store %arg9[%c1_128, %c64_129, %c0_130], %171 {strides = array<i32>} : memref<2x256x128xf32, #tpu.memory_space<vmem>>, vector<1x16x128xf32>,
    %172 = vector.extract_strided_slice %151 {offsets = [90, 0], sizes = [16, 128], strides = [1, 1]} : vector<288x128xf32> to vector<16x128xf32>
    %c1_131 = arith.constant 1 : index
    %c80_132 = arith.constant 80 : index
    %c0_133 = arith.constant 0 : index
    %173 = vector.load %arg9[%c1_131, %c80_132, %c0_133] : memref<2x256x128xf32, #tpu.memory_space<vmem>>, vector<1x16x128xf32>
    %174 = vector.shape_cast %173 : vector<1x16x128xf32> to vector<16x128xf32>
    %175 = vector.shape_cast %172 : vector<16x128xf32> to vector<1x16x128xf32>
    tpu.vector_store %arg9[%c1_131, %c80_132, %c0_133], %175 {strides = array<i32>} : memref<2x256x128xf32, #tpu.memory_space<vmem>>, vector<1x16x128xf32>,
    %176 = vector.extract_strided_slice %151 {offsets = [108, 0], sizes = [16, 128], strides = [1, 1]} : vector<288x128xf32> to vector<16x128xf32>
    %c1_134 = arith.constant 1 : index
    %c96_135 = arith.constant 96 : index
    %c0_136 = arith.constant 0 : index
    %177 = vector.load %arg9[%c1_134, %c96_135, %c0_136] : memref<2x256x128xf32, #tpu.memory_space<vmem>>, vector<1x16x128xf32>
    %178 = vector.shape_cast %177 : vector<1x16x128xf32> to vector<16x128xf32>
    %179 = vector.shape_cast %176 : vector<16x128xf32> to vector<1x16x128xf32>
    tpu.vector_store %arg9[%c1_134, %c96_135, %c0_136], %179 {strides = array<i32>} : memref<2x256x128xf32, #tpu.memory_space<vmem>>, vector<1x16x128xf32>,
    %180 = vector.extract_strided_slice %151 {offsets = [126, 0], sizes = [16, 128], strides = [1, 1]} : vector<288x128xf32> to vector<16x128xf32>
    %c1_137 = arith.constant 1 : index
    %c112_138 = arith.constant 112 : index
    %c0_139 = arith.constant 0 : index
    %181 = vector.load %arg9[%c1_137, %c112_138, %c0_139] : memref<2x256x128xf32, #tpu.memory_space<vmem>>, vector<1x16x128xf32>
    %182 = vector.shape_cast %181 : vector<1x16x128xf32> to vector<16x128xf32>
    %183 = vector.shape_cast %180 : vector<16x128xf32> to vector<1x16x128xf32>
    tpu.vector_store %arg9[%c1_137, %c112_138, %c0_139], %183 {strides = array<i32>} : memref<2x256x128xf32, #tpu.memory_space<vmem>>, vector<1x16x128xf32>,
    %184 = vector.extract_strided_slice %151 {offsets = [144, 0], sizes = [16, 128], strides = [1, 1]} : vector<288x128xf32> to vector<16x128xf32>
    %c1_140 = arith.constant 1 : index
    %c128_141 = arith.constant 128 : index
    %c0_142 = arith.constant 0 : index
    %185 = vector.load %arg9[%c1_140, %c128_141, %c0_142] : memref<2x256x128xf32, #tpu.memory_space<vmem>>, vector<1x16x128xf32>
    %186 = vector.shape_cast %185 : vector<1x16x128xf32> to vector<16x128xf32>
    %187 = vector.shape_cast %184 : vector<16x128xf32> to vector<1x16x128xf32>
    tpu.vector_store %arg9[%c1_140, %c128_141, %c0_142], %187 {strides = array<i32>} : memref<2x256x128xf32, #tpu.memory_space<vmem>>, vector<1x16x128xf32>,
    %188 = vector.extract_strided_slice %151 {offsets = [162, 0], sizes = [16, 128], strides = [1, 1]} : vector<288x128xf32> to vector<16x128xf32>
    %c1_143 = arith.constant 1 : index
    %c144_144 = arith.constant 144 : index
    %c0_145 = arith.constant 0 : index
    %189 = vector.load %arg9[%c1_143, %c144_144, %c0_145] : memref<2x256x128xf32, #tpu.memory_space<vmem>>, vector<1x16x128xf32>
    %190 = vector.shape_cast %189 : vector<1x16x128xf32> to vector<16x128xf32>
    %191 = vector.shape_cast %188 : vector<16x128xf32> to vector<1x16x128xf32>
    tpu.vector_store %arg9[%c1_143, %c144_144, %c0_145], %191 {strides = array<i32>} : memref<2x256x128xf32, #tpu.memory_space<vmem>>, vector<1x16x128xf32>,
    %192 = vector.extract_strided_slice %151 {offsets = [180, 0], sizes = [16, 128], strides = [1, 1]} : vector<288x128xf32> to vector<16x128xf32>
    %c1_146 = arith.constant 1 : index
    %c160_147 = arith.constant 160 : index
    %c0_148 = arith.constant 0 : index
    %193 = vector.load %arg9[%c1_146, %c160_147, %c0_148] : memref<2x256x128xf32, #tpu.memory_space<vmem>>, vector<1x16x128xf32>
    %194 = vector.shape_cast %193 : vector<1x16x128xf32> to vector<16x128xf32>
    %195 = vector.shape_cast %192 : vector<16x128xf32> to vector<1x16x128xf32>
    tpu.vector_store %arg9[%c1_146, %c160_147, %c0_148], %195 {strides = array<i32>} : memref<2x256x128xf32, #tpu.memory_space<vmem>>, vector<1x16x128xf32>,
    %196 = vector.extract_strided_slice %151 {offsets = [198, 0], sizes = [16, 128], strides = [1, 1]} : vector<288x128xf32> to vector<16x128xf32>
    %c1_149 = arith.constant 1 : index
    %c176_150 = arith.constant 176 : index
    %c0_151 = arith.constant 0 : index
    %197 = vector.load %arg9[%c1_149, %c176_150, %c0_151] : memref<2x256x128xf32, #tpu.memory_space<vmem>>, vector<1x16x128xf32>
    %198 = vector.shape_cast %197 : vector<1x16x128xf32> to vector<16x128xf32>
    %199 = vector.shape_cast %196 : vector<16x128xf32> to vector<1x16x128xf32>
    tpu.vector_store %arg9[%c1_149, %c176_150, %c0_151], %199 {strides = array<i32>} : memref<2x256x128xf32, #tpu.memory_space<vmem>>, vector<1x16x128xf32>,
    %200 = vector.extract_strided_slice %151 {offsets = [216, 0], sizes = [16, 128], strides = [1, 1]} : vector<288x128xf32> to vector<16x128xf32>
    %c1_152 = arith.constant 1 : index
    %c192_153 = arith.constant 192 : index
    %c0_154 = arith.constant 0 : index
    %201 = vector.load %arg9[%c1_152, %c192_153, %c0_154] : memref<2x256x128xf32, #tpu.memory_space<vmem>>, vector<1x16x128xf32>
    %202 = vector.shape_cast %201 : vector<1x16x128xf32> to vector<16x128xf32>
    %203 = vector.shape_cast %200 : vector<16x128xf32> to vector<1x16x128xf32>
    tpu.vector_store %arg9[%c1_152, %c192_153, %c0_154], %203 {strides = array<i32>} : memref<2x256x128xf32, #tpu.memory_space<vmem>>, vector<1x16x128xf32>,
    %204 = vector.extract_strided_slice %151 {offsets = [234, 0], sizes = [16, 128], strides = [1, 1]} : vector<288x128xf32> to vector<16x128xf32>
    %c1_155 = arith.constant 1 : index
    %c208_156 = arith.constant 208 : index
    %c0_157 = arith.constant 0 : index
    %205 = vector.load %arg9[%c1_155, %c208_156, %c0_157] : memref<2x256x128xf32, #tpu.memory_space<vmem>>, vector<1x16x128xf32>
    %206 = vector.shape_cast %205 : vector<1x16x128xf32> to vector<16x128xf32>
    %207 = vector.shape_cast %204 : vector<16x128xf32> to vector<1x16x128xf32>
    tpu.vector_store %arg9[%c1_155, %c208_156, %c0_157], %207 {strides = array<i32>} : memref<2x256x128xf32, #tpu.memory_space<vmem>>, vector<1x16x128xf32>,
    %208 = vector.extract_strided_slice %151 {offsets = [252, 0], sizes = [16, 128], strides = [1, 1]} : vector<288x128xf32> to vector<16x128xf32>
    %c1_158 = arith.constant 1 : index
    %c224_159 = arith.constant 224 : index
    %c0_160 = arith.constant 0 : index
    %209 = vector.load %arg9[%c1_158, %c224_159, %c0_160] : memref<2x256x128xf32, #tpu.memory_space<vmem>>, vector<1x16x128xf32>
    %210 = vector.shape_cast %209 : vector<1x16x128xf32> to vector<16x128xf32>
    %211 = vector.shape_cast %208 : vector<16x128xf32> to vector<1x16x128xf32>
    tpu.vector_store %arg9[%c1_158, %c224_159, %c0_160], %211 {strides = array<i32>} : memref<2x256x128xf32, #tpu.memory_space<vmem>>, vector<1x16x128xf32>,
    %212 = vector.extract_strided_slice %151 {offsets = [270, 0], sizes = [16, 128], strides = [1, 1]} : vector<288x128xf32> to vector<16x128xf32>
    %c1_161 = arith.constant 1 : index
    %c240_162 = arith.constant 240 : index
    %c0_163 = arith.constant 0 : index
    %213 = vector.load %arg9[%c1_161, %c240_162, %c0_163] : memref<2x256x128xf32, #tpu.memory_space<vmem>>, vector<1x16x128xf32>
    %214 = vector.shape_cast %213 : vector<1x16x128xf32> to vector<16x128xf32>
    %215 = vector.shape_cast %212 : vector<16x128xf32> to vector<1x16x128xf32>
    tpu.vector_store %arg9[%c1_161, %c240_162, %c0_163], %215 {strides = array<i32>} : memref<2x256x128xf32, #tpu.memory_space<vmem>>, vector<1x16x128xf32>,
    return
  }
  func.func @transform_0(%arg0: i32) -> (i32, i32, i32) {
    %c0_i32 = arith.constant 0 : i32
    %c0_i32_0 = arith.constant 0 : i32
    %c0_i32_1 = arith.constant 0 : i32
    return %arg0, %c0_i32, %c0_i32_0 : i32, i32, i32
  }
  func.func @transform_1(%arg0: i32) -> (i32, i32) {
    %c0_i32 = arith.constant 0 : i32
    %c0_i32_0 = arith.constant 0 : i32
    %c0_i32_1 = arith.constant 0 : i32
    return %c0_i32, %c0_i32_0 : i32, i32
  }
  func.func @transform_2(%arg0: i32) -> (i32, i32) {
    %c0_i32 = arith.constant 0 : i32
    %c0_i32_0 = arith.constant 0 : i32
    %c0_i32_1 = arith.constant 0 : i32
    return %c0_i32, %c0_i32_0 : i32, i32
  }
  func.func @transform_3(%arg0: i32) -> (i32, i32) {
    %c0_i32 = arith.constant 0 : i32
    %c0_i32_0 = arith.constant 0 : i32
    %c0_i32_1 = arith.constant 0 : i32
    return %c0_i32, %c0_i32_0 : i32, i32
  }
  func.func @transform_4(%arg0: i32) -> (i32, i32) {
    %c0_i32 = arith.constant 0 : i32
    %c0_i32_0 = arith.constant 0 : i32
    %c0_i32_1 = arith.constant 0 : i32
    return %c0_i32, %c0_i32_0 : i32, i32
  }
  func.func @transform_5(%arg0: i32) -> (i32, i32) {
    %c0_i32 = arith.constant 0 : i32
    %c0_i32_0 = arith.constant 0 : i32
    %c0_i32_1 = arith.constant 0 : i32
    return %c0_i32, %c0_i32_0 : i32, i32
  }
  func.func @transform_6(%arg0: i32) -> (i32, i32) {
    %c0_i32 = arith.constant 0 : i32
    %c0_i32_0 = arith.constant 0 : i32
    %c0_i32_1 = arith.constant 0 : i32
    return %c0_i32, %c0_i32_0 : i32, i32
  }
  func.func @transform_7(%arg0: i32) -> (i32, i32) {
    %c0_i32 = arith.constant 0 : i32
    %c0_i32_0 = arith.constant 0 : i32
    %c0_i32_1 = arith.constant 0 : i32
    return %c0_i32, %c0_i32_0 : i32, i32
  }
  func.func @transform_8(%arg0: i32) -> (i32, i32, i32) {
    %c0_i32 = arith.constant 0 : i32
    %c0_i32_0 = arith.constant 0 : i32
    %c0_i32_1 = arith.constant 0 : i32
    return %arg0, %c0_i32, %c0_i32_0 : i32, i32, i32
  }
}

</mosaic_0001>

<bundles_post_ra>
// kernel: _lambda_.1
= control target key start
LH: loop header
LB: loop body
LE: loop exit
PB: predicated region body
PF: predicated region fallthrough
CT: control target
= control target key end

     0   :  { %13 = vsyncpa [#allocation4], 0  ;;  %s14945_s0 = inlined_call_operand.vmem [shape: bf16[8,324,128], index: 0, kind: input, shape index: {}]   ;;  %s14946_s1 = inlined_call_operand.vmem [shape: f32[324,1], index: 1, kind: input, shape index: {}]   ;;  %s14947_s2 = inlined_call_operand.vmem [shape: bf16[128,32], index: 2, kind: input, shape index: {}]   ;;  %s14948_s3 = inlined_call_operand.vmem [shape: f32[1,32], index: 3, kind: input, shape index: {}]   ;;  %s14949_s4 = inlined_call_operand.vmem [shape: bf16[288,32], index: 4, kind: input, shape index: {}]   ;;  %s14950_s5 = inlined_call_operand.vmem [shape: f32[1,32], index: 5, kind: input, shape index: {}]   ;;  %s14951_s6 = inlined_call_operand.vmem [shape: bf16[32,128], index: 6, kind: input, shape index: {}]   ;;  %s14952_s7 = inlined_call_operand.vmem [shape: f32[1,128], index: 7, kind: input, shape index: {}]   ;;  %s14953_s8 = inlined_call_operand.hbm [shape: f32[8,256,128], index: 8, kind: output, shape index: {}]  }
   0x1   :  { %15 = vsyncpa [#allocation4 + $0x1], 0  ;;  %s9399_s27 = smov 0   ;;  %s9401_s28 = smov 0  }
   0x2   :  { %s9403_s29 = smov 0   ;;  %s9405_s30 = smov 0  }
   0x3 LB: > { %s9420_s9 = sadd.s32 4294967295, %s9343_s30   ;;  %s8140_s10 = sadd.s32 4294967294, %s9343_s30   ;;  %s9343_s30 = sphi %s9405_s30, %s15473_s30   ;;  %s9339_s29 = sphi %s9403_s29, %s15472_s29   ;;  %s9335_s28 = sphi %s9401_s28, %s15471_s28   ;;  %s9331_s27 = sphi %s9399_s27, %s15470_s27  }
   0x4   : > { %s9424_s11 = sadd.s32 1, %s9343_s30   ;;  %s201_s12 = sadd.s32 1, %s9339_s29 }
   0x5   : > { %s198_s13 = ssub.s32 %s9343_s30, %s9424_s11  ;;  %p211_p0 = scmp.ne.s32.totalorder %s9339_s29, %s9335_s28 }
   0x6   : > { %p199_p1 = scmp.eq.s32.totalorder %s198_s13, 0  ;;  %p212_p2 = scmp.eq.s32.totalorder %s9420_s9, 3 }
   0x7   : > { %p217_p3 = scmp.ne.s32.totalorder %s9335_s28, %s9331_s27  ;;  %p218_p4 = scmp.eq.s32.totalorder %s8140_s10, 3 }
   0x8   : > { %s9435_s14 = scalar_select %p199_p1, %s9339_s29, %s201_s12  }
   0x9   : > { %p9437_p5 = por %p212_p2, %p211_p0  ;;  %p9441_p6 = por %p218_p4, %p217_p3 }
   0xa   : > { %p8143_p7 = scmp.ge.s32.totalorder %s9343_s30, 1  ;;  %p267_p8 = scmp.lt.s32.totalorder %s9343_s30, 5 }
   0xc   : > { %p268_p9 = pnand %p8143_p7, %p267_p8 }
   0xe   : > { %271 = sbr.rel (%p268_p9) target bundleno = 1980 (0x7bc), region = 52 }
  0x15   : > { %v9175_v0 = vld [vmem:[%s14947_s2] sm:$0xff]   ;;  %v14957_v1 = vmov 0.0   ;;  %v9176_v2 = vld [vmem:[%s14947_s2 + $0x8] sm:$0xff]   ;;  %vm9346_vm0 = vmmov 0   ;;  %s8145_s21 = sshll.u32 %s9420_s9, 1  ;;  %v14955_v3 = vmov 0  }
  0x16   : > { %8761 = vmatprep.subr.bf16.mxu0 %v14957_v1  ;;  %1075 = vst [vmem:[#allocation2 + $0x3c0] sm:$0xc0] %v14957_v1  ;;  %1076 = vst [vmem:[#allocation2 + $0x3c8] sm:$0xc0] %v14957_v1  ;;  %8777 = vmatprep.mubr.msk.bf16.mxu0 %vm9346_vm0, %v14957_v1  ;;  %p303_p10 = scmp.lt.s32.totalorder %s8145_s21, 7  ;;  %v9177_v4 = vld [vmem:[%s14947_s2 + $0x10] sm:$0xff]  }
  0x17   : > { %8762 = vmatpush3.bf16.msra.mxu0 %v9175_v0  ;;  %9173 = vset.pattern.permute.xlu0 %v14955_v3  ;;  %v788_v5 = vld [vmem:[%s14946_s1] sm:$0xff]  ;;  %v9178_v6 = vld [vmem:[%s14947_s2 + $0x18] sm:$0xff]   ;;  %v790_v7 = vld [vmem:[%s14946_s1 + $0x10] sm:$0xff]  ;;  %vm1079_vm1 = vcmask 261120   ;;  %vm2668_vm2 = vcmask 1041408   ;;  %vm1163_vm3 = vcmask 1046528  }
  0x18   : > { %8763 = vmatprep.subr.bf16.mxu0 %v14957_v1  ;;  %s15475_s21 = smov (!%p303_p10, %s8145_s21), 7  ;;  %9174 = vset.pattern.permute.xlu1 %v14955_v3  ;;  %v789_v8 = vld [vmem:[%s14946_s1 + $0x8] sm:$0xff]  ;;  %v791_v9 = vld [vmem:[%s14946_s1 + $0x18] sm:$0xff]  ;;  %v9179_v10 = vld [vmem:[%s14947_s2 + $0x20] sm:$0xff]   ;;  %vm1416_vm4 = vcmask 1045504   ;;  %vm2008_vm5 = vcmask 1043456  }
  0x19   : > { %3201 = vmatprep.subr.bf16.mxu1 %v14955_v3  ;;  %s9125_s24 = smul.u32 164, %s15475_s21  ;;  %831 = vperm.xlu0 %9173, %v788_v5   ;;  %v792_v11 = vld [vmem:[%s14946_s1 + $0x20] sm:$0xff]  ;;  %v793_v12 = vld [vmem:[%s14946_s1 + $0x28] sm:$0xff]  ;;  %v794_v14 = vld [vmem:[%s14946_s1 + $0x30] sm:$0xff]  ;;  %vm2420_vm6 = vcmask 1042432   ;;  %vm1840_vm7 = vcmask 1044480  }
  0x1a   : > { %841 = vperm.xlu1 %9174, %v790_v7   ;;  %v9180_v13 = vld [vmem:[%s14947_s2 + $0x28] sm:$0xff]   ;;  %v795_v15 = vld [vmem:[%s14946_s1 + $0x38] sm:$0xff]  ;;  %v9181_v16 = vld [vmem:[%s14947_s2 + $0x30] sm:$0xff]   ;;  %s9348_s19 = smov 32   ;;  %s9349_s22 = smov 64   ;;  %vm1077_vm8 = vcmask 261126  }
  0x1b   : > { %8764 = vmatpush3.bf16.msra.mxu0 %v9176_v2  ;;  %s9476_s18 = scalar_lea.vmem %s14945_s0, %s9125_s24  ;;  %v796_v17 = vld [vmem:[%s14946_s1 + $0x40] sm:$0xff]  ;;  %v797_v18 = vld [vmem:[%s14946_s1 + $0x48] sm:$0xff]  ;;  %v9182_v19 = vld [vmem:[%s14947_s2 + $0x38] sm:$0xff]   ;;  %s9350_s20 = smov 96   ;;  %1078 = vst.msk [vmem:[#allocation2 + $0x3d0] sm:$0xc0] %vm1077_vm8, %v14957_v1 }
  0x1c   : > { %8765 = vmatprep.subr.bf16.mxu0 %v14957_v1  ;;  %v798_v20 = vld [vmem:[%s14946_s1 + $0x50] sm:$0xff]  ;;  %v799_v21 = vld [vmem:[%s14946_s1 + $0x58] sm:$0xff]  ;;  %v9183_v22 = vld [vmem:[%s9476_s18] sm:$0xff]   ;;  %vm1373_vm9 = vcmask 523520   ;;  %vm1626_vm10 = vcmask 785920   ;;  %vm1797_vm11 = vcmask 1048320  }
  0x1d   : > { %836 = vperm.xlu0 %9173, %v789_v8   ;;  %v800_v23 = vld [vmem:[%s14946_s1 + $0x60] sm:$0xff]  ;;  %v801_v24 = vld [vmem:[%s14946_s1 + $0x68] sm:$0xff]  ;;  %v802_v25 = vld [vmem:[%s14946_s1 + $0x70] sm:$0xff]  ;;  %vm2832_vm12 = vcmask 259072   ;;  %vm2666_vm13 = vcmask 1047296   ;;  %s299_s23 = sand.u32 1, %s9335_s28  }
  0x1e   : > { %846 = vperm.xlu1 %9174, %v791_v9   ;;  %v803_v26 = vld [vmem:[%s14946_s1 + $0x78] sm:$0xff]  ;;  %v9184_v27 = vld [vmem:[%s9476_s18 + $0x8] sm:$0xff]   ;;  %v804_v28 = vld [vmem:[%s14946_s1 + $0x80] sm:$0xff]  ;;  %s13485_s26 = sshll.u32 %s299_s23, 9 }
  0x1f   : > { %8766 = vmatpush3.bf16.msra.mxu0 %v9177_v4  ;;  %v805_v29 = vld [vmem:[%s14946_s1 + $0x88] sm:$0xff]  ;;  %v806_v30 = vld [vmem:[%s14946_s1 + $0x90] sm:$0xff]  ;;  %v807_v31 = vld [vmem:[%s14946_s1 + $0x98] sm:$0xff]  ;;  %s13511_s10 = scalar_lea.vmem [#allocation3], %s13485_s26 }
  0x20   : > { %8767 = vmatprep.subr.bf16.mxu0 %v14957_v1  ;;  %v9185_v32 = vld [vmem:[%s9476_s18 + $0x10] sm:$0xff]   ;;  %v808_v33 = vld [vmem:[%s14946_s1 + $0xa0] sm:$0xff]  ;;  %v809_v34 = vld [vmem:[%s14946_s1 + $0xa8] sm:$0xff]  ;;  %s8078_s21 = sshll.u32 %s13511_s10, 4  ;;  %s14896_s21 = int_to_ptr.vmem [resolvable:$true] %s8078_s21 }
  0x21   : > { %851 = vperm.xlu0 %9173, %v792_v11   ;;  %v810_v35 = vld [vmem:[%s14946_s1 + $0xb0] sm:$0xff]  ;;  %v811_v36 = vld [vmem:[%s14946_s1 + $0xb8] sm:$0xff]  ;;  %v812_v38 = vld [vmem:[%s14946_s1 + $0xc0] sm:$0xff] }
  0x22   : > { %856 = vperm.xlu1 %9174, %v793_v12   ;;  %v9186_v37 = vld [vmem:[%s9476_s18 + $0x18] sm:$0xff]   ;;  %v813_v39 = vld [vmem:[%s14946_s1 + $0xc8] sm:$0xff]  ;;  %v814_v40 = vld [vmem:[%s14946_s1 + $0xd0] sm:$0xff] }
  0x23   : > { %8768 = vmatpush3.bf16.msra.mxu0 %v9178_v6  ;;  %v815_v41 = vld [vmem:[%s14946_s1 + $0xd8] sm:$0xff]  ;;  %v9187_v42 = vld [vmem:[%s9476_s18 + $0x20] sm:$0xff]   ;;  %v817_v44 = vld [vmem:[%s14946_s1 + $0xe8] sm:$0xff] }
  0x24   : > { %8769 = vmatprep.subr.bf16.mxu0 %v14957_v1  ;;  %v816_v43 = vld [vmem:[%s14946_s1 + $0xe0] sm:$0xff]  ;;  %v818_v45 = vld [vmem:[%s14946_s1 + $0xf0] sm:$0xff]  ;;  %v819_v46 = vld [vmem:[%s14946_s1 + $0xf8] sm:$0xff] }
  0x25   : > { %861 = vperm.xlu0 %9173, %v794_v14   ;;  %v9188_v47 = vld [vmem:[%s9476_s18 + $0x28] sm:$0xff]   ;;  %v820_v48 = vld [vmem:[%s14946_s1 + $0x100] sm:$0xff]  ;;  %v822_v50 = vld [vmem:[%s14946_s1 + $0x110] sm:$0xff] }
  0x26   : > { %866 = vperm.xlu1 %9174, %v795_v15   ;;  %v821_v49 = vld [vmem:[%s14946_s1 + $0x108] sm:$0xff]  ;;  %v823_v51 = vld [vmem:[%s14946_s1 + $0x118] sm:$0xff]  ;;  %v9189_v52 = vld [vmem:[%s9476_s18 + $0x30] sm:$0xff]  }
  0x27   : > { %8770 = vmatpush3.bf16.msra.mxu0 %v9179_v10  ;;  %v824_v53 = vld [vmem:[%s14946_s1 + $0x120] sm:$0xff]  ;;  %v825_v54 = vld [vmem:[%s14946_s1 + $0x128] sm:$0xff]  ;;  %v826_v55 = vld [vmem:[%s14946_s1 + $0x130] sm:$0xff] }
  0x28   : > { %8771 = vmatprep.subr.bf16.mxu0 %v14957_v1  ;;  %v827_v56 = vld [vmem:[%s14946_s1 + $0x138] sm:$0xff]  ;;  %v828_v58 = vld [vmem:[%s14946_s1 + $0x140] sm:$0xf]  ;;  %v9192_v60 = vld [vmem:[%s9476_s18 + $0x48] sm:$0xff]  }
  0x29   : > { %871 = vperm.xlu0 %9173, %v796_v17   ;;  %v9190_v57 = vld [vmem:[%s9476_s18 + $0x38] sm:$0xff]   ;;  %v9191_v59 = vld [vmem:[%s9476_s18 + $0x40] sm:$0xff]   ;;  %v9193_v61 = vld [vmem:[%s9476_s18 + $0x50] sm:$0xff]  }
  0x2a   : > { %876 = vperm.xlu1 %9174, %v797_v18   ;;  %v9194_v62 = vld [vmem:[%s9476_s18 + $0x58] sm:$0xff]   ;;  %v9195_v63 = vld [vmem:[%s9476_s18 + $0x60] sm:$0xff]   ;;  %v9196_v0 = vld [vmem:[%s9476_s18 + $0x68] sm:$0xff]  }
  0x2b   : > { %8772 = vmatpush3.bf16.msra.mxu0 %v9180_v13  ;;  %v9197_v2 = vld [vmem:[%s9476_s18 + $0x70] sm:$0xff]   ;;  %v9198_v4 = vld [vmem:[%s9476_s18 + $0x78] sm:$0xff]   ;;  %v9199_v5 = vld [vmem:[%s9476_s18 + $0x80] sm:$0xff]  }
  0x2c   : > { %8773 = vmatprep.subr.bf16.mxu0 %v14957_v1  ;;  %v9667_v6 = vld [vmem:[%s14949_s4 + $0x80] sm:$0xff]   ;;  %v9205_v7 = vld [vmem:[%s14949_s4 + $0x88] sm:$0xff]   ;;  %v9201_v9 = vld [vmem:[%s9476_s18 + $0x90] sm:$0xff]  }
  0x2d   : > { %881 = vperm.xlu0 %9173, %v798_v20   ;;  %v9200_v8 = vld [vmem:[%s9476_s18 + $0x88] sm:$0xff]   ;;  %v9202_v10 = vld [vmem:[%s9476_s18 + $0x98] sm:$0xff]   ;;  %v9203_v11 = vld [vmem:[%s9476_s18 + $0xa0] ss:$0 sps:$4 sm:$0x33]  }
  0x2e   : > { %886 = vperm.xlu1 %9174, %v799_v21   ;;  %v9206_v12 = vld [vmem:[%s14949_s4] sm:$0xff]   ;;  %v9207_v13 = vld [vmem:[%s14949_s4 + $0x8] sm:$0xff]   ;;  %v9208_v14 = vld [vmem:[%s14949_s4 + $0x10] sm:$0xff]  }
  0x2f   : > { %8774 = vmatpush3.bf16.msra.mxu0 %v9181_v16  ;;  %3202 = vmatpush1.bf16.msra.mxu1 %v9206_v12  ;;  %v9209_v15 = vld [vmem:[%s14949_s4 + $0x18] sm:$0xff]   ;;  %v9706_v16 = vld [vmem:[%s14948_s3] ss:$0 sm:$0xff] }
  0x30   : > { %8775 = vmatprep.subr.bf16.mxu0 %v14957_v1  ;;  %3203 = vmatprep.subr.bf16.mxu1 %v14955_v3  ;;  %v9210_v17 = vld [vmem:[%s14949_s4 + $0x20] sm:$0xff]  }
  0x31   : > { %891 = vperm.xlu0 %9173, %v800_v23   ;;  %v9211_v23 = vld [vmem:[%s14949_s4 + $0x28] sm:$0xff]  }
  0x32   : > { %896 = vperm.xlu1 %9174, %v801_v24  }
  0x33   : > { %8776 = vmatpush3.bf16.msra.mxu0 %v9182_v19  ;;  %3204 = vmatpush1.bf16.msra.mxu1 %v9207_v13  ;;  %v9215_v13 = vld [vmem:[%s14949_s4 + $0x48] sm:$0xff]  }
  0x34   : > { %8861 = vmatprep.subr.bf16.mxu0 %v9667_v6  ;;  %3205 = vmatprep.subr.bf16.mxu1 %v14955_v3 }
  0x35   : > { %901 = vperm.xlu0 %9173, %v802_v25  }
  0x36   : > { %8778 = vmatmul.mubr.bf16.vlgmr.msra.gmra.mrb[0].mxu0 %v9183_v22  ;;  %906 = vperm.xlu1 %9174, %v803_v26  }
  0x37   : > { %8781 = vmatprep.mubr.msk.bf16.mxu0 %vm9346_vm0, %v14957_v1  ;;  %8862 = vmatpush3.bf16.msra.mxu0 %v9667_v6 }
  0x38   : > { %8863 = vmatprep.subr.bf16.mxu0 %v9205_v7  ;;  %3206 = vmatpush1.bf16.msra.mxu1 %v9208_v14 }
  0x39   : > { %911 = vperm.xlu0 %9173, %v804_v28   ;;  %3207 = vmatprep.subr.bf16.mxu1 %v14955_v3 }
  0x3a   : > { %916 = vperm.xlu1 %9174, %v805_v29  }
  0x3b   : > { %8864 = vmatpush3.bf16.msra.mxu0 %v9205_v7 }
  0x3c   : > { %8941 = vmatprep.subr.bf16.mxu0 %v14957_v1  ;;  %3208 = vmatpush1.bf16.msra.mxu1 %v9209_v15 }
  0x3d   : > { %921 = vperm.xlu0 %9173, %v806_v30   ;;  %3209 = vmatprep.subr.bf16.mxu1 %v14955_v3 }
  0x3e   : > { %8782 = vmatmul.mubr.bf16.gmra.mrb[4].mxu0 %v9184_v27  ;;  %926 = vperm.xlu1 %9174, %v807_v31   ;;  %v9212_v31 = vld [vmem:[%s14949_s4 + $0x30] sm:$0xff]  }
  0x3f   : > { %8785 = vmatprep.mubr.msk.bf16.mxu0 %vm9346_vm0, %v14957_v1 }
  0x40   : > { %3210 = vmatpush1.bf16.msra.mxu1 %v9210_v17 }
  0x41   : > { %931 = vperm.xlu0 %9173, %v808_v33   ;;  %3211 = vmatprep.subr.bf16.mxu1 %v14955_v3 }
  0x42   : > { %936 = vperm.xlu1 %9174, %v809_v34  }
  0x44   : > { %3212 = vmatpush1.bf16.msra.mxu1 %v9211_v23 }
  0x45   : > { %941 = vperm.xlu0 %9173, %v810_v35   ;;  %3213 = vmatprep.subr.bf16.mxu1 %v14955_v3 }
  0x46   : > { %8786 = vmatmul.mubr.bf16.gmra.mrb[8].mxu0 %v9185_v32  ;;  %946 = vperm.xlu1 %9174, %v811_v36  }
  0x47   : > { %8789 = vmatprep.mubr.msk.bf16.mxu0 %vm9346_vm0, %v14957_v1 }
  0x48   : > { %3214 = vmatpush1.bf16.msra.mxu1 %v9212_v31 }
  0x49   : > { %951 = vperm.xlu0 %9173, %v812_v38   ;;  %3215 = vmatprep.subr.bf16.mxu1 %v14955_v3 }
  0x4a   : > { %956 = vperm.xlu1 %9174, %v813_v39  }
  0x4d   : > { %961 = vperm.xlu0 %9173, %v814_v40  }
  0x4e   : > { %8790 = vmatmul.mubr.bf16.gmra.mrb[12].mxu0 %v9186_v37  ;;  %966 = vperm.xlu1 %9174, %v815_v41  }
  0x4f   : > { %8793 = vmatprep.mubr.msk.bf16.mxu0 %vm9346_vm0, %v14957_v1 }
  0x51   : > { %971 = vperm.xlu0 %9173, %v816_v43  }
  0x52   : > { %976 = vperm.xlu1 %9174, %v817_v44  }
  0x55   : > { %981 = vperm.xlu0 %9173, %v818_v45  }
  0x56   : > { %8794 = vmatmul.mubr.bf16.gmra.mrb[16].mxu0 %v9187_v42  ;;  %986 = vperm.xlu1 %9174, %v819_v46   ;;  %v9213_v42 = vld [vmem:[%s14949_s4 + $0x38] sm:$0xff]  }
  0x57   : > { %8797 = vmatprep.mubr.msk.bf16.mxu0 %vm9346_vm0, %v14957_v1  ;;  %3216 = vmatpush1.bf16.msra.mxu1 %v9213_v42 }
  0x58   : > { %3217 = vmatprep.subr.bf16.mxu1 %v14955_v3 }
  0x59   : > { %991 = vperm.xlu0 %9173, %v820_v48  }
  0x5a   : > { %996 = vperm.xlu1 %9174, %v821_v49  }
  0x5d   : > { %1001 = vperm.xlu0 %9173, %v822_v50  }
  0x5e   : > { %8798 = vmatmul.mubr.bf16.gmra.mrb[20].mxu0 %v9188_v47  ;;  %1006 = vperm.xlu1 %9174, %v823_v51  }
  0x5f   : > { %8801 = vmatprep.mubr.msk.bf16.mxu0 %vm9346_vm0, %v14957_v1 }
  0x61   : > { %1011 = vperm.xlu0 %9173, %v824_v53  }
  0x62   : > { %1016 = vperm.xlu1 %9174, %v825_v54  }
  0x65   : > { %1021 = vperm.xlu0 %9173, %v826_v55  }
  0x66   : > { %8802 = vmatmul.mubr.bf16.gmra.mrb[24].mxu0 %v9189_v52  ;;  %1026 = vperm.xlu1 %9174, %v827_v56  }
  0x67   : > { %8805 = vmatprep.mubr.msk.bf16.mxu0 %vm9346_vm0, %v14957_v1 }
  0x69   : > { %1031 = vperm.xlu0 %9173, %v828_v58  }
  0x6e   : > { %8806 = vmatmul.mubr.bf16.gmra.mrb[28].mxu0 %v9190_v57  ;;  %v9214_v57 = vld [vmem:[%s14949_s4 + $0x40] sm:$0xff]  }
  0x6f   : > { %8809 = vmatprep.mubr.msk.bf16.mxu0 %vm9346_vm0, %v14957_v1  ;;  %3218 = vmatpush1.bf16.msra.mxu1 %v9214_v57  ;;  %v9217_v57 = vld [vmem:[%s14949_s4 + $0x58] sm:$0xff]  }
  0x70   : > { %3219 = vmatprep.subr.bf16.mxu1 %v14955_v3 }
  0x73   : > { %3220 = vmatpush1.bf16.msra.mxu1 %v9215_v13  ;;  %v9218_v13 = vld [vmem:[%s14949_s4 + $0x60] sm:$0xff]  }
  0x74   : > { %3221 = vmatprep.subr.bf16.mxu1 %v14955_v3 }
  0x76   : > { %8810 = vmatmul.mubr.bf16.gmra.mrb[32].mxu0 %v9191_v59 }
  0x77   : > { %8813 = vmatprep.mubr.msk.bf16.mxu0 %vm9346_vm0, %v14957_v1 }
  0x7e   : > { %8814 = vmatmul.mubr.bf16.gmra.mrb[36].mxu0 %v9192_v60 }
  0x7f   : > { %8817 = vmatprep.mubr.msk.bf16.mxu0 %vm9346_vm0, %v14957_v1 }
  0x86   : > { %8818 = vmatmul.mubr.bf16.gmra.mrb[40].mxu0 %v9193_v61 }
  0x87   : > { %8821 = vmatprep.mubr.msk.bf16.mxu0 %vm9346_vm0, %v14957_v1 }
  0x8e   : > { %8822 = vmatmul.mubr.bf16.gmra.mrb[44].mxu0 %v9194_v62 }
  0x8f   : > { %8825 = vmatprep.mubr.msk.bf16.mxu0 %vm9346_vm0, %v14957_v1 }
  0x96   : > { %8826 = vmatmul.mubr.bf16.gmra.mrb[48].mxu0 %v9195_v63 }
  0x97   : > { %8829 = vmatprep.mubr.msk.bf16.mxu0 %vm9346_vm0, %v14957_v1 }
  0x98   : > { %v832_v18 = vpop.permute.xlu0 %831 }
  0x99   : > { %v842_v27 = vpop.permute.xlu1 %841 }
  0x9c   : > { %v837_v30 = vpop.permute.xlu0 %836 }
  0x9d   : > { %v847_v46 = vpop.permute.xlu1 %846 }
  0x9e   : > { %8830 = vmatmul.mubr.bf16.gmra.mrb[52].mxu0 %v9196_v0 }
  0x9f   : > { %8833 = vmatprep.mubr.msk.bf16.mxu0 %vm9346_vm0, %v14957_v1 }
  0xa0   : > { %v852_v56 = vpop.permute.xlu0 %851 }
  0xa6   : > { %8834 = vmatmul.mubr.bf16.gmra.mrb[56].mxu0 %v9197_v2  ;;  %v857_v2 = vpop.permute.xlu1 %856 }
  0xa7   : > { %8837 = vmatprep.mubr.msk.bf16.mxu0 %vm9346_vm0, %v14957_v1 }
  0xaa   : > { %v867_v31 = vpop.permute.xlu1 %866 }
  0xae   : > { %8838 = vmatmul.mubr.bf16.gmra.mrb[60].mxu0 %v9198_v4 }
  0xaf   : > { %8841 = vmatprep.mubr.msk.bf16.mxu0 %vm9346_vm0, %v14957_v1 }
  0xb6   : > { %8842 = vmatmul.mubr.bf16.gmra.mrb[64].mxu0 %v9199_v5 }
  0xb7   : > { %8845 = vmatprep.mubr.msk.bf16.mxu0 %vm9346_vm0, %v14957_v1 }
  0xbe   : > { %8846 = vmatmul.mubr.bf16.gmra.mrb[68].mxu0 %v9200_v8 }
  0xbf   : > { %8849 = vmatprep.mubr.msk.bf16.mxu0 %vm9346_vm0, %v14957_v1 }
  0xc6   : > { %8850 = vmatmul.mubr.bf16.gmra.mrb[72].mxu0 %v9201_v9 }
  0xc7   : > { %8853 = vmatprep.mubr.msk.bf16.mxu0 %vm9346_vm0, %v14957_v1 }
  0xce   : > { %8854 = vmatmul.mubr.bf16.gmra.mrb[76].mxu0 %v9202_v10 }
  0xcf   : > { %8857 = vmatprep.mubr.msk.bf16.mxu0 %vm9346_vm0, %v14957_v1 }
  0xd6   : > { %8858 = vmatmul.mubr.bf16.gmra.mrb[80].mxu0 %v9203_v11 }
 0x109   : > { %v581_v19 = vpop.f32.mrb[0].mxu0 }
 0x10a   : > { %v582_v20 = vadd.f32 %v9706_v16, %v581_v19  ;;  %v8779_v21 = vpop.f32.mrb[1].mxu0  ;;  %v862_v19 = vpop.permute.xlu0 %861 }
 0x10b   : > { %v584_v22 = vpop.f32.mrb[2].mxu0 }
 0x10c   : > { %v747_v24 = vmax.f32 %v582_v20, 0.0  ;;  %v585_v25 = vadd.f32 %v9706_v16, %v584_v22  ;;  %v8780_v26 = vpop.f32.mrb[3].mxu0 }
 0x10e   : > { %v9717_v28 = vmul.f32 %v832_v18, %v747_v24  ;;  %v748_v29 = vmax.f32 %v585_v25, 0.0 }
 0x110   : > { %15079 = vst [vmem:[#allocation6_spill] sm:$0xff] %v9717_v28  ;;  %v9723_v32 = vmul.f32 %v837_v30, %v748_v29  ;;  %1080 = vst.msk [vmem:[#allocation2 + $0x78] sm:$0xff] %vm1079_vm1, %v9717_v28  ;;  %v1164_v33 = vrot.slane %v9717_v28, 1  ;;  %v9729_v35 = vrot.slane %v9717_v28, 2  ;;  %v9732_v36 = vrot.slane %v9717_v28, 4  ;;  %v9216_v29 = vld [vmem:[%s14949_s4 + $0x50] sm:$0xff]  }
 0x111   : > { %v589_v34 = vpop.f32.mrb[4].mxu0  ;;  %v14954_v44 = vrot.slane %v9717_v28, 5  ;;  %3222 = vmatpush1.bf16.msra.mxu1 %v9216_v29 }
 0x112   : > { %15080 = vst [vmem:[#allocation7_spill] sm:$0xff] %v9729_v35  ;;  %15081 = vst [vmem:[#allocation8_spill] sm:$0xff] %v9732_v36  ;;  %v590_v37 = vadd.f32 %v9706_v16, %v589_v34  ;;  %1245 = vrot.lane.b32.xlu1 %v1164_v33, %s9348_s19  ;;  %v8783_v38 = vpop.f32.mrb[5].mxu0  ;;  %v1165_v39 = vrot.slane %v9723_v32, 1  ;;  %v1418_v40 = vrot.slane %v9723_v32, 2  ;;  %v2010_v43 = vrot.slane %v9723_v32, 4  ;;  %3223 = vmatprep.subr.bf16.mxu1 %v14955_v3 }
 0x113   : > { %1081 = vst.msk [vmem:[#allocation2 + $0x90] sm:$0xff] %vm1079_vm1, %v9723_v32  ;;  %v592_v41 = vpop.f32.mrb[6].mxu0  ;;  %v2422_v45 = vrot.slane %v9723_v32, 5 }
 0x114   : > { %v749_v47 = vmax.f32 %v590_v37, 0.0  ;;  %v593_v48 = vadd.f32 %v9706_v16, %v592_v41  ;;  %v8784_v49 = vpop.f32.mrb[7].mxu0  ;;  %v1166_v50 = vsel %vm1163_vm3, %v1164_v33, %v1165_v39  ;;  %v9752_v51 = vsel %vm1416_vm4, %v9729_v35, %v1418_v40 }
 0x115   : > { %1247 = vrot.lane.b32.xlu0 %v1166_v50, %s9348_s19  ;;  %15082 = vst [vmem:[#allocation9_spill] sm:$0xff] %v9752_v51  ;;  %v9756_v52 = vsel %vm2008_vm5, %v9732_v36, %v2010_v43  ;;  %v9761_v53 = vsel %vm2420_vm6, %v14954_v44, %v2422_v45  ;;  %3224 = vmatpush1.bf16.msra.mxu1 %v9217_v57 }
 0x116   : > { %15083 = vst [vmem:[#allocation10_spill] sm:$0xff] %v9756_v52  ;;  %15084 = vst [vmem:[#allocation11_spill] sm:$0xff] %v9761_v53  ;;  %v9763_v54 = vmul.f32 %v842_v27, %v749_v47  ;;  %v750_v55 = vmax.f32 %v593_v48, 0.0  ;;  %1500 = vrot.lane.b32.xlu1 %v9752_v51, %s9349_s22  ;;  %v9845_v48 = vpop.permute.xlu0 %871  ;;  %3225 = vmatprep.subr.bf16.mxu1 %v14955_v3 }
 0x118   : > { %1082 = vst.msk [vmem:[#allocation2 + $0xa8] sm:$0xff] %vm1079_vm1, %v9763_v54  ;;  %v9773_v58 = vmul.f32 %v847_v46, %v750_v55  ;;  %v1420_v59 = vrot.slane %v9763_v54, 2  ;;  %v1167_v60 = vrot.slane %v9763_v54, 1  ;;  %v2012_v62 = vrot.slane %v9763_v54, 4 }
 0x119   : > { %v597_v61 = vpop.f32.mrb[8].mxu0  ;;  %v1844_v63 = vrot.slane %v9763_v54, 3  ;;  %v2424_v0 = vrot.slane %v9763_v54, 5  ;;  %3226 = vmatpush1.bf16.msra.mxu1 %v9218_v13 }
 0x11a   : > { %1083 = vst.msk [vmem:[#allocation2 + $0xc0] sm:$0xff] %vm1079_vm1, %v9773_v58  ;;  %v598_v4 = vadd.f32 %v9706_v16, %v597_v61  ;;  %v8787_v5 = vpop.f32.mrb[9].mxu0  ;;  %v9784_v7 = vsel %vm1416_vm4, %v1418_v40, %v1420_v59  ;;  %v1168_v8 = vsel %vm1163_vm3, %v1165_v39, %v1167_v60  ;;  %v2014_v10 = vrot.slane %v9773_v58, 4  ;;  %3227 = vmatprep.subr.bf16.mxu1 %v14955_v3 }
 0x11b   : > { %15085 = vst [vmem:[#allocation12_spill] sm:$0xff] %v9784_v7  ;;  %1502 = vrot.lane.b32.xlu0 %v9784_v7, %s9349_s22  ;;  %v600_v9 = vpop.f32.mrb[10].mxu0  ;;  %v1169_v11 = vrot.slane %v9773_v58, 1  ;;  %v1422_v12 = vrot.slane %v9773_v58, 2  ;;  %1249 = vrot.lane.b32.xlu1 %v1168_v8, %s9348_s19  ;;  %v1846_v18 = vrot.slane %v9773_v58, 3  ;;  %v9807_v23 = vsel %vm2008_vm5, %v2010_v43, %v2012_v62  ;;  %v9868_v5 = vpop.permute.xlu1 %876 }
 0x11c   : > { %v751_v14 = vmax.f32 %v598_v4, 0.0  ;;  %v601_v15 = vadd.f32 %v9706_v16, %v600_v9  ;;  %v8788_v17 = vpop.f32.mrb[11].mxu0  ;;  %v9800_v20 = vsel %vm2008_vm5, %v2012_v62, %v2014_v10  ;;  %15087 = vst [vmem:[#allocation14_spill] sm:$0xff] %v9807_v23  ;;  %v9814_v27 = vsel %vm2420_vm6, %v2422_v45, %v2424_v0 }
 0x11d   : > { %15086 = vst [vmem:[#allocation13_spill] sm:$0xff] %v9800_v20  ;;  %v1170_v21 = vsel %vm1163_vm3, %v1167_v60, %v1169_v11  ;;  %v9804_v22 = vsel %vm1416_vm4, %v1420_v59, %v1422_v12  ;;  %v1847_v26 = vsel %vm1840_vm7, %v1844_v63, %v1846_v18  ;;  %15088 = vst [vmem:[#allocation15_spill] sm:$0xff] %v9814_v27  ;;  %v2426_v30 = vrot.slane %v9773_v58, 5 }
 0x11e   : > { %v9809_v24 = vmul.f32 %v852_v56, %v751_v14  ;;  %v752_v25 = vmax.f32 %v601_v15, 0.0  ;;  %1968 = vst.msk [vmem:[#allocation2 + $0x80] sm:$0xff] %vm1079_vm1, %v1847_v26 }
 0x11f   : > { %1251 = vrot.lane.b32.xlu0 %v1170_v21, %s9348_s19  ;;  %2096 = vrot.lane.b32.xlu1 %v9800_v20, %s9348_s19  ;;  %v9835_v42 = vsel %vm2420_vm6, %v2424_v0, %v2426_v30  ;;  %v9897_v21 = vpop.permute.xlu0 %881 }
 0x120   : > { %v2676_v32 = vrot.slane %v9809_v24, 6  ;;  %1084 = vst.msk [vmem:[#allocation2 + $0xd8] sm:$0xff] %vm1079_vm1, %v9809_v24  ;;  %v9825_v33 = vmul.f32 %v857_v2, %v752_v25  ;;  %v2016_v34 = vrot.slane %v9809_v24, 4  ;;  %v1424_v37 = vrot.slane %v9809_v24, 2  ;;  %15089 = vst [vmem:[#allocation16_spill] sm:$0xff] %v9835_v42 }
 0x121   : > { %v605_v38 = vpop.f32.mrb[12].mxu0  ;;  %v1171_v39 = vrot.slane %v9809_v24, 1  ;;  %v2428_v40 = vrot.slane %v9809_v24, 5  ;;  %v1848_v41 = vrot.slane %v9809_v24, 3 }
 0x122   : > { %v2678_v43 = vrot.slane %v9825_v33, 6  ;;  %1085 = vst.msk [vmem:[#allocation2 + $0xf0] sm:$0xff] %vm1079_vm1, %v9825_v33  ;;  %v606_v45 = vadd.f32 %v9706_v16, %v605_v38  ;;  %v8791_v46 = vpop.f32.mrb[13].mxu0  ;;  %v9842_v47 = vsel %vm2008_vm5, %v2014_v10, %v2016_v34  ;;  %v1425_v50 = vsel %vm1416_vm4, %v1422_v12, %v1424_v37 }
 0x123   : > { %15090 = vst [vmem:[#allocation17_spill] sm:$0xff] %v9842_v47  ;;  %2098 = vrot.lane.b32.xlu0 %v9842_v47, %s9348_s19  ;;  %v608_v49 = vpop.f32.mrb[14].mxu0  ;;  %v1172_v54 = vsel %vm1163_vm3, %v1169_v11, %v1171_v39  ;;  %v2018_v55 = vrot.slane %v9825_v33, 4  ;;  %v1173_v56 = vrot.slane %v9825_v33, 1  ;;  %1675 = vrot.lane.b32.xlu1 %v9804_v22, %s9350_s20  ;;  %v2430_v62 = vrot.slane %v9825_v33, 5 }
 0x124   : > { %v2679_v58 = vsel %vm2668_vm2, %v2676_v32, %v2678_v43  ;;  %v753_v59 = vmax.f32 %v606_v45, 0.0  ;;  %v609_v60 = vadd.f32 %v9706_v16, %v608_v49  ;;  %v8792_v61 = vpop.f32.mrb[15].mxu0  ;;  %v1426_v2 = vrot.slane %v9825_v33, 2 }
 0x125   : > { %2797 = vst.msk [vmem:[#allocation2 + $0x88] sm:$0xff] %vm1079_vm1, %v2679_v58  ;;  %v9863_v63 = vsel %vm2008_vm5, %v2016_v34, %v2018_v55  ;;  %v1174_v0 = vsel %vm1163_vm3, %v1171_v39, %v1173_v56  ;;  %v1849_v4 = vsel %vm1840_vm7, %v1846_v18, %v1848_v41  ;;  %v9873_v10 = vsel %vm2420_vm6, %v2428_v40, %v2430_v62 }
 0x126   : > { %v9870_v8 = vmul.f32 %v862_v19, %v753_v59  ;;  %v754_v9 = vmax.f32 %v609_v60, 0.0  ;;  %1969 = vst.msk [vmem:[#allocation2 + $0x98] sm:$0xff] %vm1079_vm1, %v1849_v4  ;;  %v1850_v11 = vrot.slane %v9825_v33, 3  ;;  %v9880_v12 = vsel %vm1416_vm4, %v1424_v37, %v1426_v2  ;;  %v9219_v59 = vld [vmem:[%s14949_s4 + $0x68] sm:$0xff]   ;;  %v9949_v4 = vpop.permute.xlu0 %891 }
 0x127   : > { %1677 = vrot.lane.b32.xlu0 %v1425_v50, %s9350_s20  ;;  %v9886_v14 = vsel %vm2420_vm6, %v2426_v30, %v2428_v40  ;;  %1504 = vrot.lane.b32.xlu1 %v9804_v22, %s9349_s22 }
 0x128   : > { %15091 = vst [vmem:[#allocation18_spill] sm:$0xff] %v9886_v14  ;;  %v2680_v15 = vrot.slane %v9870_v8, 6  ;;  %1086 = vst.msk [vmem:[#allocation2 + $0x108] sm:$0xff] %vm1079_vm1, %v9870_v8  ;;  %v9891_v17 = vmul.f32 %v867_v31, %v754_v9  ;;  %v2020_v18 = vrot.slane %v9870_v8, 4  ;;  %v2432_v19 = vrot.slane %v9870_v8, 5  ;;  %3228 = vmatpush1.bf16.msra.mxu1 %v9219_v59 }
 0x129   : > { %v613_v24 = vpop.f32.mrb[16].mxu0  ;;  %v1428_v25 = vrot.slane %v9870_v8, 2  ;;  %v1175_v26 = vrot.slane %v9870_v8, 1  ;;  %v1851_v29 = vsel %vm1840_vm7, %v1848_v41, %v1850_v11  ;;  %v1852_v30 = vrot.slane %v9870_v8, 3  ;;  %3229 = vmatprep.subr.bf16.mxu1 %v14955_v3 }
 0x12a   : > { %v2681_v31 = vsel %vm2668_vm2, %v2678_v43, %v2680_v15  ;;  %v2682_v22 = vrot.slane %v9891_v17, 6  ;;  %1087 = vst.msk [vmem:[#allocation2 + $0x120] sm:$0xff] %vm1079_vm1, %v9891_v17  ;;  %v614_v32 = vadd.f32 %v9706_v16, %v613_v24  ;;  %v8795_v33 = vpop.f32.mrb[17].mxu0  ;;  %v9909_v34 = vsel %vm2008_vm5, %v2018_v55, %v2020_v18  ;;  %1970 = vst.msk [vmem:[#allocation2 + $0xb0] sm:$0xff] %vm1079_vm1, %v1851_v29  ;;  %v9925_v43 = vpop.permute.xlu1 %886 }
 0x12b   : > { %2798 = vst.msk [vmem:[#allocation2 + $0xa0] sm:$0xff] %vm1079_vm1, %v2681_v31  ;;  %1506 = vrot.lane.b32.xlu0 %v1425_v50, %s9349_s22  ;;  %v616_v37 = vpop.f32.mrb[18].mxu0  ;;  %v9916_v38 = vsel %vm2420_vm6, %v2430_v62, %v2432_v19  ;;  %v9919_v39 = vsel %vm1416_vm4, %v1426_v2, %v1428_v25  ;;  %v9922_v40 = vsel %vm1163_vm3, %v1173_v56, %v1175_v26  ;;  %v2022_v41 = vrot.slane %v9891_v17, 4 }
 0x12c   : > { %v2683_v45 = vsel %vm2668_vm2, %v2680_v15, %v2682_v22  ;;  %v755_v46 = vmax.f32 %v614_v32, 0.0  ;;  %1253 = vrot.lane.b32.xlu1 %v1172_v54, %s9348_s19  ;;  %v617_v49 = vadd.f32 %v9706_v16, %v616_v37  ;;  %v8796_v50 = vpop.f32.mrb[19].mxu0  ;;  %v1177_v55 = vrot.slane %v9891_v17, 1  ;;  %v2836_v33 = vld [vmem:[#allocation2 + $0x88] sm:$0xff] }
 0x12d   : > { %2799 = vst.msk [vmem:[#allocation2 + $0xb8] sm:$0xff] %vm1079_vm1, %v2683_v45  ;;  %v9933_v57 = vsel %vm2008_vm5, %v2020_v18, %v2022_v41  ;;  %v2434_v56 = vrot.slane %v9891_v17, 5  ;;  %v1430_v58 = vrot.slane %v9891_v17, 2  ;;  %v1853_v54 = vsel %vm1840_vm7, %v1850_v11, %v1852_v30 }
 0x12e   : > { %v9942_v60 = vmul.f32 %v9845_v48, %v755_v46  ;;  %v756_v61 = vmax.f32 %v617_v49, 0.0  ;;  %v9945_v62 = vsel %vm1163_vm3, %v1175_v26, %v1177_v55  ;;  %1971 = vst.msk [vmem:[#allocation2 + $0xc8] sm:$0xff] %vm1079_vm1, %v1853_v54  ;;  %v1854_v2 = vrot.slane %v9891_v17, 3 }
 0x12f   : > { %1255 = vrot.lane.b32.xlu0 %v1174_v0, %s9348_s19  ;;  %v9953_v8 = vsel %vm2420_vm6, %v2432_v19, %v2434_v56  ;;  %v9956_v9 = vsel %vm1416_vm4, %v1428_v25, %v1430_v58  ;;  %v9220_v19 = vld [vmem:[%s14949_s4 + $0x70] sm:$0xff]   ;;  %v9976_v25 = vpop.permute.xlu1 %896 }
 0x130   : > { %v2684_v48 = vrot.slane %v9942_v60, 6  ;;  %1088 = vst.msk [vmem:[#allocation2 + $0x138] sm:$0xff] %vm1079_vm1, %v9942_v60  ;;  %v9962_v11 = vmul.f32 %v9868_v5, %v756_v61  ;;  %2265 = vrot.lane.b32.xlu1 %v9863_v63, %s9349_s22  ;;  %v2024_v0 = vrot.slane %v9942_v60, 4  ;;  %v2436_v13 = vrot.slane %v9942_v60, 5  ;;  %3230 = vmatpush1.bf16.msra.mxu1 %v9220_v19 }
 0x131   : > { %v621_v15 = vpop.f32.mrb[20].mxu0  ;;  %v1432_v17 = vrot.slane %v9942_v60, 2  ;;  %v1179_v18 = vrot.slane %v9942_v60, 1  ;;  %v1855_v5 = vsel %vm1840_vm7, %v1852_v30, %v1854_v2  ;;  %v1856_v24 = vrot.slane %v9942_v60, 3  ;;  %3231 = vmatprep.subr.bf16.mxu1 %v14955_v3 }
 0x132   : > { %v2685_v26 = vsel %vm2668_vm2, %v2682_v22, %v2684_v48  ;;  %v2686_v29 = vrot.slane %v9962_v11, 6  ;;  %1089 = vst.msk [vmem:[#allocation2 + $0x150] sm:$0xff] %vm1079_vm1, %v9962_v11  ;;  %v622_v31 = vadd.f32 %v9706_v16, %v621_v15  ;;  %v8799_v32 = vpop.f32.mrb[21].mxu0  ;;  %v2839_v37 = vld [vmem:[#allocation2 + $0xa0] sm:$0xff]  ;;  %v9984_v45 = vsel %vm2008_vm5, %v2022_v41, %v2024_v0  ;;  %1972 = vst.msk [vmem:[#allocation2 + $0xe0] sm:$0xff] %vm1079_vm1, %v1855_v5 }
 0x133   : > { %2800 = vst.msk [vmem:[#allocation2 + $0xd0] sm:$0xff] %vm1079_vm1, %v2685_v26  ;;  %2267 = vrot.lane.b32.xlu0 %v9909_v34, %s9349_s22  ;;  %v624_v30 = vpop.f32.mrb[22].mxu0  ;;  %v2944_v22 = vpack.c.bf16 %v2839_v37, %v2836_v33  ;;  %v9991_v46 = vsel %vm2420_vm6, %v2434_v56, %v2436_v13  ;;  %v9994_v49 = vsel %vm1416_vm4, %v1430_v58, %v1432_v17  ;;  %v2026_v61 = vrot.slane %v9962_v11, 4  ;;  %v9221_v56 = vld [vmem:[%s14949_s4 + $0x78] sm:$0xff]   ;;  %v10007_v58 = vpop.permute.xlu0 %901 }
 0x134   : > { %v9997_v50 = vsel %vm1163_vm3, %v1177_v55, %v1179_v18  ;;  %v2687_v41 = vsel %vm2668_vm2, %v2684_v48, %v2686_v29  ;;  %v757_v59 = vmax.f32 %v622_v31, 0.0  ;;  %2512 = vrot.lane.b32.xlu1 %v9873_v10, %s9350_s20  ;;  %v625_v54 = vadd.f32 %v9706_v16, %v624_v30  ;;  %v8800_v60 = vpop.f32.mrb[23].mxu0  ;;  %3232 = vmatpush1.bf16.msra.mxu1 %v9221_v56 }
 0x135   : > { %2801 = vst.msk [vmem:[#allocation2 + $0xe8] sm:$0xff] %vm1079_vm1, %v2687_v41  ;;  %8865 = vmatprep.mubr.msk.bf16.mxu0 %vm1079_vm1, %v2944_v22  ;;  %v1181_v55 = vrot.slane %v9962_v11, 1  ;;  %v2438_v10 = vrot.slane %v9962_v11, 5  ;;  %v1434_v48 = vrot.slane %v9962_v11, 2  ;;  %v10019_v5 = vsel %vm2008_vm5, %v2024_v0, %v2026_v61  ;;  %v10035_v0 = vpop.permute.xlu1 %906  ;;  %9121 = vmatprep.subr.bf16.mxu1 %v9667_v6 }
 0x136   : > { %v10016_v15 = vmul.f32 %v9897_v21, %v757_v59  ;;  %v758_v19 = vmax.f32 %v625_v54, 0.0  ;;  %v1857_v26 = vsel %vm1840_vm7, %v1854_v2, %v1856_v24  ;;  %v1858_v21 = vrot.slane %v9962_v11, 3  ;;  %v2842_v54 = vld [vmem:[#allocation2 + $0xb8] sm:$0xff] }
 0x137   : > { %2514 = vrot.lane.b32.xlu0 %v9916_v38, %s9350_s20  ;;  %v10025_v31 = vsel %vm1163_vm3, %v1179_v18, %v1181_v55  ;;  %v10028_v32 = vsel %vm2420_vm6, %v2436_v13, %v2438_v10  ;;  %v10031_v33 = vsel %vm1416_vm4, %v1432_v17, %v1434_v48  ;;  %1973 = vst.msk [vmem:[#allocation2 + $0xf8] sm:$0xff] %vm1079_vm1, %v1857_v26 }
 0x138   : > { %v2688_v2 = vrot.slane %v10016_v15, 6  ;;  %1090 = vst.msk [vmem:[#allocation2 + $0x168] sm:$0xff] %vm1079_vm1, %v10016_v15  ;;  %v10041_v38 = vmul.f32 %v9925_v43, %v758_v19  ;;  %2100 = vrot.lane.b32.xlu1 %v9863_v63, %s9348_s19  ;;  %v2028_v13 = vrot.slane %v10016_v15, 4  ;;  %v2440_v17 = vrot.slane %v10016_v15, 5 }
 0x139   : > { %v629_v18 = vpop.f32.mrb[24].mxu0  ;;  %v1436_v11 = vrot.slane %v10016_v15, 2  ;;  %v1183_v37 = vrot.slane %v10016_v15, 1  ;;  %v1859_v30 = vsel %vm1840_vm7, %v1856_v24, %v1858_v21  ;;  %v1860_v22 = vrot.slane %v10016_v15, 3  ;;  %v10061_v24 = vpop.permute.xlu0 %911 }
 0x13a   : > { %v2689_v43 = vsel %vm2668_vm2, %v2686_v29, %v2688_v2  ;;  %v2690_v63 = vrot.slane %v10041_v38, 6  ;;  %1091 = vst.msk [vmem:[#allocation2 + $0x180] sm:$0xff] %vm1079_vm1, %v10041_v38  ;;  %v630_v41 = vadd.f32 %v9706_v16, %v629_v18  ;;  %v8803_v59 = vpop.f32.mrb[25].mxu0  ;;  %v2845_v60 = vld [vmem:[#allocation2 + $0xd0] sm:$0xff]  ;;  %v10058_v56 = vsel %vm2008_vm5, %v2026_v61, %v2028_v13  ;;  %1974 = vst.msk [vmem:[#allocation2 + $0x110] sm:$0xff] %vm1079_vm1, %v1859_v30 }
 0x13b   : > { %2802 = vst.msk [vmem:[#allocation2 + $0x100] sm:$0xff] %vm1079_vm1, %v2689_v43  ;;  %2102 = vrot.lane.b32.xlu0 %v9909_v34, %s9348_s19  ;;  %v632_v6 = vpop.f32.mrb[26].mxu0  ;;  %v2947_v29 = vpack.c.bf16 %v2845_v60, %v2842_v54  ;;  %v10067_v15 = vsel %vm2420_vm6, %v2438_v10, %v2440_v17  ;;  %v10070_v19 = vsel %vm1416_vm4, %v1434_v48, %v1436_v11  ;;  %v2030_v43 = vrot.slane %v10041_v38, 4 }
 0x13c   : > { %v10073_v61 = vsel %vm1163_vm3, %v1181_v55, %v1183_v37  ;;  %v2691_v26 = vsel %vm2668_vm2, %v2688_v2, %v2690_v63  ;;  %v759_v18 = vmax.f32 %v630_v41, 0.0  ;;  %1679 = vrot.lane.b32.xlu1 %v9880_v12, %s9350_s20  ;;  %v633_v30 = vadd.f32 %v9706_v16, %v632_v6  ;;  %v8804_v34 = vpop.f32.mrb[27].mxu0  ;;  %v10086_v41 = vpop.permute.xlu1 %916  ;;  %v2848_v3 = vld [vmem:[#allocation2 + $0xe8] sm:$0xff] }
 0x13d   : > { %2803 = vst.msk [vmem:[#allocation2 + $0x118] sm:$0xff] %vm1079_vm1, %v2691_v26  ;;  %8866 = vmatmul.mubr.msk.bf16.vlgmr.msra.gmra.mrb[84].mxu0 %vm1079_vm1, %v2947_v29  ;;  %v1185_v10 = vrot.slane %v10041_v38, 1  ;;  %v2442_v55 = vrot.slane %v10041_v38, 5  ;;  %v1438_v48 = vrot.slane %v10041_v38, 2  ;;  %v1861_v2 = vsel %vm1840_vm7, %v1858_v21, %v1860_v22 }
 0x13e   : > { %v10089_v59 = vmul.f32 %v9949_v4, %v759_v18  ;;  %v760_v54 = vmax.f32 %v633_v30, 0.0  ;;  %v10092_v60 = vsel %vm2008_vm5, %v2028_v13, %v2030_v43  ;;  %1975 = vst.msk [vmem:[#allocation2 + $0x128] sm:$0xff] %vm1079_vm1, %v1861_v2  ;;  %v1862_v6 = vrot.slane %v10041_v38, 3 }
 0x13f   : > { %1681 = vrot.lane.b32.xlu0 %v9919_v39, %s9350_s20  ;;  %v10099_v29 = vsel %vm1163_vm3, %v1183_v37, %v1185_v10  ;;  %v10102_v21 = vsel %vm2420_vm6, %v2440_v17, %v2442_v55  ;;  %v10105_v4 = vsel %vm1416_vm4, %v1436_v11, %v1438_v48  ;;  %v10119_v11 = vpop.permute.xlu0 %921 }
 0x140   : > { %v2692_v13 = vrot.slane %v10089_v59, 6  ;;  %1092 = vst.msk [vmem:[#allocation2 + $0x198] sm:$0xff] %vm1079_vm1, %v10089_v59  ;;  %v10111_v38 = vmul.f32 %v9976_v25, %v760_v54  ;;  %1508 = vrot.lane.b32.xlu1 %v9880_v12, %s9349_s22  ;;  %v2032_v37 = vrot.slane %v10089_v59, 4  ;;  %v2444_v17 = vrot.slane %v10089_v59, 5 }
 0x141   : > { %v637_v26 = vpop.f32.mrb[28].mxu0  ;;  %v1440_v18 = vrot.slane %v10089_v59, 2  ;;  %v1187_v30 = vrot.slane %v10089_v59, 1  ;;  %v1863_v25 = vsel %vm1840_vm7, %v1860_v22, %v1862_v6  ;;  %v1864_v34 = vrot.slane %v10089_v59, 3 }
 0x142   : > { %v2693_v12 = vsel %vm2668_vm2, %v2690_v63, %v2692_v13  ;;  %v2694_v2 = vrot.slane %v10111_v38, 6  ;;  %1093 = vst.msk [vmem:[#allocation2 + $0x1b0] sm:$0xff] %vm1079_vm1, %v10111_v38  ;;  %v638_v54 = vadd.f32 %v9706_v16, %v637_v26  ;;  %v8807_v44 = vpop.f32.mrb[29].mxu0  ;;  %v2851_v1 = vld [vmem:[#allocation2 + $0x100] sm:$0xff]  ;;  %v10131_v14 = vsel %vm2008_vm5, %v2030_v43, %v2032_v37  ;;  %1976 = vst.msk [vmem:[#allocation2 + $0x140] sm:$0xff] %vm1079_vm1, %v1863_v25  ;;  %v10146_v43 = vpop.permute.xlu1 %926 }
 0x143   : > { %2804 = vst.msk [vmem:[#allocation2 + $0x130] sm:$0xff] %vm1079_vm1, %v2693_v12  ;;  %1510 = vrot.lane.b32.xlu0 %v9919_v39, %s9349_s22  ;;  %v640_v22 = vpop.f32.mrb[30].mxu0  ;;  %v2950_v63 = vpack.c.bf16 %v2851_v1, %v2848_v3  ;;  %v10138_v59 = vsel %vm2420_vm6, %v2442_v55, %v2444_v17  ;;  %v10141_v26 = vsel %vm1416_vm4, %v1438_v48, %v1440_v18  ;;  %v2034_v3 = vrot.slane %v10111_v38, 4 }
 0x144   : > { %v10144_v44 = vsel %vm1163_vm3, %v1185_v10, %v1187_v30  ;;  %v2695_v25 = vsel %vm2668_vm2, %v2692_v13, %v2694_v2  ;;  %v761_v42 = vmax.f32 %v638_v54, 0.0  ;;  %1257 = vrot.lane.b32.xlu1 %v9922_v40, %s9348_s19  ;;  %v641_v39 = vadd.f32 %v9706_v16, %v640_v22  ;;  %v8808_v1 = vpop.f32.mrb[31].mxu0  ;;  %v2854_v28 = vld [vmem:[#allocation2 + $0x118] sm:$0xff] }
 0x145   : > { %2805 = vst.msk [vmem:[#allocation2 + $0x148] sm:$0xff] %vm1079_vm1, %v2695_v25  ;;  %8869 = vmatprep.mubr.msk.bf16.mxu0 %vm1079_vm1, %v2950_v63  ;;  %v1189_v10 = vrot.slane %v10111_v38, 1  ;;  %v2446_v55 = vrot.slane %v10111_v38, 5  ;;  %v1442_v48 = vrot.slane %v10111_v38, 2  ;;  %v1865_v13 = vsel %vm1840_vm7, %v1862_v6, %v1864_v34  ;;  %v10167_v63 = vpop.permute.xlu0 %931 }
 0x146   : > { %v10160_v12 = vmul.f32 %v10007_v58, %v761_v42  ;;  %v762_v40 = vmax.f32 %v641_v39, 0.0  ;;  %v10163_v54 = vsel %vm2008_vm5, %v2032_v37, %v2034_v3  ;;  %1977 = vst.msk [vmem:[#allocation2 + $0x158] sm:$0xff] %vm1079_vm1, %v1865_v13  ;;  %v1866_v22 = vrot.slane %v10111_v38, 3  ;;  %v10194_v13 = vpop.permute.xlu1 %936 }
 0x147   : > { %1259 = vrot.lane.b32.xlu0 %v9945_v62, %s9348_s19  ;;  %v10172_v25 = vsel %vm1163_vm3, %v1187_v30, %v1189_v10  ;;  %v10175_v6 = vsel %vm2420_vm6, %v2444_v17, %v2446_v55  ;;  %v10178_v42 = vsel %vm1416_vm4, %v1440_v18, %v1442_v48 }
 0x148   : > { %v2696_v58 = vrot.slane %v10160_v12, 6  ;;  %1094 = vst.msk [vmem:[#allocation2 + $0x1c8] sm:$0xff] %vm1079_vm1, %v10160_v12  ;;  %v10184_v38 = vmul.f32 %v10035_v0, %v762_v40  ;;  %2269 = vrot.lane.b32.xlu1 %v9933_v57, %s9349_s22  ;;  %v2036_v62 = vrot.slane %v10160_v12, 4  ;;  %v2448_v37 = vrot.slane %v10160_v12, 5 }
 0x149   : > { %v645_v17 = vpop.f32.mrb[32].mxu0  ;;  %v1444_v30 = vrot.slane %v10160_v12, 2  ;;  %v1191_v18 = vrot.slane %v10160_v12, 1  ;;  %v1867_v39 = vsel %vm1840_vm7, %v1864_v34, %v1866_v22  ;;  %v1868_v1 = vrot.slane %v10160_v12, 3 }
 0x14a   : > { %v2697_v0 = vsel %vm2668_vm2, %v2694_v2, %v2696_v58  ;;  %v2698_v40 = vrot.slane %v10184_v38, 6  ;;  %1095 = vst.msk [vmem:[#allocation2 + $0x1e0] sm:$0xff] %vm1079_vm1, %v10184_v38  ;;  %v646_v27 = vadd.f32 %v9706_v16, %v645_v17  ;;  %v8811_v53 = vpop.f32.mrb[33].mxu0  ;;  %v2857_v47 = vld [vmem:[#allocation2 + $0x130] sm:$0xff]  ;;  %v10202_v20 = vsel %vm2008_vm5, %v2034_v3, %v2036_v62  ;;  %1978 = vst.msk [vmem:[#allocation2 + $0x170] sm:$0xff] %vm1079_vm1, %v1867_v39 }
 0x14b   : > { %2806 = vst.msk [vmem:[#allocation2 + $0x160] sm:$0xff] %vm1079_vm1, %v2697_v0  ;;  %2271 = vrot.lane.b32.xlu0 %v9984_v45, %s9349_s22  ;;  %v648_v34 = vpop.f32.mrb[34].mxu0  ;;  %v2953_v2 = vpack.c.bf16 %v2857_v47, %v2854_v28  ;;  %v10209_v12 = vsel %vm2420_vm6, %v2446_v55, %v2448_v37  ;;  %v10212_v17 = vsel %vm1416_vm4, %v1442_v48, %v1444_v30  ;;  %v2038_v28 = vrot.slane %v10184_v38, 4  ;;  %v10222_v47 = vpop.permute.xlu0 %941 }
 0x14c   : > { %v10215_v53 = vsel %vm1163_vm3, %v1189_v10, %v1191_v18  ;;  %v2699_v3 = vsel %vm2668_vm2, %v2696_v58, %v2698_v40  ;;  %v763_v23 = vmax.f32 %v646_v27, 0.0  ;;  %2516 = vrot.lane.b32.xlu1 %v9953_v8, %s9350_s20  ;;  %v649_v39 = vadd.f32 %v9706_v16, %v648_v34  ;;  %v8812_v0 = vpop.f32.mrb[35].mxu0  ;;  %v2860_v36 = vld [vmem:[#allocation2 + $0x148] sm:$0xff] }
 0x14d   : > { %2807 = vst.msk [vmem:[#allocation2 + $0x178] sm:$0xff] %vm1079_vm1, %v2699_v3  ;;  %8870 = vmatmul.mubr.msk.bf16.gmra.mrb[88].mxu0 %vm1079_vm1, %v2953_v2  ;;  %v1193_v10 = vrot.slane %v10184_v38, 1  ;;  %v2450_v55 = vrot.slane %v10184_v38, 5  ;;  %v1446_v27 = vrot.slane %v10184_v38, 2  ;;  %v1869_v48 = vsel %vm1840_vm7, %v1866_v22, %v1868_v1 }
 0x14e   : > { %v10231_v8 = vmul.f32 %v10061_v24, %v763_v23  ;;  %v764_v58 = vmax.f32 %v649_v39, 0.0  ;;  %v10234_v34 = vsel %vm2008_vm5, %v2036_v62, %v2038_v28  ;;  %1979 = vst.msk [vmem:[#allocation2 + $0x188] sm:$0xff] %vm1079_vm1, %v1869_v48  ;;  %v1870_v3 = vrot.slane %v10184_v38, 3  ;;  %v10249_v24 = vpop.permute.xlu1 %946 }
 0x14f   : > { %2518 = vrot.lane.b32.xlu0 %v9991_v46, %s9350_s20  ;;  %v10241_v2 = vsel %vm1163_vm3, %v1191_v18, %v1193_v10  ;;  %v10244_v0 = vsel %vm2420_vm6, %v2448_v37, %v2450_v55  ;;  %v10247_v23 = vsel %vm1416_vm4, %v1444_v30, %v1446_v27 }
 0x150   : > { %v2700_v22 = vrot.slane %v10231_v8, 6  ;;  %1096 = vst.msk [vmem:[#allocation2 + $0x1f8] sm:$0xff] %vm1079_vm1, %v10231_v8  ;;  %v10255_v38 = vmul.f32 %v10086_v41, %v764_v58  ;;  %2104 = vrot.lane.b32.xlu1 %v9933_v57, %s9348_s19  ;;  %v2040_v46 = vrot.slane %v10231_v8, 4  ;;  %v2452_v62 = vrot.slane %v10231_v8, 5 }
 0x151   : > { %v653_v37 = vpop.f32.mrb[36].mxu0  ;;  %v1448_v30 = vrot.slane %v10231_v8, 2  ;;  %v1195_v18 = vrot.slane %v10231_v8, 1  ;;  %v1871_v39 = vsel %vm1840_vm7, %v1868_v1, %v1870_v3  ;;  %v1872_v48 = vrot.slane %v10231_v8, 3  ;;  %v10274_v1 = vpop.permute.xlu0 %951 }
 0x152   : > { %v2701_v52 = vsel %vm2668_vm2, %v2698_v40, %v2700_v22  ;;  %v2702_v41 = vrot.slane %v10255_v38, 6  ;;  %1097 = vst.msk [vmem:[#allocation2 + $0x210] sm:$0xff] %vm1079_vm1, %v10255_v38  ;;  %v654_v57 = vadd.f32 %v9706_v16, %v653_v37  ;;  %v8815_v58 = vpop.f32.mrb[37].mxu0  ;;  %v2863_v7 = vld [vmem:[#allocation2 + $0x160] sm:$0xff]  ;;  %v10271_v51 = vsel %vm2008_vm5, %v2038_v28, %v2040_v46  ;;  %1980 = vst.msk [vmem:[#allocation2 + $0x1a0] sm:$0xff] %vm1079_vm1, %v1871_v39 }
 0x153   : > { %2808 = vst.msk [vmem:[#allocation2 + $0x190] sm:$0xff] %vm1079_vm1, %v2701_v52  ;;  %2106 = vrot.lane.b32.xlu0 %v9984_v45, %s9348_s19  ;;  %v656_v40 = vpop.f32.mrb[38].mxu0  ;;  %v2956_v8 = vpack.c.bf16 %v2863_v7, %v2860_v36  ;;  %v10280_v35 = vsel %vm2420_vm6, %v2450_v55, %v2452_v62  ;;  %v10283_v37 = vsel %vm1416_vm4, %v1446_v27, %v1448_v30  ;;  %v2042_v36 = vrot.slane %v10255_v38, 4 }
 0x154   : > { %15092 = vst [vmem:[#allocation19_spill] sm:$0xff] %v10283_v37  ;;  %v10286_v28 = vsel %vm1163_vm3, %v1193_v10, %v1195_v18  ;;  %v2703_v39 = vsel %vm2668_vm2, %v2700_v22, %v2702_v41  ;;  %v765_v58 = vmax.f32 %v654_v57, 0.0  ;;  %1683 = vrot.lane.b32.xlu1 %v9956_v9, %s9350_s20  ;;  %v657_v52 = vadd.f32 %v9706_v16, %v656_v40  ;;  %v8816_v45 = vpop.f32.mrb[39].mxu0  ;;  %v10299_v22 = vpop.permute.xlu1 %956 }
 0x155   : > { %15093 = vst [vmem:[#allocation20_spill] sm:$0xff] %v10286_v28  ;;  %2809 = vst.msk [vmem:[#allocation2 + $0x1a8] sm:$0xff] %vm1079_vm1, %v2703_v39  ;;  %8873 = vmatprep.mubr.msk.bf16.mxu0 %vm1079_vm1, %v2956_v8  ;;  %v1197_v7 = vrot.slane %v10255_v38, 1  ;;  %v2454_v10 = vrot.slane %v10255_v38, 5  ;;  %v1450_v55 = vrot.slane %v10255_v38, 2  ;;  %v1873_v27 = vsel %vm1840_vm7, %v1870_v3, %v1872_v48 }
 0x156   : > { %v10302_v57 = vmul.f32 %v10119_v11, %v765_v58  ;;  %v766_v40 = vmax.f32 %v657_v52, 0.0  ;;  %v10305_v45 = vsel %vm2008_vm5, %v2040_v46, %v2042_v36  ;;  %1981 = vst.msk [vmem:[#allocation2 + $0x1b8] sm:$0xff] %vm1079_vm1, %v1873_v27  ;;  %v1874_v8 = vrot.slane %v10255_v38, 3 }
 0x157   : > { %15094 = vst [vmem:[#allocation21_spill] sm:$0xff] %v10305_v45  ;;  %1685 = vrot.lane.b32.xlu0 %v9994_v49, %s9350_s20  ;;  %v10312_v39 = vsel %vm1163_vm3, %v1195_v18, %v1197_v7  ;;  %v10315_v3 = vsel %vm2420_vm6, %v2452_v62, %v2454_v10  ;;  %v10318_v11 = vsel %vm1416_vm4, %v1448_v30, %v1450_v55  ;;  %v10330_v62 = vpop.permute.xlu0 %961 }
 0x158   : > { %15095 = vst [vmem:[#allocation22_spill] sm:$0xff] %v10312_v39  ;;  %15096 = vst [vmem:[#allocation23_spill] sm:$0xff] %v10315_v3  ;;  %v2704_v58 = vrot.slane %v10302_v57, 6  ;;  %v10324_v46 = vmul.f32 %v10146_v43, %v766_v40  ;;  %1512 = vrot.lane.b32.xlu1 %v9956_v9, %s9349_s22  ;;  %v2044_v38 = vrot.slane %v10302_v57, 4  ;;  %v2456_v18 = vrot.slane %v10302_v57, 5  ;;  %v2866_v39 = vld [vmem:[#allocation2 + $0x178] sm:$0xff] }
 0x159   : > { %15097 = vst [vmem:[#allocation24_spill] sm:$0xff] %v10318_v11  ;;  %1098 = vst.msk [vmem:[#allocation2 + $0x228] sm:$0xff] %vm1079_vm1, %v10302_v57  ;;  %v661_v52 = vpop.f32.mrb[40].mxu0  ;;  %v1452_v30 = vrot.slane %v10302_v57, 2  ;;  %v1199_v27 = vrot.slane %v10302_v57, 1  ;;  %v1875_v11 = vsel %vm1840_vm7, %v1872_v48, %v1874_v8  ;;  %v1876_v3 = vrot.slane %v10302_v57, 3 }
 0x15a   : > { %v2705_v43 = vsel %vm2668_vm2, %v2702_v41, %v2704_v58  ;;  %v2706_v40 = vrot.slane %v10324_v46, 6  ;;  %1099 = vst.msk [vmem:[#allocation2 + $0x240] sm:$0xff] %vm1079_vm1, %v10324_v46  ;;  %v662_v9 = vadd.f32 %v9706_v16, %v661_v52  ;;  %v8819_v45 = vpop.f32.mrb[41].mxu0  ;;  %v2869_v28 = vld [vmem:[#allocation2 + $0x190] sm:$0xff]  ;;  %v10342_v37 = vsel %vm2008_vm5, %v2042_v36, %v2044_v38  ;;  %1982 = vst.msk [vmem:[#allocation2 + $0x1d0] sm:$0xff] %vm1079_vm1, %v1875_v11  ;;  %v10357_v36 = vpop.permute.xlu1 %966 }
 0x15b   : > { %2810 = vst.msk [vmem:[#allocation2 + $0x1c0] sm:$0xff] %vm1079_vm1, %v2705_v43  ;;  %1514 = vrot.lane.b32.xlu0 %v9994_v49, %s9349_s22  ;;  %v664_v48 = vpop.f32.mrb[42].mxu0  ;;  %v2959_v41 = vpack.c.bf16 %v2869_v28, %v2866_v39  ;;  %v10349_v57 = vsel %vm2420_vm6, %v2454_v10, %v2456_v18  ;;  %v10352_v16 = vsel %vm1416_vm4, %v1450_v55, %v1452_v30  ;;  %v10365_v49 = vld [vmem:[%s14948_s3] ss:$0 sm:$0xff]  ;;  %v2046_v55 = vrot.slane %v10324_v46, 4 }
 0x15c   : > { %15098 = vst [vmem:[#allocation25_spill] sm:$0xff] %v10352_v16  ;;  %v10355_v45 = vsel %vm1163_vm3, %v1197_v7, %v1199_v27  ;;  %v2707_v11 = vsel %vm2668_vm2, %v2704_v58, %v2706_v40  ;;  %v767_v52 = vmax.f32 %v662_v9, 0.0  ;;  %1261 = vrot.lane.b32.xlu1 %v9997_v50, %s9348_s19  ;;  %v665_v28 = vadd.f32 %v10365_v49, %v664_v48  ;;  %v8820_v10 = vpop.f32.mrb[43].mxu0 }
 0x15d   : > { %15099 = vst [vmem:[#allocation26_spill] sm:$0xff] %v10355_v45  ;;  %2811 = vst.msk [vmem:[#allocation2 + $0x1d8] sm:$0xff] %vm1079_vm1, %v2707_v11  ;;  %8874 = vmatmul.mubr.msk.bf16.gmra.mrb[92].mxu0 %vm1079_vm1, %v2959_v41  ;;  %v1201_v7 = vrot.slane %v10324_v46, 1  ;;  %v2458_v39 = vrot.slane %v10324_v46, 5  ;;  %v1454_v50 = vrot.slane %v10324_v46, 2  ;;  %v1877_v58 = vsel %vm1840_vm7, %v1874_v8, %v1876_v3  ;;  %v10383_v41 = vpop.permute.xlu0 %971 }
 0x15e   : > { %v10376_v43 = vmul.f32 %v10167_v63, %v767_v52  ;;  %v768_v9 = vmax.f32 %v665_v28, 0.0  ;;  %v10379_v48 = vsel %vm2008_vm5, %v2044_v38, %v2046_v55  ;;  %1983 = vst.msk [vmem:[#allocation2 + $0x1e8] sm:$0xff] %vm1079_vm1, %v1877_v58  ;;  %v1878_v11 = vrot.slane %v10324_v46, 3 }
 0x15f   : > { %15100 = vst [vmem:[#allocation27_spill] sm:$0xff] %v10379_v48  ;;  %1263 = vrot.lane.b32.xlu0 %v10025_v31, %s9348_s19  ;;  %v10388_v10 = vsel %vm1163_vm3, %v1199_v27, %v1201_v7  ;;  %v10391_v8 = vsel %vm2420_vm6, %v2456_v18, %v2458_v39  ;;  %v10394_v63 = vsel %vm1416_vm4, %v1452_v30, %v1454_v50 }
 0x160   : > { %15101 = vst [vmem:[#allocation28_spill] sm:$0xff] %v10388_v10  ;;  %15102 = vst [vmem:[#allocation29_spill] sm:$0xff] %v10391_v8  ;;  %v2708_v38 = vrot.slane %v10376_v43, 6  ;;  %v10400_v46 = vmul.f32 %v10194_v13, %v768_v9  ;;  %2273 = vrot.lane.b32.xlu1 %v10019_v5, %s9349_s22  ;;  %v2048_v31 = vrot.slane %v10376_v43, 4  ;;  %v2460_v27 = vrot.slane %v10376_v43, 5  ;;  %v2872_v10 = vld [vmem:[#allocation2 + $0x1a8] sm:$0xff] }
 0x161   : > { %15103 = vst [vmem:[#allocation30_spill] sm:$0xff] %v10394_v63  ;;  %1100 = vst.msk [vmem:[#allocation2 + $0x258] sm:$0xff] %vm1079_vm1, %v10376_v43  ;;  %v669_v18 = vpop.f32.mrb[44].mxu0  ;;  %v1456_v52 = vrot.slane %v10376_v43, 2  ;;  %v1203_v30 = vrot.slane %v10376_v43, 1  ;;  %v1879_v28 = vsel %vm1840_vm7, %v1876_v3, %v1878_v11  ;;  %v1880_v58 = vrot.slane %v10376_v43, 3  ;;  %v10410_v63 = vpop.permute.xlu1 %976 }
 0x162   : > { %v2709_v13 = vsel %vm2668_vm2, %v2706_v40, %v2708_v38  ;;  %v2710_v9 = vrot.slane %v10400_v46, 6  ;;  %1101 = vst.msk [vmem:[#allocation2 + $0x270] sm:$0xff] %vm1079_vm1, %v10400_v46  ;;  %v670_v8 = vadd.f32 %v10365_v49, %v669_v18  ;;  %v8823_v48 = vpop.f32.mrb[45].mxu0  ;;  %v2875_v45 = vld [vmem:[#allocation2 + $0x1c0] sm:$0xff]  ;;  %v10418_v16 = vsel %vm2008_vm5, %v2046_v55, %v2048_v31  ;;  %1984 = vst.msk [vmem:[#allocation2 + $0x200] sm:$0xff] %vm1079_vm1, %v1879_v28 }
 0x163   : > { %15104 = vst [vmem:[#allocation31_spill] sm:$0xff] %v10418_v16  ;;  %2812 = vst.msk [vmem:[#allocation2 + $0x1f0] sm:$0xff] %vm1079_vm1, %v2709_v13  ;;  %2275 = vrot.lane.b32.xlu0 %v10058_v56, %s9349_s22  ;;  %v672_v3 = vpop.f32.mrb[46].mxu0  ;;  %v2962_v40 = vpack.c.bf16 %v2875_v45, %v2872_v10  ;;  %v10425_v43 = vsel %vm2420_vm6, %v2458_v39, %v2460_v27  ;;  %v10428_v18 = vsel %vm1416_vm4, %v1454_v50, %v1456_v52  ;;  %v10438_v10 = vpop.permute.xlu0 %981 }
 0x164   : > { %v10431_v48 = vsel %vm1163_vm3, %v1201_v7, %v1203_v30  ;;  %v2711_v55 = vsel %vm2668_vm2, %v2708_v38, %v2710_v9  ;;  %v769_v16 = vmax.f32 %v670_v8, 0.0  ;;  %2520 = vrot.lane.b32.xlu1 %v10028_v32, %s9350_s20  ;;  %v673_v28 = vadd.f32 %v10365_v49, %v672_v3  ;;  %v8824_v13 = vpop.f32.mrb[47].mxu0 }
 0x165   : > { %15105 = vst [vmem:[#allocation32_spill] sm:$0xff] %v10431_v48  ;;  %v2050_v45 = vrot.slane %v10400_v46, 4  ;;  %2813 = vst.msk [vmem:[#allocation2 + $0x208] sm:$0xff] %vm1079_vm1, %v2711_v55  ;;  %8877 = vmatprep.mubr.msk.bf16.mxu0 %vm1079_vm1, %v2962_v40  ;;  %v1205_v7 = vrot.slane %v10400_v46, 1  ;;  %v2462_v39 = vrot.slane %v10400_v46, 5  ;;  %v1458_v50 = vrot.slane %v10400_v46, 2 }
 0x166   : > { %v1881_v8 = vsel %vm1840_vm7, %v1878_v11, %v1880_v58  ;;  %v10447_v32 = vmul.f32 %v10222_v47, %v769_v16  ;;  %v770_v38 = vmax.f32 %v673_v28, 0.0  ;;  %v1882_v55 = vrot.slane %v10400_v46, 3  ;;  %v10465_v16 = vpop.permute.xlu1 %986 }
 0x167   : > { %v10450_v3 = vsel %vm2008_vm5, %v2048_v31, %v2050_v45  ;;  %1985 = vst.msk [vmem:[#allocation2 + $0x218] sm:$0xff] %vm1079_vm1, %v1881_v8  ;;  %2522 = vrot.lane.b32.xlu0 %v10067_v15, %s9350_s20  ;;  %v10457_v40 = vsel %vm1163_vm3, %v1203_v30, %v1205_v7  ;;  %v10460_v13 = vsel %vm2420_vm6, %v2460_v27, %v2462_v39 }
 0x168   : > { %15106 = vst [vmem:[#allocation33_spill] sm:$0xff] %v10450_v3  ;;  %15107 = vst [vmem:[#allocation34_spill] sm:$0xff] %v10457_v40  ;;  %v10463_v47 = vsel %vm1416_vm4, %v1456_v52, %v1458_v50  ;;  %v2712_v11 = vrot.slane %v10447_v32, 6  ;;  %v10471_v46 = vmul.f32 %v10249_v24, %v770_v38  ;;  %2108 = vrot.lane.b32.xlu1 %v10019_v5, %s9348_s19  ;;  %v2052_v15 = vrot.slane %v10447_v32, 4 }
 0x169   : > { %15108 = vst [vmem:[#allocation35_spill] sm:$0xff] %v10460_v13  ;;  %15109 = vst [vmem:[#allocation36_spill] sm:$0xff] %v10463_v47  ;;  %v2464_v31 = vrot.slane %v10447_v32, 5  ;;  %v677_v27 = vpop.f32.mrb[48].mxu0  ;;  %v1460_v52 = vrot.slane %v10447_v32, 2  ;;  %v1207_v30 = vrot.slane %v10447_v32, 1  ;;  %v1883_v28 = vsel %vm1840_vm7, %v1880_v58, %v1882_v55  ;;  %v10490_v58 = vpop.permute.xlu0 %991 }
 0x16a   : > { %1102 = vst.msk [vmem:[#allocation2 + $0x288] sm:$0xff] %vm1079_vm1, %v10447_v32  ;;  %v1884_v8 = vrot.slane %v10447_v32, 3  ;;  %v2713_v47 = vsel %vm2668_vm2, %v2710_v9, %v2712_v11  ;;  %v2714_v24 = vrot.slane %v10471_v46, 6  ;;  %1103 = vst.msk [vmem:[#allocation2 + $0x2a0] sm:$0xff] %vm1079_vm1, %v10471_v46  ;;  %v678_v5 = vadd.f32 %v10365_v49, %v677_v27  ;;  %v8827_v38 = vpop.f32.mrb[49].mxu0  ;;  %v2878_v13 = vld [vmem:[#allocation2 + $0x1d8] sm:$0xff] }
 0x16b   : > { %v2881_v3 = vld [vmem:[#allocation2 + $0x1f0] sm:$0xff]  ;;  %v10487_v40 = vsel %vm2008_vm5, %v2050_v45, %v2052_v15  ;;  %1986 = vst.msk [vmem:[#allocation2 + $0x230] sm:$0xff] %vm1079_vm1, %v1883_v28  ;;  %2814 = vst.msk [vmem:[#allocation2 + $0x220] sm:$0xff] %vm1079_vm1, %v2713_v47  ;;  %2110 = vrot.lane.b32.xlu0 %v10058_v56, %s9348_s19  ;;  %v680_v9 = vpop.f32.mrb[50].mxu0  ;;  %v10496_v48 = vsel %vm2420_vm6, %v2462_v39, %v2464_v31  ;;  %v10499_v27 = vsel %vm1416_vm4, %v1458_v50, %v1460_v52 }
 0x16c   : > { %v2965_v32 = vpack.c.bf16 %v2881_v3, %v2878_v13  ;;  %15110 = vst [vmem:[#allocation37_spill] sm:$0xff] %v10499_v27  ;;  %v10502_v45 = vsel %vm1163_vm3, %v1205_v7, %v1207_v30  ;;  %v2715_v28 = vsel %vm2668_vm2, %v2712_v11, %v2714_v24  ;;  %v771_v38 = vmax.f32 %v678_v5, 0.0  ;;  %1687 = vrot.lane.b32.xlu1 %v10031_v33, %s9350_s20  ;;  %v8828_v56 = vpop.f32.mrb[51].mxu0  ;;  %v10515_v11 = vpop.permute.xlu1 %996 }
 0x16d   : > { %15111 = vst [vmem:[#allocation38_spill] sm:$0xff] %v10502_v45  ;;  %v681_v47 = vadd.f32 %v10365_v49, %v680_v9  ;;  %v2054_v3 = vrot.slane %v10471_v46, 4  ;;  %2815 = vst.msk [vmem:[#allocation2 + $0x238] sm:$0xff] %vm1079_vm1, %v2715_v28  ;;  %v1209_v39 = vrot.slane %v10471_v46, 1  ;;  %v2466_v7 = vrot.slane %v10471_v46, 5 }
 0x16e   : > { %8878 = vmatmul.mubr.msk.bf16.gmra.mrb[96].mxu0 %vm1079_vm1, %v2965_v32  ;;  %v1462_v50 = vrot.slane %v10471_v46, 2  ;;  %v1885_v13 = vsel %vm1840_vm7, %v1882_v55, %v1884_v8  ;;  %v10518_v5 = vmul.f32 %v10274_v1, %v771_v38  ;;  %v1886_v32 = vrot.slane %v10471_v46, 3 }
 0x16f   : > { %v772_v9 = vmax.f32 %v681_v47, 0.0  ;;  %v10521_v56 = vsel %vm2008_vm5, %v2052_v15, %v2054_v3  ;;  %1987 = vst.msk [vmem:[#allocation2 + $0x248] sm:$0xff] %vm1079_vm1, %v1885_v13  ;;  %1689 = vrot.lane.b32.xlu0 %v10070_v19, %s9350_s20  ;;  %v10528_v28 = vsel %vm1163_vm3, %v1207_v30, %v1209_v39  ;;  %v10531_v55 = vsel %vm2420_vm6, %v2464_v31, %v2466_v7  ;;  %v10546_v31 = vpop.permute.xlu0 %1001 }
 0x170   : > { %15112 = vst [vmem:[#allocation39_spill] sm:$0xff] %v10521_v56  ;;  %15113 = vst [vmem:[#allocation40_spill] sm:$0xff] %v10528_v28  ;;  %v10534_v1 = vsel %vm1416_vm4, %v1460_v52, %v1462_v50  ;;  %v2716_v38 = vrot.slane %v10518_v5, 6  ;;  %1516 = vrot.lane.b32.xlu1 %v10031_v33, %s9349_s22  ;;  %v2056_v46 = vrot.slane %v10518_v5, 4  ;;  %v2468_v30 = vrot.slane %v10518_v5, 5  ;;  %v2884_v28 = vld [vmem:[#allocation2 + $0x208] sm:$0xff] }
 0x171   : > { %15114 = vst [vmem:[#allocation41_spill] sm:$0xff] %v10531_v55  ;;  %15115 = vst [vmem:[#allocation42_spill] sm:$0xff] %v10534_v1  ;;  %v10540_v15 = vmul.f32 %v10299_v22, %v772_v9  ;;  %v685_v47 = vpop.f32.mrb[52].mxu0  ;;  %v1464_v52 = vrot.slane %v10518_v5, 2  ;;  %v1211_v13 = vrot.slane %v10518_v5, 1  ;;  %v1887_v1 = vsel %vm1840_vm7, %v1884_v8, %v1886_v32 }
 0x172   : > { %1104 = vst.msk [vmem:[#allocation2 + $0x2b8] sm:$0xff] %vm1079_vm1, %v10518_v5  ;;  %v1888_v55 = vrot.slane %v10518_v5, 3  ;;  %v2717_v22 = vsel %vm2668_vm2, %v2714_v24, %v2716_v38  ;;  %v686_v33 = vadd.f32 %v10365_v49, %v685_v47  ;;  %v8831_v56 = vpop.f32.mrb[53].mxu0  ;;  %v2887_v45 = vld [vmem:[#allocation2 + $0x220] sm:$0xff]  ;;  %v10558_v27 = vsel %vm2008_vm5, %v2054_v3, %v2056_v46  ;;  %1988 = vst.msk [vmem:[#allocation2 + $0x260] sm:$0xff] %vm1079_vm1, %v1887_v1  ;;  %v10573_v3 = vpop.permute.xlu1 %1006 }
 0x173   : > { %v2718_v9 = vrot.slane %v10540_v15, 6  ;;  %1105 = vst.msk [vmem:[#allocation2 + $0x2d0] sm:$0xff] %vm1079_vm1, %v10540_v15  ;;  %15116 = vst [vmem:[#allocation43_spill] sm:$0xff] %v10558_v27  ;;  %1518 = vrot.lane.b32.xlu0 %v10070_v19, %s9349_s22  ;;  %v688_v8 = vpop.f32.mrb[54].mxu0  ;;  %v2968_v24 = vpack.c.bf16 %v2887_v45, %v2884_v28  ;;  %v10565_v5 = vsel %vm2420_vm6, %v2466_v7, %v2468_v30  ;;  %v2058_v7 = vrot.slane %v10540_v15, 4 }
 0x174   : > { %2816 = vst.msk [vmem:[#allocation2 + $0x250] sm:$0xff] %vm1079_vm1, %v2717_v22  ;;  %v10568_v47 = vsel %vm1416_vm4, %v1462_v50, %v1464_v52  ;;  %v10571_v56 = vsel %vm1163_vm3, %v1209_v39, %v1211_v13  ;;  %v773_v27 = vmax.f32 %v686_v33, 0.0  ;;  %1265 = vrot.lane.b32.xlu1 %v10073_v61, %s9348_s19  ;;  %v689_v19 = vadd.f32 %v10365_v49, %v688_v8  ;;  %v8832_v45 = vpop.f32.mrb[55].mxu0 }
 0x175   : > { %15117 = vst [vmem:[#allocation44_spill] sm:$0xff] %v10568_v47  ;;  %15118 = vst [vmem:[#allocation45_spill] sm:$0xff] %v10571_v56  ;;  %v2719_v1 = vsel %vm2668_vm2, %v2716_v38, %v2718_v9  ;;  %8881 = vmatprep.mubr.msk.bf16.mxu0 %vm1079_vm1, %v2968_v24  ;;  %v1213_v39 = vrot.slane %v10540_v15, 1  ;;  %v2470_v50 = vrot.slane %v10540_v15, 5  ;;  %v1466_v28 = vrot.slane %v10540_v15, 2  ;;  %v10594_v24 = vpop.permute.xlu0 %1011 }
 0x176   : > { %2817 = vst.msk [vmem:[#allocation2 + $0x268] sm:$0xff] %vm1079_vm1, %v2719_v1  ;;  %v1889_v38 = vsel %vm1840_vm7, %v1886_v32, %v1888_v55  ;;  %v10587_v22 = vmul.f32 %v10330_v62, %v773_v27  ;;  %v774_v61 = vmax.f32 %v689_v19, 0.0  ;;  %v10590_v33 = vsel %vm2008_vm5, %v2056_v46, %v2058_v7 }
 0x177   : > { %15119 = vst [vmem:[#allocation46_spill] sm:$0xff] %v10590_v33  ;;  %1989 = vst.msk [vmem:[#allocation2 + $0x278] sm:$0xff] %vm1079_vm1, %v1889_v38  ;;  %v1890_v8 = vrot.slane %v10540_v15, 3  ;;  %1267 = vrot.lane.b32.xlu0 %v10099_v29, %s9348_s19  ;;  %v10599_v1 = vsel %vm1163_vm3, %v1211_v13, %v1213_v39  ;;  %v10602_v32 = vsel %vm2420_vm6, %v2468_v30, %v2470_v50  ;;  %v10621_v38 = vpop.permute.xlu1 %1016  ;;  %v2890_v33 = vld [vmem:[#allocation2 + $0x238] sm:$0xff] }
 0x178   : > { %15120 = vst [vmem:[#allocation47_spill] sm:$0xff] %v10599_v1  ;;  %15121 = vst [vmem:[#allocation48_spill] sm:$0xff] %v10602_v32  ;;  %v10605_v62 = vsel %vm1416_vm4, %v1464_v52, %v1466_v28  ;;  %v2720_v27 = vrot.slane %v10587_v22, 6  ;;  %v10611_v15 = vmul.f32 %v10357_v36, %v774_v61  ;;  %2277 = vrot.lane.b32.xlu1 %v10092_v60, %s9349_s22  ;;  %v2060_v29 = vrot.slane %v10587_v22, 4 }
 0x179   : > { %15122 = vst [vmem:[#allocation49_spill] sm:$0xff] %v10605_v62  ;;  %1106 = vst.msk [vmem:[#allocation2 + $0x2e8] sm:$0xff] %vm1079_vm1, %v10587_v22  ;;  %v2472_v46 = vrot.slane %v10587_v22, 5  ;;  %v693_v30 = vpop.f32.mrb[56].mxu0  ;;  %v1215_v13 = vrot.slane %v10587_v22, 1  ;;  %v1468_v52 = vrot.slane %v10587_v22, 2  ;;  %v1891_v19 = vsel %vm1840_vm7, %v1888_v55, %v1890_v8 }
 0x17a   : > { %v1892_v45 = vrot.slane %v10587_v22, 3  ;;  %v2721_v36 = vsel %vm2668_vm2, %v2718_v9, %v2720_v27  ;;  %v2722_v61 = vrot.slane %v10611_v15, 6  ;;  %1107 = vst.msk [vmem:[#allocation2 + $0x300] sm:$0xff] %vm1079_vm1, %v10611_v15  ;;  %v694_v62 = vadd.f32 %v10365_v49, %v693_v30  ;;  %v8835_v32 = vpop.f32.mrb[57].mxu0  ;;  %1990 = vst.msk [vmem:[#allocation2 + $0x290] sm:$0xff] %vm1079_vm1, %v1891_v19 }
 0x17b   : > { %v2893_v1 = vld [vmem:[#allocation2 + $0x250] sm:$0xff]  ;;  %v10629_v56 = vsel %vm2008_vm5, %v2058_v7, %v2060_v29  ;;  %2818 = vst.msk [vmem:[#allocation2 + $0x280] sm:$0xff] %vm1079_vm1, %v2721_v36  ;;  %2279 = vrot.lane.b32.xlu0 %v10131_v14, %s9349_s22  ;;  %v696_v55 = vpop.f32.mrb[58].mxu0  ;;  %v10636_v22 = vsel %vm2420_vm6, %v2470_v50, %v2472_v46  ;;  %v10639_v30 = vsel %vm1163_vm3, %v1213_v39, %v1215_v13  ;;  %v2062_v32 = vrot.slane %v10611_v15, 4 }
 0x17c   : > { %15123 = vst [vmem:[#allocation50_spill] sm:$0xff] %v10629_v56  ;;  %v2971_v9 = vpack.c.bf16 %v2893_v1, %v2890_v33  ;;  %v2723_v7 = vsel %vm2668_vm2, %v2720_v27, %v2722_v61  ;;  %v775_v56 = vmax.f32 %v694_v62, 0.0  ;;  %2524 = vrot.lane.b32.xlu1 %v10102_v21, %s9350_s20  ;;  %v697_v19 = vadd.f32 %v10365_v49, %v696_v55  ;;  %v8836_v36 = vpop.f32.mrb[59].mxu0  ;;  %v10647_v33 = vpop.permute.xlu0 %1021 }
 0x17d   : > { %v1217_v47 = vrot.slane %v10611_v15, 1  ;;  %2819 = vst.msk [vmem:[#allocation2 + $0x298] sm:$0xff] %vm1079_vm1, %v2723_v7  ;;  %v10652_v39 = vsel %vm2008_vm5, %v2060_v29, %v2062_v32  ;;  %v2474_v50 = vrot.slane %v10611_v15, 5  ;;  %v10656_v1 = vsel %vm1416_vm4, %v1466_v28, %v1468_v52 }
 0x17e   : > { %8882 = vmatmul.mubr.msk.bf16.gmra.mrb[100].mxu0 %vm1079_vm1, %v2971_v9  ;;  %15124 = vst [vmem:[#allocation51_spill] sm:$0xff] %v10652_v39  ;;  %15125 = vst [vmem:[#allocation52_spill] sm:$0xff] %v10656_v1  ;;  %v1470_v21 = vrot.slane %v10611_v15, 2  ;;  %v10660_v62 = vmul.f32 %v10383_v41, %v775_v56  ;;  %v776_v27 = vmax.f32 %v697_v19, 0.0  ;;  %v1893_v9 = vsel %vm1840_vm7, %v1890_v8, %v1892_v45  ;;  %v10676_v56 = vpop.permute.xlu1 %1026 }
 0x17f   : > { %v10663_v55 = vsel %vm1163_vm3, %v1215_v13, %v1217_v47  ;;  %2526 = vrot.lane.b32.xlu0 %v10138_v59, %s9350_s20  ;;  %v10669_v29 = vsel %vm2420_vm6, %v2472_v46, %v2474_v50  ;;  %1991 = vst.msk [vmem:[#allocation2 + $0x2a8] sm:$0xff] %vm1079_vm1, %v1893_v9  ;;  %v1894_v41 = vrot.slane %v10611_v15, 3 }
 0x180   : > { %15126 = vst [vmem:[#allocation53_spill] sm:$0xff] %v10669_v29  ;;  %v10672_v28 = vsel %vm1416_vm4, %v1468_v52, %v1470_v21  ;;  %v2724_v13 = vrot.slane %v10660_v62, 6  ;;  %1108 = vst.msk [vmem:[#allocation2 + $0x318] sm:$0xff] %vm1079_vm1, %v10660_v62  ;;  %v10682_v59 = vmul.f32 %v10410_v63, %v776_v27  ;;  %2112 = vrot.lane.b32.xlu1 %v10092_v60, %s9348_s19  ;;  %v2064_v8 = vrot.slane %v10660_v62, 4 }
 0x181   : > { %15127 = vst [vmem:[#allocation54_spill] sm:$0xff] %v10672_v28  ;;  %v1219_v46 = vrot.slane %v10660_v62, 1  ;;  %v701_v52 = vpop.f32.mrb[60].mxu0  ;;  %v2476_v15 = vrot.slane %v10660_v62, 5  ;;  %v1472_v7 = vrot.slane %v10660_v62, 2  ;;  %v1895_v19 = vsel %vm1840_vm7, %v1892_v45, %v1894_v41  ;;  %v2896_v28 = vld [vmem:[#allocation2 + $0x268] sm:$0xff]  ;;  %v10701_v45 = vpop.permute.xlu0 %1031 }
 0x182   : > { %v1896_v36 = vrot.slane %v10660_v62, 3  ;;  %v2725_v9 = vsel %vm2668_vm2, %v2722_v61, %v2724_v13  ;;  %v2726_v63 = vrot.slane %v10682_v59, 6  ;;  %1109 = vst.msk [vmem:[#allocation2 + $0x330] sm:$0xff] %vm1079_vm1, %v10682_v59  ;;  %v702_v60 = vadd.f32 %v10365_v49, %v701_v52  ;;  %v8839_v27 = vpop.f32.mrb[61].mxu0  ;;  %v2899_v1 = vld [vmem:[#allocation2 + $0x280] sm:$0xff]  ;;  %1992 = vst.msk [vmem:[#allocation2 + $0x2c0] sm:$0xff] %vm1079_vm1, %v1895_v19 }
 0x183   : > { %v10698_v29 = vsel %vm2008_vm5, %v2062_v32, %v2064_v8  ;;  %2820 = vst.msk [vmem:[#allocation2 + $0x2b0] sm:$0xff] %vm1079_vm1, %v2725_v9  ;;  %2114 = vrot.lane.b32.xlu0 %v10131_v14, %s9348_s19  ;;  %v704_v61 = vpop.f32.mrb[62].mxu0  ;;  %v2974_v62 = vpack.c.bf16 %v2899_v1, %v2896_v28  ;;  %v10707_v39 = vsel %vm1163_vm3, %v1217_v47, %v1219_v46  ;;  %v1221_v52 = vrot.slane %v10682_v59, 1 }
 0x184   : > { %15128 = vst [vmem:[#allocation55_spill] sm:$0xff] %v10698_v29  ;;  %v10711_v27 = vsel %vm2420_vm6, %v2474_v50, %v2476_v15  ;;  %v2727_v32 = vsel %vm2668_vm2, %v2724_v13, %v2726_v63  ;;  %v777_v19 = vmax.f32 %v702_v60, 0.0  ;;  %1691 = vrot.lane.b32.xlu1 %v10105_v4, %s9350_s20  ;;  %v705_v9 = vadd.f32 %v10365_v49, %v704_v61  ;;  %v1246_v29 = vpop.permute.xlu1 %1245  ;;  %v8840_v14 = vpop.f32.mrb[63].mxu0 }
 0x185   : > { %v2066_v1 = vrot.slane %v10682_v59, 4  ;;  %2821 = vst.msk [vmem:[#allocation2 + $0x2c8] sm:$0xff] %vm1079_vm1, %v2727_v32  ;;  %8885 = vmatprep.mubr.msk.bf16.mxu0 %vm1079_vm1, %v2974_v62  ;;  %v10721_v47 = vsel %vm1163_vm3, %v1219_v46, %v1221_v52  ;;  %v2478_v50 = vrot.slane %v10682_v59, 5  ;;  %v10725_v28 = vsel %vm1416_vm4, %v1470_v21, %v1472_v7 }
 0x186   : > { %15129 = vst [vmem:[#allocation56_spill] sm:$0xff] %v10725_v28  ;;  %v1474_v13 = vrot.slane %v10682_v59, 2  ;;  %v10729_v60 = vmul.f32 %v10438_v10, %v777_v19  ;;  %v778_v29 = vmax.f32 %v705_v9, 0.0  ;;  %v1897_v32 = vsel %vm1840_vm7, %v1894_v41, %v1896_v36 }
 0x187   : > { %v10732_v61 = vsel %vm2008_vm5, %v2064_v8, %v2066_v1  ;;  %v1248_v62 = vpop.permute.xlu0 %1247  ;;  %1693 = vrot.lane.b32.xlu0 %v10141_v26, %s9350_s20  ;;  %v10738_v46 = vsel %vm2420_vm6, %v2476_v15, %v2478_v50  ;;  %1993 = vst.msk [vmem:[#allocation2 + $0x2d8] sm:$0xff] %vm1079_vm1, %v1897_v32  ;;  %v1898_v10 = vrot.slane %v10682_v59, 3 }
 0x188   : > { %15130 = vst [vmem:[#allocation57_spill] sm:$0xff] %v10732_v61  ;;  %15131 = vst [vmem:[#allocation58_spill] sm:$0xff] %v10738_v46  ;;  %v10741_v21 = vsel %vm1416_vm4, %v1472_v7, %v1474_v13  ;;  %v2728_v19 = vrot.slane %v10729_v60, 6  ;;  %v10749_v41 = vmul.f32 %v10465_v16, %v778_v29  ;;  %1520 = vrot.lane.b32.xlu1 %v10105_v4, %s9349_s22  ;;  %v1501_v8 = vpop.permute.xlu1 %1500  ;;  %v1223_v15 = vrot.slane %v10729_v60, 1 }
 0x189   : > { %15132 = vst [vmem:[#allocation59_spill] sm:$0xff] %v10741_v21  ;;  %1110 = vst.msk [vmem:[#allocation2 + $0x348] sm:$0xff] %vm1079_vm1, %v10729_v60  ;;  %v2068_v7 = vrot.slane %v10729_v60, 4  ;;  %v709_v59 = vpop.f32.mrb[64].mxu0  ;;  %v2480_v9 = vrot.slane %v10729_v60, 5  ;;  %v1476_v14 = vrot.slane %v10729_v60, 2  ;;  %v1899_v16 = vsel %vm1840_vm7, %v1896_v36, %v1898_v10 }
 0x18a   : > { %1374 = vst.msk [vmem:[#allocation2 + $0x78] sm:$0xff] %vm1373_vm9, %v1248_v62  ;;  %v1900_v29 = vrot.slane %v10729_v60, 3  ;;  %v2729_v32 = vsel %vm2668_vm2, %v2726_v63, %v2728_v19  ;;  %v2730_v4 = vrot.slane %v10749_v41, 6  ;;  %v710_v62 = vadd.f32 %v10365_v49, %v709_v59  ;;  %v8843_v21 = vpop.f32.mrb[65].mxu0  ;;  %v2905_v28 = vld [vmem:[#allocation2 + $0x2b0] sm:$0xff] }
 0x18b   : > { %1627 = vst.msk [vmem:[#allocation2 + $0x78] sm:$0xff] %vm1626_vm10, %v1501_v8  ;;  %v2902_v8 = vld [vmem:[#allocation2 + $0x298] sm:$0xff]  ;;  %v10767_v46 = vsel %vm1163_vm3, %v1221_v52, %v1223_v15  ;;  %1522 = vrot.lane.b32.xlu0 %v10141_v26, %s9349_s22  ;;  %v712_v36 = vpop.f32.mrb[66].mxu0  ;;  %v14994_v60 = vrot.slane %v10749_v41, 1  ;;  %v10775_v61 = vsel %vm2008_vm5, %v2066_v1, %v2068_v7  ;;  %v10778_v21 = vsel %vm2420_vm6, %v2478_v50, %v2480_v9 }
 0x18c   : > { %1111 = vst.msk [vmem:[#allocation2 + $0x360] sm:$0xff] %vm1079_vm1, %v10749_v41  ;;  %1994 = vst.msk [vmem:[#allocation2 + $0x2f0] sm:$0xff] %vm1079_vm1, %v1899_v16  ;;  %v2977_v63 = vpack.c.bf16 %v2905_v28, %v2902_v8  ;;  %v2731_v52 = vsel %vm2668_vm2, %v2728_v19, %v2730_v4  ;;  %v779_v59 = vmax.f32 %v710_v62, 0.0  ;;  %1269 = vrot.lane.b32.xlu1 %v10144_v44, %s9348_s19  ;;  %v2070_v26 = vrot.slane %v10749_v41, 4 }
 0x18d   : > { %2822 = vst.msk [vmem:[#allocation2 + $0x2e0] sm:$0xff] %vm1079_vm1, %v2729_v32  ;;  %v713_v16 = vadd.f32 %v10365_v49, %v712_v36  ;;  %v8844_v32 = vpop.f32.mrb[67].mxu0  ;;  %2823 = vst.msk [vmem:[#allocation2 + $0x2f8] sm:$0xff] %vm1079_vm1, %v2731_v52  ;;  %v1503_v28 = vpop.permute.xlu0 %1502  ;;  %v10790_v1 = vsel %vm1163_vm3, %v1223_v15, %v14994_v60  ;;  %v2482_v50 = vrot.slane %v10749_v41, 5  ;;  %v10794_v19 = vsel %vm1416_vm4, %v1474_v13, %v1476_v14 }
 0x18e   : > { %8886 = vmatmul.mubr.msk.bf16.gmra.mrb[104].mxu0 %vm1079_vm1, %v2977_v63  ;;  %15133 = vst [vmem:[#allocation60_spill] sm:$0xff] %v10794_v19  ;;  %v1478_v44 = vrot.slane %v10749_v41, 2  ;;  %v10798_v62 = vmul.f32 %v10490_v58, %v779_v59  ;;  %v1250_v36 = vpop.permute.xlu1 %1249  ;;  %v10801_v52 = vsel %vm2008_vm5, %v2068_v7, %v2070_v26  ;;  %v1901_v63 = vsel %vm1840_vm7, %v1898_v10, %v1900_v29  ;;  %v2908_v19 = vld [vmem:[#allocation2 + $0x2c8] sm:$0xff] }
 0x18f   : > { %v780_v8 = vmax.f32 %v713_v16, 0.0  ;;  %15134 = vst [vmem:[#allocation61_spill] sm:$0xff] %v10801_v52  ;;  %1375 = vst.msk [vmem:[#allocation2 + $0x90] sm:$0xff] %vm1373_vm9, %v1250_v36  ;;  %1271 = vrot.lane.b32.xlu0 %v10172_v25, %s9348_s19  ;;  %v10808_v13 = vsel %vm2420_vm6, %v2480_v9, %v2482_v50  ;;  %v1902_v58 = vrot.slane %v10749_v41, 3 }
 0x190   : > { %15135 = vst [vmem:[#allocation62_spill] sm:$0xff] %v10808_v13  ;;  %v10811_v15 = vsel %vm1416_vm4, %v1476_v14, %v1478_v44  ;;  %1995 = vst.msk [vmem:[#allocation2 + $0x308] sm:$0xff] %vm1079_vm1, %v1901_v63  ;;  %v2732_v7 = vrot.slane %v10798_v62, 6  ;;  %2281 = vrot.lane.b32.xlu1 %v10163_v54, %s9349_s22  ;;  %v2072_v25 = vrot.slane %v10798_v62, 4  ;;  %v2484_v9 = vrot.slane %v10798_v62, 5 }
 0x191   : > { %15136 = vst [vmem:[#allocation63_spill] sm:$0xff] %v10811_v15  ;;  %1112 = vst.msk [vmem:[#allocation2 + $0x378] sm:$0xff] %vm1079_vm1, %v10798_v62  ;;  %v10819_v10 = vmul.f32 %v10515_v11, %v780_v8  ;;  %v1252_v14 = vpop.permute.xlu0 %1251  ;;  %v717_v59 = vpop.f32.mrb[68].mxu0  ;;  %v1480_v16 = vrot.slane %v10798_v62, 2  ;;  %v1227_v32 = vrot.slane %v10798_v62, 1  ;;  %v1903_v36 = vsel %vm1840_vm7, %v1900_v29, %v1902_v58 }
 0x192   : > { %1628 = vst.msk [vmem:[#allocation2 + $0x90] sm:$0xff] %vm1626_vm10, %v1503_v28  ;;  %v1904_v11 = vrot.slane %v10798_v62, 3  ;;  %v2733_v8 = vsel %vm2668_vm2, %v2730_v4, %v2732_v7  ;;  %v2097_v63 = vpop.permute.xlu1 %2096  ;;  %v718_v60 = vadd.f32 %v10365_v49, %v717_v59  ;;  %v8847_v15 = vpop.f32.mrb[69].mxu0  ;;  %v10837_v52 = vsel %vm2008_vm5, %v2070_v26, %v2072_v25 }
 0x193   : > { %v2734_v28 = vrot.slane %v10819_v10, 6  ;;  %1113 = vst.msk [vmem:[#allocation2 + $0x390] sm:$0xff] %vm1079_vm1, %v10819_v10  ;;  %1996 = vst.msk [vmem:[#allocation2 + $0x320] sm:$0xff] %vm1079_vm1, %v1903_v36  ;;  %2283 = vrot.lane.b32.xlu0 %v10202_v20, %s9349_s22  ;;  %v720_v29 = vpop.f32.mrb[70].mxu0  ;;  %v10845_v62 = vsel %vm2420_vm6, %v2482_v50, %v2484_v9  ;;  %v2074_v15 = vrot.slane %v10819_v10, 4  ;;  %v10857_v50 = vsel %vm1416_vm4, %v1478_v44, %v1480_v16 }
 0x194   : > { %1376 = vst.msk [vmem:[#allocation2 + $0xa8] sm:$0xff] %vm1373_vm9, %v1252_v14  ;;  %v2911_v13 = vld [vmem:[#allocation2 + $0x2e0] sm:$0xff]  ;;  %2217 = vst.msk [vmem:[#allocation2 + $0x80] sm:$0xff] %vm1373_vm9, %v2097_v63  ;;  %v2486_v14 = vrot.slane %v10819_v10, 5  ;;  %v781_v59 = vmax.f32 %v718_v60, 0.0  ;;  %2528 = vrot.lane.b32.xlu1 %v10175_v6, %s9350_s20  ;;  %v721_v36 = vadd.f32 %v10365_v49, %v720_v29  ;;  %v1482_v29 = vrot.slane %v10819_v10, 2 }
 0x195   : > { %2824 = vst.msk [vmem:[#allocation2 + $0x310] sm:$0xff] %vm1079_vm1, %v2733_v8  ;;  %v2980_v4 = vpack.c.bf16 %v2911_v13, %v2908_v19  ;;  %v2735_v26 = vsel %vm2668_vm2, %v2732_v7, %v2734_v28  ;;  %v8848_v8 = vpop.f32.mrb[71].mxu0  ;;  %v9222_v19 = vld [vmem:[%s14947_s2] sm:$0xff]   ;;  %15137 = vst [vmem:[#allocation64_spill] sm:$0xff] %v10857_v50  ;;  %v2099_v13 = vpop.permute.xlu0 %2098  ;;  %v10862_v60 = vsel %vm2008_vm5, %v2072_v25, %v2074_v15  ;;  %v15139_v7 = vrot.slane %v10749_v41, 1 }
 0x196   : > { %2825 = vst.msk [vmem:[#allocation2 + $0x328] sm:$0xff] %vm1079_vm1, %v2735_v26  ;;  %v10865_v6 = vsel %vm2420_vm6, %v2484_v9, %v2486_v14  ;;  %v10874_v44 = vmul.f32 %v10546_v31, %v781_v59  ;;  %v782_v26 = vmax.f32 %v721_v36, 0.0  ;;  %v1676_v8 = vpop.permute.xlu1 %1675  ;;  %8942 = vmatpush3.bf16.msra.mxu0 %v9222_v19  ;;  %v1229_v25 = vrot.slane %v10819_v10, 1 }
 0x197   : > { %8889 = vmatprep.mubr.msk.bf16.mxu0 %vm1079_vm1, %v2980_v4  ;;  %15138 = vst [vmem:[#allocation65_spill] sm:$0xff] %v10865_v6  ;;  %v10870_v63 = vsel %vm1163_vm3, %v15139_v7, %v1227_v32  ;;  %2218 = vst.msk [vmem:[#allocation2 + $0x98] sm:$0xff] %vm1373_vm9, %v2099_v13  ;;  %v1905_v9 = vsel %vm1840_vm7, %v1902_v58, %v1904_v11  ;;  %2530 = vrot.lane.b32.xlu0 %v10209_v12, %s9350_s20  ;;  %v15141_v41 = vmov 0.0   ;;  %v1906_v31 = vrot.slane %v10819_v10, 3  ;;  %v9223_v12 = vld [vmem:[%s14947_s2 + $0x8] sm:$0xff]  }
 0x198   : > { %15140 = vst [vmem:[#allocation66_spill] sm:$0xff] %v10870_v63  ;;  %1800 = vst.msk [vmem:[#allocation2 + $0x78] sm:$0xff] %vm1797_vm11, %v1676_v8  ;;  %8943 = vmatprep.subr.bf16.mxu0 %v15141_v41  ;;  %v10884_v4 = vsel %vm1416_vm4, %v1480_v16, %v1482_v29  ;;  %v2736_v59 = vrot.slane %v10874_v44, 6  ;;  %v10892_v58 = vmul.f32 %v10573_v3, %v782_v26  ;;  %2116 = vrot.lane.b32.xlu1 %v10163_v54, %s9348_s19 }
 0x199   : > { %15142 = vst [vmem:[#allocation67_spill] sm:$0xff] %v10884_v4  ;;  %1997 = vst.msk [vmem:[#allocation2 + $0x338] sm:$0xff] %vm1079_vm1, %v1905_v9  ;;  %v2076_v16 = vrot.slane %v10874_v44, 4  ;;  %v2488_v36 = vrot.slane %v10874_v44, 5  ;;  %v1678_v19 = vpop.permute.xlu0 %1677  ;;  %v725_v13 = vpop.f32.mrb[72].mxu0  ;;  %v1484_v7 = vrot.slane %v10874_v44, 2  ;;  %v10903_v8 = vsel %vm1163_vm3, %v1227_v32, %v1229_v25 }
 0x19a   : > { %1114 = vst.msk [vmem:[#allocation2 + $0x3a8] sm:$0xff] %vm1079_vm1, %v10874_v44  ;;  %15143 = vst [vmem:[#allocation68_spill] sm:$0xff] %v10903_v8  ;;  %v1231_v3 = vrot.slane %v10874_v44, 1  ;;  %v1907_v54 = vsel %vm1840_vm7, %v1904_v11, %v1906_v31  ;;  %v2737_v26 = vsel %vm2668_vm2, %v2734_v28, %v2736_v59  ;;  %v2738_v9 = vrot.slane %v10892_v58, 6  ;;  %v1505_v4 = vpop.permute.xlu1 %1504  ;;  %v8851_v32 = vpop.f32.mrb[73].mxu0  ;;  %v2914_v8 = vld [vmem:[#allocation2 + $0x2f8] sm:$0xff]  ;;  %8944 = vmatpush3.bf16.msra.mxu0 %v9223_v12 }
 0x19b   : > { %1115 = vst.msk [vmem:[#allocation2 + $0x3c0] sm:$0xff] %vm1079_vm1, %v10892_v58  ;;  %v726_v63 = vadd.f32 %v10365_v49, %v725_v13  ;;  %v10916_v6 = vsel %vm2008_vm5, %v2074_v15, %v2076_v16  ;;  %1998 = vst.msk [vmem:[#allocation2 + $0x350] sm:$0xff] %vm1079_vm1, %v1907_v54  ;;  %2118 = vrot.lane.b32.xlu0 %v10202_v20, %s9348_s19  ;;  %v728_v11 = vpop.f32.mrb[74].mxu0  ;;  %8945 = vmatprep.subr.bf16.mxu0 %v15141_v41  ;;  %v2078_v12 = vrot.slane %v10892_v58, 4 }
 0x19c   : > { %1801 = vst.msk [vmem:[#allocation2 + $0x90] sm:$0xff] %vm1797_vm11, %v1678_v19  ;;  %v2917_v50 = vld [vmem:[#allocation2 + $0x310] sm:$0xff]  ;;  %v10925_v19 = vsel %vm2420_vm6, %v2486_v14, %v2488_v36  ;;  %v2490_v15 = vrot.slane %v10892_v58, 5  ;;  %v2739_v13 = vsel %vm2668_vm2, %v2736_v59, %v2738_v9  ;;  %1695 = vrot.lane.b32.xlu1 %v10178_v42, %s9350_s20  ;;  %v8852_v20 = vpop.f32.mrb[75].mxu0  ;;  %v10937_v14 = vsel %vm1416_vm4, %v1482_v29, %v1484_v7 }
 0x19d   : > { %2826 = vst.msk [vmem:[#allocation2 + $0x340] sm:$0xff] %vm1079_vm1, %v2737_v26  ;;  %v2983_v28 = vpack.c.bf16 %v2917_v50, %v2914_v8  ;;  %v783_v54 = vmax.f32 %v726_v63, 0.0  ;;  %v9224_v50 = vld [vmem:[%s14947_s2 + $0x10] sm:$0xff]   ;;  %15144 = vst [vmem:[#allocation69_spill] sm:$0xff] %v10937_v14  ;;  %v1507_v8 = vpop.permute.xlu0 %1506  ;;  %v10942_v63 = vsel %vm2008_vm5, %v2076_v16, %v2078_v12  ;;  %v10948_v26 = vsel %vm1163_vm3, %v1229_v25, %v1231_v3 }
 0x19e   : > { %1629 = vst.msk [vmem:[#allocation2 + $0xa8] sm:$0xff] %vm1626_vm10, %v1505_v4  ;;  %v729_v4 = vadd.f32 %v10365_v49, %v728_v11  ;;  %15145 = vst [vmem:[#allocation70_spill] sm:$0xff] %v10942_v63  ;;  %v10945_v59 = vsel %vm2420_vm6, %v2488_v36, %v2490_v15  ;;  %v1486_v32 = vrot.slane %v10892_v58, 2  ;;  %v1254_v20 = vpop.permute.xlu1 %1253  ;;  %8946 = vmatpush3.bf16.msra.mxu0 %v9224_v50 }
 0x19f   : > { %2827 = vst.msk [vmem:[#allocation2 + $0x358] sm:$0xff] %vm1079_vm1, %v2739_v13  ;;  %8890 = vmatmul.mubr.msk.bf16.gmra.mrb[108].mxu0 %vm1079_vm1, %v2983_v28  ;;  %15146 = vst [vmem:[#allocation71_spill] sm:$0xff] %v10945_v59  ;;  %v10952_v11 = vmul.f32 %v10594_v24, %v783_v54  ;;  %v1233_v13 = vrot.slane %v10892_v58, 1  ;;  %v1908_v28 = vrot.slane %v10874_v44, 3  ;;  %1697 = vrot.lane.b32.xlu0 %v10212_v17, %s9350_s20  ;;  %v9225_v44 = vld [vmem:[%s14947_s2 + $0x18] sm:$0xff]   ;;  %v2920_v59 = vld [vmem:[#allocation2 + $0x328] sm:$0xff] }
 0x1a0   : > { %15147 = vst [vmem:[#allocation72_spill] sm:$0xff] %v10948_v26  ;;  %v784_v29 = vmax.f32 %v729_v4, 0.0  ;;  %1377 = vst.msk [vmem:[#allocation2 + $0xc0] sm:$0xff] %vm1373_vm9, %v1254_v20  ;;  %8947 = vmatprep.subr.bf16.mxu0 %v15141_v41  ;;  %v10961_v25 = vsel %vm1416_vm4, %v1484_v7, %v1486_v32  ;;  %1524 = vrot.lane.b32.xlu1 %v10178_v42, %s9349_s22 }
 0x1a1   : > { %15148 = vst [vmem:[#allocation73_spill] sm:$0xff] %v10961_v25  ;;  %v2740_v24 = vrot.slane %v10952_v11, 6  ;;  %1630 = vst.msk [vmem:[#allocation2 + $0xc0] sm:$0xff] %vm1626_vm10, %v1507_v8  ;;  %v2080_v36 = vrot.slane %v10952_v11, 4  ;;  %v2492_v54 = vrot.slane %v10952_v11, 5  ;;  %v1256_v7 = vpop.permute.xlu0 %1255  ;;  %v733_v4 = vpop.f32.mrb[76].mxu0  ;;  %v1909_v42 = vsel %vm1840_vm7, %v1906_v31, %v1908_v28 }
 0x1a2   : > { %v10965_v16 = vmul.f32 %v10621_v38, %v784_v29  ;;  %v1488_v50 = vrot.slane %v10952_v11, 2  ;;  %v10977_v38 = vsel %vm1163_vm3, %v1231_v3, %v1233_v13  ;;  %v15003_v8 = vrot.slane %v10952_v11, 1  ;;  %v2266_v25 = vpop.permute.xlu1 %2265  ;;  %1378 = vst.msk [vmem:[#allocation2 + $0xd8] sm:$0xff] %vm1373_vm9, %v1256_v7  ;;  %v8855_v14 = vpop.f32.mrb[77].mxu0  ;;  %8948 = vmatpush3.bf16.msra.mxu0 %v9225_v44 }
 0x1a3   : > { %v2741_v29 = vsel %vm2668_vm2, %v2738_v9, %v2740_v24  ;;  %v734_v26 = vadd.f32 %v10365_v49, %v733_v4  ;;  %1999 = vst.msk [vmem:[#allocation2 + $0x368] sm:$0xff] %vm1079_vm1, %v1909_v42  ;;  %v1910_v3 = vrot.slane %v10892_v58, 3  ;;  %1526 = vrot.lane.b32.xlu0 %v10212_v17, %s9349_s22  ;;  %v736_v10 = vpop.f32.mrb[78].mxu0  ;;  %8949 = vmatprep.subr.bf16.mxu0 %v15141_v41 }
 0x1a4   : > { %v2742_v20 = vrot.slane %v10965_v16, 6  ;;  %v2923_v63 = vld [vmem:[#allocation2 + $0x340] sm:$0xff]  ;;  %2828 = vst.msk [vmem:[#allocation2 + $0x370] sm:$0xff] %vm1079_vm1, %v2741_v29  ;;  %v10995_v9 = vsel %vm2008_vm5, %v2078_v12, %v2080_v36  ;;  %v10998_v14 = vsel %vm2420_vm6, %v2490_v15, %v2492_v54  ;;  %v2082_v44 = vrot.slane %v10965_v16, 4  ;;  %1273 = vrot.lane.b32.xlu1 %v10215_v53, %s9348_s19 }
 0x1a5   : > { %2384 = vst.msk [vmem:[#allocation2 + $0x80] sm:$0xff] %vm1626_vm10, %v2266_v25  ;;  %v2986_v31 = vpack.c.bf16 %v2923_v63, %v2920_v59  ;;  %v785_v7 = vmax.f32 %v734_v26, 0.0  ;;  %v737_v17 = vadd.f32 %v10365_v49, %v736_v10  ;;  %v8856_v25 = vpop.f32.mrb[79].mxu0  ;;  %v9226_v63 = vld [vmem:[%s14947_s2 + $0x20] sm:$0xff]   ;;  %v2494_v12 = vrot.slane %v10965_v16, 5  ;;  %v2268_v15 = vpop.permute.xlu0 %2267 }
 0x1a6   : > { %v2743_v58 = vsel %vm2668_vm2, %v2740_v24, %v2742_v20  ;;  %v11012_v59 = vsel %vm2008_vm5, %v2080_v36, %v2082_v44  ;;  %v11015_v26 = vsel %vm1416_vm4, %v1486_v32, %v1488_v50  ;;  %v11020_v53 = vsel %vm1163_vm3, %v1233_v13, %v15003_v8  ;;  %v2513_v42 = vpop.permute.xlu1 %2512  ;;  %2385 = vst.msk [vmem:[#allocation2 + $0x98] sm:$0xff] %vm1626_vm10, %v2268_v15  ;;  %v2926_v8 = vld [vmem:[#allocation2 + $0x358] sm:$0xff] }
 0x1a7   : > { %2829 = vst.msk [vmem:[#allocation2 + $0x388] sm:$0xff] %vm1079_vm1, %v2743_v58  ;;  %8893 = vmatprep.mubr.msk.bf16.mxu0 %vm1079_vm1, %v2986_v31  ;;  %v1490_v49 = vrot.slane %v10965_v16, 2  ;;  %v11024_v24 = vmul.f32 %v10647_v33, %v785_v7  ;;  %v786_v4 = vmax.f32 %v737_v17, 0.0  ;;  %8950 = vmatpush3.bf16.msra.mxu0 %v9226_v63  ;;  %v11028_v36 = vsel %vm2420_vm6, %v2492_v54, %v2494_v12 }
 0x1a8   : > { %v1911_v32 = vsel %vm1840_vm7, %v1908_v28, %v1910_v3  ;;  %2631 = vst.msk [vmem:[#allocation2 + $0x80] sm:$0xff] %vm1797_vm11, %v2513_v42  ;;  %1275 = vrot.lane.b32.xlu0 %v10241_v2, %s9348_s19  ;;  %8951 = vmatprep.subr.bf16.mxu0 %v15141_v41  ;;  %v1912_v13 = vrot.slane %v10952_v11, 3  ;;  %v1914_v29 = vrot.slane %v10965_v16, 3  ;;  %v1237_v54 = vrot.slane %v10965_v16, 1  ;;  %v9227_v2 = vld [vmem:[%s14947_s2 + $0x28] sm:$0xff]  }
 0x1a9   : > { %v11036_v33 = vsel %vm1416_vm4, %v1488_v50, %v1490_v49  ;;  %2000 = vst.msk [vmem:[#allocation2 + $0x380] sm:$0xff] %vm1079_vm1, %v1911_v32  ;;  %v2744_v28 = vrot.slane %v11024_v24, 6  ;;  %v11044_v10 = vmul.f32 %v10676_v56, %v786_v4  ;;  %2285 = vrot.lane.b32.xlu1 %v10234_v34, %s9349_s22  ;;  %v2084_v50 = vrot.slane %v11024_v24, 4  ;;  %v2515_v58 = vpop.permute.xlu0 %2514  ;;  %v741_v7 = vpop.f32.mrb[80].mxu0  ;;  %v9274_v42 = vld [vmem:[%s14948_s3] ss:$0 sm:$0xff] }
 0x1aa   : > { %15149 = vst [vmem:[#allocation74_spill] sm:$0xff] %v11036_v33  ;;  %v2496_v31 = vrot.slane %v11024_v24, 5  ;;  %v1913_v17 = vsel %vm1840_vm7, %v1910_v3, %v1912_v13  ;;  %v1915_v56 = vsel %vm1840_vm7, %v1912_v13, %v1914_v29  ;;  %v1916_v25 = vrot.slane %v11024_v24, 3  ;;  %v2101_v4 = vpop.permute.xlu1 %2100  ;;  %2632 = vst.msk [vmem:[#allocation2 + $0x98] sm:$0xff] %vm1797_vm11, %v2515_v58  ;;  %v8859_v33 = vpop.f32.mrb[81].mxu0 }
 0x1ab   : > { %v2745_v63 = vsel %vm2668_vm2, %v2742_v20, %v2744_v28  ;;  %v2746_v15 = vrot.slane %v11044_v10, 6  ;;  %v742_v32 = vadd.f32 %v9274_v42, %v741_v7  ;;  %v2929_v16 = vld [vmem:[#allocation2 + $0x370] sm:$0xff]  ;;  %8952 = vmatpush3.bf16.msra.mxu0 %v9227_v2  ;;  %v11064_v3 = vsel %vm2008_vm5, %v2082_v44, %v2084_v50  ;;  %2001 = vst.msk [vmem:[#allocation2 + $0x398] sm:$0xff] %vm1079_vm1, %v1913_v17  ;;  %v744_v13 = vpop.f32.mrb[82].mxu0 }
 0x1ac   : > { %2002 = vst.msk [vmem:[#allocation2 + $0x3b0] sm:$0xff] %vm1079_vm1, %v1915_v56  ;;  %2830 = vst.msk [vmem:[#allocation2 + $0x3a0] sm:$0xff] %vm1079_vm1, %v2745_v63  ;;  %2287 = vrot.lane.b32.xlu0 %v10271_v51, %s9349_s22  ;;  %v2989_v20 = vpack.c.bf16 %v2929_v16, %v2926_v8  ;;  %8953 = vmatprep.subr.bf16.mxu0 %v15141_v41  ;;  %v11074_v33 = vsel %vm2420_vm6, %v2494_v12, %v2496_v31  ;;  %v2086_v44 = vrot.slane %v11044_v10, 4  ;;  %v8860_v17 = vpop.f32.mrb[83].mxu0  ;;  %v9228_v8 = vld [vmem:[%s14947_s2 + $0x30] sm:$0xff]  }
 0x1ad   : > { %2219 = vst.msk [vmem:[#allocation2 + $0xb0] sm:$0xff] %vm1373_vm9, %v2101_v4  ;;  %v2498_v2 = vrot.slane %v11044_v10, 5  ;;  %v2747_v58 = vsel %vm2668_vm2, %v2744_v28, %v2746_v15  ;;  %v787_v7 = vmax.f32 %v742_v32, 0.0  ;;  %2532 = vrot.lane.b32.xlu1 %v10244_v0, %s9350_s20  ;;  %v15150_v16 = vrot.slane %v11024_v24, 2  ;;  %v2103_v63 = vpop.permute.xlu0 %2102  ;;  %v2837_v32 = vld [vmem:[#allocation2 + $0x90] sm:$0xff] }
 0x1ae   : > { %v1917_v56 = vsel %vm1840_vm7, %v1914_v29, %v1916_v25  ;;  %2831 = vst.msk [vmem:[#allocation2 + $0x3b8] sm:$0xff] %vm1079_vm1, %v2747_v58  ;;  %8894 = vmatmul.mubr.msk.bf16.gmra.mrb[112].mxu0 %vm1079_vm1, %v2989_v20  ;;  %v11093_v28 = vsel %vm2008_vm5, %v2084_v50, %v2086_v44  ;;  %v15153_v4 = vrot.slane %v10952_v11, 1  ;;  %v1239_v29 = vrot.slane %v11024_v24, 1  ;;  %v1680_v42 = vpop.permute.xlu1 %1679 }
 0x1af   : > { %v11087_v12 = vsel %vm1416_vm4, %v1490_v49, %v15150_v16  ;;  %15152 = vst [vmem:[#allocation76_spill] sm:$0xff] %v11093_v28  ;;  %v11096_v0 = vsel %vm2420_vm6, %v2496_v31, %v2498_v2  ;;  %2003 = vst.msk [vmem:[#allocation2 + $0x3c8] sm:$0xff] %vm1079_vm1, %v1917_v56  ;;  %v11106_v25 = vmul.f32 %v10701_v45, %v787_v7  ;;  %8954 = vmatpush3.bf16.msra.mxu0 %v9228_v8 }
 0x1b0   : > { %15151 = vst [vmem:[#allocation75_spill] sm:$0xff] %v11087_v12  ;;  %v11102_v49 = vsel %vm1163_vm3, %v15153_v4, %v1237_v54  ;;  %2220 = vst.msk [vmem:[#allocation2 + $0xc8] sm:$0xff] %vm1373_vm9, %v2103_v63  ;;  %8957 = vmatprep.mubr.msk.bf16.mxu0 %vm9346_vm0, %v15141_v41  ;;  %v1241_v50 = vrot.slane %v11044_v10, 1  ;;  %v1494_v31 = vrot.slane %v11044_v10, 2  ;;  %2534 = vrot.lane.b32.xlu0 %v10280_v35, %s9350_s20  ;;  %v9229_v10 = vld [vmem:[%s14947_s2 + $0x38] sm:$0xff]   ;;  %v15158_v8 = vmov %v15150_v16 }
 0x1b1   : > { %15154 = vst [vmem:[#allocation77_spill] sm:$0xff] %v11102_v49  ;;  %15155 = vst [vmem:[#allocation78_spill] sm:$0xff] %v11106_v25  ;;  %8955 = vmatprep.subr.bf16.mxu0 %v15141_v41  ;;  %v11118_v45 = vsel %vm1163_vm3, %v1237_v54, %v1239_v29  ;;  %v2748_v11 = vrot.slane %v11106_v25, 6  ;;  %2120 = vrot.lane.b32.xlu1 %v10234_v34, %s9348_s19  ;;  %v2088_v20 = vrot.slane %v11106_v25, 4  ;;  %v2500_v13 = vrot.slane %v11106_v25, 5  ;;  %v1682_v58 = vpop.permute.xlu0 %1681  ;;  %v2835_v54 = vld [vmem:[#allocation2 + $0x80] sm:$0xff] }
 0x1b2   : > { %1802 = vst.msk [vmem:[#allocation2 + $0xa8] sm:$0xff] %vm1797_vm11, %v1680_v42  ;;  %15156 = vst [vmem:[#allocation79_spill] sm:$0xff] %v11118_v45  ;;  %v11129_v35 = vsel %vm1163_vm3, %v1239_v29, %v1241_v50  ;;  %v2838_v7 = vld [vmem:[#allocation2 + $0x98] sm:$0xff]  ;;  %v15005_v17 = vrot.slane %v11106_v25, 1  ;;  %v11135_v34 = vsel %vm1416_vm4, %v15158_v8, %v1494_v31  ;;  %v11138_v16 = vrot.slane %v11106_v25, 2  ;;  %v1509_v63 = vpop.permute.xlu1 %1508 }
 0x1b3   : > { %15157 = vst [vmem:[#allocation80_spill] sm:$0xff] %v11129_v35  ;;  %15159 = vst [vmem:[#allocation81_spill] sm:$0xff] %v11135_v34  ;;  %v2749_v56 = vsel %vm2668_vm2, %v2746_v15, %v2748_v11  ;;  %v2943_v4 = vpack.c.bf16 %v2838_v7, %v2835_v54  ;;  %v2834_v29 = vld [vmem:[#allocation2 + $0x78] sm:$0xff]  ;;  %8956 = vmatpush3.bf16.msra.mxu0 %v9229_v10  ;;  %v11143_v42 = vsel %vm2008_vm5, %v2086_v44, %v2088_v20  ;;  %v9231_v54 = vld [vmem:[%s9476_s18 + $0xac] sm:$0xff]  }
 0x1b4   : > { %15160 = vst [vmem:[#allocation82_spill] sm:$0xff] %v11138_v16  ;;  %1803 = vst.msk [vmem:[#allocation2 + $0xc0] sm:$0xff] %vm1797_vm11, %v1682_v58  ;;  %v11146_v24 = vsel %vm2420_vm6, %v2498_v2, %v2500_v13  ;;  %2122 = vrot.lane.b32.xlu0 %v10271_v51, %s9348_s19  ;;  %v2942_v15 = vpack.c.bf16 %v2837_v32, %v2834_v29  ;;  %v11155_v11 = vsel %vm1163_vm3, %v1241_v50, %v15005_v17  ;;  %v9230_v2 = vld [vmem:[%s9476_s18 + $0xa4] sm:$0xff]   ;;  %v15164_v50 = vld [vmem:[#allocation19_spill] sm:$0xff] }
 0x1b5   : > { %15161 = vst [vmem:[#allocation83_spill] sm:$0xff] %v11143_v42  ;;  %2833 = vst.msk [vmem:[#allocation2 + $0x3d0] sm:$0x3f] %vm2832_vm12, %v2749_v56  ;;  %v11159_v44 = vsel %vm1416_vm4, %v1494_v31, %v11138_v16  ;;  %1699 = vrot.lane.b32.xlu1 %v10247_v23, %s9350_s20  ;;  %3233 = vmatprep.mubr.bf16.mxu1 %v2943_v4  ;;  %v1511_v10 = vpop.permute.xlu0 %1510  ;;  %v9275_v51 = vld [vmem:[%s14949_s4 + $0x80] sm:$0xff]   ;;  %v9276_v31 = vld [vmem:[%s14949_s4 + $0x88] sm:$0xff]  }
 0x1b6   : > { %1631 = vst.msk [vmem:[#allocation2 + $0xd8] sm:$0xff] %vm1626_vm10, %v1509_v63  ;;  %15162 = vst [vmem:[#allocation84_spill] sm:$0xff] %v11155_v11  ;;  %3234 = vmatmul.mubr.bf16.vlgmr.msra.gmra.mrb[0].mxu1 %v2942_v15  ;;  %v1258_v20 = vpop.permute.xlu1 %1257  ;;  %8958 = vmatmul.mubr.bf16.vlgmr.msra.gmra.mrb[116].mxu0 %v9230_v2  ;;  %v15166_v56 = vld [vmem:[#allocation22_spill] sm:$0xff]  ;;  %v15167_v63 = vld [vmem:[#allocation21_spill] sm:$0xff] }
 0x1b7   : > { %15163 = vst [vmem:[#allocation85_spill] sm:$0xff] %v11159_v44  ;;  %9123 = vmatpush3.bf16.msra.mxu1 %v9275_v51  ;;  %1379 = vst.msk [vmem:[#allocation2 + $0xf0] sm:$0xff] %vm1373_vm9, %v1258_v20  ;;  %8961 = vmatprep.mubr.msk.bf16.mxu0 %vm9346_vm0, %v15141_v41  ;;  %v15168_v15 = vld [vmem:[#allocation23_spill] sm:$0xff] }
 0x1b8   : > { %1701 = vrot.lane.b32.xlu0 %v15164_v50, %s9350_s20  ;;  %1632 = vst.msk [vmem:[#allocation2 + $0xf0] sm:$0xff] %vm1626_vm10, %v1511_v10  ;;  %9122 = vmatprep.subr.bf16.mxu1 %v9276_v31  ;;  %v9232_v2 = vld [vmem:[%s9476_s18 + $0xb4] sm:$0xff]  }
 0x1b9   : > { %1528 = vrot.lane.b32.xlu1 %v10247_v23, %s9349_s22  ;;  %v1260_v32 = vpop.permute.xlu0 %1259  ;;  %v15165_v23 = vld [vmem:[#allocation20_spill] sm:$0xff] }
 0x1ba   : > { %v2270_v13 = vpop.permute.xlu1 %2269  ;;  %1380 = vst.msk [vmem:[#allocation2 + $0x108] sm:$0xff] %vm1373_vm9, %v1260_v32 }
 0x1bb   : > { %9124 = vmatpush3.bf16.msra.mxu1 %v9276_v31  ;;  %2386 = vst.msk [vmem:[#allocation2 + $0xb0] sm:$0xff] %vm1626_vm10, %v2270_v13  ;;  %v2843_v51 = vld [vmem:[#allocation2 + $0xc0] sm:$0xff] }
 0x1bc   : > { %v11179_v58 = vld [vmem:[#allocation2 + $0x3d0] sm:$0xff]  ;;  %1530 = vrot.lane.b32.xlu0 %v15164_v50, %s9349_s22 }
 0x1bd   : > { %4966 = vst.msk [vmem:[#allocation2 + $0x3d0] sm:$0xc0] %vm1077_vm8, %v15141_v41  ;;  %1277 = vrot.lane.b32.xlu1 %v15165_v23, %s9348_s19  ;;  %v2272_v7 = vpop.permute.xlu0 %2271 }
 0x1be   : > { %v2517_v8 = vpop.permute.xlu1 %2516  ;;  %2387 = vst.msk [vmem:[#allocation2 + $0xc8] sm:$0xff] %vm1626_vm10, %v2272_v7  ;;  %8962 = vmatmul.mubr.bf16.gmra.mrb[120].mxu0 %v9231_v54  ;;  %v2840_v54 = vld [vmem:[#allocation2 + $0xa8] sm:$0xff]  ;;  %v15169_v7 = vld [vmem:[#allocation24_spill] sm:$0xff] }
 0x1bf   : > { %2633 = vst.msk [vmem:[#allocation2 + $0xb0] sm:$0xff] %vm1797_vm11, %v2517_v8  ;;  %8965 = vmatprep.mubr.msk.bf16.mxu0 %vm9346_vm0, %v15141_v41  ;;  %v9233_v8 = vld [vmem:[%s9476_s18 + $0xbc] sm:$0xff]  }
 0x1c0   : > { %1279 = vrot.lane.b32.xlu0 %v15166_v56, %s9348_s19 }
 0x1c1   : > { %2289 = vrot.lane.b32.xlu1 %v15167_v63, %s9349_s22  ;;  %v2519_v4 = vpop.permute.xlu0 %2518 }
 0x1c2   : > { %v2105_v29 = vpop.permute.xlu1 %2104  ;;  %2634 = vst.msk [vmem:[#allocation2 + $0xc8] sm:$0xff] %vm1797_vm11, %v2519_v4  ;;  %v15170_v4 = vld [vmem:[#allocation25_spill] sm:$0xff] }
 0x1c3   : > { %2221 = vst.msk [vmem:[#allocation2 + $0xe0] sm:$0xff] %vm1373_vm9, %v2105_v29 }
 0x1c4   : > { %2291 = vrot.lane.b32.xlu0 %v10342_v37, %s9349_s22 }
 0x1c5   : > { %2536 = vrot.lane.b32.xlu1 %v15168_v15, %s9350_s20  ;;  %v2107_v10 = vpop.permute.xlu0 %2106  ;;  %v15171_v15 = vld [vmem:[#allocation26_spill] sm:$0xff] }
 0x1c6   : > { %v1684_v20 = vpop.permute.xlu1 %1683  ;;  %2222 = vst.msk [vmem:[#allocation2 + $0xf8] sm:$0xff] %vm1373_vm9, %v2107_v10  ;;  %8966 = vmatmul.mubr.bf16.gmra.mrb[124].mxu0 %v9232_v2  ;;  %v2841_v31 = vld [vmem:[#allocation2 + $0xb0] sm:$0xff]  ;;  %v9234_v2 = vld [vmem:[%s9476_s18 + $0xc4] sm:$0xff]  }
 0x1c7   : > { %1804 = vst.msk [vmem:[#allocation2 + $0xd8] sm:$0xff] %vm1797_vm11, %v1684_v20  ;;  %8969 = vmatprep.mubr.msk.bf16.mxu0 %vm9346_vm0, %v15141_v41 }
 0x1c8   : > { %2538 = vrot.lane.b32.xlu0 %v10349_v57, %s9350_s20  ;;  %v2945_v57 = vpack.c.bf16 %v2843_v51, %v2840_v54  ;;  %v15172_v51 = vld [vmem:[#allocation28_spill] sm:$0xff]  ;;  %v9235_v54 = vld [vmem:[%s9476_s18 + $0xcc] sm:$0xff]  }
 0x1c9   : > { %2124 = vrot.lane.b32.xlu1 %v15167_v63, %s9348_s19  ;;  %v1686_v50 = vpop.permute.xlu0 %1685  ;;  %v2844_v32 = vld [vmem:[#allocation2 + $0xc8] sm:$0xff] }
 0x1ca   : > { %v1513_v13 = vpop.permute.xlu1 %1512  ;;  %1805 = vst.msk [vmem:[#allocation2 + $0xf0] sm:$0xff] %vm1797_vm11, %v1686_v50  ;;  %v2946_v23 = vpack.c.bf16 %v2844_v32, %v2841_v31  ;;  %v15173_v50 = vld [vmem:[#allocation27_spill] sm:$0xff] }
 0x1cb   : > { %1633 = vst.msk [vmem:[#allocation2 + $0x108] sm:$0xff] %vm1626_vm10, %v1513_v13  ;;  %v15174_v13 = vld [vmem:[#allocation31_spill] sm:$0xff] }
 0x1cc   : > { %2126 = vrot.lane.b32.xlu0 %v10342_v37, %s9348_s19  ;;  %3241 = vmatprep.mubr.bf16.mxu1 %v2946_v23  ;;  %v15175_v23 = vld [vmem:[#allocation29_spill] sm:$0xff] }
 0x1cd   : > { %1703 = vrot.lane.b32.xlu1 %v15169_v7, %s9350_s20  ;;  %3242 = vmatmul.mubr.bf16.gmra.mrb[4].mxu1 %v2945_v57  ;;  %v1515_v56 = vpop.permute.xlu0 %1514 }
 0x1ce   : > { %v1262_v63 = vpop.permute.xlu1 %1261  ;;  %8970 = vmatmul.mubr.bf16.gmra.mrb[128].mxu0 %v9233_v8 }
 0x1cf   : > { %1381 = vst.msk [vmem:[#allocation2 + $0x120] sm:$0xff] %vm1373_vm9, %v1262_v63  ;;  %8973 = vmatprep.mubr.msk.bf16.mxu0 %vm9346_vm0, %v15141_v41 }
 0x1d0   : > { %1705 = vrot.lane.b32.xlu0 %v15170_v4, %s9350_s20  ;;  %1634 = vst.msk [vmem:[#allocation2 + $0x120] sm:$0xff] %vm1626_vm10, %v1515_v56 }
 0x1d1   : > { %1532 = vrot.lane.b32.xlu1 %v15169_v7, %s9349_s22  ;;  %v1264_v37 = vpop.permute.xlu0 %1263  ;;  %v2849_v8 = vld [vmem:[#allocation2 + $0xf0] sm:$0xff] }
 0x1d2   : > { %v2274_v29 = vpop.permute.xlu1 %2273  ;;  %1382 = vst.msk [vmem:[#allocation2 + $0x138] sm:$0xff] %vm1373_vm9, %v1264_v37 }
 0x1d3   : > { %2388 = vst.msk [vmem:[#allocation2 + $0xe0] sm:$0xff] %vm1626_vm10, %v2274_v29 }
 0x1d4   : > { %1534 = vrot.lane.b32.xlu0 %v15170_v4, %s9349_s22 }
 0x1d5   : > { %1281 = vrot.lane.b32.xlu1 %v15171_v15, %s9348_s19  ;;  %v2276_v10 = vpop.permute.xlu0 %2275  ;;  %v2846_v15 = vld [vmem:[#allocation2 + $0xd8] sm:$0xff] }
 0x1d6   : > { %v2521_v20 = vpop.permute.xlu1 %2520  ;;  %2389 = vst.msk [vmem:[#allocation2 + $0xf8] sm:$0xff] %vm1626_vm10, %v2276_v10  ;;  %8974 = vmatmul.mubr.bf16.gmra.mrb[132].mxu0 %v9234_v2  ;;  %v15176_v2 = vld [vmem:[#allocation30_spill] sm:$0xff] }
 0x1d7   : > { %2635 = vst.msk [vmem:[#allocation2 + $0xe0] sm:$0xff] %vm1797_vm11, %v2521_v20  ;;  %8977 = vmatprep.mubr.msk.bf16.mxu0 %vm9346_vm0, %v15141_v41  ;;  %v9236_v10 = vld [vmem:[%s9476_s18 + $0xd4] sm:$0xff]  }
 0x1d8   : > { %1283 = vrot.lane.b32.xlu0 %v15172_v51, %s9348_s19 }
 0x1d9   : > { %2293 = vrot.lane.b32.xlu1 %v15173_v50, %s9349_s22  ;;  %v2523_v31 = vpop.permute.xlu0 %2522 }
 0x1da   : > { %v2109_v32 = vpop.permute.xlu1 %2108  ;;  %2636 = vst.msk [vmem:[#allocation2 + $0xf8] sm:$0xff] %vm1797_vm11, %v2523_v31 }
 0x1db   : > { %2223 = vst.msk [vmem:[#allocation2 + $0x110] sm:$0xff] %vm1373_vm9, %v2109_v32  ;;  %v15177_v32 = vld [vmem:[#allocation32_spill] sm:$0xff] }
 0x1dc   : > { %2295 = vrot.lane.b32.xlu0 %v15174_v13, %s9349_s22 }
 0x1dd   : > { %2540 = vrot.lane.b32.xlu1 %v15175_v23, %s9350_s20  ;;  %v2111_v57 = vpop.permute.xlu0 %2110 }
 0x1de   : > { %v1688_v7 = vpop.permute.xlu1 %1687  ;;  %2224 = vst.msk [vmem:[#allocation2 + $0x128] sm:$0xff] %vm1373_vm9, %v2111_v57  ;;  %8978 = vmatmul.mubr.bf16.gmra.mrb[136].mxu0 %v9235_v54  ;;  %v2847_v63 = vld [vmem:[#allocation2 + $0xe0] sm:$0xff]  ;;  %v15178_v57 = vld [vmem:[#allocation34_spill] sm:$0xff] }
 0x1df   : > { %1806 = vst.msk [vmem:[#allocation2 + $0x108] sm:$0xff] %vm1797_vm11, %v1688_v7  ;;  %8981 = vmatprep.mubr.msk.bf16.mxu0 %vm9346_vm0, %v15141_v41 }
 0x1e0   : > { %2542 = vrot.lane.b32.xlu0 %v10425_v43, %s9350_s20  ;;  %v2948_v43 = vpack.c.bf16 %v2849_v8, %v2846_v15 }
 0x1e1   : > { %2128 = vrot.lane.b32.xlu1 %v15173_v50, %s9348_s19  ;;  %v1690_v56 = vpop.permute.xlu0 %1689  ;;  %v2850_v4 = vld [vmem:[#allocation2 + $0xf8] sm:$0xff] }
 0x1e2   : > { %v1517_v37 = vpop.permute.xlu1 %1516  ;;  %1807 = vst.msk [vmem:[#allocation2 + $0x120] sm:$0xff] %vm1797_vm11, %v1690_v56  ;;  %v2949_v29 = vpack.c.bf16 %v2850_v4, %v2847_v63  ;;  %v15180_v56 = vld [vmem:[#allocation35_spill] sm:$0xff]  ;;  %v9238_v63 = vld [vmem:[%s9476_s18 + $0xe4] sm:$0xff]  }
 0x1e3   : > { %1635 = vst.msk [vmem:[#allocation2 + $0x138] sm:$0xff] %vm1626_vm10, %v1517_v37 }
 0x1e4   : > { %2130 = vrot.lane.b32.xlu0 %v15174_v13, %s9348_s19  ;;  %3249 = vmatprep.mubr.bf16.mxu1 %v2949_v29  ;;  %v9237_v13 = vld [vmem:[%s9476_s18 + $0xdc] sm:$0xff]  }
 0x1e5   : > { %1707 = vrot.lane.b32.xlu1 %v15176_v2, %s9350_s20  ;;  %3250 = vmatmul.mubr.bf16.gmra.mrb[8].mxu1 %v2948_v43  ;;  %v1519_v20 = vpop.permute.xlu0 %1518 }
 0x1e6   : > { %v1266_v51 = vpop.permute.xlu1 %1265  ;;  %8982 = vmatmul.mubr.bf16.gmra.mrb[140].mxu0 %v9236_v10 }
 0x1e7   : > { %1383 = vst.msk [vmem:[#allocation2 + $0x150] sm:$0xff] %vm1373_vm9, %v1266_v51  ;;  %8985 = vmatprep.mubr.msk.bf16.mxu0 %vm9346_vm0, %v15141_v41  ;;  %v2852_v51 = vld [vmem:[#allocation2 + $0x108] sm:$0xff] }
 0x1e8   : > { %1709 = vrot.lane.b32.xlu0 %v10428_v18, %s9350_s20  ;;  %1636 = vst.msk [vmem:[#allocation2 + $0x150] sm:$0xff] %vm1626_vm10, %v1519_v20 }
 0x1e9   : > { %1536 = vrot.lane.b32.xlu1 %v15176_v2, %s9349_s22  ;;  %v1268_v50 = vpop.permute.xlu0 %1267  ;;  %v2855_v29 = vld [vmem:[#allocation2 + $0x120] sm:$0xff] }
 0x1ea   : > { %v2278_v31 = vpop.permute.xlu1 %2277  ;;  %1384 = vst.msk [vmem:[#allocation2 + $0x168] sm:$0xff] %vm1373_vm9, %v1268_v50  ;;  %v15181_v50 = vld [vmem:[#allocation36_spill] sm:$0xff] }
 0x1eb   : > { %2390 = vst.msk [vmem:[#allocation2 + $0x110] sm:$0xff] %vm1626_vm10, %v2278_v31  ;;  %v9239_v31 = vld [vmem:[%s9476_s18 + $0xec] sm:$0xff]  }
 0x1ec   : > { %1538 = vrot.lane.b32.xlu0 %v10428_v18, %s9349_s22  ;;  %v15179_v18 = vld [vmem:[#allocation33_spill] sm:$0xff] }
 0x1ed   : > { %1285 = vrot.lane.b32.xlu1 %v15177_v32, %s9348_s19  ;;  %v2280_v23 = vpop.permute.xlu0 %2279 }
 0x1ee   : > { %v2525_v54 = vpop.permute.xlu1 %2524  ;;  %2391 = vst.msk [vmem:[#allocation2 + $0x128] sm:$0xff] %vm1626_vm10, %v2280_v23  ;;  %8986 = vmatmul.mubr.bf16.gmra.mrb[144].mxu0 %v9237_v13  ;;  %v15182_v23 = vld [vmem:[#allocation37_spill] sm:$0xff] }
 0x1ef   : > { %2637 = vst.msk [vmem:[#allocation2 + $0x110] sm:$0xff] %vm1797_vm11, %v2525_v54  ;;  %8989 = vmatprep.mubr.msk.bf16.mxu0 %vm9346_vm0, %v15141_v41 }
 0x1f0   : > { %1287 = vrot.lane.b32.xlu0 %v15178_v57, %s9348_s19  ;;  %v15183_v57 = vld [vmem:[#allocation38_spill] sm:$0xff] }
 0x1f1   : > { %2297 = vrot.lane.b32.xlu1 %v15179_v18, %s9349_s22  ;;  %v2527_v7 = vpop.permute.xlu0 %2526 }
 0x1f2   : > { %v2113_v8 = vpop.permute.xlu1 %2112  ;;  %2638 = vst.msk [vmem:[#allocation2 + $0x128] sm:$0xff] %vm1797_vm11, %v2527_v7 }
 0x1f3   : > { %2225 = vst.msk [vmem:[#allocation2 + $0x140] sm:$0xff] %vm1373_vm9, %v2113_v8 }
 0x1f4   : > { %2299 = vrot.lane.b32.xlu0 %v10487_v40, %s9349_s22 }
 0x1f5   : > { %2544 = vrot.lane.b32.xlu1 %v15180_v56, %s9350_s20  ;;  %v2115_v4 = vpop.permute.xlu0 %2114  ;;  %v15184_v56 = vld [vmem:[#allocation40_spill] sm:$0xff] }
 0x1f6   : > { %v1692_v37 = vpop.permute.xlu1 %1691  ;;  %2226 = vst.msk [vmem:[#allocation2 + $0x158] sm:$0xff] %vm1373_vm9, %v2115_v4  ;;  %8990 = vmatmul.mubr.bf16.gmra.mrb[148].mxu0 %v9238_v63  ;;  %v2853_v43 = vld [vmem:[#allocation2 + $0x110] sm:$0xff]  ;;  %v15185_v63 = vld [vmem:[#allocation39_spill] sm:$0xff] }
 0x1f7   : > { %1808 = vst.msk [vmem:[#allocation2 + $0x138] sm:$0xff] %vm1797_vm11, %v1692_v37  ;;  %8993 = vmatprep.mubr.msk.bf16.mxu0 %vm9346_vm0, %v15141_v41 }
 0x1f8   : > { %2546 = vrot.lane.b32.xlu0 %v10496_v48, %s9350_s20  ;;  %v2951_v48 = vpack.c.bf16 %v2855_v29, %v2852_v51  ;;  %v15186_v29 = vld [vmem:[#allocation43_spill] sm:$0xff] }
 0x1f9   : > { %2132 = vrot.lane.b32.xlu1 %v15179_v18, %s9348_s19  ;;  %v1694_v15 = vpop.permute.xlu0 %1693  ;;  %v2856_v2 = vld [vmem:[#allocation2 + $0x128] sm:$0xff]  ;;  %v9240_v18 = vld [vmem:[%s9476_s18 + $0xf4] sm:$0xff]  }
 0x1fa   : > { %v1521_v10 = vpop.permute.xlu1 %1520  ;;  %1809 = vst.msk [vmem:[#allocation2 + $0x150] sm:$0xff] %vm1797_vm11, %v1694_v15  ;;  %v2952_v20 = vpack.c.bf16 %v2856_v2, %v2853_v43  ;;  %v15187_v15 = vld [vmem:[#allocation41_spill] sm:$0xff] }
 0x1fb   : > { %1637 = vst.msk [vmem:[#allocation2 + $0x168] sm:$0xff] %vm1626_vm10, %v1521_v10  ;;  %v9241_v10 = vld [vmem:[%s9476_s18 + $0xfc] sm:$0xff]  }
 0x1fc   : > { %2134 = vrot.lane.b32.xlu0 %v10487_v40, %s9348_s19  ;;  %3257 = vmatprep.mubr.bf16.mxu1 %v2952_v20 }
 0x1fd   : > { %1711 = vrot.lane.b32.xlu1 %v15181_v50, %s9350_s20  ;;  %3258 = vmatmul.mubr.bf16.gmra.mrb[12].mxu1 %v2951_v48  ;;  %v1523_v32 = vpop.permute.xlu0 %1522 }
 0x1fe   : > { %v1270_v13 = vpop.permute.xlu1 %1269  ;;  %8994 = vmatmul.mubr.bf16.gmra.mrb[152].mxu0 %v9239_v31 }
 0x1ff   : > { %1385 = vst.msk [vmem:[#allocation2 + $0x180] sm:$0xff] %vm1373_vm9, %v1270_v13  ;;  %8997 = vmatprep.mubr.msk.bf16.mxu0 %vm9346_vm0, %v15141_v41 }
 0x200   : > { %1713 = vrot.lane.b32.xlu0 %v15182_v23, %s9350_s20  ;;  %1638 = vst.msk [vmem:[#allocation2 + $0x180] sm:$0xff] %vm1626_vm10, %v1523_v32 }
 0x201   : > { %1540 = vrot.lane.b32.xlu1 %v15181_v50, %s9349_s22  ;;  %v1272_v40 = vpop.permute.xlu0 %1271  ;;  %v2861_v51 = vld [vmem:[#allocation2 + $0x150] sm:$0xff] }
 0x202   : > { %v2282_v54 = vpop.permute.xlu1 %2281  ;;  %1386 = vst.msk [vmem:[#allocation2 + $0x198] sm:$0xff] %vm1373_vm9, %v1272_v40  ;;  %v2858_v40 = vld [vmem:[#allocation2 + $0x138] sm:$0xff] }
 0x203   : > { %2392 = vst.msk [vmem:[#allocation2 + $0x140] sm:$0xff] %vm1626_vm10, %v2282_v54 }
 0x204   : > { %1542 = vrot.lane.b32.xlu0 %v15182_v23, %s9349_s22 }
 0x205   : > { %1289 = vrot.lane.b32.xlu1 %v15183_v57, %s9348_s19  ;;  %v2284_v7 = vpop.permute.xlu0 %2283  ;;  %v2954_v57 = vpack.c.bf16 %v2861_v51, %v2858_v40 }
 0x206   : > { %v2529_v8 = vpop.permute.xlu1 %2528  ;;  %2393 = vst.msk [vmem:[#allocation2 + $0x158] sm:$0xff] %vm1626_vm10, %v2284_v7  ;;  %8998 = vmatmul.mubr.bf16.gmra.mrb[156].mxu0 %v9240_v18  ;;  %v15188_v18 = vld [vmem:[#allocation42_spill] sm:$0xff]  ;;  %v9242_v7 = vld [vmem:[%s9476_s18 + $0x104] sm:$0xff]  }
 0x207   : > { %2639 = vst.msk [vmem:[#allocation2 + $0x140] sm:$0xff] %vm1797_vm11, %v2529_v8  ;;  %9001 = vmatprep.mubr.msk.bf16.mxu0 %vm9346_vm0, %v15141_v41 }
 0x208   : > { %1291 = vrot.lane.b32.xlu0 %v15184_v56, %s9348_s19 }
 0x209   : > { %2301 = vrot.lane.b32.xlu1 %v15185_v63, %s9349_s22  ;;  %v2531_v4 = vpop.permute.xlu0 %2530 }
 0x20a   : > { %v2117_v37 = vpop.permute.xlu1 %2116  ;;  %2640 = vst.msk [vmem:[#allocation2 + $0x158] sm:$0xff] %vm1797_vm11, %v2531_v4  ;;  %v15190_v4 = vld [vmem:[#allocation45_spill] sm:$0xff] }
 0x20b   : > { %2227 = vst.msk [vmem:[#allocation2 + $0x170] sm:$0xff] %vm1373_vm9, %v2117_v37 }
 0x20c   : > { %2303 = vrot.lane.b32.xlu0 %v15186_v29, %s9349_s22 }
 0x20d   : > { %2548 = vrot.lane.b32.xlu1 %v15187_v15, %s9350_s20  ;;  %v2119_v43 = vpop.permute.xlu0 %2118  ;;  %v15191_v15 = vld [vmem:[#allocation47_spill] sm:$0xff] }
 0x20e   : > { %v1696_v2 = vpop.permute.xlu1 %1695  ;;  %2228 = vst.msk [vmem:[#allocation2 + $0x188] sm:$0xff] %vm1373_vm9, %v2119_v43  ;;  %9002 = vmatmul.mubr.bf16.gmra.mrb[160].mxu0 %v9241_v10  ;;  %v2859_v31 = vld [vmem:[#allocation2 + $0x140] sm:$0xff]  ;;  %v15192_v43 = vld [vmem:[#allocation46_spill] sm:$0xff] }
 0x20f   : > { %1810 = vst.msk [vmem:[#allocation2 + $0x168] sm:$0xff] %vm1797_vm11, %v1696_v2  ;;  %9005 = vmatprep.mubr.msk.bf16.mxu0 %vm9346_vm0, %v15141_v41  ;;  %v9243_v2 = vld [vmem:[%s9476_s18 + $0x10c] sm:$0xff]  }
 0x210   : > { %2550 = vrot.lane.b32.xlu0 %v10565_v5, %s9350_s20  ;;  %v11345_v20 = vpop.f32.mrb[84].mxu0 }
 0x211   : > { %2136 = vrot.lane.b32.xlu1 %v15185_v63, %s9348_s19  ;;  %v1698_v48 = vpop.permute.xlu0 %1697  ;;  %v11347_v50 = vpop.f32.mrb[85].mxu0  ;;  %v2862_v32 = vld [vmem:[#allocation2 + $0x158] sm:$0xff]  ;;  %v15189_v63 = vld [vmem:[#allocation44_spill] sm:$0xff] }
 0x212   : > { %v1525_v13 = vpop.permute.xlu1 %1524  ;;  %1811 = vst.msk [vmem:[#allocation2 + $0x180] sm:$0xff] %vm1797_vm11, %v1698_v48  ;;  %v11352_v5 = vpop.f32.mrb[86].mxu0  ;;  %v2955_v23 = vpack.c.bf16 %v2862_v32, %v2859_v31  ;;  %v15193_v48 = vld [vmem:[#allocation50_spill] sm:$0xff]  ;;  %v15194_v31 = vld [vmem:[#allocation48_spill] sm:$0xff] }
 0x213   : > { %1639 = vst.msk [vmem:[#allocation2 + $0x198] sm:$0xff] %vm1626_vm10, %v1525_v13  ;;  %v11357_v54 = vpop.f32.mrb[87].mxu0 }
 0x214   : > { %2138 = vrot.lane.b32.xlu0 %v15186_v29, %s9348_s19  ;;  %3265 = vmatprep.mubr.bf16.mxu1 %v2955_v23 }
 0x215   : > { %1715 = vrot.lane.b32.xlu1 %v15188_v18, %s9350_s20  ;;  %3266 = vmatmul.mubr.bf16.gmra.mrb[16].mxu1 %v2954_v57  ;;  %v1527_v8 = vpop.permute.xlu0 %1526 }
 0x216   : > { %v1274_v56 = vpop.permute.xlu1 %1273  ;;  %9006 = vmatmul.mubr.bf16.gmra.mrb[164].mxu0 %v9242_v7 }
 0x217   : > { %1387 = vst.msk [vmem:[#allocation2 + $0x1b0] sm:$0xff] %vm1373_vm9, %v1274_v56  ;;  %9009 = vmatprep.mubr.msk.bf16.mxu0 %vm9346_vm0, %v15141_v41 }
 0x218   : > { %1717 = vrot.lane.b32.xlu0 %v15189_v63, %s9350_s20  ;;  %1640 = vst.msk [vmem:[#allocation2 + $0x1b0] sm:$0xff] %vm1626_vm10, %v1527_v8 }
 0x219   : > { %1293 = vrot.lane.b32.xlu1 %v15190_v4, %s9348_s19  ;;  %v9244_v4 = vld [vmem:[%s9476_s18 + $0x114] sm:$0xff]  }
 0x21a   : > { %v1276_v37 = vpop.permute.xlu0 %1275 }
 0x21b   : > { %v2286_v29 = vpop.permute.xlu1 %2285  ;;  %1388 = vst.msk [vmem:[#allocation2 + $0x1c8] sm:$0xff] %vm1373_vm9, %v1276_v37 }
 0x21c   : > { %2394 = vst.msk [vmem:[#allocation2 + $0x170] sm:$0xff] %vm1626_vm10, %v2286_v29  ;;  %1295 = vrot.lane.b32.xlu0 %v15191_v15, %s9348_s19 }
 0x21d   : > { %2305 = vrot.lane.b32.xlu1 %v15192_v43, %s9349_s22 }
 0x21e   : > { %v2288_v10 = vpop.permute.xlu0 %2287  ;;  %9010 = vmatmul.mubr.bf16.gmra.mrb[168].mxu0 %v9243_v2 }
 0x21f   : > { %v2533_v51 = vpop.permute.xlu1 %2532  ;;  %2395 = vst.msk [vmem:[#allocation2 + $0x188] sm:$0xff] %vm1626_vm10, %v2288_v10  ;;  %9013 = vmatprep.mubr.msk.bf16.mxu0 %vm9346_vm0, %v15141_v41  ;;  %v2864_v10 = vld [vmem:[#allocation2 + $0x168] sm:$0xff] }
 0x220   : > { %2641 = vst.msk [vmem:[#allocation2 + $0x170] sm:$0xff] %vm1797_vm11, %v2533_v51  ;;  %2307 = vrot.lane.b32.xlu0 %v15193_v48, %s9349_s22  ;;  %v11383_v32 = vpop.f32.mrb[88].mxu0  ;;  %v15195_v51 = vld [vmem:[#allocation51_spill] sm:$0xff] }
 0x221   : > { %2552 = vrot.lane.b32.xlu1 %v15194_v31, %s9350_s20  ;;  %v11385_v23 = vpop.f32.mrb[89].mxu0 }
 0x222   : > { %v2535_v13 = vpop.permute.xlu0 %2534  ;;  %v11390_v57 = vpop.f32.mrb[90].mxu0 }
 0x223   : > { %v2121_v40 = vpop.permute.xlu1 %2120  ;;  %2642 = vst.msk [vmem:[#allocation2 + $0x188] sm:$0xff] %vm1797_vm11, %v2535_v13  ;;  %v11395_v7 = vpop.f32.mrb[91].mxu0 }
 0x224   : > { %2229 = vst.msk [vmem:[#allocation2 + $0x1a0] sm:$0xff] %vm1373_vm9, %v2121_v40  ;;  %2554 = vrot.lane.b32.xlu0 %v10636_v22, %s9350_s20  ;;  %v2867_v22 = vld [vmem:[#allocation2 + $0x180] sm:$0xff]  ;;  %v15196_v40 = vld [vmem:[#allocation55_spill] sm:$0xff] }
 0x225   : > { %2140 = vrot.lane.b32.xlu1 %v15192_v43, %s9348_s19 }
 0x226   : > { %v2123_v8 = vpop.permute.xlu0 %2122  ;;  %9014 = vmatmul.mubr.bf16.gmra.mrb[172].mxu0 %v9244_v4 }
 0x227   : > { %v1700_v56 = vpop.permute.xlu1 %1699  ;;  %2230 = vst.msk [vmem:[#allocation2 + $0x1b8] sm:$0xff] %vm1373_vm9, %v2123_v8  ;;  %v2865_v29 = vld [vmem:[#allocation2 + $0x170] sm:$0xff]  ;;  %9017 = vmatprep.mubr.msk.bf16.mxu0 %vm9346_vm0, %v15141_v41 }
 0x228   : > { %1812 = vst.msk [vmem:[#allocation2 + $0x198] sm:$0xff] %vm1797_vm11, %v1700_v56  ;;  %2142 = vrot.lane.b32.xlu0 %v15193_v48, %s9348_s19  ;;  %v9245_v48 = vld [vmem:[%s9476_s18 + $0x11c] sm:$0xff]  }
 0x229   : > { %1297 = vrot.lane.b32.xlu1 %v10639_v30, %s9348_s19  ;;  %v2957_v30 = vpack.c.bf16 %v2867_v22, %v2864_v10 }
 0x22a   : > { %v1702_v37 = vpop.permute.xlu0 %1701  ;;  %v2868_v15 = vld [vmem:[#allocation2 + $0x188] sm:$0xff] }
 0x22b   : > { %v1529_v43 = vpop.permute.xlu1 %1528  ;;  %1813 = vst.msk [vmem:[#allocation2 + $0x1b0] sm:$0xff] %vm1797_vm11, %v1702_v37  ;;  %v2958_v2 = vpack.c.bf16 %v2868_v15, %v2865_v29 }
 0x22c   : > { %1641 = vst.msk [vmem:[#allocation2 + $0x1c8] sm:$0xff] %vm1626_vm10, %v1529_v43  ;;  %1299 = vrot.lane.b32.xlu0 %v10663_v55, %s9348_s19 }
 0x22d   : > { %2309 = vrot.lane.b32.xlu1 %v15195_v51, %s9349_s22  ;;  %3273 = vmatprep.mubr.bf16.mxu1 %v2958_v2 }
 0x22e   : > { %3274 = vmatmul.mubr.bf16.gmra.mrb[20].mxu1 %v2957_v30  ;;  %v1531_v31 = vpop.permute.xlu0 %1530  ;;  %9018 = vmatmul.mubr.bf16.gmra.mrb[176].mxu0 %v9245_v48 }
 0x22f   : > { %v1278_v13 = vpop.permute.xlu1 %1277  ;;  %9021 = vmatprep.mubr.msk.bf16.mxu0 %vm9346_vm0, %v15141_v41 }
 0x230   : > { %1389 = vst.msk [vmem:[#allocation2 + $0x1e0] sm:$0xff] %vm1373_vm9, %v1278_v13  ;;  %2311 = vrot.lane.b32.xlu0 %v15196_v40, %s9349_s22  ;;  %v11421_v55 = vpop.f32.mrb[92].mxu0 }
 0x231   : > { %1642 = vst.msk [vmem:[#allocation2 + $0x1e0] sm:$0xff] %vm1626_vm10, %v1531_v31  ;;  %1301 = vrot.lane.b32.xlu1 %v10707_v39, %s9348_s19  ;;  %v11423_v56 = vpop.f32.mrb[93].mxu0 }
 0x232   : > { %v1280_v8 = vpop.permute.xlu0 %1279  ;;  %v11428_v22 = vpop.f32.mrb[94].mxu0  ;;  %v2873_v10 = vld [vmem:[#allocation2 + $0x1b0] sm:$0xff] }
 0x233   : > { %v2290_v4 = vpop.permute.xlu1 %2289  ;;  %1390 = vst.msk [vmem:[#allocation2 + $0x1f8] sm:$0xff] %vm1373_vm9, %v1280_v8  ;;  %v11433_v39 = vpop.f32.mrb[95].mxu0 }
 0x234   : > { %2396 = vst.msk [vmem:[#allocation2 + $0x1a0] sm:$0xff] %vm1626_vm10, %v2290_v4  ;;  %1303 = vrot.lane.b32.xlu0 %v10721_v47, %s9348_s19  ;;  %v15197_v47 = vld [vmem:[#allocation53_spill] sm:$0xff] }
 0x235   : > { %1544 = vrot.lane.b32.xlu1 %v15188_v18, %s9349_s22 }
 0x236   : > { %v2292_v37 = vpop.permute.xlu0 %2291 }
 0x237   : > { %v2537_v29 = vpop.permute.xlu1 %2536  ;;  %2397 = vst.msk [vmem:[#allocation2 + $0x1b8] sm:$0xff] %vm1626_vm10, %v2292_v37  ;;  %v2870_v37 = vld [vmem:[#allocation2 + $0x198] sm:$0xff] }
 0x238   : > { %2643 = vst.msk [vmem:[#allocation2 + $0x1a0] sm:$0xff] %vm1797_vm11, %v2537_v29  ;;  %1546 = vrot.lane.b32.xlu0 %v15189_v63, %s9349_s22 }
 0x239   : > { %1305 = vrot.lane.b32.xlu1 %v10767_v46, %s9348_s19  ;;  %v15198_v46 = vld [vmem:[#allocation49_spill] sm:$0xff] }
 0x23a   : > { %v2539_v15 = vpop.permute.xlu0 %2538 }
 0x23b   : > { %v2125_v43 = vpop.permute.xlu1 %2124  ;;  %2644 = vst.msk [vmem:[#allocation2 + $0x1b8] sm:$0xff] %vm1797_vm11, %v2539_v15  ;;  %v2960_v15 = vpack.c.bf16 %v2873_v10, %v2870_v37 }
 0x23c   : > { %2231 = vst.msk [vmem:[#allocation2 + $0x1d0] sm:$0xff] %vm1373_vm9, %v2125_v43  ;;  %1307 = vrot.lane.b32.xlu0 %v10790_v1, %s9348_s19 }
 0x23d   : > { %2556 = vrot.lane.b32.xlu1 %v15197_v47, %s9350_s20 }
 0x23e   : > { %v2127_v18 = vpop.permute.xlu0 %2126 }
 0x23f   : > { %v1704_v2 = vpop.permute.xlu1 %1703  ;;  %2232 = vst.msk [vmem:[#allocation2 + $0x1e8] sm:$0xff] %vm1373_vm9, %v2127_v18  ;;  %v2871_v48 = vld [vmem:[#allocation2 + $0x1a0] sm:$0xff]  ;;  %v15200_v18 = vld [vmem:[#allocation57_spill] sm:$0xff] }
 0x240   : > { %1814 = vst.msk [vmem:[#allocation2 + $0x1c8] sm:$0xff] %vm1797_vm11, %v1704_v2  ;;  %2558 = vrot.lane.b32.xlu0 %v10711_v27, %s9350_s20  ;;  %v15199_v27 = vld [vmem:[#allocation52_spill] sm:$0xff] }
 0x241   : > { %1719 = vrot.lane.b32.xlu1 %v15198_v46, %s9350_s20  ;;  %v11455_v63 = vpop.f32.mrb[96].mxu0 }
 0x242   : > { %v1706_v30 = vpop.permute.xlu0 %1705  ;;  %v11457_v1 = vpop.f32.mrb[97].mxu0  ;;  %v2874_v31 = vld [vmem:[#allocation2 + $0x1b8] sm:$0xff] }
 0x243   : > { %v1533_v13 = vpop.permute.xlu1 %1532  ;;  %1815 = vst.msk [vmem:[#allocation2 + $0x1e0] sm:$0xff] %vm1797_vm11, %v1706_v30  ;;  %v11460_v8 = vpop.f32.mrb[98].mxu0  ;;  %v2961_v4 = vpack.c.bf16 %v2874_v31, %v2871_v48 }
 0x244   : > { %1643 = vst.msk [vmem:[#allocation2 + $0x1f8] sm:$0xff] %vm1626_vm10, %v1533_v13  ;;  %1721 = vrot.lane.b32.xlu0 %v15199_v27, %s9350_s20  ;;  %v11465_v29 = vpop.f32.mrb[99].mxu0 }
 0x245   : > { %2144 = vrot.lane.b32.xlu1 %v15195_v51, %s9348_s19  ;;  %3281 = vmatprep.mubr.bf16.mxu1 %v2961_v4 }
 0x246   : > { %3282 = vmatmul.mubr.bf16.gmra.mrb[24].mxu1 %v2960_v15  ;;  %v1535_v43 = vpop.permute.xlu0 %1534 }
 0x247   : > { %v1282_v47 = vpop.permute.xlu1 %1281 }
 0x248   : > { %1391 = vst.msk [vmem:[#allocation2 + $0x210] sm:$0xff] %vm1373_vm9, %v1282_v47  ;;  %2146 = vrot.lane.b32.xlu0 %v15196_v40, %s9348_s19  ;;  %v15201_v40 = vld [vmem:[#allocation58_spill] sm:$0xff]  ;;  %v15203_v47 = vld [vmem:[#allocation56_spill] sm:$0xff] }
 0x249   : > { %1644 = vst.msk [vmem:[#allocation2 + $0x210] sm:$0xff] %vm1626_vm10, %v1535_v43  ;;  %2313 = vrot.lane.b32.xlu1 %v15200_v18, %s9349_s22 }
 0x24a   : > { %v1284_v2 = vpop.permute.xlu0 %1283 }
 0x24b   : > { %v2294_v30 = vpop.permute.xlu1 %2293  ;;  %1392 = vst.msk [vmem:[#allocation2 + $0x228] sm:$0xff] %vm1373_vm9, %v1284_v2  ;;  %v2879_v2 = vld [vmem:[#allocation2 + $0x1e0] sm:$0xff] }
 0x24c   : > { %2398 = vst.msk [vmem:[#allocation2 + $0x1d0] sm:$0xff] %vm1626_vm10, %v2294_v30  ;;  %2315 = vrot.lane.b32.xlu0 %v10775_v61, %s9349_s22 }
 0x24d   : > { %1548 = vrot.lane.b32.xlu1 %v15198_v46, %s9349_s22 }
 0x24e   : > { %v2296_v51 = vpop.permute.xlu0 %2295 }
 0x24f   : > { %v2541_v10 = vpop.permute.xlu1 %2540  ;;  %2399 = vst.msk [vmem:[#allocation2 + $0x1e8] sm:$0xff] %vm1626_vm10, %v2296_v51 }
 0x250   : > { %2645 = vst.msk [vmem:[#allocation2 + $0x1d0] sm:$0xff] %vm1797_vm11, %v2541_v10  ;;  %1550 = vrot.lane.b32.xlu0 %v15199_v27, %s9349_s22  ;;  %v15202_v27 = vld [vmem:[#allocation54_spill] sm:$0xff] }
 0x251   : > { %2560 = vrot.lane.b32.xlu1 %v15201_v40, %s9350_s20  ;;  %v11487_v48 = vpop.f32.mrb[100].mxu0 }
 0x252   : > { %v2543_v31 = vpop.permute.xlu0 %2542  ;;  %v11489_v13 = vpop.f32.mrb[101].mxu0 }
 0x253   : > { %v2129_v4 = vpop.permute.xlu1 %2128  ;;  %2646 = vst.msk [vmem:[#allocation2 + $0x1e8] sm:$0xff] %vm1797_vm11, %v2543_v31  ;;  %v11492_v46 = vpop.f32.mrb[102].mxu0  ;;  %v2876_v31 = vld [vmem:[#allocation2 + $0x1c8] sm:$0xff] }
 0x254   : > { %2233 = vst.msk [vmem:[#allocation2 + $0x200] sm:$0xff] %vm1373_vm9, %v2129_v4  ;;  %2562 = vrot.lane.b32.xlu0 %v10778_v21, %s9350_s20  ;;  %v11497_v37 = vpop.f32.mrb[103].mxu0  ;;  %v2963_v4 = vpack.c.bf16 %v2879_v2, %v2876_v31 }
 0x255   : > { %1723 = vrot.lane.b32.xlu1 %v15202_v27, %s9350_s20 }
 0x256   : > { %v2131_v15 = vpop.permute.xlu0 %2130 }
 0x257   : > { %v1708_v43 = vpop.permute.xlu1 %1707  ;;  %2234 = vst.msk [vmem:[#allocation2 + $0x218] sm:$0xff] %vm1373_vm9, %v2131_v15  ;;  %v2877_v21 = vld [vmem:[#allocation2 + $0x1d0] sm:$0xff]  ;;  %v15204_v15 = vld [vmem:[#allocation61_spill] sm:$0xff] }
 0x258   : > { %1816 = vst.msk [vmem:[#allocation2 + $0x1f8] sm:$0xff] %vm1797_vm11, %v1708_v43  ;;  %1725 = vrot.lane.b32.xlu0 %v15203_v47, %s9350_s20 }
 0x259   : > { %2148 = vrot.lane.b32.xlu1 %v15200_v18, %s9348_s19 }
 0x25a   : > { %v1710_v30 = vpop.permute.xlu0 %1709  ;;  %v2880_v51 = vld [vmem:[#allocation2 + $0x1e8] sm:$0xff] }
 0x25b   : > { %v1537_v10 = vpop.permute.xlu1 %1536  ;;  %1817 = vst.msk [vmem:[#allocation2 + $0x210] sm:$0xff] %vm1797_vm11, %v1710_v30  ;;  %v2964_v40 = vpack.c.bf16 %v2880_v51, %v2877_v21 }
 0x25c   : > { %1645 = vst.msk [vmem:[#allocation2 + $0x228] sm:$0xff] %vm1626_vm10, %v1537_v10  ;;  %2150 = vrot.lane.b32.xlu0 %v10775_v61, %s9348_s19 }
 0x25d   : > { %2317 = vrot.lane.b32.xlu1 %v15204_v15, %s9349_s22  ;;  %3289 = vmatprep.mubr.bf16.mxu1 %v2964_v40  ;;  %v15208_v40 = vld [vmem:[#allocation62_spill] sm:$0xff] }
 0x25e   : > { %3290 = vmatmul.mubr.bf16.gmra.mrb[28].mxu1 %v2963_v4  ;;  %v1539_v18 = vpop.permute.xlu0 %1538  ;;  %v15209_v4 = vld [vmem:[#allocation59_spill] sm:$0xff] }
 0x25f   : > { %v1286_v43 = vpop.permute.xlu1 %1285  ;;  %v2882_v17 = vld [vmem:[#allocation2 + $0x1f8] sm:$0xff] }
 0x260   : > { %1393 = vst.msk [vmem:[#allocation2 + $0x240] sm:$0xff] %vm1373_vm9, %v1286_v43  ;;  %2319 = vrot.lane.b32.xlu0 %v10837_v52, %s9349_s22 }
 0x261   : > { %1646 = vst.msk [vmem:[#allocation2 + $0x240] sm:$0xff] %vm1626_vm10, %v1539_v18  ;;  %1552 = vrot.lane.b32.xlu1 %v15202_v27, %s9349_s22  ;;  %v11519_v30 = vpop.f32.mrb[104].mxu0 }
 0x262   : > { %15205 = vst [vmem:[#allocation19_spill] sm:$0xff] %v11519_v30  ;;  %v1288_v61 = vpop.permute.xlu0 %1287  ;;  %v11521_v2 = vpop.f32.mrb[105].mxu0 }
 0x263   : > { %v2298_v21 = vpop.permute.xlu1 %2297  ;;  %1394 = vst.msk [vmem:[#allocation2 + $0x258] sm:$0xff] %vm1373_vm9, %v1288_v61  ;;  %v11524_v51 = vpop.f32.mrb[106].mxu0 }
 0x264   : > { %15206 = vst [vmem:[#allocation20_spill] sm:$0xff] %v11524_v51  ;;  %2400 = vst.msk [vmem:[#allocation2 + $0x200] sm:$0xff] %vm1626_vm10, %v2298_v21  ;;  %1554 = vrot.lane.b32.xlu0 %v15203_v47, %s9349_s22  ;;  %v11529_v10 = vpop.f32.mrb[107].mxu0  ;;  %v15210_v47 = vld [vmem:[#allocation60_spill] sm:$0xff] }
 0x265   : > { %15207 = vst [vmem:[#allocation22_spill] sm:$0xff] %v11529_v10  ;;  %2564 = vrot.lane.b32.xlu1 %v15208_v40, %s9350_s20  ;;  %v2885_v40 = vld [vmem:[#allocation2 + $0x210] sm:$0xff] }
 0x266   : > { %v2300_v27 = vpop.permute.xlu0 %2299  ;;  %v2966_v16 = vpack.c.bf16 %v2885_v40, %v2882_v17  ;;  %v15216_v17 = vld [vmem:[#allocation63_spill] sm:$0xff] }
 0x267   : > { %v2545_v31 = vpop.permute.xlu1 %2544  ;;  %2401 = vst.msk [vmem:[#allocation2 + $0x218] sm:$0xff] %vm1626_vm10, %v2300_v27 }
 0x268   : > { %2647 = vst.msk [vmem:[#allocation2 + $0x200] sm:$0xff] %vm1797_vm11, %v2545_v31  ;;  %2566 = vrot.lane.b32.xlu0 %v10845_v62, %s9350_s20 }
 0x269   : > { %1727 = vrot.lane.b32.xlu1 %v15209_v4, %s9350_s20 }
 0x26a   : > { %v2547_v18 = vpop.permute.xlu0 %2546 }
 0x26b   : > { %v2133_v43 = vpop.permute.xlu1 %2132  ;;  %2648 = vst.msk [vmem:[#allocation2 + $0x218] sm:$0xff] %vm1797_vm11, %v2547_v18 }
 0x26c   : > { %2235 = vst.msk [vmem:[#allocation2 + $0x230] sm:$0xff] %vm1373_vm9, %v2133_v43  ;;  %1729 = vrot.lane.b32.xlu0 %v15210_v47, %s9350_s20 }
 0x26d   : > { %2152 = vrot.lane.b32.xlu1 %v15204_v15, %s9348_s19 }
 0x26e   : > { %v2135_v61 = vpop.permute.xlu0 %2134 }
 0x26f   : > { %v1712_v21 = vpop.permute.xlu1 %1711  ;;  %2236 = vst.msk [vmem:[#allocation2 + $0x248] sm:$0xff] %vm1373_vm9, %v2135_v61  ;;  %v2883_v18 = vld [vmem:[#allocation2 + $0x200] sm:$0xff] }
 0x270   : > { %1818 = vst.msk [vmem:[#allocation2 + $0x228] sm:$0xff] %vm1797_vm11, %v1712_v21  ;;  %2154 = vrot.lane.b32.xlu0 %v10837_v52, %s9348_s19 }
 0x271   : > { %2321 = vrot.lane.b32.xlu1 %v10862_v60, %s9349_s22 }
 0x272   : > { %v11551_v62 = vpop.f32.mrb[108].mxu0  ;;  %v1714_v27 = vpop.permute.xlu0 %1713  ;;  %v2886_v15 = vld [vmem:[#allocation2 + $0x218] sm:$0xff] }
 0x273   : > { %15211 = vst [vmem:[#allocation21_spill] sm:$0xff] %v11551_v62  ;;  %v11553_v31 = vpop.f32.mrb[109].mxu0  ;;  %v1541_v43 = vpop.permute.xlu1 %1540  ;;  %1819 = vst.msk [vmem:[#allocation2 + $0x240] sm:$0xff] %vm1797_vm11, %v1714_v27  ;;  %v2967_v21 = vpack.c.bf16 %v2886_v15, %v2883_v18  ;;  %v15215_v27 = vld [vmem:[#allocation65_spill] sm:$0xff] }
 0x274   : > { %15212 = vst [vmem:[#allocation23_spill] sm:$0xff] %v11553_v31  ;;  %v11556_v61 = vpop.f32.mrb[110].mxu0  ;;  %1647 = vst.msk [vmem:[#allocation2 + $0x258] sm:$0xff] %vm1626_vm10, %v1541_v43  ;;  %2323 = vrot.lane.b32.xlu0 %v10916_v6, %s9349_s22 }
 0x275   : > { %15213 = vst [vmem:[#allocation24_spill] sm:$0xff] %v11556_v61  ;;  %v11561_v52 = vpop.f32.mrb[111].mxu0  ;;  %1556 = vrot.lane.b32.xlu1 %v15209_v4, %s9349_s22  ;;  %3297 = vmatprep.mubr.bf16.mxu1 %v2967_v21 }
 0x276   : > { %15214 = vst [vmem:[#allocation25_spill] sm:$0xff] %v11561_v52  ;;  %3298 = vmatmul.mubr.bf16.gmra.mrb[32].mxu1 %v2966_v16  ;;  %v1543_v44 = vpop.permute.xlu0 %1542 }
 0x277   : > { %v1290_v34 = vpop.permute.xlu1 %1289 }
 0x278   : > { %1395 = vst.msk [vmem:[#allocation2 + $0x270] sm:$0xff] %vm1373_vm9, %v1290_v34  ;;  %1558 = vrot.lane.b32.xlu0 %v15210_v47, %s9349_s22 }
 0x279   : > { %1648 = vst.msk [vmem:[#allocation2 + $0x270] sm:$0xff] %vm1626_vm10, %v1543_v44  ;;  %2568 = vrot.lane.b32.xlu1 %v15215_v27, %s9350_s20  ;;  %v15217_v44 = vld [vmem:[#allocation64_spill] sm:$0xff]  ;;  %v15222_v27 = vld [vmem:[#allocation66_spill] sm:$0xff] }
 0x27a   : > { %v1292_v18 = vpop.permute.xlu0 %1291 }
 0x27b   : > { %v2302_v15 = vpop.permute.xlu1 %2301  ;;  %1396 = vst.msk [vmem:[#allocation2 + $0x288] sm:$0xff] %vm1373_vm9, %v1292_v18 }
 0x27c   : > { %2402 = vst.msk [vmem:[#allocation2 + $0x230] sm:$0xff] %vm1626_vm10, %v2302_v15  ;;  %2570 = vrot.lane.b32.xlu0 %v10925_v19, %s9350_s20  ;;  %v11601_v15 = vld [vmem:[%s14950_s5] ss:$0 sm:$0xff] }
 0x27d   : > { %1731 = vrot.lane.b32.xlu1 %v15216_v17, %s9350_s20 }
 0x27e   : > { %v2304_v34 = vpop.permute.xlu0 %2303 }
 0x27f   : > { %v2549_v16 = vpop.permute.xlu1 %2548  ;;  %2403 = vst.msk [vmem:[#allocation2 + $0x248] sm:$0xff] %vm1626_vm10, %v2304_v34  ;;  %v15223_v34 = vld [vmem:[#allocation70_spill] sm:$0xff] }
 0x280   : > { %2649 = vst.msk [vmem:[#allocation2 + $0x230] sm:$0xff] %vm1797_vm11, %v2549_v16  ;;  %1733 = vrot.lane.b32.xlu0 %v15217_v44, %s9350_s20  ;;  %v2891_v16 = vld [vmem:[#allocation2 + $0x240] sm:$0xff] }
 0x281   : > { %2156 = vrot.lane.b32.xlu1 %v10862_v60, %s9348_s19  ;;  %v11583_v4 = vpop.f32.mrb[112].mxu0 }
 0x282   : > { %15218 = vst [vmem:[#allocation26_spill] sm:$0xff] %v11583_v4  ;;  %v2551_v47 = vpop.permute.xlu0 %2550  ;;  %v11585_v40 = vpop.f32.mrb[113].mxu0 }
 0x283   : > { %15219 = vst [vmem:[#allocation28_spill] sm:$0xff] %v11585_v40  ;;  %v2137_v19 = vpop.permute.xlu1 %2136  ;;  %2650 = vst.msk [vmem:[#allocation2 + $0x248] sm:$0xff] %vm1797_vm11, %v2551_v47  ;;  %v11588_v43 = vpop.f32.mrb[114].mxu0 }
 0x284   : > { %15220 = vst [vmem:[#allocation27_spill] sm:$0xff] %v11588_v43  ;;  %2237 = vst.msk [vmem:[#allocation2 + $0x260] sm:$0xff] %vm1373_vm9, %v2137_v19  ;;  %2158 = vrot.lane.b32.xlu0 %v10916_v6, %s9348_s19  ;;  %v11593_v21 = vpop.f32.mrb[115].mxu0 }
 0x285   : > { %15221 = vst [vmem:[#allocation31_spill] sm:$0xff] %v11593_v21  ;;  %1309 = vrot.lane.b32.xlu1 %v15222_v27, %s9348_s19 }
 0x286   : > { %v2139_v60 = vpop.permute.xlu0 %2138 }
 0x287   : > { %v1716_v18 = vpop.permute.xlu1 %1715  ;;  %2238 = vst.msk [vmem:[#allocation2 + $0x278] sm:$0xff] %vm1373_vm9, %v2139_v60  ;;  %v2889_v60 = vld [vmem:[#allocation2 + $0x230] sm:$0xff] }
 0x288   : > { %1820 = vst.msk [vmem:[#allocation2 + $0x258] sm:$0xff] %vm1797_vm11, %v1716_v18  ;;  %2325 = vrot.lane.b32.xlu0 %v15223_v34, %s9349_s22  ;;  %v2888_v18 = vld [vmem:[#allocation2 + $0x228] sm:$0xff] }
 0x289   : > { %2327 = vrot.lane.b32.xlu1 %v10995_v9, %s9349_s22  ;;  %v3235_v6 = vpop.f32.mrb[0].mxu1 }
 0x28a   : > { %v3236_v47 = vadd.f32 %v11601_v15, %v3235_v6  ;;  %v3237_v19 = vpop.f32.mrb[1].mxu1  ;;  %v1718_v27 = vpop.permute.xlu0 %1717  ;;  %v2892_v25 = vld [vmem:[#allocation2 + $0x248] sm:$0xff]  ;;  %v2969_v6 = vpack.c.bf16 %v2891_v16, %v2888_v18 }
 0x28b   : > { %1821 = vst.msk [vmem:[#allocation2 + $0x270] sm:$0xff] %vm1797_vm11, %v1718_v27  ;;  %v1294_v11 = vpop.permute.xlu1 %1293  ;;  %v3238_v35 = vpop.f32.mrb[2].mxu1  ;;  %v2970_v45 = vpack.c.bf16 %v2892_v25, %v2889_v60  ;;  %v15228_v60 = vld [vmem:[#allocation72_spill] sm:$0xff] }
 0x28c   : > { %v3413_v49 = vadd.f32 %v11347_v50, %v3236_v47  ;;  %1397 = vst.msk [vmem:[#allocation2 + $0x2a0] sm:$0xff] %vm1373_vm9, %v1294_v11  ;;  %v3239_v43 = vadd.f32 %v11601_v15, %v3238_v35  ;;  %v3240_v4 = vpop.f32.mrb[3].mxu1  ;;  %1560 = vrot.lane.b32.xlu0 %v15216_v17, %s9349_s22  ;;  %v15224_v35 = vld [vmem:[#allocation71_spill] sm:$0xff]  ;;  %v15227_v47 = vld [vmem:[#allocation68_spill] sm:$0xff] }
 0x28d   : > { %1562 = vrot.lane.b32.xlu1 %v15217_v44, %s9349_s22  ;;  %3305 = vmatprep.mubr.bf16.mxu1 %v2970_v45 }
 0x28e   : > { %v3416_v19 = vadd.f32 %v11357_v54, %v3239_v43  ;;  %3306 = vmatmul.mubr.bf16.gmra.mrb[36].mxu1 %v2969_v6  ;;  %v1296_v25 = vpop.permute.xlu0 %1295  ;;  %v3555_v50 = vmax.f32 %v3413_v49, 0.0  ;;  %v15225_v54 = vld [vmem:[#allocation67_spill] sm:$0xff]  ;;  %v15226_v49 = vld [vmem:[#allocation69_spill] sm:$0xff] }
 0x28f   : > { %v2306_v27 = vpop.permute.xlu1 %2305  ;;  %1398 = vst.msk [vmem:[#allocation2 + $0x2b8] sm:$0xff] %vm1373_vm9, %v1296_v25 }
 0x290   : > { %v3556_v11 = vmax.f32 %v3416_v19, 0.0  ;;  %2404 = vst.msk [vmem:[#allocation2 + $0x260] sm:$0xff] %vm1626_vm10, %v2306_v27  ;;  %2572 = vrot.lane.b32.xlu0 %v15224_v35, %s9350_s20  ;;  %v2894_v27 = vld [vmem:[#allocation2 + $0x258] sm:$0xff] }
 0x291   : > { %2574 = vrot.lane.b32.xlu1 %v10998_v14, %s9350_s20 }
 0x292   : > { %v11624_v17 = vpack.c.bf16 %v3556_v11, %v3555_v50  ;;  %v2308_v45 = vpop.permute.xlu0 %2307  ;;  %v2897_v18 = vld [vmem:[#allocation2 + $0x270] sm:$0xff] }
 0x293   : > { %v2553_v44 = vpop.permute.xlu1 %2552  ;;  %2405 = vst.msk [vmem:[#allocation2 + $0x278] sm:$0xff] %vm1626_vm10, %v2308_v45  ;;  %v2972_v50 = vpack.c.bf16 %v2897_v18, %v2894_v27 }
 0x294   : > { %2651 = vst.msk [vmem:[#allocation2 + $0x260] sm:$0xff] %vm1797_vm11, %v2553_v44  ;;  %1735 = vrot.lane.b32.xlu0 %v15225_v54, %s9350_s20 }
 0x295   : > { %1737 = vrot.lane.b32.xlu1 %v15226_v49, %s9350_s20 }
 0x296   : > { %v2555_v4 = vpop.permute.xlu0 %2554 }
 0x297   : > { %v2141_v43 = vpop.permute.xlu1 %2140  ;;  %2652 = vst.msk [vmem:[#allocation2 + $0x278] sm:$0xff] %vm1797_vm11, %v2555_v4 }
 0x298   : > { %2239 = vst.msk [vmem:[#allocation2 + $0x290] sm:$0xff] %vm1373_vm9, %v2141_v43  ;;  %2160 = vrot.lane.b32.xlu0 %v15223_v34, %s9348_s19 }
 0x299   : > { %2162 = vrot.lane.b32.xlu1 %v10995_v9, %s9348_s19 }
 0x29a   : > { %v2143_v14 = vpop.permute.xlu0 %2142 }
 0x29b   : > { %2240 = vst.msk [vmem:[#allocation2 + $0x2a8] sm:$0xff] %vm1373_vm9, %v2143_v14  ;;  %v1298_v16 = vpop.permute.xlu1 %1297  ;;  %v2895_v19 = vld [vmem:[#allocation2 + $0x260] sm:$0xff] }
 0x29c   : > { %1399 = vst.msk [vmem:[#allocation2 + $0x2d0] sm:$0xff] %vm1373_vm9, %v1298_v16  ;;  %1311 = vrot.lane.b32.xlu0 %v15227_v47, %s9348_s19 }
 0x29d   : > { %1313 = vrot.lane.b32.xlu1 %v15228_v60, %s9348_s19 }
 0x29e   : > { %v1300_v6 = vpop.permute.xlu0 %1299  ;;  %v2898_v25 = vld [vmem:[#allocation2 + $0x278] sm:$0xff] }
 0x29f   : > { %v2310_v34 = vpop.permute.xlu1 %2309  ;;  %1400 = vst.msk [vmem:[#allocation2 + $0x2e8] sm:$0xff] %vm1373_vm9, %v1300_v6  ;;  %v2973_v9 = vpack.c.bf16 %v2898_v25, %v2895_v19 }
 0x2a0   : > { %2406 = vst.msk [vmem:[#allocation2 + $0x290] sm:$0xff] %vm1626_vm10, %v2310_v34  ;;  %2329 = vrot.lane.b32.xlu0 %v11012_v59, %s9349_s22  ;;  %v3243_v11 = vpop.f32.mrb[4].mxu1 }
 0x2a1   : > { %2331 = vrot.lane.b32.xlu1 %v11064_v3, %s9349_s22  ;;  %3313 = vmatprep.mubr.bf16.mxu1 %v2973_v9  ;;  %v3244_v35 = vadd.f32 %v11601_v15, %v3243_v11  ;;  %v3245_v45 = vpop.f32.mrb[5].mxu1 }
 0x2a2   : > { %3314 = vmatmul.mubr.bf16.gmra.mrb[40].mxu1 %v2972_v50  ;;  %v2312_v44 = vpop.permute.xlu0 %2311  ;;  %v3246_v43 = vpop.f32.mrb[6].mxu1 }
 0x2a3   : > { %2407 = vst.msk [vmem:[#allocation2 + $0x2a8] sm:$0xff] %vm1626_vm10, %v2312_v44  ;;  %v1302_v4 = vpop.permute.xlu1 %1301  ;;  %v3421_v14 = vadd.f32 %v11345_v20, %v3244_v35  ;;  %v3247_v16 = vadd.f32 %v11601_v15, %v3246_v43  ;;  %v3248_v47 = vpop.f32.mrb[7].mxu1 }
 0x2a4   : > { %1401 = vst.msk [vmem:[#allocation2 + $0x300] sm:$0xff] %vm1373_vm9, %v1302_v4  ;;  %1564 = vrot.lane.b32.xlu0 %v15225_v54, %s9349_s22 }
 0x2a5   : > { %1566 = vrot.lane.b32.xlu1 %v15226_v49, %s9349_s22  ;;  %v3424_v60 = vadd.f32 %v11352_v5, %v3247_v16  ;;  %v3557_v19 = vmax.f32 %v3421_v14, 0.0  ;;  %v15229_v49 = vld [vmem:[#allocation73_spill] sm:$0xff] }
 0x2a6   : > { %v1304_v18 = vpop.permute.xlu0 %1303 }
 0x2a7   : > { %v1545_v6 = vpop.permute.xlu1 %1544  ;;  %1402 = vst.msk [vmem:[#allocation2 + $0x318] sm:$0xff] %vm1373_vm9, %v1304_v18  ;;  %v3558_v25 = vmax.f32 %v3424_v60, 0.0 }
 0x2a8   : > { %1649 = vst.msk [vmem:[#allocation2 + $0x288] sm:$0xff] %vm1626_vm10, %v1545_v6  ;;  %2576 = vrot.lane.b32.xlu0 %v11028_v36, %s9350_s20 }
 0x2a9   : > { %2578 = vrot.lane.b32.xlu1 %v11074_v33, %s9350_s20  ;;  %v11666_v20 = vpack.c.bf16 %v3558_v25, %v3557_v19 }
 0x2aa   : > { %v1547_v54 = vpop.permute.xlu0 %1546 }
 0x2ab   : > { %1650 = vst.msk [vmem:[#allocation2 + $0x2a0] sm:$0xff] %vm1626_vm10, %v1547_v54  ;;  %v1306_v5 = vpop.permute.xlu1 %1305 }
 0x2ac   : > { %1403 = vst.msk [vmem:[#allocation2 + $0x330] sm:$0xff] %vm1373_vm9, %v1306_v5  ;;  %1739 = vrot.lane.b32.xlu0 %v15229_v49, %s9350_s20  ;;  %v11706_v5 = vpop.f32.mrb[116].mxu0 }
 0x2ad   : > { %1741 = vrot.lane.b32.xlu1 %v11015_v26, %s9350_s20 }
 0x2ae   : > { %v1308_v34 = vpop.permute.xlu0 %1307 }
 0x2af   : > { %v2557_v9 = vpop.permute.xlu1 %2556  ;;  %1404 = vst.msk [vmem:[#allocation2 + $0x348] sm:$0xff] %vm1373_vm9, %v1308_v34 }
 0x2b0   : > { %2653 = vst.msk [vmem:[#allocation2 + $0x290] sm:$0xff] %vm1797_vm11, %v2557_v9  ;;  %2164 = vrot.lane.b32.xlu0 %v11012_v59, %s9348_s19 }
 0x2b1   : > { %2166 = vrot.lane.b32.xlu1 %v11064_v3, %s9348_s19 }
 0x2b2   : > { %v2559_v36 = vpop.permute.xlu0 %2558 }
 0x2b3   : > { %v1720_v33 = vpop.permute.xlu1 %1719  ;;  %2654 = vst.msk [vmem:[#allocation2 + $0x2a8] sm:$0xff] %vm1797_vm11, %v2559_v36 }
 0x2b4   : > { %1822 = vst.msk [vmem:[#allocation2 + $0x288] sm:$0xff] %vm1797_vm11, %v1720_v33  ;;  %1315 = vrot.lane.b32.xlu0 %v10977_v38, %s9348_s19 }
 0x2b5   : > { %1317 = vrot.lane.b32.xlu1 %v11020_v53, %s9348_s19 }
 0x2b6   : > { %v1722_v27 = vpop.permute.xlu0 %1721 }
 0x2b7   : > { %v2145_v50 = vpop.permute.xlu1 %2144  ;;  %1823 = vst.msk [vmem:[#allocation2 + $0x2a0] sm:$0xff] %vm1797_vm11, %v1722_v27  ;;  %v2901_v35 = vld [vmem:[#allocation2 + $0x290] sm:$0xff] }
 0x2b8   : > { %2241 = vst.msk [vmem:[#allocation2 + $0x2c0] sm:$0xff] %vm1373_vm9, %v2145_v50  ;;  %2333 = vrot.lane.b32.xlu0 %v11093_v28, %s9349_s22  ;;  %v3251_v59 = vpop.f32.mrb[8].mxu1 }
 0x2b9   : > { %2335 = vrot.lane.b32.xlu1 %v11143_v42, %s9349_s22  ;;  %v3252_v3 = vadd.f32 %v11601_v15, %v3251_v59  ;;  %v3253_v11 = vpop.f32.mrb[9].mxu1  ;;  %v4680_v59 = vld [vmem:[%s14946_s1 + $0x18] sm:$0xff] }
 0x2ba   : > { %v2147_v38 = vpop.permute.xlu0 %2146  ;;  %v2904_v45 = vld [vmem:[#allocation2 + $0x2a8] sm:$0xff]  ;;  %v3254_v44 = vpop.f32.mrb[10].mxu1 }
 0x2bb   : > { %v2314_v53 = vpop.permute.xlu1 %2313  ;;  %2242 = vst.msk [vmem:[#allocation2 + $0x2d8] sm:$0xff] %vm1373_vm9, %v2147_v38  ;;  %v2976_v4 = vpack.c.bf16 %v2904_v45, %v2901_v35  ;;  %v3429_v43 = vadd.f32 %v11385_v23, %v3252_v3  ;;  %v3255_v14 = vadd.f32 %v11601_v15, %v3254_v44  ;;  %v3256_v16 = vpop.f32.mrb[11].mxu1  ;;  %v2900_v18 = vld [vmem:[#allocation2 + $0x288] sm:$0xff]  ;;  %v4681_v35 = vld [vmem:[%s14946_s1 + $0x20] sm:$0xff] }
 0x2bc   : > { %2408 = vst.msk [vmem:[#allocation2 + $0x2c0] sm:$0xff] %vm1626_vm10, %v2314_v53  ;;  %1568 = vrot.lane.b32.xlu0 %v15229_v49, %s9349_s22  ;;  %v4677_v53 = vld [vmem:[%s14946_s1] sm:$0xff] }
 0x2bd   : > { %1570 = vrot.lane.b32.xlu1 %v11015_v26, %s9349_s22  ;;  %3321 = vmatprep.mubr.bf16.mxu1 %v2976_v4  ;;  %v3432_v47 = vadd.f32 %v11395_v7, %v3255_v14  ;;  %v3559_v25 = vmax.f32 %v3429_v43, 0.0  ;;  %v8959_v26 = vpop.f32.mrb[117].mxu0  ;;  %v4678_v4 = vld [vmem:[%s14946_s1 + $0x8] sm:$0xff] }
 0x2be   : > { %v2316_v60 = vpop.permute.xlu0 %2315  ;;  %v2903_v6 = vld [vmem:[#allocation2 + $0x2a0] sm:$0xff]  ;;  %v11712_v34 = vpop.f32.mrb[118].mxu0  ;;  %v4682_v43 = vld [vmem:[%s14946_s1 + $0x28] sm:$0xff] }
 0x2bf   : > { %v1549_v19 = vpop.permute.xlu1 %1548  ;;  %2409 = vst.msk [vmem:[#allocation2 + $0x2d8] sm:$0xff] %vm1626_vm10, %v2316_v60  ;;  %v2975_v23 = vpack.c.bf16 %v2903_v6, %v2900_v18  ;;  %v3560_v54 = vmax.f32 %v3432_v47, 0.0  ;;  %v8960_v36 = vpop.f32.mrb[119].mxu0  ;;  %v11751_v18 = vld [vmem:[%s14951_s6] sm:$0xff]  }
 0x2c0   : > { %1651 = vst.msk [vmem:[#allocation2 + $0x2b8] sm:$0xff] %vm1626_vm10, %v1549_v19  ;;  %2580 = vrot.lane.b32.xlu0 %v11096_v0, %s9350_s20  ;;  %v15230_v0 = vld [vmem:[#allocation74_spill] sm:$0xff]  ;;  %v11718_v33 = vpop.f32.mrb[120].mxu0  ;;  %8901 = vmatprep.subr.bf16.mxu1 %v11751_v18  ;;  %v4684_v36 = vld [vmem:[%s14946_s1 + $0x38] sm:$0xff] }
 0x2c1   : > { %2582 = vrot.lane.b32.xlu1 %v11146_v24, %s9350_s20  ;;  %3322 = vmatmul.mubr.bf16.gmra.mrb[44].mxu1 %v2975_v23  ;;  %v11710_v7 = vpack.c.bf16 %v3560_v54, %v3559_v25  ;;  %v4679_v24 = vld [vmem:[%s14946_s1 + $0x10] sm:$0xff]  ;;  %v8963_v27 = vpop.f32.mrb[121].mxu0 }
 0x2c2   : > { %v1551_v49 = vpop.permute.xlu0 %1550  ;;  %v11728_v3 = vpop.f32.mrb[122].mxu0  ;;  %v4683_v54 = vld [vmem:[%s14946_s1 + $0x30] sm:$0xff] }
 0x2c3   : > { %v2561_v9 = vpop.permute.xlu1 %2560  ;;  %1652 = vst.msk [vmem:[#allocation2 + $0x2d0] sm:$0xff] %vm1626_vm10, %v1551_v49  ;;  %v8964_v38 = vpop.f32.mrb[123].mxu0 }
 0x2c4   : > { %2655 = vst.msk [vmem:[#allocation2 + $0x2c0] sm:$0xff] %vm1797_vm11, %v2561_v9  ;;  %1743 = vrot.lane.b32.xlu0 %v15230_v0, %s9350_s20  ;;  %v11746_v60 = vpop.f32.mrb[124].mxu0 }
 0x2c5   : > { %1745 = vrot.lane.b32.xlu1 %v11087_v12, %s9350_s20  ;;  %v8967_v23 = vpop.f32.mrb[125].mxu0 }
 0x2c6   : > { %v2563_v50 = vpop.permute.xlu0 %2562 }
 0x2c7   : > { %v1724_v11 = vpop.permute.xlu1 %1723  ;;  %2656 = vst.msk [vmem:[#allocation2 + $0x2d8] sm:$0xff] %vm1797_vm11, %v2563_v50 }
 0x2c8   : > { %1824 = vst.msk [vmem:[#allocation2 + $0x2b8] sm:$0xff] %vm1797_vm11, %v1724_v11  ;;  %4730 = vperm.xlu0 %9173, %v4679_v24  }
 0x2c9   : > { %4735 = vperm.xlu1 %9174, %v4680_v59  }
 0x2ca   : > { %v1726_v45 = vpop.permute.xlu0 %1725 }
 0x2cb   : > { %v2149_v44 = vpop.permute.xlu1 %2148  ;;  %1825 = vst.msk [vmem:[#allocation2 + $0x2d0] sm:$0xff] %vm1797_vm11, %v1726_v45  ;;  %v2907_v16 = vld [vmem:[#allocation2 + $0x2c0] sm:$0xff] }
 0x2cc   : > { %2243 = vst.msk [vmem:[#allocation2 + $0x2f0] sm:$0xff] %vm1373_vm9, %v2149_v44  ;;  %4740 = vperm.xlu0 %9173, %v4681_v35   ;;  %v4685_v44 = vld [vmem:[%s14946_s1 + $0x40] sm:$0xff] }
 0x2cd   : > { %4720 = vperm.xlu1 %9174, %v4677_v53   ;;  %v11767_v53 = vpop.f32.mrb[126].mxu0 }
 0x2ce   : > { %v2151_v14 = vpop.permute.xlu0 %2150  ;;  %v2910_v47 = vld [vmem:[#allocation2 + $0x2d8] sm:$0xff] }
 0x2cf   : > { %v2318_v6 = vpop.permute.xlu1 %2317  ;;  %2244 = vst.msk [vmem:[#allocation2 + $0x308] sm:$0xff] %vm1373_vm9, %v2151_v14  ;;  %v2979_v19 = vpack.c.bf16 %v2910_v47, %v2907_v16  ;;  %v2906_v24 = vld [vmem:[#allocation2 + $0x2b8] sm:$0xff] }
 0x2d0   : > { %2410 = vst.msk [vmem:[#allocation2 + $0x2f0] sm:$0xff] %vm1626_vm10, %v2318_v6  ;;  %4725 = vperm.xlu0 %9173, %v4678_v4   ;;  %v3259_v25 = vpop.f32.mrb[12].mxu1  ;;  %v8968_v4 = vpop.f32.mrb[127].mxu0 }
 0x2d1   : > { %4745 = vperm.xlu1 %9174, %v4682_v43   ;;  %3329 = vmatprep.mubr.bf16.mxu1 %v2979_v19  ;;  %v3260_v26 = vadd.f32 %v11601_v15, %v3259_v25  ;;  %v3261_v49 = vpop.f32.mrb[13].mxu1  ;;  %v11776_v16 = vpop.f32.mrb[128].mxu0 }
 0x2d2   : > { %v2320_v9 = vpop.permute.xlu0 %2319  ;;  %v2909_v27 = vld [vmem:[#allocation2 + $0x2d0] sm:$0xff]  ;;  %v3262_v59 = vpop.f32.mrb[14].mxu1 }
 0x2d3   : > { %v1553_v50 = vpop.permute.xlu1 %1552  ;;  %2411 = vst.msk [vmem:[#allocation2 + $0x308] sm:$0xff] %vm1626_vm10, %v2320_v9  ;;  %v2978_v11 = vpack.c.bf16 %v2909_v27, %v2906_v24  ;;  %v3437_v38 = vadd.f32 %v11383_v32, %v3260_v26  ;;  %v3263_v35 = vadd.f32 %v11601_v15, %v3262_v59  ;;  %v3264_v45 = vpop.f32.mrb[15].mxu1  ;;  %v4686_v32 = vld [vmem:[%s14946_s1 + $0x48] sm:$0xff]  ;;  %v4688_v9 = vld [vmem:[%s14946_s1 + $0x58] sm:$0xff]  ;;  %v4689_v59 = vld [vmem:[%s14946_s1 + $0x60] sm:$0xff] }
 0x2d4   : > { %1653 = vst.msk [vmem:[#allocation2 + $0x2e8] sm:$0xff] %vm1626_vm10, %v1553_v50  ;;  %4750 = vperm.xlu0 %9173, %v4683_v54   ;;  %v8971_v6 = vpop.f32.mrb[129].mxu0 }
 0x2d5   : > { %4755 = vperm.xlu1 %9174, %v4684_v36   ;;  %3330 = vmatmul.mubr.bf16.gmra.mrb[48].mxu1 %v2978_v11  ;;  %v3440_v43 = vadd.f32 %v11390_v57, %v3263_v35  ;;  %v3561_v19 = vmax.f32 %v3437_v38, 0.0  ;;  %v11780_v25 = vpop.f32.mrb[130].mxu0  ;;  %v4687_v57 = vld [vmem:[%s14946_s1 + $0x50] sm:$0xff]  ;;  %v4690_v35 = vld [vmem:[%s14946_s1 + $0x68] sm:$0xff]  ;;  %v4692_v6 = vld [vmem:[%s14946_s1 + $0x78] sm:$0xff] }
 0x2d6   : > { %v1555_v14 = vpop.permute.xlu0 %1554  ;;  %v8972_v54 = vpop.f32.mrb[131].mxu0 }
 0x2d7   : > { %v2565_v47 = vpop.permute.xlu1 %2564  ;;  %1654 = vst.msk [vmem:[#allocation2 + $0x300] sm:$0xff] %vm1626_vm10, %v1555_v14  ;;  %v3562_v23 = vmax.f32 %v3440_v43, 0.0  ;;  %v11790_v36 = vpop.f32.mrb[132].mxu0  ;;  %v4691_v14 = vld [vmem:[%s14946_s1 + $0x70] sm:$0xff] }
 0x2d8   : > { %2657 = vst.msk [vmem:[#allocation2 + $0x2f0] sm:$0xff] %vm1797_vm11, %v2565_v47  ;;  %4760 = vperm.xlu0 %9173, %v4685_v44   ;;  %v8975_v27 = vpop.f32.mrb[133].mxu0 }
 0x2d9   : > { %4765 = vperm.xlu1 %9174, %v4686_v32   ;;  %v11785_v26 = vpack.c.bf16 %v3562_v23, %v3561_v19  ;;  %v11794_v50 = vpop.f32.mrb[134].mxu0  ;;  %v4693_v27 = vld [vmem:[%s14946_s1 + $0x80] sm:$0xff] }
 0x2da   : > { %v2567_v49 = vpop.permute.xlu0 %2566  ;;  %v8976_v11 = vpop.f32.mrb[135].mxu0 }
 0x2db   : > { %v1728_v24 = vpop.permute.xlu1 %1727  ;;  %2658 = vst.msk [vmem:[#allocation2 + $0x308] sm:$0xff] %vm1797_vm11, %v2567_v49  ;;  %v11802_v45 = vpop.f32.mrb[136].mxu0 }
 0x2dc   : > { %1826 = vst.msk [vmem:[#allocation2 + $0x2e8] sm:$0xff] %vm1797_vm11, %v1728_v24  ;;  %4770 = vperm.xlu0 %9173, %v4687_v57   ;;  %v8979_v4 = vpop.f32.mrb[137].mxu0 }
 0x2dd   : > { %4775 = vperm.xlu1 %9174, %v4688_v9   ;;  %v11806_v43 = vpop.f32.mrb[138].mxu0 }
 0x2de   : > { %v1730_v38 = vpop.permute.xlu0 %1729  ;;  %v8980_v32 = vpop.f32.mrb[139].mxu0 }
 0x2df   : > { %v2153_v44 = vpop.permute.xlu1 %2152  ;;  %1827 = vst.msk [vmem:[#allocation2 + $0x300] sm:$0xff] %vm1797_vm11, %v1730_v38  ;;  %v2913_v19 = vld [vmem:[#allocation2 + $0x2f0] sm:$0xff]  ;;  %v11814_v57 = vpop.f32.mrb[140].mxu0  ;;  %v4694_v38 = vld [vmem:[%s14946_s1 + $0x88] sm:$0xff] }
 0x2e0   : > { %2245 = vst.msk [vmem:[#allocation2 + $0x320] sm:$0xff] %vm1373_vm9, %v2153_v44  ;;  %4780 = vperm.xlu0 %9173, %v4689_v59   ;;  %v8983_v9 = vpop.f32.mrb[141].mxu0 }
 0x2e1   : > { %4785 = vperm.xlu1 %9174, %v4690_v35   ;;  %v11818_v24 = vpop.f32.mrb[142].mxu0 }
 0x2e2   : > { %v2155_v47 = vpop.permute.xlu0 %2154  ;;  %v2916_v23 = vld [vmem:[#allocation2 + $0x308] sm:$0xff]  ;;  %v8984_v59 = vpop.f32.mrb[143].mxu0 }
 0x2e3   : > { %2246 = vst.msk [vmem:[#allocation2 + $0x338] sm:$0xff] %vm1373_vm9, %v2155_v47  ;;  %v2322_v54 = vpop.permute.xlu1 %2321  ;;  %v2982_v49 = vpack.c.bf16 %v2916_v23, %v2913_v19  ;;  %v2912_v35 = vld [vmem:[#allocation2 + $0x2e8] sm:$0xff]  ;;  %v11826_v4 = vpop.f32.mrb[144].mxu0  ;;  %v4695_v23 = vld [vmem:[%s14946_s1 + $0x90] sm:$0xff] }
 0x2e4   : > { %2412 = vst.msk [vmem:[#allocation2 + $0x320] sm:$0xff] %vm1626_vm10, %v2322_v54  ;;  %4790 = vperm.xlu0 %9173, %v4691_v14   ;;  %v8987_v47 = vpop.f32.mrb[145].mxu0 }
 0x2e5   : > { %4795 = vperm.xlu1 %9174, %v4692_v6   ;;  %3337 = vmatprep.mubr.bf16.mxu1 %v2982_v49  ;;  %v11830_v6 = vpop.f32.mrb[146].mxu0  ;;  %v4697_v47 = vld [vmem:[%s14946_s1 + $0xa0] sm:$0xff] }
 0x2e6   : > { %v2324_v11 = vpop.permute.xlu0 %2323  ;;  %v2915_v44 = vld [vmem:[#allocation2 + $0x300] sm:$0xff]  ;;  %v8988_v54 = vpop.f32.mrb[147].mxu0 }
 0x2e7   : > { %v1557_v32 = vpop.permute.xlu1 %1556  ;;  %2413 = vst.msk [vmem:[#allocation2 + $0x338] sm:$0xff] %vm1626_vm10, %v2324_v11  ;;  %v2981_v14 = vpack.c.bf16 %v2915_v44, %v2912_v35  ;;  %v4696_v11 = vld [vmem:[%s14946_s1 + $0x98] sm:$0xff] }
 0x2e8   : > { %1655 = vst.msk [vmem:[#allocation2 + $0x318] sm:$0xff] %vm1626_vm10, %v1557_v32  ;;  %4800 = vperm.xlu0 %9173, %v4693_v27   ;;  %v3267_v19 = vpop.f32.mrb[16].mxu1 }
 0x2e9   : > { %4805 = vperm.xlu1 %9174, %v4694_v38   ;;  %3338 = vmatmul.mubr.bf16.gmra.mrb[52].mxu1 %v2981_v14  ;;  %v3268_v49 = vadd.f32 %v11601_v15, %v3267_v19  ;;  %v3269_v9 = vpop.f32.mrb[17].mxu1  ;;  %v11843_v14 = vpop.f32.mrb[148].mxu0 }
 0x2ea   : > { %v1559_v59 = vpop.permute.xlu0 %1558  ;;  %v3270_v27 = vpop.f32.mrb[18].mxu1 }
 0x2eb   : > { %v2569_v35 = vpop.permute.xlu1 %2568  ;;  %1656 = vst.msk [vmem:[#allocation2 + $0x330] sm:$0xff] %vm1626_vm10, %v1559_v59  ;;  %v3445_v38 = vadd.f32 %v11423_v56, %v3268_v49  ;;  %v3271_v44 = vadd.f32 %v11601_v15, %v3270_v27  ;;  %v3272_v32 = vpop.f32.mrb[19].mxu1  ;;  %v4698_v56 = vld [vmem:[%s14946_s1 + $0xa8] sm:$0xff] }
 0x2ec   : > { %2659 = vst.msk [vmem:[#allocation2 + $0x320] sm:$0xff] %vm1797_vm11, %v2569_v35  ;;  %4810 = vperm.xlu0 %9173, %v4695_v23   ;;  %v8991_v19 = vpop.f32.mrb[149].mxu0 }
 0x2ed   : > { %4815 = vperm.xlu1 %9174, %v4696_v11   ;;  %v3448_v54 = vadd.f32 %v11433_v39, %v3271_v44  ;;  %v11852_v49 = vpop.f32.mrb[150].mxu0  ;;  %v3563_v35 = vmax.f32 %v3445_v38, 0.0  ;;  %v4699_v39 = vld [vmem:[%s14946_s1 + $0xb0] sm:$0xff] }
 0x2ee   : > { %v2571_v9 = vpop.permute.xlu0 %2570  ;;  %v8992_v23 = vpop.f32.mrb[151].mxu0 }
 0x2ef   : > { %v1732_v59 = vpop.permute.xlu1 %1731  ;;  %2660 = vst.msk [vmem:[#allocation2 + $0x338] sm:$0xff] %vm1797_vm11, %v2571_v9  ;;  %v3564_v11 = vmax.f32 %v3448_v54, 0.0  ;;  %v11856_v27 = vpop.f32.mrb[152].mxu0  ;;  %v4700_v9 = vld [vmem:[%s14946_s1 + $0xb8] sm:$0xff]  ;;  %v4702_v23 = vld [vmem:[%s14946_s1 + $0xc8] sm:$0xff] }
 0x2f0   : > { %1828 = vst.msk [vmem:[#allocation2 + $0x318] sm:$0xff] %vm1797_vm11, %v1732_v59  ;;  %4820 = vperm.xlu0 %9173, %v4697_v47   ;;  %v8995_v44 = vpop.f32.mrb[153].mxu0  ;;  %v4701_v59 = vld [vmem:[%s14946_s1 + $0xc0] sm:$0xff] }
 0x2f1   : > { %4825 = vperm.xlu1 %9174, %v4698_v56   ;;  %v11861_v32 = vpack.c.bf16 %v3564_v11, %v3563_v35  ;;  %v11866_v38 = vpop.f32.mrb[154].mxu0 }
 0x2f2   : > { %v1734_v19 = vpop.permute.xlu0 %1733  ;;  %v8996_v47 = vpop.f32.mrb[155].mxu0 }
 0x2f3   : > { %v2157_v54 = vpop.permute.xlu1 %2156  ;;  %1829 = vst.msk [vmem:[#allocation2 + $0x330] sm:$0xff] %vm1797_vm11, %v1734_v19  ;;  %v11870_v56 = vpop.f32.mrb[156].mxu0  ;;  %v2919_v44 = vld [vmem:[#allocation2 + $0x320] sm:$0xff] }
 0x2f4   : > { %2247 = vst.msk [vmem:[#allocation2 + $0x350] sm:$0xff] %vm1373_vm9, %v2157_v54  ;;  %4830 = vperm.xlu0 %9173, %v4699_v39   ;;  %v8999_v35 = vpop.f32.mrb[157].mxu0  ;;  %v9248_v47 = vld [vmem:[%s9476_s18 + $0x124] sm:$0xff]  }
 0x2f5   : > { %4835 = vperm.xlu1 %9174, %v4700_v9   ;;  %v11878_v19 = vpop.f32.mrb[158].mxu0  ;;  %9022 = vmatmul.mubr.bf16.gmra.mrb[180].mxu0 %v9248_v47  ;;  %v4703_v35 = vld [vmem:[%s14946_s1 + $0xd0] sm:$0xff] }
 0x2f6   : > { %v2159_v11 = vpop.permute.xlu0 %2158  ;;  %v2922_v42 = vld [vmem:[#allocation2 + $0x338] sm:$0xff]  ;;  %v9000_v9 = vpop.f32.mrb[159].mxu0  ;;  %9025 = vmatprep.mubr.msk.bf16.mxu0 %vm9346_vm0, %v15141_v41 }
 0x2f7   : > { %v1310_v54 = vpop.permute.xlu1 %1309  ;;  %2248 = vst.msk [vmem:[#allocation2 + $0x368] sm:$0xff] %vm1373_vm9, %v2159_v11  ;;  %v2985_v39 = vpack.c.bf16 %v2922_v42, %v2919_v44  ;;  %v11883_v28 = vpop.f32.mrb[160].mxu0  ;;  %v4704_v11 = vld [vmem:[%s14946_s1 + $0xd8] sm:$0xff] }
 0x2f8   : > { %1405 = vst.msk [vmem:[#allocation2 + $0x360] sm:$0xff] %vm1373_vm9, %v1310_v54  ;;  %4840 = vperm.xlu0 %9173, %v4701_v59   ;;  %v9003_v12 = vpop.f32.mrb[161].mxu0  ;;  %v2918_v42 = vld [vmem:[#allocation2 + $0x318] sm:$0xff]  ;;  %v4705_v54 = vld [vmem:[%s14946_s1 + $0xe0] sm:$0xff] }
 0x2f9   : > { %4845 = vperm.xlu1 %9174, %v4702_v23   ;;  %3345 = vmatprep.mubr.bf16.mxu1 %v2985_v39  ;;  %v11891_v9 = vpop.f32.mrb[162].mxu0 }
 0x2fa   : > { %v2326_v0 = vpop.permute.xlu0 %2325  ;;  %v2921_v44 = vld [vmem:[#allocation2 + $0x330] sm:$0xff]  ;;  %v9004_v47 = vpop.f32.mrb[163].mxu0 }
 0x2fb   : > { %2414 = vst.msk [vmem:[#allocation2 + $0x350] sm:$0xff] %vm1626_vm10, %v2326_v0  ;;  %v2328_v59 = vpop.permute.xlu1 %2327  ;;  %v2984_v23 = vpack.c.bf16 %v2921_v44, %v2918_v42  ;;  %v11897_v12 = vpop.f32.mrb[164].mxu0  ;;  %v4706_v0 = vld [vmem:[%s14946_s1 + $0xe8] sm:$0xff] }
 0x2fc   : > { %2415 = vst.msk [vmem:[#allocation2 + $0x368] sm:$0xff] %vm1626_vm10, %v2328_v59  ;;  %4850 = vperm.xlu0 %9173, %v4703_v35   ;;  %v9007_v39 = vpop.f32.mrb[165].mxu0  ;;  %v4707_v59 = vld [vmem:[%s14946_s1 + $0xf0] sm:$0xff] }
 0x2fd   : > { %4855 = vperm.xlu1 %9174, %v4704_v11   ;;  %3346 = vmatmul.mubr.bf16.gmra.mrb[56].mxu1 %v2984_v23  ;;  %v11905_v40 = vpop.f32.mrb[166].mxu0 }
 0x2fe   : > { %v1561_v21 = vpop.permute.xlu0 %1560  ;;  %v9008_v35 = vpop.f32.mrb[167].mxu0 }
 0x2ff   : > { %1657 = vst.msk [vmem:[#allocation2 + $0x348] sm:$0xff] %vm1626_vm10, %v1561_v21  ;;  %v1563_v42 = vpop.permute.xlu1 %1562  ;;  %v11909_v11 = vpop.f32.mrb[168].mxu0 }
 0x300   : > { %1658 = vst.msk [vmem:[#allocation2 + $0x360] sm:$0xff] %vm1626_vm10, %v1563_v42  ;;  %4860 = vperm.xlu0 %9173, %v4705_v54   ;;  %v9011_v23 = vpop.f32.mrb[169].mxu0 }
 0x301   : > { %4865 = vperm.xlu1 %9174, %v4706_v0   ;;  %v3275_v44 = vpop.f32.mrb[20].mxu1  ;;  %v11919_v62 = vpop.f32.mrb[170].mxu0 }
 0x302   : > { %v3276_v47 = vadd.f32 %v11601_v15, %v3275_v44  ;;  %v3277_v39 = vpop.f32.mrb[21].mxu1  ;;  %v2573_v61 = vpop.permute.xlu0 %2572 }
 0x303   : > { %2661 = vst.msk [vmem:[#allocation2 + $0x350] sm:$0xff] %vm1797_vm11, %v2573_v61  ;;  %v2575_v21 = vpop.permute.xlu1 %2574  ;;  %v3278_v35 = vpop.f32.mrb[22].mxu1 }
 0x304   : > { %v3453_v42 = vadd.f32 %v11421_v55, %v3276_v47  ;;  %2662 = vst.msk [vmem:[#allocation2 + $0x368] sm:$0xff] %vm1797_vm11, %v2575_v21  ;;  %v3279_v54 = vadd.f32 %v11601_v15, %v3278_v35  ;;  %v3280_v0 = vpop.f32.mrb[23].mxu1  ;;  %4870 = vperm.xlu0 %9173, %v4707_v59   ;;  %v9012_v52 = vpop.f32.mrb[171].mxu0 }
 0x305   : > { %v11922_v39 = vpop.f32.mrb[172].mxu0 }
 0x306   : > { %v3456_v44 = vadd.f32 %v11428_v22, %v3279_v54  ;;  %v1736_v23 = vpop.permute.xlu0 %1735  ;;  %v9015_v31 = vpop.f32.mrb[173].mxu0  ;;  %v3565_v55 = vmax.f32 %v3453_v42, 0.0  ;;  %v9249_v22 = vld [vmem:[%s9476_s18 + $0x12c] sm:$0xff]  }
 0x307   : > { %1830 = vst.msk [vmem:[#allocation2 + $0x348] sm:$0xff] %vm1797_vm11, %v1736_v23  ;;  %v1738_v61 = vpop.permute.xlu1 %1737  ;;  %v11926_v21 = vpop.f32.mrb[174].mxu0  ;;  %9026 = vmatmul.mubr.bf16.gmra.mrb[184].mxu0 %v9249_v22 }
 0x308   : > { %v3566_v47 = vmax.f32 %v3456_v44, 0.0  ;;  %1831 = vst.msk [vmem:[#allocation2 + $0x360] sm:$0xff] %vm1797_vm11, %v1738_v61  ;;  %v9016_v59 = vpop.f32.mrb[175].mxu0  ;;  %9029 = vmatprep.mubr.msk.bf16.mxu0 %vm9346_vm0, %v15141_v41 }
 0x309   : > { %v11930_v51 = vpop.f32.mrb[176].mxu0 }
 0x30a   : > { %v11928_v35 = vpack.c.bf16 %v3566_v47, %v3565_v55  ;;  %v2161_v52 = vpop.permute.xlu0 %2160  ;;  %v2925_v0 = vld [vmem:[#allocation2 + $0x350] sm:$0xff]  ;;  %v9019_v30 = vpop.f32.mrb[177].mxu0 }
 0x30b   : > { %2249 = vst.msk [vmem:[#allocation2 + $0x380] sm:$0xff] %vm1373_vm9, %v2161_v52  ;;  %v2163_v54 = vpop.permute.xlu1 %2162  ;;  %v2928_v23 = vld [vmem:[#allocation2 + $0x368] sm:$0xff] }
 0x30c   : > { %2250 = vst.msk [vmem:[#allocation2 + $0x398] sm:$0xff] %vm1373_vm9, %v2163_v54  ;;  %v2988_v31 = vpack.c.bf16 %v2928_v23, %v2925_v0 }
 0x30e   : > { %3353 = vmatprep.mubr.bf16.mxu1 %v2988_v31  ;;  %v1312_v42 = vpop.permute.xlu0 %1311  ;;  %v2924_v44 = vld [vmem:[#allocation2 + $0x348] sm:$0xff] }
 0x30f   : > { %1406 = vst.msk [vmem:[#allocation2 + $0x378] sm:$0xff] %vm1373_vm9, %v1312_v42  ;;  %v1314_v61 = vpop.permute.xlu1 %1313  ;;  %v2927_v55 = vld [vmem:[#allocation2 + $0x360] sm:$0xff] }
 0x310   : > { %1407 = vst.msk [vmem:[#allocation2 + $0x390] sm:$0xff] %vm1373_vm9, %v1314_v61  ;;  %v2987_v47 = vpack.c.bf16 %v2927_v55, %v2924_v44 }
 0x312   : > { %3354 = vmatmul.mubr.bf16.gmra.mrb[60].mxu1 %v2987_v47  ;;  %v2330_v59 = vpop.permute.xlu0 %2329 }
 0x313   : > { %2416 = vst.msk [vmem:[#allocation2 + $0x380] sm:$0xff] %vm1626_vm10, %v2330_v59  ;;  %v2332_v30 = vpop.permute.xlu1 %2331 }
 0x314   : > { %2417 = vst.msk [vmem:[#allocation2 + $0x398] sm:$0xff] %vm1626_vm10, %v2332_v30 }
 0x316   : > { %v1565_v52 = vpop.permute.xlu0 %1564 }
 0x317   : > { %1659 = vst.msk [vmem:[#allocation2 + $0x378] sm:$0xff] %vm1626_vm10, %v1565_v52  ;;  %v1567_v0 = vpop.permute.xlu1 %1566 }
 0x318   : > { %1660 = vst.msk [vmem:[#allocation2 + $0x390] sm:$0xff] %vm1626_vm10, %v1567_v0 }
 0x319   : > { %v3283_v22 = vpop.f32.mrb[24].mxu1 }
 0x31a   : > { %v3284_v54 = vadd.f32 %v11601_v15, %v3283_v22  ;;  %v3285_v23 = vpop.f32.mrb[25].mxu1  ;;  %v2577_v31 = vpop.permute.xlu0 %2576 }
 0x31b   : > { %2663 = vst.msk [vmem:[#allocation2 + $0x380] sm:$0xff] %vm1797_vm11, %v2577_v31  ;;  %v2579_v42 = vpop.permute.xlu1 %2578  ;;  %v3286_v44 = vpop.f32.mrb[26].mxu1 }
 0x31c   : > { %v3461_v61 = vadd.f32 %v11457_v1, %v3284_v54  ;;  %2664 = vst.msk [vmem:[#allocation2 + $0x398] sm:$0xff] %vm1797_vm11, %v2579_v42  ;;  %v3287_v55 = vadd.f32 %v11601_v15, %v3286_v44  ;;  %v3288_v47 = vpop.f32.mrb[27].mxu1 }
 0x31e   : > { %v3464_v59 = vadd.f32 %v11465_v29, %v3287_v55  ;;  %v1740_v30 = vpop.permute.xlu0 %1739  ;;  %v3567_v0 = vmax.f32 %v3461_v61, 0.0 }
 0x31f   : > { %1832 = vst.msk [vmem:[#allocation2 + $0x378] sm:$0xff] %vm1797_vm11, %v1740_v30  ;;  %v1742_v52 = vpop.permute.xlu1 %1741 }
 0x320   : > { %v3568_v22 = vmax.f32 %v3464_v59, 0.0  ;;  %1833 = vst.msk [vmem:[#allocation2 + $0x390] sm:$0xff] %vm1797_vm11, %v1742_v52  ;;  %v9250_v52 = vld [vmem:[%s9476_s18 + $0x134] sm:$0xff]  }
 0x321   : > { %9030 = vmatmul.mubr.bf16.gmra.mrb[188].mxu0 %v9250_v52  ;;  %v2935_v52 = vld [vmem:[#allocation2 + $0x3a0] sm:$0xff] }
 0x322   : > { %v11951_v23 = vpack.c.bf16 %v3568_v22, %v3567_v0  ;;  %v2165_v31 = vpop.permute.xlu0 %2164  ;;  %v2931_v10 = vld [vmem:[#allocation2 + $0x380] sm:$0xff]  ;;  %9033 = vmatprep.mubr.msk.bf16.mxu0 %vm9346_vm0, %v15141_v41 }
 0x323   : > { %2251 = vst.msk [vmem:[#allocation2 + $0x3b0] sm:$0xff] %vm1373_vm9, %v2165_v31  ;;  %v2167_v1 = vpop.permute.xlu1 %2166  ;;  %v2934_v54 = vld [vmem:[#allocation2 + $0x398] sm:$0xff] }
 0x324   : > { %2252 = vst.msk [vmem:[#allocation2 + $0x3c8] sm:$0xff] %vm1373_vm9, %v2167_v1  ;;  %v2991_v29 = vpack.c.bf16 %v2934_v54, %v2931_v10 }
 0x326   : > { %3361 = vmatprep.mubr.bf16.mxu1 %v2991_v29  ;;  %v1316_v42 = vpop.permute.xlu0 %1315  ;;  %v2930_v44 = vld [vmem:[#allocation2 + $0x378] sm:$0xff] }
 0x327   : > { %1408 = vst.msk [vmem:[#allocation2 + $0x3a8] sm:$0xff] %vm1373_vm9, %v1316_v42  ;;  %v1318_v61 = vpop.permute.xlu1 %1317  ;;  %v2933_v55 = vld [vmem:[#allocation2 + $0x390] sm:$0xff] }
 0x328   : > { %1409 = vst.msk [vmem:[#allocation2 + $0x3c0] sm:$0xff] %vm1373_vm9, %v1318_v61  ;;  %v2990_v47 = vpack.c.bf16 %v2933_v55, %v2930_v44 }
 0x32a   : > { %3362 = vmatmul.mubr.bf16.gmra.mrb[64].mxu1 %v2990_v47  ;;  %v2334_v59 = vpop.permute.xlu0 %2333  ;;  %v11972_v47 = vld [vmem:[%s14948_s3] ss:$0 sm:$0xff] }
 0x32b   : > { %2418 = vst.msk [vmem:[#allocation2 + $0x3b0] sm:$0xff] %vm1626_vm10, %v2334_v59  ;;  %v2336_v30 = vpop.permute.xlu1 %2335 }
 0x32c   : > { %2419 = vst.msk [vmem:[#allocation2 + $0x3c8] sm:$0xff] %vm1626_vm10, %v2336_v30 }
 0x32e   : > { %v1569_v0 = vpop.permute.xlu0 %1568 }
 0x32f   : > { %1661 = vst.msk [vmem:[#allocation2 + $0x3a8] sm:$0xff] %vm1626_vm10, %v1569_v0  ;;  %v1571_v10 = vpop.permute.xlu1 %1570 }
 0x330   : > { %1662 = vst.msk [vmem:[#allocation2 + $0x3c0] sm:$0xff] %vm1626_vm10, %v1571_v10 }
 0x331   : > { %v3291_v22 = vpop.f32.mrb[28].mxu1 }
 0x332   : > { %v3292_v31 = vadd.f32 %v11601_v15, %v3291_v22  ;;  %v3293_v1 = vpop.f32.mrb[29].mxu1  ;;  %v2581_v54 = vpop.permute.xlu0 %2580 }
 0x333   : > { %2665 = vst.msk [vmem:[#allocation2 + $0x3b0] sm:$0xff] %vm1797_vm11, %v2581_v54  ;;  %v2583_v29 = vpop.permute.xlu1 %2582  ;;  %v3294_v42 = vpop.f32.mrb[30].mxu1  ;;  %v11985_v1 = vadd.f32 %v11972_v47, %v11712_v34  ;;  %v12005_v34 = vadd.f32 %v11972_v47, %v11767_v53 }
 0x334   : > { %v3469_v44 = vadd.f32 %v11455_v63, %v3292_v31  ;;  %2667 = vst.msk [vmem:[#allocation2 + $0x3c8] sm:$0x7f] %vm2666_vm13, %v2583_v29  ;;  %v3295_v61 = vadd.f32 %v11601_v15, %v3294_v42  ;;  %v3296_v55 = vpop.f32.mrb[31].mxu1  ;;  %v11979_v63 = vadd.f32 %v11972_v47, %v11706_v5  ;;  %v2932_v15 = vld [vmem:[#allocation2 + $0x388] sm:$0xff]  ;;  %v11981_v31 = vld [vmem:[#allocation2 + $0x3b8] sm:$0xff]  ;;  %v11997_v5 = vadd.f32 %v11972_v47, %v11728_v3 }
 0x335   : > { %v2992_v54 = vpack.c.bf16 %v2935_v52, %v2932_v15  ;;  %v2995_v29 = vpack.c.bf16 %v11179_v58, %v11981_v31  ;;  %v12009_v55 = vadd.f32 %v11972_v47, %v11776_v16  ;;  %v12017_v3 = vadd.f32 %v11972_v47, %v11790_v36 }
 0x336   : > { %v3472_v59 = vadd.f32 %v11460_v8, %v3295_v61  ;;  %v1744_v30 = vpop.permute.xlu0 %1743  ;;  %v3569_v10 = vmax.f32 %v3469_v44, 0.0  ;;  %v11989_v8 = vadd.f32 %v11972_v47, %v11718_v33  ;;  %v12001_v61 = vadd.f32 %v11972_v47, %v11746_v60 }
 0x337   : > { %1834 = vst.msk [vmem:[#allocation2 + $0x3a8] sm:$0xff] %vm1797_vm11, %v1744_v30  ;;  %v1746_v0 = vpop.permute.xlu1 %1745  ;;  %v12021_v60 = vadd.f32 %v11972_v47, %v11794_v50  ;;  %v4636_v30 = vmax.f32 %v11979_v63, 0.0  ;;  %v12027_v16 = vadd.f32 %v11972_v47, %v11802_v45  ;;  %v12036_v52 = vadd.f32 %v11972_v47, %v11814_v57 }
 0x338   : > { %v3570_v22 = vmax.f32 %v3472_v59, 0.0  ;;  %1835 = vst.msk [vmem:[#allocation2 + $0x3c0] sm:$0xff] %vm1797_vm11, %v1746_v0  ;;  %v12013_v59 = vadd.f32 %v11972_v47, %v11780_v25  ;;  %v12031_v25 = vadd.f32 %v11972_v47, %v11806_v43  ;;  %v12040_v50 = vadd.f32 %v11972_v47, %v11818_v24 }
 0x339   : > { %v12044_v0 = vadd.f32 %v11972_v47, %v11826_v4  ;;  %v4639_v43 = vmax.f32 %v11997_v5, 0.0  ;;  %v12059_v36 = vadd.f32 %v11972_v47, %v11830_v6  ;;  %v12066_v4 = vadd.f32 %v11972_v47, %v11843_v14 }
 0x33a   : > { %v11993_v42 = vpack.c.bf16 %v3570_v22, %v3569_v10  ;;  %v2937_v44 = vld [vmem:[#allocation2 + $0x3b0] sm:$0xff]  ;;  %v4638_v10 = vmax.f32 %v11989_v8, 0.0  ;;  %v4640_v22 = vmax.f32 %v12001_v61, 0.0  ;;  %v12078_v6 = vadd.f32 %v11972_v47, %v11866_v38 }
 0x33b   : > { %v2940_v33 = vld [vmem:[#allocation2 + $0x3c8] sm:$0xff]  ;;  %v12082_v24 = vadd.f32 %v11972_v47, %v11870_v56  ;;  %v12087_v14 = vadd.f32 %v11972_v47, %v11878_v19  ;;  %v12099_v38 = vadd.f32 %v11972_v47, %v11897_v12  ;;  %v12108_v19 = vadd.f32 %v11972_v47, %v11909_v11  ;;  %v9251_v11 = vld [vmem:[%s9476_s18 + $0x13c] sm:$0xff]  }
 0x33c   : > { %4965 = vst [vmem:[#allocation2 + $0x3c8] sm:$0xc0] %v15141_v41  ;;  %v2994_v53 = vpack.c.bf16 %v2940_v33, %v2937_v44  ;;  %v12117_v12 = vadd.f32 %v11972_v47, %v11922_v39  ;;  %9034 = vmatmul.mubr.bf16.gmra.mrb[192].mxu0 %v9251_v11  ;;  %v15245_v33 = vmov 0  }
 0x33d   : > { %15231 = vst [vmem:[#allocation29_spill] sm:$0xff] %v12108_v19  ;;  %9037 = vmatprep.mubr.msk.bf16.mxu0 %vm9346_vm0, %v15141_v41 }
 0x33e   : > { %3369 = vmatprep.mubr.bf16.mxu1 %v2994_v53  ;;  %v2936_v45 = vld [vmem:[#allocation2 + $0x3a8] sm:$0xff]  ;;  %15233 = vst [vmem:[#allocation32_spill] sm:$0xff] %v12117_v12  ;;  %v15250_v12 = vmax.f32 %v12013_v59, 0.0 }
 0x33f   : > { %v2939_v57 = vld [vmem:[#allocation2 + $0x3c0] sm:$0xff] }
 0x340   : > { %4964 = vst [vmem:[#allocation2 + $0x3c0] sm:$0xc0] %v15141_v41  ;;  %v2993_v53 = vpack.c.bf16 %v2939_v57, %v2936_v45  ;;  %v12070_v45 = vadd.f32 %v11972_v47, %v11852_v49  ;;  %v12074_v57 = vadd.f32 %v11972_v47, %v11856_v27  ;;  %v12091_v49 = vadd.f32 %v11972_v47, %v11883_v28 }
 0x341   : > { %v12095_v27 = vadd.f32 %v11972_v47, %v11891_v9  ;;  %v12112_v28 = vadd.f32 %v11972_v47, %v11919_v62  ;;  %v9247_v62 = vld [vmem:[%s14951_s6 + $0x8] sm:$0xff]   ;;  %v12156_v9 = vld [vmem:[%s14950_s5] ss:$0 sm:$0xff] }
 0x342   : > { %3370 = vmatmul.mubr.bf16.gmra.mrb[68].mxu1 %v2993_v53  ;;  %v12121_v53 = vadd.f32 %v11972_v47, %v11926_v21 }
 0x343   : > { %8897 = vmatprep.mubr.msk.bf16.mxu1 %vm1079_vm1, %v2992_v54  ;;  %v12104_v54 = vadd.f32 %v11972_v47, %v11905_v40  ;;  %15232 = vst [vmem:[#allocation30_spill] sm:$0xff] %v12112_v28  ;;  %v12125_v40 = vadd.f32 %v11972_v47, %v11930_v51 }
 0x344   : > { %15234 = vst [vmem:[#allocation34_spill] sm:$0xff] %v12121_v53 }
 0x345   : > { %15235 = vst [vmem:[#allocation33_spill] sm:$0xff] %v12125_v40 }
 0x347   : > { %v4731_v15 = vpop.permute.xlu0 %4730 }
 0x348   : > { %v12136_v51 = vmul.f32 %v4731_v15, %v4638_v10  ;;  %v4736_v47 = vpop.permute.xlu1 %4735 }
 0x349   : > { %v12146_v21 = vmul.f32 %v4736_v47, %v4639_v43  ;;  %v3299_v8 = vpop.f32.mrb[32].mxu1 }
 0x34a   : > { %15236 = vst [vmem:[#allocation35_spill] sm:$0xff] %v12136_v51  ;;  %4969 = vst.msk [vmem:[#allocation2 + $0xa8] sm:$0xff] %vm1079_vm1, %v12136_v51  ;;  %v3300_v39 = vadd.f32 %v12156_v9, %v3299_v8  ;;  %8898 = vmatmul.mubr.msk.bf16.vlgmr.msra.gmra.mrb[72].mxu1 %vm1079_vm1, %v2995_v29  ;;  %v3301_v41 = vpop.f32.mrb[33].mxu1  ;;  %v5052_v43 = vrot.slane %v12136_v51, 1  ;;  %v15015_v47 = vrot.slane %v12136_v51, 2  ;;  %v15014_v15 = vrot.slane %v12136_v51, 4 }
 0x34b   : > { %15237 = vst [vmem:[#allocation36_spill] sm:$0xff] %v12146_v21  ;;  %4970 = vst.msk [vmem:[#allocation2 + $0xc0] sm:$0xff] %vm1079_vm1, %v12146_v21  ;;  %8902 = vmatpush3.bf16.msra.mxu1 %v11751_v18  ;;  %8905 = vmatprep.mubr.msk.bf16.mxu1 %vm1079_vm1, %v11624_v17  ;;  %v3302_v11 = vpop.f32.mrb[34].mxu1  ;;  %v4741_v8 = vpop.permute.xlu0 %4740  ;;  %v5885_v58 = vrot.slane %v12146_v21, 4  ;;  %v5303_v31 = vrot.slane %v12146_v21, 2  ;;  %v5054_v17 = vrot.slane %v12146_v21, 1 }
 0x34c   : > { %v3477_v29 = vadd.f32 %v11489_v13, %v3300_v39  ;;  %v3303_v41 = vadd.f32 %v12156_v9, %v3302_v11  ;;  %v12177_v10 = vmul.f32 %v4741_v8, %v4640_v22  ;;  %v4721_v18 = vpop.permute.xlu1 %4720  ;;  %v3304_v44 = vpop.f32.mrb[35].mxu1  ;;  %8903 = vmatprep.subr.bf16.mxu1 %v9247_v62  ;;  %v15252_v59 = vrot.slane %v12136_v51, 2 }
 0x34d   : > { %v12182_v5 = vmul.f32 %v4721_v18, %v4636_v30  ;;  %v12187_v56 = vsel %vm2008_vm5, %v15014_v15, %v5885_v58  ;;  %v12192_v13 = vsel %vm1416_vm4, %v15015_v47, %v5303_v31  ;;  %v12222_v40 = vsel %vm1163_vm3, %v5052_v43, %v5054_v17 }
 0x34e   : > { %15238 = vst [vmem:[#allocation37_spill] sm:$0xff] %v12177_v10  ;;  %15240 = vst [vmem:[#allocation40_spill] sm:$0xff] %v12187_v56  ;;  %v3571_v61 = vmax.f32 %v3477_v29, 0.0  ;;  %v3480_v22 = vadd.f32 %v11497_v37, %v3303_v41  ;;  %v6541_v44 = vrot.slane %v12177_v10, 6  ;;  %v5887_v63 = vrot.slane %v12177_v10, 4 }
 0x34f   : > { %15239 = vst [vmem:[#allocation38_spill] sm:$0xff] %v12182_v5  ;;  %4971 = vst.msk [vmem:[#allocation2 + $0xd8] sm:$0xff] %vm1079_vm1, %v12177_v10  ;;  %8904 = vmatpush3.bf16.msra.mxu1 %v9247_v62  ;;  %v4726_v30 = vpop.permute.xlu0 %4725  ;;  %v12203_v11 = vrot.slane %v12182_v5, 2  ;;  %v5305_v8 = vrot.slane %v12177_v10, 2  ;;  %v15242_v29 = vmax.f32 %v11985_v1, 0.0  ;;  %v15246_v62 = vmax.f32 %v12005_v34, 0.0 }
 0x350   : > { %4967 = vst.msk [vmem:[#allocation2 + $0x78] sm:$0xff] %vm1079_vm1, %v12182_v5  ;;  %v3572_v37 = vmax.f32 %v3480_v22, 0.0  ;;  %v4746_v18 = vpop.permute.xlu1 %4745  ;;  %v12211_v15 = vsel %vm2008_vm5, %v5885_v58, %v5887_v63  ;;  %7064 = vmatprep.subr.bf16.mxu1 %v15245_v33  ;;  %v15022_v1 = vrot.slane %v12177_v10, 1 }
 0x351   : > { %15241 = vst [vmem:[#allocation39_spill] sm:$0xff] %v12203_v11  ;;  %v12208_v41 = vmul.f32 %v4726_v30, %v15242_v29  ;;  %15244 = vst [vmem:[#allocation41_spill] sm:$0xff] %v12211_v15  ;;  %v12216_v47 = vmul.f32 %v4746_v18, %v15246_v62  ;;  %v12219_v39 = vsel %vm1416_vm4, %v5303_v31, %v5305_v8  ;;  %v15247_v29 = vmax.f32 %v12009_v55, 0.0 }
 0x352   : > { %v12225_v22 = vpack.c.bf16 %v3572_v37, %v3571_v61  ;;  %8906 = vmatmul.mubr.msk.bf16.vlgmr.msra.gmra.mrb[76].mxu1 %vm1079_vm1, %v11666_v20  ;;  %v12241_v30 = vsel %vm1163_vm3, %v5054_v17, %v15022_v1 }
 0x353   : > { %15243 = vst [vmem:[#allocation43_spill] sm:$0xff] %v12208_v41  ;;  %4968 = vst.msk [vmem:[#allocation2 + $0x90] sm:$0xff] %vm1079_vm1, %v12208_v41  ;;  %v5050_v34 = vrot.slane %v12208_v41, 1  ;;  %v5299_v58 = vrot.slane %v12208_v41, 2  ;;  %v6543_v31 = vrot.slane %v12216_v47, 6  ;;  %8909 = vmatprep.mubr.msk.bf16.mxu1 %vm1079_vm1, %v11710_v7  ;;  %v4751_v61 = vpop.permute.xlu0 %4750  ;;  %v5889_v20 = vrot.slane %v12216_v47, 4 }
 0x354   : > { %4972 = vst.msk [vmem:[#allocation2 + $0xf0] sm:$0xff] %vm1079_vm1, %v12216_v47  ;;  %v12247_v18 = vmul.f32 %v4751_v61, %v15247_v29  ;;  %v4756_v62 = vpop.permute.xlu1 %4755  ;;  %v15249_v41 = vrot.slane %v12182_v5, 1 }
 0x355   : > { %v6544_v7 = vsel %vm2668_vm2, %v6541_v44, %v6543_v31  ;;  %v12255_v28 = vmul.f32 %v4756_v62, %v15250_v12  ;;  %v5053_v17 = vsel %vm1163_vm3, %v5050_v34, %v5052_v43  ;;  %v12261_v55 = vsel %vm1416_vm4, %v12203_v11, %v5299_v58 }
 0x356   : > { %15248 = vst [vmem:[#allocation42_spill] sm:$0xff] %v12247_v18  ;;  %v5051_v53 = vsel %vm1163_vm3, %v15249_v41, %v5050_v34  ;;  %15251 = vst [vmem:[#allocation44_spill] sm:$0xff] %v12261_v55  ;;  %v6545_v61 = vrot.slane %v12247_v18, 6  ;;  %5134 = vrot.lane.b32.xlu0 %v5053_v17, %s9348_s19  ;;  %v12271_v12 = vsel %vm1416_vm4, %v5299_v58, %v15252_v59  ;;  %v5891_v43 = vrot.slane %v12247_v18, 4 }
 0x357   : > { %5132 = vrot.lane.b32.xlu1 %v5051_v53, %s9348_s19  ;;  %6661 = vst.msk [vmem:[#allocation2 + $0x88] sm:$0xff] %vm1079_vm1, %v6544_v7  ;;  %4973 = vst.msk [vmem:[#allocation2 + $0x108] sm:$0xff] %vm1079_vm1, %v12247_v18  ;;  %v12274_v53 = vsel %vm2008_vm5, %v5887_v63, %v5889_v20  ;;  %v6547_v44 = vrot.slane %v12255_v28, 6  ;;  %v4761_v41 = vpop.permute.xlu0 %4760  ;;  %v6298_v34 = vrot.slane %v12216_v47, 5  ;;  %v6300_v29 = vrot.slane %v12247_v18, 5 }
 0x358   : > { %15253 = vst [vmem:[#allocation45_spill] sm:$0xff] %v12271_v12  ;;  %4974 = vst.msk [vmem:[#allocation2 + $0x120] sm:$0xff] %vm1079_vm1, %v12255_v28  ;;  %v5307_v62 = vrot.slane %v12216_v47, 2  ;;  %v6546_v58 = vsel %vm2668_vm2, %v6543_v31, %v6545_v61  ;;  %v15254_v7 = vmax.f32 %v12017_v3, 0.0  ;;  %v4766_v17 = vpop.permute.xlu1 %4765  ;;  %v12289_v59 = vsel %vm2008_vm5, %v5889_v20, %v5891_v43 }
 0x359   : > { %v5309_v1 = vrot.slane %v12247_v18, 2  ;;  %6662 = vst.msk [vmem:[#allocation2 + $0xa0] sm:$0xff] %vm1079_vm1, %v6546_v58  ;;  %v6548_v37 = vsel %vm2668_vm2, %v6545_v61, %v6547_v44  ;;  %v15255_v11 = vmax.f32 %v12021_v60, 0.0  ;;  %v15256_v3 = vrot.slane %v12177_v10, 5 }
 0x35a   : > { %v12286_v63 = vmul.f32 %v4761_v41, %v15254_v7  ;;  %v12306_v20 = vsel %vm2420_vm6, %v6298_v34, %v6300_v29  ;;  %6663 = vst.msk [vmem:[#allocation2 + $0xb8] sm:$0xff] %vm1079_vm1, %v6548_v37  ;;  %5383 = vrot.lane.b32.xlu0 %v12271_v12, %s9349_s22  ;;  %8910 = vmatmul.mubr.msk.bf16.gmra.mrb[80].mxu1 %vm1079_vm1, %v11785_v26  ;;  %v5058_v61 = vrot.slane %v12216_v47, 1  ;;  %v5060_v58 = vrot.slane %v12247_v18, 1 }
 0x35b   : > { %v12296_v5 = vmul.f32 %v4766_v17, %v15255_v11  ;;  %5381 = vrot.lane.b32.xlu1 %v12261_v55, %s9349_s22  ;;  %v12303_v31 = vsel %vm2420_vm6, %v15256_v3, %v6298_v34  ;;  %v12317_v60 = vsel %vm1416_vm4, %v5305_v8, %v5307_v62  ;;  %v12320_v11 = vsel %vm1416_vm4, %v5307_v62, %v5309_v1  ;;  %v4771_v34 = vpop.permute.xlu0 %4770 }
 0x35c   : > { %v6549_v41 = vrot.slane %v12286_v63, 6  ;;  %4975 = vst.msk [vmem:[#allocation2 + $0x138] sm:$0xff] %vm1079_vm1, %v12286_v63  ;;  %8913 = vmatprep.mubr.msk.bf16.mxu1 %vm1079_vm1, %v11861_v32  ;;  %v5893_v26 = vrot.slane %v12255_v28, 4  ;;  %v15257_v7 = vmax.f32 %v12027_v16, 0.0  ;;  %v4776_v3 = vpop.permute.xlu1 %4775  ;;  %v15258_v12 = vrot.slane %v12177_v10, 1 }
 0x35d   : > { %v6551_v37 = vrot.slane %v12296_v5, 6  ;;  %4976 = vst.msk [vmem:[#allocation2 + $0x150] sm:$0xff] %vm1079_vm1, %v12296_v5  ;;  %v6302_v32 = vrot.slane %v12255_v28, 5  ;;  %v15259_v8 = vmax.f32 %v12031_v25, 0.0  ;;  %v12351_v16 = vsel %vm1163_vm3, %v5058_v61, %v5060_v58 }
 0x35e   : > { %v6550_v62 = vsel %vm2668_vm2, %v6547_v44, %v6549_v41  ;;  %v12334_v17 = vmul.f32 %v4771_v34, %v15257_v7  ;;  %v12339_v55 = vsel %vm1163_vm3, %v15258_v12, %v5058_v61  ;;  %v12354_v44 = vsel %vm2008_vm5, %v5891_v43, %v5893_v26  ;;  %5969 = vrot.lane.b32.xlu0 %v12211_v15, %s9348_s19 }
 0x35f   : > { %6664 = vst.msk [vmem:[#allocation2 + $0xd0] sm:$0xff] %vm1079_vm1, %v6550_v62  ;;  %v6552_v18 = vsel %vm2668_vm2, %v6549_v41, %v6551_v37  ;;  %v12346_v19 = vmul.f32 %v4776_v3, %v15259_v8  ;;  %5967 = vrot.lane.b32.xlu1 %v12187_v56, %s9348_s19  ;;  %15260 = vst [vmem:[#allocation47_spill] sm:$0xff] %v12354_v44  ;;  %v15261_v25 = vrot.slane %v12286_v63, 4  ;;  %v6304_v43 = vrot.slane %v12286_v63, 5  ;;  %v4781_v34 = vpop.permute.xlu0 %4780 }
 0x360   : > { %6665 = vst.msk [vmem:[#allocation2 + $0xe8] sm:$0xff] %vm1079_vm1, %v6552_v18  ;;  %v6553_v12 = vrot.slane %v12334_v17, 6  ;;  %4977 = vst.msk [vmem:[#allocation2 + $0x168] sm:$0xff] %vm1079_vm1, %v12334_v17  ;;  %v12368_v61 = vsel %vm2420_vm6, %v6300_v29, %v6302_v32  ;;  %v5311_v8 = vrot.slane %v12255_v28, 2  ;;  %v5062_v7 = vrot.slane %v12255_v28, 1 }
 0x361   : > { %v12365_v41 = vsel %vm2008_vm5, %v5893_v26, %v15261_v25  ;;  %15263 = vst [vmem:[#allocation50_spill] sm:$0xff] %v12368_v61  ;;  %v6555_v18 = vrot.slane %v12346_v19, 6  ;;  %4978 = vst.msk [vmem:[#allocation2 + $0x180] sm:$0xff] %vm1079_vm1, %v12346_v19  ;;  %v15264_v29 = vmax.f32 %v12036_v52, 0.0  ;;  %v4786_v25 = vpop.permute.xlu1 %4785  ;;  %v12383_v15 = vsel %vm2420_vm6, %v6302_v32, %v6304_v43  ;;  %v3307_v44 = vpop.f32.mrb[36].mxu1 }
 0x362   : > { %15262 = vst [vmem:[#allocation46_spill] sm:$0xff] %v12365_v41  ;;  %v6554_v26 = vsel %vm2668_vm2, %v6551_v37, %v6553_v12  ;;  %v15036_v56 = vrot.slane %v12286_v63, 1  ;;  %v15265_v62 = vmax.f32 %v12040_v50, 0.0  ;;  %v12395_v52 = vsel %vm1416_vm4, %v5309_v1, %v5311_v8  ;;  %5555 = vrot.lane.b32.xlu0 %v12219_v39, %s9350_s20  ;;  %8914 = vmatmul.mubr.msk.bf16.gmra.mrb[84].mxu1 %vm1079_vm1, %v11928_v35  ;;  %v3309_v1 = vpop.f32.mrb[37].mxu1 }
 0x363   : > { %v12380_v3 = vmul.f32 %v4781_v34, %v15264_v29  ;;  %6666 = vst.msk [vmem:[#allocation2 + $0x100] sm:$0xff] %vm1079_vm1, %v6554_v26  ;;  %v6556_v61 = vsel %vm2668_vm2, %v6553_v12, %v6555_v18  ;;  %5553 = vrot.lane.b32.xlu1 %v12192_v13, %s9350_s20  ;;  %v15266_v37 = vrot.slane %v12286_v63, 2  ;;  %v9252_v34 = vld [vmem:[%s9476_s18 + $0x144] ss:$0 sps:$4 sm:$0x33]   ;;  %v3308_v50 = vadd.f32 %v12156_v9, %v3307_v44  ;;  %v3310_v44 = vpop.f32.mrb[38].mxu1  ;;  %v4791_v26 = vpop.permute.xlu0 %4790 }
 0x364   : > { %v12390_v41 = vmul.f32 %v4786_v25, %v15265_v62  ;;  %6667 = vst.msk [vmem:[#allocation2 + $0x118] sm:$0xff] %vm1079_vm1, %v6556_v61  ;;  %v12418_v61 = vsel %vm1163_vm3, %v5062_v7, %v15036_v56  ;;  %8917 = vmatprep.mubr.msk.bf16.mxu1 %vm1079_vm1, %v11951_v23  ;;  %v5897_v35 = vrot.slane %v12296_v5, 4  ;;  %v6306_v29 = vrot.slane %v12296_v5, 5  ;;  %9038 = vmatmul.mubr.bf16.gmra.mrb[196].mxu0 %v9252_v34 }
 0x365   : > { %v12400_v32 = vsel %vm1416_vm4, %v5311_v8, %v15266_v37  ;;  %v6557_v12 = vrot.slane %v12380_v3, 6  ;;  %4979 = vst.msk [vmem:[#allocation2 + $0x198] sm:$0xff] %vm1079_vm1, %v12380_v3  ;;  %v12413_v8 = vsel %vm1163_vm3, %v5060_v58, %v5062_v7  ;;  %15269 = vst [vmem:[#allocation55_spill] sm:$0xff] %v12418_v61  ;;  %v3485_v25 = vadd.f32 %v11487_v48, %v3308_v50  ;;  %v4796_v23 = vpop.permute.xlu1 %4795  ;;  %v3312_v61 = vpop.f32.mrb[39].mxu1 }
 0x366   : > { %15267 = vst [vmem:[#allocation48_spill] sm:$0xff] %v12400_v32  ;;  %15268 = vst [vmem:[#allocation51_spill] sm:$0xff] %v12413_v8  ;;  %v6559_v62 = vrot.slane %v12390_v41, 6  ;;  %v3311_v37 = vadd.f32 %v12156_v9, %v3310_v44  ;;  %v15270_v1 = vmax.f32 %v12044_v0, 0.0  ;;  %v15271_v58 = vmax.f32 %v12059_v36, 0.0  ;;  %5138 = vrot.lane.b32.xlu0 %v12241_v30, %s9348_s19 }
 0x367   : > { %4980 = vst.msk [vmem:[#allocation2 + $0x1b0] sm:$0xff] %vm1079_vm1, %v12390_v41  ;;  %v6558_v7 = vsel %vm2668_vm2, %v6555_v18, %v6557_v12  ;;  %5136 = vrot.lane.b32.xlu1 %v12222_v40, %s9348_s19  ;;  %v15272_v48 = vrot.slane %v12286_v63, 4  ;;  %v15273_v0 = vrot.slane %v12334_v17, 4  ;;  %v12461_v40 = vsel %vm2420_vm6, %v6304_v43, %v6306_v29 }
 0x368   : > { %v12433_v56 = vmul.f32 %v4791_v26, %v15270_v1  ;;  %6668 = vst.msk [vmem:[#allocation2 + $0x130] sm:$0xff] %vm1079_vm1, %v6558_v7  ;;  %v6560_v8 = vsel %vm2668_vm2, %v6557_v12, %v6559_v62  ;;  %v12439_v32 = vmul.f32 %v4796_v23, %v15271_v58  ;;  %v3573_v12 = vmax.f32 %v3485_v25, 0.0 }
 0x369   : > { %v12446_v18 = vsel %vm2008_vm5, %v15272_v48, %v5897_v35  ;;  %v12451_v34 = vsel %vm2008_vm5, %v5897_v35, %v15273_v0  ;;  %6669 = vst.msk [vmem:[#allocation2 + $0x148] sm:$0xff] %vm1079_vm1, %v6560_v8  ;;  %v3488_v36 = vadd.f32 %v11492_v46, %v3311_v37  ;;  %v4801_v8 = vpop.permute.xlu0 %4800  ;;  %v6308_v44 = vrot.slane %v12334_v17, 5  ;;  %v4806_v43 = vpop.permute.xlu1 %4805 }
 0x36a   : > { %v6561_v50 = vrot.slane %v12433_v56, 6  ;;  %4981 = vst.msk [vmem:[#allocation2 + $0x1c8] sm:$0xff] %vm1079_vm1, %v12433_v56  ;;  %v6563_v61 = vrot.slane %v12439_v32, 6  ;;  %4982 = vst.msk [vmem:[#allocation2 + $0x1e0] sm:$0xff] %vm1079_vm1, %v12439_v32  ;;  %v5315_v46 = vrot.slane %v12296_v5, 2  ;;  %v15039_v26 = vrot.slane %v12334_v17, 2  ;;  %5387 = vrot.lane.b32.xlu0 %v12219_v39, %s9349_s22  ;;  %8918 = vmatmul.mubr.msk.bf16.gmra.mrb[88].mxu1 %vm1079_vm1, %v11993_v42 }
 0x36b   : > { %v3574_v35 = vmax.f32 %v3488_v36, 0.0  ;;  %v15274_v30 = vmax.f32 %v12066_v4, 0.0  ;;  %v5066_v25 = vrot.slane %v12296_v5, 1  ;;  %v15275_v1 = vmax.f32 %v12070_v45, 0.0  ;;  %5385 = vrot.lane.b32.xlu1 %v12192_v13, %s9349_s22  ;;  %8921 = vmatprep.mubr.msk.bf16.mxu1 %vm1079_vm1, %v12225_v22 }
 0x36c   : > { %v6562_v58 = vsel %vm2668_vm2, %v6559_v62, %v6561_v50  ;;  %v6564_v37 = vsel %vm2668_vm2, %v6561_v50, %v6563_v61  ;;  %v12484_v62 = vsel %vm2420_vm6, %v6306_v29, %v6308_v44  ;;  %v15276_v4 = vrot.slane %v12286_v63, 2 }
 0x36d   : > { %v12472_v7 = vmul.f32 %v4801_v8, %v15274_v30  ;;  %6670 = vst.msk [vmem:[#allocation2 + $0x160] sm:$0xff] %vm1079_vm1, %v6562_v58  ;;  %v12479_v23 = vmul.f32 %v4806_v43, %v15275_v1  ;;  %v3600_v0 = vpack.c.bf16 %v3574_v35, %v3573_v12  ;;  %6671 = vst.msk [vmem:[#allocation2 + $0x178] sm:$0xff] %vm1079_vm1, %v6564_v37  ;;  %v15277_v13 = vrot.slane %v12286_v63, 1  ;;  %v4811_v39 = vpop.permute.xlu0 %4810  ;;  %v4816_v30 = vpop.permute.xlu1 %4815 }
 0x36e   : > { %v12489_v48 = vsel %vm1416_vm4, %v15276_v4, %v5315_v46  ;;  %v12502_v45 = vsel %vm1416_vm4, %v5315_v46, %v15039_v26  ;;  %v15038_v42 = vrot.slane %v12334_v17, 1  ;;  %v5901_v50 = vrot.slane %v12346_v19, 4  ;;  %6137 = vrot.lane.b32.xlu0 %v12289_v59, %s9349_s22 }
 0x36f   : > { %v6565_v36 = vrot.slane %v12472_v7, 6  ;;  %4983 = vst.msk [vmem:[#allocation2 + $0x1f8] sm:$0xff] %vm1079_vm1, %v12472_v7  ;;  %v12507_v29 = vsel %vm1163_vm3, %v15277_v13, %v5066_v25  ;;  %v6567_v12 = vrot.slane %v12479_v23, 6  ;;  %4984 = vst.msk [vmem:[#allocation2 + $0x210] sm:$0xff] %vm1079_vm1, %v12479_v23  ;;  %v5903_v8 = vrot.slane %v12380_v3, 4  ;;  %6135 = vrot.lane.b32.xlu1 %v12274_v53, %s9349_s22 }
 0x370   : > { %v15278_v35 = vmax.f32 %v12074_v57, 0.0  ;;  %v6310_v43 = vrot.slane %v12346_v19, 5  ;;  %v6312_v37 = vrot.slane %v12380_v3, 5  ;;  %v15279_v1 = vmax.f32 %v12078_v6, 0.0 }
 0x371   : > { %v6566_v46 = vsel %vm2668_vm2, %v6563_v61, %v6565_v36  ;;  %v6568_v22 = vsel %vm2668_vm2, %v6565_v36, %v6567_v12  ;;  %v12535_v57 = vsel %vm1163_vm3, %v5066_v25, %v15038_v42  ;;  %v15280_v61 = vrot.slane %v12334_v17, 4 }
 0x372   : > { %v12520_v58 = vmul.f32 %v4811_v39, %v15278_v35  ;;  %6672 = vst.msk [vmem:[#allocation2 + $0x190] sm:$0xff] %vm1079_vm1, %v6566_v46  ;;  %v12528_v4 = vmul.f32 %v4816_v30, %v15279_v1  ;;  %6673 = vst.msk [vmem:[#allocation2 + $0x1a8] sm:$0xff] %vm1079_vm1, %v6568_v22  ;;  %v12549_v6 = vsel %vm2008_vm5, %v5901_v50, %v5903_v8  ;;  %v4821_v35 = vpop.permute.xlu0 %4820  ;;  %v5905_v30 = vrot.slane %v12390_v41, 4 }
 0x373   : > { %v12540_v13 = vsel %vm2008_vm5, %v15280_v61, %v5901_v50  ;;  %v12552_v25 = vsel %vm2420_vm6, %v6308_v44, %v6310_v43  ;;  %v12555_v39 = vsel %vm2420_vm6, %v6310_v43, %v6312_v37  ;;  %v6314_v1 = vrot.slane %v12390_v41, 5  ;;  %v4826_v43 = vpop.permute.xlu1 %4825  ;;  %6380 = vrot.lane.b32.xlu1 %v12303_v31, %s9350_s20  ;;  %6382 = vrot.lane.b32.xlu0 %v12306_v20, %s9350_s20 }
 0x374   : > { %v6569_v36 = vrot.slane %v12520_v58, 6  ;;  %4985 = vst.msk [vmem:[#allocation2 + $0x228] sm:$0xff] %vm1079_vm1, %v12520_v58  ;;  %15281 = vst [vmem:[#allocation53_spill] sm:$0xff] %v12552_v25  ;;  %v6571_v46 = vrot.slane %v12528_v4, 6  ;;  %v15283_v44 = vmax.f32 %v12082_v24, 0.0  ;;  %v15040_v42 = vrot.slane %v12433_v56, 5  ;;  %8922 = vmatmul.mubr.msk.bf16.gmra.mrb[92].mxu1 %vm1079_vm1, %v3600_v0 }
 0x375   : > { %15282 = vst [vmem:[#allocation49_spill] sm:$0xff] %v12555_v39  ;;  %4986 = vst.msk [vmem:[#allocation2 + $0x240] sm:$0xff] %vm1079_vm1, %v12528_v4  ;;  %v5319_v26 = vrot.slane %v12346_v19, 2  ;;  %v15284_v25 = vmax.f32 %v12087_v14, 0.0  ;;  %v12579_v24 = vsel %vm2008_vm5, %v5903_v8, %v5905_v30  ;;  %v12597_v31 = vsel %vm2420_vm6, %v6312_v37, %v6314_v1 }
 0x376   : > { %v6570_v50 = vsel %vm2668_vm2, %v6567_v12, %v6569_v36  ;;  %v12566_v61 = vmul.f32 %v4821_v35, %v15283_v44  ;;  %v6572_v39 = vsel %vm2668_vm2, %v6569_v36, %v6571_v46  ;;  %v15285_v12 = vrot.slane %v12433_v56, 4  ;;  %v4831_v20 = vpop.permute.xlu0 %4830 }
 0x377   : > { %6674 = vst.msk [vmem:[#allocation2 + $0x1c0] sm:$0xff] %vm1079_vm1, %v6570_v50  ;;  %v12574_v22 = vmul.f32 %v4826_v43, %v15284_v25  ;;  %v9253_v50 = vld [vmem:[%s14949_s4] sm:$0xff]   ;;  %6675 = vst.msk [vmem:[#allocation2 + $0x1d8] sm:$0xff] %vm1079_vm1, %v6572_v39  ;;  %v12602_v8 = vsel %vm2420_vm6, %v6314_v1, %v15040_v42  ;;  %v15286_v36 = vrot.slane %v12334_v17, 2  ;;  %v5718_v37 = vrot.slane %v12136_v51, 3  ;;  %5971 = vrot.lane.b32.xlu1 %v12274_v53, %s9348_s19 }
 0x378   : > { %v12584_v35 = vsel %vm2008_vm5, %v5905_v30, %v15285_v12  ;;  %v6573_v14 = vrot.slane %v12566_v61, 6  ;;  %4987 = vst.msk [vmem:[#allocation2 + $0x258] sm:$0xff] %vm1079_vm1, %v12566_v61  ;;  %v5720_v30 = vrot.slane %v12146_v21, 3  ;;  %7065 = vmatpush1.bf16.msra.mxu1 %v9253_v50  ;;  %v15287_v44 = vmax.f32 %v12091_v49, 0.0  ;;  %v4836_v12 = vpop.permute.xlu1 %4835  ;;  %5973 = vrot.lane.b32.xlu0 %v12289_v59, %s9348_s19 }
 0x379   : > { %v12607_v25 = vsel %vm1416_vm4, %v15286_v36, %v5319_v26  ;;  %v6575_v39 = vrot.slane %v12574_v22, 6  ;;  %4988 = vst.msk [vmem:[#allocation2 + $0x270] sm:$0xff] %vm1079_vm1, %v12574_v22  ;;  %v15042_v36 = vrot.slane %v12177_v10, 3  ;;  %v5070_v42 = vrot.slane %v12346_v19, 1  ;;  %7066 = vmatprep.subr.bf16.mxu1 %v15245_v33 }
 0x37a   : > { %v6574_v1 = vsel %vm2668_vm2, %v6571_v46, %v6573_v14  ;;  %v12618_v43 = vmul.f32 %v4831_v20, %v15287_v44  ;;  %v15288_v21 = vmax.f32 %v12095_v27, 0.0  ;;  %v3315_v46 = vpop.f32.mrb[40].mxu1  ;;  %v15289_v49 = vrot.slane %v12380_v3, 2 }
 0x37b   : > { %6676 = vst.msk [vmem:[#allocation2 + $0x1f0] sm:$0xff] %vm1079_vm1, %v6574_v1  ;;  %v6576_v0 = vsel %vm2668_vm2, %v6573_v14, %v6575_v39  ;;  %v5721_v44 = vsel %vm1840_vm7, %v5718_v37, %v5720_v30  ;;  %v9254_v1 = vld [vmem:[%s14949_s4 + $0x8] sm:$0xff]   ;;  %v3317_v53 = vpop.f32.mrb[41].mxu1  ;;  %v15291_v14 = vrot.slane %v12334_v17, 1  ;;  %v15046_v59 = vrot.slane %v12380_v3, 1  ;;  %5557 = vrot.lane.b32.xlu1 %v12317_v60, %s9350_s20 }
 0x37c   : > { %v12627_v50 = vmul.f32 %v4836_v12, %v15288_v21  ;;  %v12634_v20 = vsel %vm1416_vm4, %v5319_v26, %v15289_v49  ;;  %6677 = vst.msk [vmem:[#allocation2 + $0x208] sm:$0xff] %vm1079_vm1, %v6576_v0  ;;  %v6577_v27 = vrot.slane %v12618_v43, 6  ;;  %4989 = vst.msk [vmem:[#allocation2 + $0x288] sm:$0xff] %vm1079_vm1, %v12618_v43  ;;  %v3316_v21 = vadd.f32 %v12156_v9, %v3315_v46  ;;  %v3318_v12 = vpop.f32.mrb[42].mxu1  ;;  %v4841_v46 = vpop.permute.xlu0 %4840 }
 0x37d   : > { %15290 = vst [vmem:[#allocation52_spill] sm:$0xff] %v12634_v20  ;;  %5841 = vst.msk [vmem:[#allocation2 + $0x80] sm:$0xff] %vm1079_vm1, %v5721_v44  ;;  %v5723_v26 = vsel %vm1840_vm7, %v5720_v30, %v15042_v36  ;;  %v12654_v0 = vsel %vm1163_vm3, %v15291_v14, %v5070_v42  ;;  %v5909_v49 = vrot.slane %v12439_v32, 4  ;;  %7067 = vmatpush1.bf16.msra.mxu1 %v9254_v1  ;;  %v15293_v36 = vmax.f32 %v12099_v38, 0.0  ;;  %v3320_v20 = vpop.f32.mrb[43].mxu1 }
 0x37e   : > { %15292 = vst [vmem:[#allocation57_spill] sm:$0xff] %v12654_v0  ;;  %v6579_v37 = vrot.slane %v12627_v50, 6  ;;  %4990 = vst.msk [vmem:[#allocation2 + $0x2a0] sm:$0xff] %vm1079_vm1, %v12627_v50  ;;  %v6578_v44 = vsel %vm2668_vm2, %v6575_v39, %v6577_v27  ;;  %v3493_v53 = vadd.f32 %v11521_v2, %v3316_v21  ;;  %v3319_v14 = vadd.f32 %v12156_v9, %v3318_v12  ;;  %v4846_v0 = vpop.permute.xlu1 %4845  ;;  %v15298_v20 = vld [vmem:[#allocation22_spill] sm:$0xff] }
 0x37f   : > { %5842 = vst.msk [vmem:[#allocation2 + $0x98] sm:$0xff] %vm1079_vm1, %v5723_v26  ;;  %v12668_v51 = vmul.f32 %v4841_v46, %v15293_v36  ;;  %7068 = vmatprep.subr.bf16.mxu1 %v15245_v33  ;;  %6678 = vst.msk [vmem:[#allocation2 + $0x220] sm:$0xff] %vm1079_vm1, %v6578_v44  ;;  %v15294_v1 = vmax.f32 %v12104_v54, 0.0  ;;  %v12682_v2 = vsel %vm1163_vm3, %v5070_v42, %v15046_v59  ;;  %v15296_v38 = vrot.slane %v12433_v56, 4  ;;  %v9255_v36 = vld [vmem:[%s14949_s4 + $0x10] sm:$0xff]  }
 0x380   : > { %v6580_v26 = vsel %vm2668_vm2, %v6577_v27, %v6579_v37  ;;  %15295 = vst [vmem:[#allocation58_spill] sm:$0xff] %v12682_v2  ;;  %v3575_v54 = vmax.f32 %v3493_v53, 0.0  ;;  %v3496_v27 = vadd.f32 %v15298_v20, %v3319_v14  ;;  %5559 = vrot.lane.b32.xlu0 %v12320_v11, %s9350_s20  ;;  %v15299_v42 = vrot.slane %v12472_v7, 4  ;;  %v4851_v46 = vpop.permute.xlu0 %4850  ;;  %v15303_v59 = vld [vmem:[#allocation42_spill] sm:$0xff]  ;;  %5140 = vrot.lane.b32.xlu1 %v12339_v55, %s9348_s19 }
 0x381   : > { %v12675_v30 = vmul.f32 %v4846_v0, %v15294_v1  ;;  %v12687_v39 = vsel %vm2008_vm5, %v15296_v38, %v5909_v49  ;;  %6679 = vst.msk [vmem:[#allocation2 + $0x238] sm:$0xff] %vm1079_vm1, %v6580_v26  ;;  %v6581_v21 = vrot.slane %v12668_v51, 6  ;;  %4991 = vst.msk [vmem:[#allocation2 + $0x2b8] sm:$0xff] %vm1079_vm1, %v12668_v51  ;;  %v6318_v44 = vrot.slane %v12439_v32, 5  ;;  %7069 = vmatpush1.bf16.msra.mxu1 %v9255_v36  ;;  %v15301_v38 = vld [vmem:[#allocation29_spill] sm:$0xff]  ;;  %v15304_v53 = vld [vmem:[#allocation30_spill] sm:$0xff] }
 0x382   : > { %15297 = vst [vmem:[#allocation54_spill] sm:$0xff] %v12687_v39  ;;  %v12702_v0 = vsel %vm2008_vm5, %v5909_v49, %v15299_v42  ;;  %v5724_v14 = vrot.slane %v12216_v47, 3  ;;  %v3576_v26 = vmax.f32 %v3496_v27, 0.0  ;;  %v15302_v20 = vmax.f32 %v15301_v38, 0.0  ;;  %v4856_v42 = vpop.permute.xlu1 %4855  ;;  %7070 = vmatprep.subr.bf16.mxu1 %v15245_v33 }
 0x383   : > { %15300 = vst [vmem:[#allocation56_spill] sm:$0xff] %v12702_v0  ;;  %v6583_v12 = vrot.slane %v12675_v30, 6  ;;  %4992 = vst.msk [vmem:[#allocation2 + $0x2d0] sm:$0xff] %vm1079_vm1, %v12675_v30  ;;  %v6582_v1 = vsel %vm2668_vm2, %v6579_v37, %v6581_v21  ;;  %v15049_v0 = vrot.slane %v15303_v59, 3  ;;  %v15305_v2 = vmax.f32 %v15304_v53, 0.0 }
 0x384   : > { %v12713_v49 = vmul.f32 %v4851_v46, %v15302_v20  ;;  %6680 = vst.msk [vmem:[#allocation2 + $0x250] sm:$0xff] %vm1079_vm1, %v6582_v1  ;;  %v15306_v37 = vrot.slane %v12433_v56, 5  ;;  %v15307_v27 = vrot.slane %v12472_v7, 5  ;;  %v3601_v1 = vpack.c.bf16 %v3576_v26, %v3575_v54  ;;  %5142 = vrot.lane.b32.xlu0 %v12351_v16, %s9348_s19  ;;  %v4861_v53 = vpop.permute.xlu0 %4860  ;;  %v15310_v20 = vld [vmem:[#allocation32_spill] sm:$0xff]  ;;  %5389 = vrot.lane.b32.xlu1 %v12317_v60, %s9349_s22 }
 0x385   : > { %v6584_v39 = vsel %vm2668_vm2, %v6581_v21, %v6583_v12  ;;  %v12721_v47 = vmul.f32 %v4856_v42, %v15305_v2  ;;  %v15309_v55 = vrot.slane %v12177_v10, 3  ;;  %v5323_v16 = vrot.slane %v12390_v41, 2 }
 0x386   : > { %v12728_v36 = vsel %vm2420_vm6, %v15306_v37, %v6318_v44  ;;  %v12733_v46 = vsel %vm2420_vm6, %v6318_v44, %v15307_v27  ;;  %6681 = vst.msk [vmem:[#allocation2 + $0x268] sm:$0xff] %vm1079_vm1, %v6584_v39  ;;  %v6585_v21 = vrot.slane %v12713_v49, 6  ;;  %4993 = vst.msk [vmem:[#allocation2 + $0x2e8] sm:$0xff] %vm1079_vm1, %v12713_v49  ;;  %v5727_v44 = vsel %vm1840_vm7, %v5724_v14, %v15049_v0  ;;  %v9256_v39 = vld [vmem:[%s14949_s4 + $0x18] sm:$0xff]   ;;  %v4866_v27 = vpop.permute.xlu1 %4865  ;;  %v15312_v0 = vld [vmem:[#allocation34_spill] sm:$0xff] }
 0x387   : > { %15308 = vst [vmem:[#allocation61_spill] sm:$0xff] %v12733_v46  ;;  %v5725_v2 = vsel %vm1840_vm7, %v15309_v55, %v5724_v14  ;;  %v6587_v54 = vrot.slane %v12721_v47, 6  ;;  %4994 = vst.msk [vmem:[#allocation2 + $0x300] sm:$0xff] %vm1079_vm1, %v12721_v47  ;;  %v5325_v26 = vrot.slane %v12433_v56, 2  ;;  %v5074_v14 = vrot.slane %v12390_v41, 1  ;;  %8925 = vmatprep.mubr.msk.bf16.mxu1 %vm1079_vm1, %v3601_v1  ;;  %7071 = vmatpush1.bf16.msra.mxu1 %v9256_v39  ;;  %v9257_v39 = vld [vmem:[%s14949_s4 + $0x20] sm:$0xff]  }
 0x388   : > { %5843 = vst.msk [vmem:[#allocation2 + $0xb0] sm:$0xff] %vm1079_vm1, %v5725_v2  ;;  %5844 = vst.msk [vmem:[#allocation2 + $0xc8] sm:$0xff] %vm1079_vm1, %v5727_v44  ;;  %v6586_v38 = vsel %vm2668_vm2, %v6583_v12, %v6585_v21  ;;  %v15311_v42 = vmax.f32 %v15310_v20, 0.0  ;;  %v5076_v55 = vrot.slane %v12433_v56, 1  ;;  %v5913_v2 = vrot.slane %v12479_v23, 4  ;;  %5391 = vrot.lane.b32.xlu0 %v12320_v11, %s9349_s22  ;;  %7072 = vmatprep.subr.bf16.mxu1 %v15245_v33  ;;  %v4871_v11 = vpop.permute.xlu0 %4870 }
 0x389   : > { %6682 = vst.msk [vmem:[#allocation2 + $0x280] sm:$0xff] %vm1079_vm1, %v6586_v38  ;;  %v6588_v44 = vsel %vm2668_vm2, %v6585_v21, %v6587_v54  ;;  %v15313_v10 = vmax.f32 %v15312_v0, 0.0  ;;  %v15314_v12 = vrot.slane %v12380_v3, 2  ;;  %v15317_v60 = vrot.slane %v12380_v3, 1 }
 0x38a   : > { %v12761_v37 = vmul.f32 %v4861_v53, %v15311_v42  ;;  %v12780_v53 = vsel %vm1416_vm4, %v5323_v16, %v5325_v26  ;;  %6683 = vst.msk [vmem:[#allocation2 + $0x298] sm:$0xff] %vm1079_vm1, %v6588_v44  ;;  %v12797_v21 = vsel %vm1163_vm3, %v5074_v14, %v5076_v55  ;;  %v5915_v42 = vrot.slane %v12520_v58, 4 }
 0x38b   : > { %v12770_v46 = vmul.f32 %v4866_v27, %v15313_v10  ;;  %v12777_v1 = vsel %vm1416_vm4, %v15314_v12, %v5323_v16  ;;  %15316 = vst [vmem:[#allocation59_spill] sm:$0xff] %v12780_v53  ;;  %v12794_v0 = vsel %vm1163_vm3, %v15317_v60, %v5074_v14  ;;  %15319 = vst [vmem:[#allocation65_spill] sm:$0xff] %v12797_v21  ;;  %v15320_v16 = vrot.slane %v12472_v7, 4  ;;  %v15322_v12 = vld [vmem:[#allocation33_spill] sm:$0xff]  ;;  %v15324_v53 = vld [vmem:[#allocation47_spill] sm:$0xff] }
 0x38c   : > { %15315 = vst [vmem:[#allocation62_spill] sm:$0xff] %v12777_v1  ;;  %v6589_v10 = vrot.slane %v12761_v37, 6  ;;  %4995 = vst.msk [vmem:[#allocation2 + $0x318] sm:$0xff] %vm1079_vm1, %v12761_v37  ;;  %v6322_v27 = vrot.slane %v12479_v23, 5  ;;  %v6324_v14 = vrot.slane %v12520_v58, 5  ;;  %v15323_v60 = vmax.f32 %v15322_v12, 0.0  ;;  %7073 = vmatpush1.bf16.msra.mxu1 %v9257_v39  ;;  %6139 = vrot.lane.b32.xlu1 %v15324_v53, %s9349_s22 }
 0x38d   : > { %15318 = vst [vmem:[#allocation60_spill] sm:$0xff] %v12794_v0  ;;  %v12802_v38 = vsel %vm2008_vm5, %v15320_v16, %v5913_v2  ;;  %v6591_v20 = vrot.slane %v12770_v46, 6  ;;  %4996 = vst.msk [vmem:[#allocation2 + $0x330] sm:$0xff] %vm1079_vm1, %v12770_v46  ;;  %v5730_v21 = vrot.slane %v12286_v63, 3  ;;  %v12823_v1 = vsel %vm2008_vm5, %v5913_v2, %v5915_v42  ;;  %v9258_v63 = vld [vmem:[%s14949_s4 + $0x28] sm:$0xff]   ;;  %v15328_v2 = vld [vmem:[#allocation46_spill] sm:$0xff]  ;;  %7074 = vmatprep.subr.bf16.mxu1 %v15245_v33 }
 0x38e   : > { %15321 = vst [vmem:[#allocation63_spill] sm:$0xff] %v12802_v38  ;;  %v6590_v44 = vsel %vm2668_vm2, %v6587_v54, %v6589_v10  ;;  %v12814_v16 = vmul.f32 %v4871_v11, %v15323_v60  ;;  %v5728_v38 = vrot.slane %v12255_v28, 3  ;;  %v15325_v54 = vrot.slane %v12472_v7, 5  ;;  %6141 = vrot.lane.b32.xlu0 %v15328_v2, %s9349_s22 }
 0x38f   : > { %6684 = vst.msk [vmem:[#allocation2 + $0x2b0] sm:$0xff] %vm1079_vm1, %v6590_v44  ;;  %v6592_v0 = vsel %vm2668_vm2, %v6589_v10, %v6591_v20  ;;  %v12831_v28 = vsel %vm2420_vm6, %v6322_v27, %v6324_v14  ;;  %v15329_v10 = vrot.slane %v15303_v59, 3  ;;  %v5327_v12 = vrot.slane %v12439_v32, 2 }
 0x390   : > { %v12828_v11 = vsel %vm2420_vm6, %v15325_v54, %v6322_v27  ;;  %15327 = vst [vmem:[#allocation66_spill] sm:$0xff] %v12831_v28  ;;  %6685 = vst.msk [vmem:[#allocation2 + $0x2c8] sm:$0xff] %vm1079_vm1, %v6592_v0  ;;  %v15054_v39 = vrot.slane %v12814_v16, 6  ;;  %v5731_v27 = vsel %vm1840_vm7, %v5728_v38, %v5730_v21  ;;  %v5329_v0 = vrot.slane %v12472_v7, 2  ;;  %7075 = vmatpush1.bf16.msra.mxu1 %v9258_v63  ;;  %v15330_v28 = vld [vmem:[#allocation50_spill] sm:$0xff] }
 0x391   : > { %15326 = vst [vmem:[#allocation64_spill] sm:$0xff] %v12828_v11  ;;  %4997 = vst.msk [vmem:[#allocation2 + $0x348] sm:$0xff] %vm1079_vm1, %v12814_v16  ;;  %v5729_v44 = vsel %vm1840_vm7, %v15329_v10, %v5728_v38  ;;  %v5078_v60 = vrot.slane %v12439_v32, 1  ;;  %v5080_v54 = vrot.slane %v12472_v7, 1  ;;  %v5917_v59 = vrot.slane %v12528_v4, 4  ;;  %6384 = vrot.lane.b32.xlu1 %v15330_v28, %s9350_s20  ;;  %7076 = vmatprep.subr.bf16.mxu1 %v15245_v33 }
 0x392   : > { %5845 = vst.msk [vmem:[#allocation2 + $0xe0] sm:$0xff] %vm1079_vm1, %v5729_v44  ;;  %5846 = vst.msk [vmem:[#allocation2 + $0xf8] sm:$0xff] %vm1079_vm1, %v5731_v27  ;;  %v6594_v38 = vsel %vm2668_vm2, %v6591_v20, %v15054_v39  ;;  %v12858_v10 = vsel %vm1416_vm4, %v5325_v26, %v5327_v12  ;;  %v5919_v44 = vrot.slane %v12566_v61, 4  ;;  %v5732_v27 = vrot.slane %v12296_v5, 3  ;;  %v9259_v20 = vld [vmem:[%s14949_s4 + $0x30] sm:$0xff]   ;;  %6386 = vrot.lane.b32.xlu0 %v12383_v15, %s9350_s20 }
 0x393   : > { %6686 = vst.msk [vmem:[#allocation2 + $0x2e0] sm:$0xff] %vm1079_vm1, %v6594_v38  ;;  %v12866_v11 = vsel %vm1416_vm4, %v5327_v12, %v5329_v0  ;;  %v12873_v26 = vsel %vm1163_vm3, %v5076_v55, %v5078_v60  ;;  %v12876_v63 = vsel %vm1163_vm3, %v5078_v60, %v5080_v54  ;;  %v5734_v5 = vrot.slane %v12334_v17, 3 }
 0x394   : > { %v12882_v28 = vsel %vm2008_vm5, %v5915_v42, %v5917_v59  ;;  %v12885_v12 = vsel %vm2008_vm5, %v5917_v59, %v5919_v44  ;;  %v5733_v38 = vsel %vm1840_vm7, %v5730_v21, %v5732_v27  ;;  %v6326_v39 = vrot.slane %v12528_v4, 5  ;;  %7077 = vmatpush1.bf16.msra.mxu1 %v9259_v20 }
 0x395   : > { %15331 = vst [vmem:[#allocation70_spill] sm:$0xff] %v12885_v12  ;;  %5847 = vst.msk [vmem:[#allocation2 + $0x110] sm:$0xff] %vm1079_vm1, %v5733_v38  ;;  %v5735_v55 = vsel %vm1840_vm7, %v5732_v27, %v5734_v5  ;;  %v6328_v60 = vrot.slane %v12566_v61, 5  ;;  %v5331_v17 = vrot.slane %v12479_v23, 2  ;;  %v5333_v15 = vrot.slane %v12520_v58, 2  ;;  %5975 = vrot.lane.b32.xlu1 %v15324_v53, %s9348_s19  ;;  %7078 = vmatprep.subr.bf16.mxu1 %v15245_v33  ;;  %v9260_v27 = vld [vmem:[%s14949_s4 + $0x38] sm:$0xff]  }
 0x396   : > { %5848 = vst.msk [vmem:[#allocation2 + $0x128] sm:$0xff] %vm1079_vm1, %v5735_v55  ;;  %v12896_v42 = vsel %vm2420_vm6, %v6324_v14, %v6326_v39  ;;  %v5082_v21 = vrot.slane %v12479_v23, 1  ;;  %v5084_v59 = vrot.slane %v12520_v58, 1  ;;  %v5921_v38 = vrot.slane %v12574_v22, 4  ;;  %5977 = vrot.lane.b32.xlu0 %v15328_v2, %s9348_s19 }
 0x397   : > { %15332 = vst [vmem:[#allocation71_spill] sm:$0xff] %v12896_v42  ;;  %v12908_v20 = vsel %vm2420_vm6, %v6326_v39, %v6328_v60  ;;  %v12911_v14 = vsel %vm1416_vm4, %v5329_v0, %v5331_v17  ;;  %v12914_v55 = vsel %vm1416_vm4, %v5331_v17, %v5333_v15  ;;  %v5923_v42 = vrot.slane %v12618_v43, 4 }
 0x398   : > { %15333 = vst [vmem:[#allocation67_spill] sm:$0xff] %v12908_v20  ;;  %15334 = vst [vmem:[#allocation69_spill] sm:$0xff] %v12911_v14  ;;  %v12920_v53 = vsel %vm1163_vm3, %v5080_v54, %v5082_v21  ;;  %v12923_v12 = vsel %vm1163_vm3, %v5082_v21, %v5084_v59  ;;  %v12926_v39 = vsel %vm2008_vm5, %v5919_v44, %v5921_v38  ;;  %v5736_v0 = vrot.slane %v12346_v19, 3  ;;  %v9261_v19 = vld [vmem:[%s14949_s4 + $0x40] sm:$0xff]  }
 0x399   : > { %15335 = vst [vmem:[#allocation68_spill] sm:$0xff] %v12914_v55  ;;  %15336 = vst [vmem:[#allocation72_spill] sm:$0xff] %v12920_v53  ;;  %v12930_v14 = vsel %vm2008_vm5, %v5921_v38, %v5923_v42  ;;  %v5738_v17 = vrot.slane %v12380_v3, 3  ;;  %v6330_v55 = vrot.slane %v12574_v22, 5  ;;  %v6332_v2 = vrot.slane %v12618_v43, 5  ;;  %7079 = vmatpush1.bf16.msra.mxu1 %v9260_v27  ;;  %5561 = vrot.lane.b32.xlu1 %v12395_v52, %s9350_s20  ;;  %v3323_v53 = vpop.f32.mrb[44].mxu1 }
 0x39a   : > { %15337 = vst [vmem:[#allocation73_spill] sm:$0xff] %v12923_v12  ;;  %15338 = vst [vmem:[#allocation22_spill] sm:$0xff] %v12926_v39  ;;  %v5737_v54 = vsel %vm1840_vm7, %v5734_v5, %v5736_v0  ;;  %v5335_v21 = vrot.slane %v12528_v4, 2  ;;  %v5337_v12 = vrot.slane %v12566_v61, 2  ;;  %v5086_v44 = vrot.slane %v12528_v4, 1  ;;  %7080 = vmatprep.subr.bf16.mxu1 %v15245_v33 }
 0x39b   : > { %15339 = vst [vmem:[#allocation29_spill] sm:$0xff] %v12930_v14  ;;  %5849 = vst.msk [vmem:[#allocation2 + $0x140] sm:$0xff] %vm1079_vm1, %v5737_v54  ;;  %v5739_v3 = vsel %vm1840_vm7, %v5736_v0, %v5738_v17  ;;  %v12948_v5 = vsel %vm2420_vm6, %v6328_v60, %v6330_v55  ;;  %v12951_v38 = vsel %vm2420_vm6, %v6330_v55, %v6332_v2  ;;  %v5088_v27 = vrot.slane %v12566_v61, 1  ;;  %v15342_v14 = vld [vmem:[#allocation48_spill] sm:$0xff] }
 0x39c   : > { %15340 = vst [vmem:[#allocation42_spill] sm:$0xff] %v12948_v5  ;;  %15341 = vst [vmem:[#allocation30_spill] sm:$0xff] %v12951_v38  ;;  %5563 = vrot.lane.b32.xlu0 %v15342_v14, %s9350_s20  ;;  %v12958_v39 = vsel %vm1416_vm4, %v5333_v15, %v5335_v21  ;;  %v12961_v54 = vsel %vm1416_vm4, %v5335_v21, %v5337_v12  ;;  %v12964_v0 = vsel %vm1163_vm3, %v5084_v59, %v5086_v44 }
 0x39d   : > { %5850 = vst.msk [vmem:[#allocation2 + $0x158] sm:$0xff] %vm1079_vm1, %v5739_v3  ;;  %15343 = vst [vmem:[#allocation32_spill] sm:$0xff] %v12958_v39  ;;  %v5925_v60 = vrot.slane %v12627_v50, 4  ;;  %v12968_v55 = vsel %vm1163_vm3, %v5086_v44, %v5088_v27  ;;  %v5927_v38 = vrot.slane %v12668_v51, 4  ;;  %v5740_v5 = vrot.slane %v12390_v41, 3  ;;  %7081 = vmatpush1.bf16.msra.mxu1 %v9261_v19  ;;  %v15350_v19 = vld [vmem:[#allocation55_spill] sm:$0xff] }
 0x39e   : > { %15344 = vst [vmem:[#allocation34_spill] sm:$0xff] %v12961_v54  ;;  %15345 = vst [vmem:[#allocation33_spill] sm:$0xff] %v12964_v0  ;;  %v5742_v3 = vrot.slane %v12433_v56, 3  ;;  %v6334_v21 = vrot.slane %v12627_v50, 5  ;;  %v6336_v59 = vrot.slane %v12668_v51, 5  ;;  %v5339_v0 = vrot.slane %v12574_v22, 2  ;;  %7082 = vmatprep.subr.bf16.mxu1 %v15245_v33 }
 0x39f   : > { %15346 = vst [vmem:[#allocation47_spill] sm:$0xff] %v12968_v55  ;;  %v12974_v15 = vsel %vm2008_vm5, %v5923_v42, %v5925_v60  ;;  %v3324_v44 = vadd.f32 %v12156_v9, %v3323_v53  ;;  %v3325_v55 = vpop.f32.mrb[45].mxu1  ;;  %v15348_v54 = vld [vmem:[#allocation51_spill] sm:$0xff]  ;;  %v12984_v56 = vsel %vm2008_vm5, %v5925_v60, %v5927_v38  ;;  %v5741_v41 = vsel %vm1840_vm7, %v5738_v17, %v5740_v5  ;;  %v9262_v53 = vld [vmem:[%s14949_s4 + $0x48] sm:$0xff]  }
 0x3a0   : > { %15347 = vst [vmem:[#allocation46_spill] sm:$0xff] %v12974_v15  ;;  %5144 = vrot.lane.b32.xlu1 %v15348_v54, %s9348_s19  ;;  %15349 = vst [vmem:[#allocation50_spill] sm:$0xff] %v12984_v56  ;;  %v5341_v42 = vrot.slane %v12618_v43, 2  ;;  %5146 = vrot.lane.b32.xlu0 %v15350_v19, %s9348_s19  ;;  %v3326_v15 = vpop.f32.mrb[46].mxu1  ;;  %v5743_v54 = vsel %vm1840_vm7, %v5740_v5, %v5742_v3  ;;  %v12996_v55 = vsel %vm2420_vm6, %v6332_v2, %v6334_v21  ;;  %v15352_v56 = vld [vmem:[#allocation19_spill] sm:$0xff] }
 0x3a1   : > { %5851 = vst.msk [vmem:[#allocation2 + $0x170] sm:$0xff] %vm1079_vm1, %v5741_v41  ;;  %v12999_v60 = vsel %vm2420_vm6, %v6334_v21, %v6336_v59  ;;  %v13002_v17 = vsel %vm1416_vm4, %v5337_v12, %v5339_v0  ;;  %v3501_v19 = vadd.f32 %v15352_v56, %v3324_v44  ;;  %v3327_v39 = vadd.f32 %v12156_v9, %v3326_v15  ;;  %v3328_v20 = vpop.f32.mrb[47].mxu1  ;;  %v15353_v56 = vld [vmem:[#allocation20_spill] sm:$0xff] }
 0x3a2   : > { %15351 = vst [vmem:[#allocation48_spill] sm:$0xff] %v13002_v17  ;;  %5852 = vst.msk [vmem:[#allocation2 + $0x188] sm:$0xff] %vm1079_vm1, %v5743_v54  ;;  %v13008_v41 = vsel %vm1416_vm4, %v5339_v0, %v5341_v42  ;;  %v5090_v5 = vrot.slane %v12574_v22, 1  ;;  %7083 = vmatpush1.bf16.msra.mxu1 %v9262_v53  ;;  %v5092_v2 = vrot.slane %v12618_v43, 1  ;;  %v5929_v21 = vrot.slane %v12675_v30, 4  ;;  %v9263_v20 = vld [vmem:[%s14949_s4 + $0x50] sm:$0xff]  }
 0x3a3   : > { %v5931_v12 = vrot.slane %v12713_v49, 4  ;;  %v6338_v17 = vrot.slane %v12675_v30, 5  ;;  %v3577_v44 = vmax.f32 %v3501_v19, 0.0  ;;  %v3504_v9 = vadd.f32 %v15353_v56, %v3327_v39  ;;  %7084 = vmatprep.subr.bf16.mxu1 %v15245_v33 }
 0x3a4   : > { %5393 = vrot.lane.b32.xlu1 %v12395_v52, %s9349_s22  ;;  %v13023_v0 = vsel %vm1163_vm3, %v5088_v27, %v5090_v5  ;;  %v6340_v15 = vrot.slane %v12713_v49, 5  ;;  %5395 = vrot.lane.b32.xlu0 %v15342_v14, %s9349_s22  ;;  %v13029_v53 = vsel %vm1163_vm3, %v5090_v5, %v5092_v2  ;;  %v13032_v39 = vsel %vm2008_vm5, %v5927_v38, %v5929_v21 }
 0x3a5   : > { %15354 = vst [vmem:[#allocation51_spill] sm:$0xff] %v13032_v39  ;;  %v13035_v52 = vsel %vm2008_vm5, %v5929_v21, %v5931_v12  ;;  %v13038_v54 = vsel %vm2420_vm6, %v6336_v59, %v6338_v17  ;;  %v3578_v19 = vmax.f32 %v3504_v9, 0.0  ;;  %v5744_v56 = vrot.slane %v12439_v32, 3 }
 0x3a6   : > { %15355 = vst [vmem:[#allocation55_spill] sm:$0xff] %v13035_v52  ;;  %v13041_v27 = vsel %vm2420_vm6, %v6338_v17, %v6340_v15  ;;  %v5746_v14 = vrot.slane %v12472_v7, 3  ;;  %7085 = vmatpush1.bf16.msra.mxu1 %v9263_v20  ;;  %v5343_v5 = vrot.slane %v12627_v50, 2  ;;  %v5345_v38 = vrot.slane %v12668_v51, 2 }
 0x3a7   : > { %v5094_v39 = vrot.slane %v12627_v50, 1  ;;  %v5096_v21 = vrot.slane %v12668_v51, 1  ;;  %v3602_v52 = vpack.c.bf16 %v3578_v19, %v3577_v44  ;;  %7086 = vmatprep.subr.bf16.mxu1 %v15245_v33  ;;  %v5745_v59 = vsel %vm1840_vm7, %v5742_v3, %v5744_v56 }
 0x3a8   : > { %6143 = vrot.lane.b32.xlu1 %v12446_v18, %s9349_s22  ;;  %v5747_v32 = vsel %vm1840_vm7, %v5744_v56, %v5746_v14  ;;  %v5933_v7 = vrot.slane %v12721_v47, 4  ;;  %6145 = vrot.lane.b32.xlu0 %v12451_v34, %s9349_s22  ;;  %5853 = vst.msk [vmem:[#allocation2 + $0x1a0] sm:$0xff] %vm1079_vm1, %v5745_v59  ;;  %v13060_v17 = vsel %vm1416_vm4, %v5341_v42, %v5343_v5  ;;  %v5935_v19 = vrot.slane %v12761_v37, 4 }
 0x3a9   : > { %5854 = vst.msk [vmem:[#allocation2 + $0x1b8] sm:$0xff] %vm1079_vm1, %v5747_v32  ;;  %v13063_v44 = vsel %vm1416_vm4, %v5343_v5, %v5345_v38  ;;  %v13066_v9 = vsel %vm1163_vm3, %v5092_v2, %v5094_v39  ;;  %v13069_v3 = vsel %vm1163_vm3, %v5094_v39, %v5096_v21  ;;  %8926 = vmatmul.mubr.msk.bf16.gmra.mrb[96].mxu1 %vm1079_vm1, %v3602_v52  ;;  %v6342_v56 = vrot.slane %v12721_v47, 5  ;;  %v9264_v5 = vld [vmem:[%s14949_s4 + $0x58] sm:$0xff]  }
 0x3aa   : > { %15356 = vst [vmem:[#allocation19_spill] sm:$0xff] %v13069_v3  ;;  %v13073_v20 = vsel %vm2008_vm5, %v5931_v12, %v5933_v7  ;;  %v6344_v42 = vrot.slane %v12761_v37, 5  ;;  %v5347_v2 = vrot.slane %v12675_v30, 2  ;;  %v5349_v39 = vrot.slane %v12713_v49, 2  ;;  %7087 = vmatpush1.bf16.msra.mxu1 %v9264_v5 }
 0x3ab   : > { %15357 = vst [vmem:[#allocation20_spill] sm:$0xff] %v13073_v20  ;;  %v5748_v59 = vrot.slane %v12479_v23, 3  ;;  %v5750_v52 = vrot.slane %v12520_v58, 3  ;;  %v13088_v12 = vsel %vm2008_vm5, %v5933_v7, %v5935_v19  ;;  %v13091_v32 = vsel %vm2420_vm6, %v6340_v15, %v6342_v56  ;;  %7088 = vmatprep.subr.bf16.mxu1 %v15245_v33 }
 0x3ac   : > { %6388 = vrot.lane.b32.xlu1 %v12461_v40, %s9350_s20  ;;  %v13094_v20 = vsel %vm2420_vm6, %v6342_v56, %v6344_v42  ;;  %v5098_v3 = vrot.slane %v12675_v30, 1  ;;  %6390 = vrot.lane.b32.xlu0 %v12484_v62, %s9350_s20  ;;  %v13100_v23 = vsel %vm1416_vm4, %v5345_v38, %v5347_v2  ;;  %v13103_v40 = vsel %vm1416_vm4, %v5347_v2, %v5349_v39 }
 0x3ad   : > { %v5749_v58 = vsel %vm1840_vm7, %v5746_v14, %v5748_v59  ;;  %v5100_v15 = vrot.slane %v12713_v49, 1  ;;  %v5751_v7 = vsel %vm1840_vm7, %v5748_v59, %v5750_v52  ;;  %v5937_v62 = vrot.slane %v12770_v46, 4 }
 0x3ae   : > { %5855 = vst.msk [vmem:[#allocation2 + $0x1d0] sm:$0xff] %vm1079_vm1, %v5749_v58  ;;  %v13111_v56 = vsel %vm1163_vm3, %v5096_v21, %v5098_v3  ;;  %v15068_v38 = vrot.slane %v12814_v16, 4  ;;  %5856 = vst.msk [vmem:[#allocation2 + $0x1e8] sm:$0xff] %vm1079_vm1, %v5751_v7  ;;  %v6346_v14 = vrot.slane %v12770_v46, 5  ;;  %v5351_v58 = vrot.slane %v12721_v47, 2  ;;  %v9265_v21 = vld [vmem:[%s14949_s4 + $0x60] sm:$0xff]  }
 0x3af   : > { %v13117_v5 = vsel %vm1163_vm3, %v5098_v3, %v5100_v15  ;;  %v13128_v59 = vsel %vm2008_vm5, %v5935_v19, %v5937_v62  ;;  %v5353_v7 = vrot.slane %v12761_v37, 2  ;;  %7089 = vmatpush1.bf16.msra.mxu1 %v9265_v21  ;;  %v5355_v21 = vrot.slane %v12770_v46, 2 }
 0x3b0   : > { %15358 = vst [vmem:[#allocation86_spill] sm:$0xff] %v13117_v5  ;;  %5979 = vrot.lane.b32.xlu1 %v12446_v18, %s9348_s19  ;;  %15359 = vst [vmem:[#allocation87_spill] sm:$0xff] %v13128_v59  ;;  %v13133_v3 = vsel %vm2008_vm5, %v5937_v62, %v15068_v38  ;;  %5981 = vrot.lane.b32.xlu0 %v12451_v34, %s9348_s19  ;;  %v13139_v2 = vsel %vm2420_vm6, %v6344_v42, %v6346_v14  ;;  %v15362_v18 = vrot.slane %v12814_v16, 5  ;;  %v3331_v34 = vpop.f32.mrb[48].mxu1 }
 0x3b1   : > { %15360 = vst [vmem:[#allocation88_spill] sm:$0xff] %v13133_v3  ;;  %15361 = vst [vmem:[#allocation89_spill] sm:$0xff] %v13139_v2  ;;  %v13147_v19 = vsel %vm1416_vm4, %v5349_v39, %v5351_v58  ;;  %v13150_v62 = vsel %vm1416_vm4, %v5351_v58, %v5353_v7  ;;  %v5752_v38 = vrot.slane %v12528_v4, 3  ;;  %v5754_v3 = vrot.slane %v12566_v61, 3  ;;  %7090 = vmatprep.subr.bf16.mxu1 %v15245_v33  ;;  %v3333_v58 = vpop.f32.mrb[49].mxu1 }
 0x3b2   : > { %v13144_v5 = vsel %vm2420_vm6, %v6346_v14, %v15362_v18  ;;  %15364 = vst [vmem:[#allocation91_spill] sm:$0xff] %v13147_v19  ;;  %15365 = vst [vmem:[#allocation92_spill] sm:$0xff] %v13150_v62  ;;  %v5102_v42 = vrot.slane %v12721_v47, 1  ;;  %v5104_v2 = vrot.slane %v12761_v37, 1  ;;  %v13160_v14 = vld [vmem:[%s14950_s5] ss:$0 sm:$0xff]  ;;  %v13182_v59 = vsel %vm1416_vm4, %v5353_v7, %v5355_v21 }
 0x3b3   : > { %15363 = vst [vmem:[#allocation90_spill] sm:$0xff] %v13144_v5  ;;  %v3332_v39 = vadd.f32 %v13160_v14, %v3331_v34  ;;  %v5753_v4 = vsel %vm1840_vm7, %v5750_v52, %v5752_v38  ;;  %v5755_v61 = vsel %vm1840_vm7, %v5752_v38, %v5754_v3  ;;  %v3334_v18 = vpop.f32.mrb[50].mxu1  ;;  %v15073_v52 = vrot.slane %v12814_v16, 2  ;;  %v15366_v62 = vld [vmem:[#allocation23_spill] sm:$0xff] }
 0x3b4   : > { %5565 = vrot.lane.b32.xlu1 %v12489_v48, %s9350_s20  ;;  %5567 = vrot.lane.b32.xlu0 %v12502_v45, %s9350_s20  ;;  %5857 = vst.msk [vmem:[#allocation2 + $0x200] sm:$0xff] %vm1079_vm1, %v5753_v4  ;;  %5858 = vst.msk [vmem:[#allocation2 + $0x218] sm:$0xff] %vm1079_vm1, %v5755_v61  ;;  %v13173_v34 = vsel %vm1163_vm3, %v5100_v15, %v5102_v42  ;;  %v13176_v58 = vsel %vm1163_vm3, %v5102_v42, %v5104_v2  ;;  %v3336_v5 = vpop.f32.mrb[51].mxu1  ;;  %v5106_v4 = vrot.slane %v12770_v46, 1  ;;  %v9266_v15 = vld [vmem:[%s14949_s4 + $0x68] sm:$0xff]  }
 0x3b5   : > { %v3509_v38 = vadd.f32 %v15366_v62, %v3332_v39  ;;  %v3335_v19 = vadd.f32 %v13160_v14, %v3334_v18  ;;  %v13191_v42 = vsel %vm1416_vm4, %v5355_v21, %v15073_v52  ;;  %v15075_v61 = vrot.slane %v12814_v16, 1  ;;  %v15368_v62 = vld [vmem:[#allocation25_spill] sm:$0xff]  ;;  %7091 = vmatpush1.bf16.msra.mxu1 %v9266_v15 }
 0x3b6   : > { %15367 = vst [vmem:[#allocation23_spill] sm:$0xff] %v13191_v42  ;;  %v13200_v5 = vsel %vm1163_vm3, %v5104_v2, %v5106_v4  ;;  %v5756_v21 = vrot.slane %v12574_v22, 3  ;;  %7092 = vmatprep.subr.bf16.mxu1 %v15245_v33  ;;  %v15074_v15 = vrot.slane %v12814_v16, 3 }
 0x3b7   : > { %v3512_v39 = vadd.f32 %v15368_v62, %v3335_v19  ;;  %15369 = vst [vmem:[#allocation25_spill] sm:$0xff] %v13200_v5  ;;  %v13205_v7 = vsel %vm1163_vm3, %v5106_v4, %v15075_v61  ;;  %v3579_v18 = vmax.f32 %v3509_v38, 0.0  ;;  %v5760_v38 = vrot.slane %v12627_v50, 3  ;;  %v15371_v62 = vld [vmem:[#allocation53_spill] sm:$0xff] }
 0x3b8   : > { %5148 = vrot.lane.b32.xlu1 %v12507_v29, %s9348_s19  ;;  %5150 = vrot.lane.b32.xlu0 %v12535_v57, %s9348_s19  ;;  %15370 = vst [vmem:[#allocation93_spill] sm:$0xff] %v13205_v7  ;;  %v9267_v29 = vld [vmem:[%s14949_s4 + $0x70] sm:$0xff]   ;;  %v5758_v57 = vrot.slane %v12618_v43, 3  ;;  %v5757_v2 = vsel %vm1840_vm7, %v5754_v3, %v5756_v21  ;;  %v5762_v43 = vrot.slane %v12668_v51, 3  ;;  %v5766_v3 = vrot.slane %v12713_v49, 3 }
 0x3b9   : > { %v3580_v52 = vmax.f32 %v3512_v39, 0.0  ;;  %5859 = vst.msk [vmem:[#allocation2 + $0x230] sm:$0xff] %vm1079_vm1, %v5757_v2  ;;  %7093 = vmatpush1.bf16.msra.mxu1 %v9267_v29  ;;  %v5770_v50 = vrot.slane %v12761_v37, 3  ;;  %v5772_v37 = vrot.slane %v12770_v46, 3  ;;  %v8597_v7 = vld [vmem:[%s9476_s18 + $0x50] sm:$0xff]  }
 0x3ba   : > { %v5759_v22 = vsel %vm1840_vm7, %v5756_v21, %v5758_v57  ;;  %7094 = vmatprep.subr.bf16.mxu1 %v15245_v33  ;;  %v5761_v4 = vsel %vm1840_vm7, %v5758_v57, %v5760_v38  ;;  %v5763_v33 = vsel %vm1840_vm7, %v5760_v38, %v5762_v43 }
 0x3bb   : > { %v3603_v19 = vpack.c.bf16 %v3580_v52, %v3579_v18  ;;  %5860 = vst.msk [vmem:[#allocation2 + $0x248] sm:$0xff] %vm1079_vm1, %v5759_v22  ;;  %v5768_v52 = vrot.slane %v12721_v47, 3  ;;  %5861 = vst.msk [vmem:[#allocation2 + $0x260] sm:$0xff] %vm1079_vm1, %v5761_v4  ;;  %v5773_v39 = vsel %vm1840_vm7, %v5770_v50, %v5772_v37  ;;  %v5775_v21 = vsel %vm1840_vm7, %v5772_v37, %v15074_v15  ;;  %v15372_v18 = vld [vmem:[#allocation49_spill] sm:$0xff]  ;;  %v15375_v37 = vld [vmem:[#allocation52_spill] sm:$0xff] }
 0x3bc   : > { %5397 = vrot.lane.b32.xlu1 %v12489_v48, %s9349_s22  ;;  %5399 = vrot.lane.b32.xlu0 %v12502_v45, %s9349_s22  ;;  %v5764_v48 = vrot.slane %v12675_v30, 3  ;;  %v9268_v45 = vld [vmem:[%s14949_s4 + $0x78] sm:$0xff]   ;;  %5862 = vst.msk [vmem:[#allocation2 + $0x278] sm:$0xff] %vm1079_vm1, %v5763_v33  ;;  %5867 = vst.msk [vmem:[#allocation2 + $0x2f0] sm:$0xff] %vm1079_vm1, %v5773_v39  ;;  %v3339_v46 = vpop.f32.mrb[52].mxu1  ;;  %v13283_v33 = vpop.f32.mrb[178].mxu0 }
 0x3bd   : > { %8929 = vmatprep.mubr.msk.bf16.mxu1 %vm1079_vm1, %v3603_v19  ;;  %v5769_v49 = vsel %vm1840_vm7, %v5766_v3, %v5768_v52  ;;  %7095 = vmatpush1.bf16.msra.mxu1 %v9268_v45  ;;  %v5771_v47 = vsel %vm1840_vm7, %v5768_v52, %v5770_v50  ;;  %5868 = vst.msk [vmem:[#allocation2 + $0x308] sm:$0xff] %vm1079_vm1, %v5775_v21  ;;  %v3341_v57 = vpop.f32.mrb[53].mxu1  ;;  %v15373_v19 = vld [vmem:[#allocation21_spill] sm:$0xff]  ;;  %v4709_v50 = vld [vmem:[%s14946_s1 + $0x100] sm:$0xff] }
 0x3be   : > { %v5765_v51 = vsel %vm1840_vm7, %v5762_v43, %v5764_v48  ;;  %v5767_v30 = vsel %vm1840_vm7, %v5764_v48, %v5766_v3  ;;  %5865 = vst.msk [vmem:[#allocation2 + $0x2c0] sm:$0xff] %vm1079_vm1, %v5769_v49  ;;  %5866 = vst.msk [vmem:[#allocation2 + $0x2d8] sm:$0xff] %vm1079_vm1, %v5771_v47  ;;  %v3340_v29 = vadd.f32 %v13160_v14, %v3339_v46  ;;  %v3342_v2 = vpop.f32.mrb[54].mxu1  ;;  %v15374_v48 = vld [vmem:[#allocation24_spill] sm:$0xff] }
 0x3bf   : > { %5863 = vst.msk [vmem:[#allocation2 + $0x290] sm:$0xff] %vm1079_vm1, %v5765_v51  ;;  %5864 = vst.msk [vmem:[#allocation2 + $0x2a8] sm:$0xff] %vm1079_vm1, %v5767_v30  ;;  %v3343_v38 = vadd.f32 %v13160_v14, %v3342_v2  ;;  %v3344_v43 = vpop.f32.mrb[55].mxu1  ;;  %v15376_v57 = vld [vmem:[#allocation28_spill] sm:$0xff] }
 0x3c0   : > { %6147 = vrot.lane.b32.xlu1 %v12540_v13, %s9349_s22  ;;  %6149 = vrot.lane.b32.xlu0 %v12549_v6, %s9349_s22  ;;  %v3517_v22 = vadd.f32 %v15373_v19, %v3340_v29 }
 0x3c1   : > { %v3520_v3 = vadd.f32 %v15374_v48, %v3343_v38  ;;  %v15377_v48 = vld [vmem:[#allocation31_spill] sm:$0xff] }
 0x3c2   : > { %v3581_v52 = vmax.f32 %v3517_v22, 0.0 }
 0x3c3   : > { %v3582_v45 = vmax.f32 %v3520_v3, 0.0 }
 0x3c4   : > { %6392 = vrot.lane.b32.xlu1 %v15371_v62, %s9350_s20  ;;  %6394 = vrot.lane.b32.xlu0 %v15372_v18, %s9350_s20 }
 0x3c8   : > { %5983 = vrot.lane.b32.xlu1 %v12540_v13, %s9348_s19  ;;  %5985 = vrot.lane.b32.xlu0 %v12549_v6, %s9348_s19  ;;  %v3604_v13 = vpack.c.bf16 %v3582_v45, %v3581_v52  ;;  %v4708_v6 = vld [vmem:[%s14946_s1 + $0xf8] sm:$0xff]  ;;  %v5135_v51 = vpop.permute.xlu0 %5134  ;;  %v15378_v52 = vld [vmem:[#allocation57_spill] sm:$0xff] }
 0x3c9   : > { %v5133_v4 = vpop.permute.xlu1 %5132  ;;  %5258 = vst.msk [vmem:[#allocation2 + $0x90] sm:$0xff] %vm1373_vm9, %v5135_v51  ;;  %v15381_v51 = vld [vmem:[#allocation56_spill] sm:$0xff] }
 0x3ca   : > { %8930 = vmatmul.mubr.msk.bf16.gmra.mrb[100].mxu1 %vm1079_vm1, %v3604_v13  ;;  %5257 = vst.msk [vmem:[#allocation2 + $0x78] sm:$0xff] %vm1373_vm9, %v5133_v4 }
 0x3cc   : > { %6151 = vrot.lane.b32.xlu1 %v12579_v24, %s9349_s22  ;;  %6153 = vrot.lane.b32.xlu0 %v12584_v35, %s9349_s22  ;;  %v5384_v30 = vpop.permute.xlu0 %5383 }
 0x3cd   : > { %5507 = vst.msk [vmem:[#allocation2 + $0x90] sm:$0xff] %vm1626_vm10, %v5384_v30 }
 0x3d0   : > { %6396 = vrot.lane.b32.xlu1 %v12597_v31, %s9350_s20  ;;  %6398 = vrot.lane.b32.xlu0 %v12602_v8, %s9350_s20  ;;  %v9020_v31 = vpop.f32.mrb[179].mxu0  ;;  %v5382_v8 = vpop.permute.xlu1 %5381 }
 0x3d1   : > { %5506 = vst.msk [vmem:[#allocation2 + $0x78] sm:$0xff] %vm1626_vm10, %v5382_v8  ;;  %v13288_v49 = vpop.f32.mrb[180].mxu0  ;;  %v5970_v39 = vpop.permute.xlu0 %5969 }
 0x3d2   : > { %v9023_v47 = vpop.f32.mrb[181].mxu0  ;;  %v3347_v21 = vpop.f32.mrb[56].mxu1  ;;  %6088 = vst.msk [vmem:[#allocation2 + $0x98] sm:$0xff] %vm1373_vm9, %v5970_v39 }
 0x3d3   : > { %v3348_v18 = vadd.f32 %v13160_v14, %v3347_v21  ;;  %v3349_v46 = vpop.f32.mrb[57].mxu1  ;;  %v13324_v30 = vpop.f32.mrb[182].mxu0  ;;  %v15382_v21 = vld [vmem:[#allocation61_spill] sm:$0xff] }
 0x3d4   : > { %4875 = vperm.xlu1 %9174, %v4708_v6   ;;  %4880 = vperm.xlu0 %9173, %v4709_v50   ;;  %v5968_v62 = vpop.permute.xlu1 %5967  ;;  %v3350_v29 = vpop.f32.mrb[58].mxu1  ;;  %v15380_v50 = vld [vmem:[#allocation54_spill] sm:$0xff] }
 0x3d5   : > { %6087 = vst.msk [vmem:[#allocation2 + $0x80] sm:$0xff] %vm1373_vm9, %v5968_v62  ;;  %v3525_v2 = vadd.f32 %v15376_v57, %v3348_v18  ;;  %v3351_v19 = vadd.f32 %v13160_v14, %v3350_v29  ;;  %v3352_v22 = vpop.f32.mrb[59].mxu1  ;;  %v5556_v43 = vpop.permute.xlu0 %5555  ;;  %v4711_v46 = vld [vmem:[%s14946_s1 + $0x110] sm:$0xff] }
 0x3d6   : > { %5677 = vst.msk [vmem:[#allocation2 + $0x90] sm:$0xff] %vm1797_vm11, %v5556_v43  ;;  %v9024_v62 = vpop.f32.mrb[183].mxu0  ;;  %v15383_v43 = vld [vmem:[#allocation26_spill] sm:$0xff] }
 0x3d7   : > { %v3528_v3 = vadd.f32 %v15377_v48, %v3351_v19 }
 0x3d8   : > { %5569 = vrot.lane.b32.xlu1 %v12607_v25, %s9350_s20  ;;  %5571 = vrot.lane.b32.xlu0 %v15375_v37, %s9350_s20  ;;  %v5554_v38 = vpop.permute.xlu1 %5553 }
 0x3d9   : > { %5676 = vst.msk [vmem:[#allocation2 + $0x78] sm:$0xff] %vm1797_vm11, %v5554_v38  ;;  %v3584_v45 = vmax.f32 %v3528_v3, 0.0  ;;  %v5139_v6 = vpop.permute.xlu0 %5138 }
 0x3da   : > { %5260 = vst.msk [vmem:[#allocation2 + $0xc0] sm:$0xff] %vm1373_vm9, %v5139_v6  ;;  %v15386_v6 = vld [vmem:[#allocation59_spill] sm:$0xff] }
 0x3dc   : > { %5987 = vrot.lane.b32.xlu1 %v12579_v24, %s9348_s19  ;;  %5989 = vrot.lane.b32.xlu0 %v12584_v35, %s9348_s19  ;;  %v15379_v24 = vld [vmem:[#allocation58_spill] sm:$0xff]  ;;  %v3583_v35 = vmax.f32 %v3525_v2, 0.0  ;;  %v5137_v13 = vpop.permute.xlu1 %5136 }
 0x3dd   : > { %5259 = vst.msk [vmem:[#allocation2 + $0xa8] sm:$0xff] %vm1373_vm9, %v5137_v13  ;;  %v5388_v8 = vpop.permute.xlu0 %5387 }
 0x3de   : > { %v3605_v4 = vpack.c.bf16 %v3584_v45, %v3583_v35  ;;  %5509 = vst.msk [vmem:[#allocation2 + $0xc0] sm:$0xff] %vm1626_vm10, %v5388_v8  ;;  %v15384_v35 = vld [vmem:[#allocation62_spill] sm:$0xff]  ;;  %v15385_v45 = vld [vmem:[#allocation27_spill] sm:$0xff] }
 0x3e0   : > { %5152 = vrot.lane.b32.xlu1 %v15378_v52, %s9348_s19  ;;  %5154 = vrot.lane.b32.xlu0 %v15379_v24, %s9348_s19  ;;  %v5386_v31 = vpop.permute.xlu1 %5385 }
 0x3e1   : > { %8933 = vmatprep.mubr.msk.bf16.mxu1 %vm1079_vm1, %v3605_v4  ;;  %5508 = vst.msk [vmem:[#allocation2 + $0xa8] sm:$0xff] %vm1626_vm10, %v5386_v31  ;;  %v6138_v39 = vpop.permute.xlu0 %6137 }
 0x3e2   : > { %6254 = vst.msk [vmem:[#allocation2 + $0x98] sm:$0xff] %vm1626_vm10, %v6138_v39 }
 0x3e4   : > { %6155 = vrot.lane.b32.xlu1 %v15380_v50, %s9349_s22  ;;  %6157 = vrot.lane.b32.xlu0 %v15381_v51, %s9349_s22  ;;  %v6136_v47 = vpop.permute.xlu1 %6135 }
 0x3e5   : > { %6253 = vst.msk [vmem:[#allocation2 + $0x80] sm:$0xff] %vm1626_vm10, %v6136_v47  ;;  %v6383_v57 = vpop.permute.xlu0 %6382 }
 0x3e6   : > { %6499 = vst.msk [vmem:[#allocation2 + $0x98] sm:$0xff] %vm1797_vm11, %v6383_v57 }
 0x3e8   : > { %5401 = vrot.lane.b32.xlu1 %v12607_v25, %s9349_s22  ;;  %5403 = vrot.lane.b32.xlu0 %v15375_v37, %s9349_s22  ;;  %v4710_v25 = vld [vmem:[%s14946_s1 + $0x108] sm:$0xff]  ;;  %v13335_v37 = vpop.f32.mrb[184].mxu0  ;;  %v6381_v18 = vpop.permute.xlu1 %6380 }
 0x3e9   : > { %v9027_v29 = vpop.f32.mrb[185].mxu0  ;;  %6498 = vst.msk [vmem:[#allocation2 + $0x80] sm:$0xff] %vm1797_vm11, %v6381_v18  ;;  %v15388_v18 = vld [vmem:[#allocation65_spill] sm:$0xff] }
 0x3ea   : > { %v5974_v24 = vpop.permute.xlu0 %5973 }
 0x3eb   : > { %6090 = vst.msk [vmem:[#allocation2 + $0xc8] sm:$0xff] %vm1373_vm9, %v5974_v24 }
 0x3ec   : > { %6400 = vrot.lane.b32.xlu1 %v12728_v36, %s9350_s20  ;;  %6402 = vrot.lane.b32.xlu0 %v15382_v21, %s9350_s20  ;;  %v3355_v36 = vpop.f32.mrb[60].mxu1  ;;  %v5972_v38 = vpop.permute.xlu1 %5971 }
 0x3ed   : > { %v3356_v2 = vadd.f32 %v13160_v14, %v3355_v36  ;;  %v3357_v19 = vpop.f32.mrb[61].mxu1  ;;  %6089 = vst.msk [vmem:[#allocation2 + $0xb0] sm:$0xff] %vm1373_vm9, %v5972_v38  ;;  %v15390_v38 = vld [vmem:[#allocation64_spill] sm:$0xff] }
 0x3ee   : > { %v3358_v22 = vpop.f32.mrb[62].mxu1  ;;  %v13378_v19 = vpop.f32.mrb[186].mxu0 }
 0x3ef   : > { %v3533_v48 = vadd.f32 %v15383_v43, %v3356_v2  ;;  %v3359_v3 = vadd.f32 %v13160_v14, %v3358_v22  ;;  %v3360_v52 = vpop.f32.mrb[63].mxu1  ;;  %v9028_v43 = vpop.f32.mrb[187].mxu0 }
 0x3f0   : > { %4885 = vperm.xlu1 %9174, %v4710_v25   ;;  %4890 = vperm.xlu0 %9173, %v4711_v46   ;;  %v5558_v4 = vpop.permute.xlu1 %5557  ;;  %v15387_v25 = vld [vmem:[#allocation60_spill] sm:$0xff]  ;;  %v4712_v52 = vld [vmem:[%s14946_s1 + $0x118] sm:$0xff] }
 0x3f1   : > { %v3536_v13 = vadd.f32 %v15385_v45, %v3359_v3  ;;  %v3585_v31 = vmax.f32 %v3533_v48, 0.0  ;;  %5678 = vst.msk [vmem:[#allocation2 + $0xa8] sm:$0xff] %vm1797_vm11, %v5558_v4  ;;  %v15391_v3 = vld [vmem:[#allocation66_spill] sm:$0xff]  ;;  %v4713_v45 = vld [vmem:[%s14946_s1 + $0x120] sm:$0xff]  ;;  %v15393_v43 = vld [vmem:[#allocation71_spill] sm:$0xff] }
 0x3f2   : > { %v5560_v47 = vpop.permute.xlu0 %5559 }
 0x3f3   : > { %v3586_v8 = vmax.f32 %v3536_v13, 0.0  ;;  %5679 = vst.msk [vmem:[#allocation2 + $0xc0] sm:$0xff] %vm1797_vm11, %v5560_v47 }
 0x3f4   : > { %5573 = vrot.lane.b32.xlu1 %v15384_v35, %s9350_s20  ;;  %5575 = vrot.lane.b32.xlu0 %v15386_v6, %s9350_s20  ;;  %v5141_v39 = vpop.permute.xlu1 %5140  ;;  %v13397_v4 = vpop.f32.mrb[188].mxu0 }
 0x3f5   : > { %v3606_v62 = vpack.c.bf16 %v3586_v8, %v3585_v31  ;;  %5261 = vst.msk [vmem:[#allocation2 + $0xd8] sm:$0xff] %vm1373_vm9, %v5141_v39  ;;  %v9031_v8 = vpop.f32.mrb[189].mxu0 }
 0x3f6   : > { %v5143_v21 = vpop.permute.xlu0 %5142 }
 0x3f7   : > { %8934 = vmatmul.mubr.msk.bf16.gmra.mrb[104].mxu1 %vm1079_vm1, %v3606_v62  ;;  %5262 = vst.msk [vmem:[#allocation2 + $0xf0] sm:$0xff] %vm1373_vm9, %v5143_v21 }
 0x3f8   : > { %5991 = vrot.lane.b32.xlu1 %v15380_v50, %s9348_s19  ;;  %5993 = vrot.lane.b32.xlu0 %v15381_v51, %s9348_s19  ;;  %v5390_v46 = vpop.permute.xlu1 %5389  ;;  %v15389_v51 = vld [vmem:[#allocation63_spill] sm:$0xff] }
 0x3f9   : > { %5510 = vst.msk [vmem:[#allocation2 + $0xd8] sm:$0xff] %vm1626_vm10, %v5390_v46 }
 0x3fa   : > { %v5392_v50 = vpop.permute.xlu0 %5391 }
 0x3fb   : > { %5511 = vst.msk [vmem:[#allocation2 + $0xf0] sm:$0xff] %vm1626_vm10, %v5392_v50 }
 0x3fc   : > { %5156 = vrot.lane.b32.xlu1 %v15387_v25, %s9348_s19  ;;  %5158 = vrot.lane.b32.xlu0 %v15388_v18, %s9348_s19 }
 0x3fd   : > { %v13381_v22 = vpop.f32.mrb[64].mxu1 }
 0x3fe   : > { %v6140_v29 = vpop.permute.xlu1 %6139  ;;  %v3365_v48 = vpop.f32.mrb[65].mxu1 }
 0x3ff   : > { %6255 = vst.msk [vmem:[#allocation2 + $0xb0] sm:$0xff] %vm1626_vm10, %v6140_v29  ;;  %v13390_v24 = vpop.f32.mrb[66].mxu1  ;;  %v13429_v29 = vpop.f32.mrb[190].mxu0  ;;  %v15394_v48 = vld [vmem:[#allocation67_spill] sm:$0xff] }
 0x400   : > { %6159 = vrot.lane.b32.xlu1 %v15389_v51, %s9349_s22  ;;  %6161 = vrot.lane.b32.xlu0 %v12823_v1, %s9349_s22  ;;  %v6142_v57 = vpop.permute.xlu0 %6141  ;;  %v3368_v13 = vpop.f32.mrb[67].mxu1 }
 0x401   : > { %6256 = vst.msk [vmem:[#allocation2 + $0xc8] sm:$0xff] %vm1626_vm10, %v6142_v57  ;;  %v3613_v13 = vld [vmem:[%s9476_s18 + $0x8] sm:$0xe] }
 0x403   : > { %v6385_v36 = vpop.permute.xlu1 %6384 }
 0x404   : > { %5405 = vrot.lane.b32.xlu1 %v15384_v35, %s9349_s22  ;;  %5407 = vrot.lane.b32.xlu0 %v15386_v6, %s9349_s22  ;;  %6500 = vst.msk [vmem:[#allocation2 + $0xb0] sm:$0xff] %vm1797_vm11, %v6385_v36  ;;  %v6387_v2 = vpop.permute.xlu0 %6386 }
 0x405   : > { %6501 = vst.msk [vmem:[#allocation2 + $0xc8] sm:$0xff] %vm1797_vm11, %v6387_v2 }
 0x407   : > { %v5976_v35 = vpop.permute.xlu1 %5975 }
 0x408   : > { %6404 = vrot.lane.b32.xlu1 %v15390_v38, %s9350_s20  ;;  %6406 = vrot.lane.b32.xlu0 %v15391_v3, %s9350_s20  ;;  %6091 = vst.msk [vmem:[#allocation2 + $0xe0] sm:$0xff] %vm1373_vm9, %v5976_v35  ;;  %v5978_v6 = vpop.permute.xlu0 %5977  ;;  %v8589_v3 = vld [vmem:[%s9476_s18 + $0x10] sm:$0xff]  }
 0x409   : > { %6092 = vst.msk [vmem:[#allocation2 + $0xf8] sm:$0xff] %vm1373_vm9, %v5978_v6  ;;  %v3614_v6 = vld [vmem:[%s9476_s18 + $0xc] sm:$0xf] }
 0x40b   : > { %v5562_v31 = vpop.permute.xlu1 %5561 }
 0x40c   : > { %4895 = vperm.xlu1 %9174, %v4712_v52   ;;  %4900 = vperm.xlu0 %9173, %v4713_v45   ;;  %5680 = vst.msk [vmem:[#allocation2 + $0xd8] sm:$0xff] %vm1797_vm11, %v5562_v31  ;;  %v4715_v45 = vld [vmem:[%s14946_s1 + $0x130] sm:$0xff] }
 0x40e   : > { %v5564_v47 = vpop.permute.xlu0 %5563 }
 0x40f   : > { %5681 = vst.msk [vmem:[#allocation2 + $0xf0] sm:$0xff] %vm1797_vm11, %v5564_v47 }
 0x410   : > { %5577 = vrot.lane.b32.xlu1 %v12858_v10, %s9350_s20  ;;  %5579 = vrot.lane.b32.xlu0 %v12866_v11, %s9350_s20 }
 0x412   : > { %v5145_v62 = vpop.permute.xlu1 %5144  ;;  %v5147_v39 = vpop.permute.xlu0 %5146 }
 0x413   : > { %5263 = vst.msk [vmem:[#allocation2 + $0x108] sm:$0xff] %vm1373_vm9, %v5145_v62  ;;  %5264 = vst.msk [vmem:[#allocation2 + $0x120] sm:$0xff] %vm1373_vm9, %v5147_v39  ;;  %v13451_v62 = vld [vmem:[%s9476_s18 + $0x18] sm:$0xff]   ;;  %v3364_v39 = vadd.f32 %v13160_v14, %v13381_v22 }
 0x414   : > { %5995 = vrot.lane.b32.xlu1 %v15389_v51, %s9348_s19  ;;  %5997 = vrot.lane.b32.xlu0 %v12823_v1, %s9348_s19  ;;  %v15392_v1 = vld [vmem:[#allocation70_spill] sm:$0xff]  ;;  %v8459_v22 = vunpack.c.l.bf16 %v13451_v62 }
 0x416   : > { %v5394_v21 = vpop.permute.xlu1 %5393  ;;  %v5396_v25 = vpop.permute.xlu0 %5395 }
 0x417   : > { %5512 = vst.msk [vmem:[#allocation2 + $0x108] sm:$0xff] %vm1626_vm10, %v5394_v21  ;;  %5513 = vst.msk [vmem:[#allocation2 + $0x120] sm:$0xff] %vm1626_vm10, %v5396_v25  ;;  %v8455_v25 = vunpack.c.l.bf16 %v8589_v3 }
 0x418   : > { %5160 = vrot.lane.b32.xlu1 %v12873_v26, %s9348_s19  ;;  %5162 = vrot.lane.b32.xlu0 %v12876_v63, %s9348_s19  ;;  %v3371_v26 = vpop.f32.mrb[68].mxu1 }
 0x419   : > { %v3373_v63 = vpop.f32.mrb[69].mxu1  ;;  %v3372_v8 = vadd.f32 %v13160_v14, %v3371_v26  ;;  %v3650_v26 = vunpack.c.l.bf16 %v3613_v13  ;;  %v15396_v13 = vld [vmem:[#allocation68_spill] sm:$0xff] }
 0x41a   : > { %v6144_v18 = vpop.permute.xlu1 %6143  ;;  %v6146_v46 = vpop.permute.xlu0 %6145  ;;  %v3651_v63 = vunpack.c.l.bf16 %v3614_v6 }
 0x41b   : > { %6257 = vst.msk [vmem:[#allocation2 + $0xe0] sm:$0xff] %vm1626_vm10, %v6144_v18  ;;  %6258 = vst.msk [vmem:[#allocation2 + $0xf8] sm:$0xff] %vm1626_vm10, %v6146_v46  ;;  %v3374_v57 = vpop.f32.mrb[70].mxu1  ;;  %v8456_v18 = vunpack.c.h.bf16 %v8589_v3  ;;  %v15395_v3 = vld [vmem:[#allocation69_spill] sm:$0xff]  ;;  %v3974_v6 = vrot.slane %v3650_v26, 3  ;;  %v6701_v26 = vld [vmem:[#allocation2 + $0x98] sm:$0xff] }
 0x41c   : > { %6163 = vrot.lane.b32.xlu1 %v12882_v28, %s9349_s22  ;;  %6165 = vrot.lane.b32.xlu0 %v15392_v1, %s9349_s22  ;;  %v3376_v2 = vpop.f32.mrb[71].mxu1  ;;  %v3375_v46 = vadd.f32 %v13160_v14, %v3374_v57 }
 0x41d   : > { %v8899_v21 = vpop.f32.mrb[72].mxu1 }
 0x41e   : > { %v6389_v50 = vpop.permute.xlu1 %6388  ;;  %v6391_v51 = vpop.permute.xlu0 %6390 }
 0x41f   : > { %6502 = vst.msk [vmem:[#allocation2 + $0xe0] sm:$0xff] %vm1797_vm11, %v6389_v50  ;;  %6503 = vst.msk [vmem:[#allocation2 + $0xf8] sm:$0xff] %vm1797_vm11, %v6391_v51  ;;  %v3549_v50 = vadd.f32 %v8899_v21, %v3372_v8  ;;  %v3540_v51 = vpop.f32.mrb[73].mxu1  ;;  %v8591_v8 = vld [vmem:[%s9476_s18 + $0x20] sm:$0xff]  }
 0x420   : > { %5409 = vrot.lane.b32.xlu1 %v12858_v10, %s9349_s22  ;;  %5411 = vrot.lane.b32.xlu0 %v12866_v11, %s9349_s22  ;;  %v9032_v10 = vpop.f32.mrb[191].mxu0  ;;  %v4714_v11 = vld [vmem:[%s14946_s1 + $0x128] sm:$0xff]  ;;  %v3541_v2 = vadd.f32 %v3540_v51, %v3364_v39  ;;  %v6698_v51 = vld [vmem:[#allocation2 + $0x80] sm:$0xff] }
 0x421   : > { %v13441_v52 = vpop.f32.mrb[192].mxu0 }
 0x422   : > { %v5980_v36 = vpop.permute.xlu1 %5979  ;;  %v5982_v38 = vpop.permute.xlu0 %5981 }
 0x423   : > { %6093 = vst.msk [vmem:[#allocation2 + $0x110] sm:$0xff] %vm1373_vm9, %v5980_v36  ;;  %6094 = vst.msk [vmem:[#allocation2 + $0x128] sm:$0xff] %vm1373_vm9, %v5982_v38  ;;  %v9035_v31 = vpop.f32.mrb[193].mxu0  ;;  %v3367_v36 = vadd.f32 %v13160_v14, %v13390_v24  ;;  %v8900_v38 = vpop.f32.mrb[74].mxu1  ;;  %v3979_v14 = vrot.slane %v8456_v18, 3  ;;  %v3589_v24 = vmax.f32 %v3549_v50, 0.0 }
 0x424   : > { %6408 = vrot.lane.b32.xlu1 %v15393_v43, %s9350_s20  ;;  %6410 = vrot.lane.b32.xlu0 %v15394_v48, %s9350_s20  ;;  %v3552_v10 = vadd.f32 %v8900_v38, %v3375_v46  ;;  %v3543_v48 = vpop.f32.mrb[75].mxu1  ;;  %v3975_v31 = vrot.slane %v3651_v63, 3  ;;  %v13471_v46 = vld [vmem:[%s14952_s7] ss:$0 sm:$0xff]  ;;  %v13477_v63 = vld [vmem:[%s9476_s18 + $0x28] sm:$0xff]  }
 0x426   : > { %v5566_v35 = vpop.permute.xlu1 %5565  ;;  %v5568_v47 = vpop.permute.xlu0 %5567 }
 0x427   : > { %5682 = vst.msk [vmem:[#allocation2 + $0x108] sm:$0xff] %vm1797_vm11, %v5566_v35  ;;  %5683 = vst.msk [vmem:[#allocation2 + $0x120] sm:$0xff] %vm1797_vm11, %v5568_v47  ;;  %v3977_v35 = vrot.slane %v8455_v25, 3  ;;  %v3587_v47 = vmax.f32 %v3541_v2, 0.0  ;;  %v13473_v25 = vrot.slane %v8459_v22, 3  ;;  %v8907_v2 = vpop.f32.mrb[76].mxu1  ;;  %v8464_v22 = vunpack.c.h.bf16 %v8591_v8 }
 0x428   : > { %4905 = vperm.xlu1 %9174, %v4714_v11   ;;  %4910 = vperm.xlu0 %9173, %v4715_v45   ;;  %v3544_v11 = vadd.f32 %v3543_v48, %v3367_v36  ;;  %v3590_v45 = vmax.f32 %v3552_v10, 0.0  ;;  %v3803_v10 = vadd.f32 %v8907_v2, %v13471_v46  ;;  %v3794_v48 = vpop.f32.mrb[77].mxu1 }
 0x429   : > { %v3980_v38 = vsel %vm1840_vm7, %v3977_v35, %v3979_v14 }
 0x42a   : > { %v5149_v43 = vpop.permute.xlu1 %5148  ;;  %v5151_v57 = vpop.permute.xlu0 %5150  ;;  %v3588_v39 = vmax.f32 %v3544_v11, 0.0  ;;  %v3608_v18 = vpack.c.bf16 %v3590_v45, %v3589_v24  ;;  %v8460_v11 = vunpack.c.h.bf16 %v13451_v62  ;;  %v3795_v24 = vadd.f32 %v13471_v46, %v3794_v48  ;;  %v15398_v48 = vld [vmem:[#allocation73_spill] sm:$0xff] }
 0x42b   : > { %5265 = vst.msk [vmem:[#allocation2 + $0x138] sm:$0xff] %vm1373_vm9, %v5149_v43  ;;  %5266 = vst.msk [vmem:[#allocation2 + $0x150] sm:$0xff] %vm1373_vm9, %v5151_v57  ;;  %v8463_v43 = vunpack.c.l.bf16 %v8591_v8  ;;  %v3976_v57 = vsel %vm1840_vm7, %v3974_v6, %v3975_v31  ;;  %v8908_v45 = vpop.f32.mrb[78].mxu1 }
 0x42c   : > { %5581 = vrot.lane.b32.xlu1 %v15395_v3, %s9350_s20  ;;  %5583 = vrot.lane.b32.xlu0 %v15396_v13, %s9350_s20  ;;  %v3607_v36 = vpack.c.bf16 %v3588_v39, %v3587_v47  ;;  %v6806_v47 = vpack.c.bf16 %v6701_v26, %v6698_v51  ;;  %v8467_v39 = vunpack.c.l.bf16 %v13477_v63  ;;  %v3797_v62 = vpop.f32.mrb[79].mxu1  ;;  %v4083_v2 = vadd.f32 %v3976_v57, %v3795_v24  ;;  %v15397_v51 = vld [vmem:[#allocation72_spill] sm:$0xff] }
 0x42d   : > { %v3985_v26 = vrot.slane %v8463_v43, 3 }
 0x42e   : > { %v5398_v21 = vpop.permute.xlu1 %5397  ;;  %v5400_v50 = vpop.permute.xlu0 %5399  ;;  %8937 = vmatprep.mubr.msk.bf16.mxu1 %vm1079_vm1, %v3607_v36  ;;  %v3987_v36 = vrot.slane %v8464_v22, 3 }
 0x42f   : > { %5514 = vst.msk [vmem:[#allocation2 + $0x138] sm:$0xff] %vm1626_vm10, %v5398_v21  ;;  %5515 = vst.msk [vmem:[#allocation2 + $0x150] sm:$0xff] %vm1626_vm10, %v5400_v50  ;;  %v4085_v21 = vadd.f32 %v3980_v38, %v3803_v10  ;;  %v3978_v50 = vsel %vm1840_vm7, %v3975_v31, %v3977_v35  ;;  %8938 = vmatmul.mubr.msk.bf16.gmra.mrb[108].mxu1 %vm1079_vm1, %v3608_v18  ;;  %v3983_v35 = vrot.slane %v8460_v11, 3  ;;  %v8593_v31 = vld [vmem:[%s9476_s18 + $0x30] sm:$0xff]   ;;  %v4119_v18 = vmax.f32 %v4083_v2, 0.0  ;;  %v6707_v11 = vld [vmem:[#allocation2 + $0xc8] sm:$0xff] }
 0x430   : > { %5999 = vrot.lane.b32.xlu1 %v12882_v28, %s9348_s19  ;;  %6001 = vrot.lane.b32.xlu0 %v15392_v1, %s9348_s19  ;;  %v3982_v28 = vsel %vm1840_vm7, %v3979_v14, %v13473_v25  ;;  %v3806_v1 = vadd.f32 %v8908_v45, %v13471_v46  ;;  %v3798_v14 = vadd.f32 %v13471_v46, %v3797_v62  ;;  %v13508_v45 = vrot.slane %v8467_v39, 3  ;;  %v15399_v62 = vld [vmem:[#allocation22_spill] sm:$0xff] }
 0x431   : > { %7096 = vmatprep.mubr.bf16.mxu1 %v6806_v47  ;;  %v4121_v38 = vmax.f32 %v4085_v21, 0.0  ;;  %v6700_v47 = vld [vmem:[#allocation2 + $0x90] sm:$0xff]  ;;  %v13516_v21 = vld [vmem:[%s9476_s18 + $0x38] sm:$0xff]   ;;  %4155 = vst [vmem:[%s13511_s10] sm:$0xff] %v4119_v18  ;;  %v8472_v2 = vunpack.c.h.bf16 %v8593_v31  ;;  %v8468_v18 = vunpack.c.h.bf16 %v13477_v63  ;;  %v3986_v63 = vsel %vm1840_vm7, %v3983_v35, %v3985_v26 }
 0x432   : > { %v6148_v8 = vpop.permute.xlu1 %6147  ;;  %v6150_v6 = vpop.permute.xlu0 %6149  ;;  %v4086_v10 = vadd.f32 %v3982_v28, %v3806_v1  ;;  %v4084_v57 = vadd.f32 %v3978_v50, %v3798_v14  ;;  %v6704_v28 = vld [vmem:[#allocation2 + $0xb0] sm:$0xff]  ;;  %v8471_v50 = vunpack.c.l.bf16 %v8593_v31  ;;  %v3990_v31 = vsel %vm1840_vm7, %v3987_v36, %v13508_v45 }
 0x433   : > { %6259 = vst.msk [vmem:[#allocation2 + $0x110] sm:$0xff] %vm1626_vm10, %v6148_v8  ;;  %6260 = vst.msk [vmem:[#allocation2 + $0x128] sm:$0xff] %vm1626_vm10, %v6150_v6  ;;  %v6697_v8 = vld [vmem:[#allocation2 + $0x78] sm:$0xff]  ;;  %v8911_v1 = vpop.f32.mrb[80].mxu1  ;;  %v3988_v6 = vsel %vm1840_vm7, %v3985_v26, %v3987_v36  ;;  %v3991_v26 = vrot.slane %v8468_v18, 3 }
 0x434   : > { %5164 = vrot.lane.b32.xlu1 %v15397_v51, %s9348_s19  ;;  %5166 = vrot.lane.b32.xlu0 %v15398_v48, %s9348_s19  ;;  %4157 = vst [vmem:[%s13511_s10 + $0xe] sm:$0xfc] %v4121_v38  ;;  %v4122_v43 = vmax.f32 %v4086_v10, 0.0  ;;  %v4120_v39 = vmax.f32 %v4084_v57, 0.0  ;;  %v3819_v14 = vadd.f32 %v8911_v1, %v13471_v46  ;;  %v15400_v51 = vld [vmem:[#allocation29_spill] sm:$0xff]  ;;  %v3810_v38 = vpop.f32.mrb[81].mxu1  ;;  %v3984_v10 = vsel %vm1840_vm7, %v13473_v25, %v3983_v35 }
 0x435   : > { %v6805_v48 = vpack.c.bf16 %v6700_v47, %v6697_v8  ;;  %v3811_v57 = vadd.f32 %v13471_v46, %v3810_v38  ;;  %v8475_v1 = vunpack.c.l.bf16 %v13516_v21  ;;  %v8595_v35 = vld [vmem:[%s9476_s18 + $0x40] sm:$0xff]   ;;  %v6713_v18 = vld [vmem:[#allocation2 + $0xf8] sm:$0xff] }
 0x436   : > { %v6393_v24 = vpop.permute.xlu1 %6392  ;;  %v6395_v22 = vpop.permute.xlu0 %6394  ;;  %4158 = vst [vmem:[%s13511_s10 + $0x16] sm:$0xff] %v4122_v43  ;;  %4156 = vst [vmem:[%s13511_s10 + $0x8] sm:$0xff] %v4120_v39  ;;  %v4089_v15 = vadd.f32 %v3988_v6, %v3819_v14 }
 0x437   : > { %6504 = vst.msk [vmem:[#allocation2 + $0x110] sm:$0xff] %vm1797_vm11, %v6393_v24  ;;  %6505 = vst.msk [vmem:[#allocation2 + $0x128] sm:$0xff] %vm1797_vm11, %v6395_v22  ;;  %v8912_v24 = vpop.f32.mrb[82].mxu1  ;;  %v6809_v22 = vpack.c.bf16 %v6707_v11, %v6704_v28  ;;  %7097 = vmatmul.mubr.bf16.vlgmr.msra.gmra.mrb[112].mxu1 %v6805_v48  ;;  %v4087_v47 = vadd.f32 %v3984_v10, %v3811_v57  ;;  %v3993_v28 = vrot.slane %v8471_v50, 3  ;;  %v3995_v11 = vrot.slane %v8472_v2, 3  ;;  %v13545_v14 = vpop.f32.mrb[194].mxu0 }
 0x438   : > { %6167 = vrot.lane.b32.xlu1 %v15399_v62, %s9349_s22  ;;  %6169 = vrot.lane.b32.xlu0 %v15400_v51, %s9349_s22  ;;  %v3822_v61 = vadd.f32 %v8912_v24, %v13471_v46  ;;  %v3813_v8 = vpop.f32.mrb[83].mxu1  ;;  %v4125_v39 = vmax.f32 %v4089_v15, 0.0  ;;  %v6703_v50 = vld [vmem:[#allocation2 + $0xa8] sm:$0xff]  ;;  %v6706_v57 = vld [vmem:[#allocation2 + $0xc0] sm:$0xff]  ;;  %v9036_v2 = vpop.f32.mrb[195].mxu0 }
 0x439   : > { %v3814_v36 = vadd.f32 %v13471_v46, %v3813_v8  ;;  %7104 = vmatprep.mubr.bf16.mxu1 %v6809_v22  ;;  %v4123_v38 = vmax.f32 %v4087_v47, 0.0  ;;  %v13553_v24 = vld [vmem:[%s9476_s18 + $0x48] sm:$0xff]   ;;  %v3996_v22 = vsel %vm1840_vm7, %v3993_v28, %v3995_v11  ;;  %v8480_v8 = vunpack.c.h.bf16 %v8595_v35  ;;  %v15402_v47 = vld [vmem:[#allocation30_spill] sm:$0xff] }
 0x43a   : > { %v5984_v43 = vpop.permute.xlu1 %5983  ;;  %v5986_v25 = vpop.permute.xlu0 %5985  ;;  %v4090_v6 = vadd.f32 %v3990_v31, %v3822_v61  ;;  %4162 = vst [vmem:[%s13511_s10 + $0x2c] sm:$0xf] %v4125_v39  ;;  %4163 = vst [vmem:[%s13511_s10 + $0x2a] sm:$0xc0] %v4125_v39  ;;  %v3992_v39 = vsel %vm1840_vm7, %v13508_v45, %v3991_v26  ;;  %v4717_v45 = vld [vmem:[%s14946_s1 + $0x140] sm:$0xf] }
 0x43b   : > { %6095 = vst.msk [vmem:[#allocation2 + $0x140] sm:$0xff] %vm1373_vm9, %v5984_v43  ;;  %6096 = vst.msk [vmem:[#allocation2 + $0x158] sm:$0xff] %vm1373_vm9, %v5986_v25  ;;  %v4088_v10 = vadd.f32 %v3986_v63, %v3814_v36  ;;  %v8915_v43 = vpop.f32.mrb[84].mxu1  ;;  %v8479_v25 = vunpack.c.l.bf16 %v8595_v35 }
 0x43c   : > { %5413 = vrot.lane.b32.xlu1 %v15395_v3, %s9349_s22  ;;  %5415 = vrot.lane.b32.xlu0 %v15396_v13, %s9349_s22  ;;  %v13547_v3 = vrot.slane %v8475_v1, 3  ;;  %v4126_v61 = vmax.f32 %v4090_v6, 0.0  ;;  %v6710_v13 = vld [vmem:[#allocation2 + $0xe0] sm:$0xff]  ;;  %4159 = vst [vmem:[%s13511_s10 + $0x1e] sm:$0x3] %v4123_v38  ;;  %v15401_v1 = vld [vmem:[#allocation42_spill] sm:$0xff]  ;;  %v3835_v63 = vadd.f32 %v8915_v43, %v13471_v46  ;;  %v6808_v6 = vpack.c.bf16 %v6706_v57, %v6703_v50 }
 0x43d   : > { %4160 = vst [vmem:[%s13511_s10 + $0x1c] sm:$0xf0] %v4123_v38  ;;  %v4124_v31 = vmax.f32 %v4088_v10, 0.0  ;;  %v3826_v36 = vpop.f32.mrb[85].mxu1  ;;  %v4716_v38 = vld [vmem:[%s14946_s1 + $0x138] sm:$0xff]  ;;  %v8476_v10 = vunpack.c.h.bf16 %v13516_v21  ;;  %v6812_v43 = vpack.c.bf16 %v6713_v18, %v6710_v13  ;;  %v8483_v50 = vunpack.c.l.bf16 %v13553_v24 }
 0x43e   : > { %v6152_v48 = vpop.permute.xlu1 %6151  ;;  %v6154_v15 = vpop.permute.xlu0 %6153  ;;  %4164 = vst [vmem:[%s13511_s10 + $0x32] sm:$0xff] %v4126_v61  ;;  %v3827_v35 = vadd.f32 %v13471_v46, %v3826_v36  ;;  %v3998_v61 = vsel %vm1840_vm7, %v3995_v11, %v13547_v3  ;;  %v4093_v57 = vadd.f32 %v3996_v22, %v3835_v63  ;;  %v4001_v18 = vrot.slane %v8479_v25, 3 }
 0x43f   : > { %6261 = vst.msk [vmem:[#allocation2 + $0x140] sm:$0xff] %vm1626_vm10, %v6152_v48  ;;  %6262 = vst.msk [vmem:[#allocation2 + $0x158] sm:$0xff] %vm1626_vm10, %v6154_v15  ;;  %v13571_v48 = vpop.f32.mrb[196].mxu0  ;;  %v8916_v2 = vpop.f32.mrb[86].mxu1  ;;  %7105 = vmatmul.mubr.bf16.gmra.mrb[116].mxu1 %v6808_v6  ;;  %v4003_v22 = vrot.slane %v8480_v8, 3  ;;  %v13587_v6 = vrot.slane %v8483_v50, 3  ;;  %v8487_v50 = vunpack.c.l.bf16 %v8597_v7 }
 0x440   : > { %6412 = vrot.lane.b32.xlu1 %v15401_v1, %s9350_s20  ;;  %6414 = vrot.lane.b32.xlu0 %v15402_v47, %s9350_s20  ;;  %4161 = vst [vmem:[%s13511_s10 + $0x24] sm:$0xff] %v4124_v31  ;;  %v3838_v21 = vadd.f32 %v8916_v2, %v13471_v46  ;;  %v3829_v1 = vpop.f32.mrb[87].mxu1  ;;  %v3994_v47 = vsel %vm1840_vm7, %v3991_v26, %v3993_v28  ;;  %v9039_v63 = vpop.f32.mrb[197].mxu0  ;;  %v4129_v36 = vmax.f32 %v4093_v57, 0.0  ;;  %v6716_v8 = vld [vmem:[#allocation2 + $0x110] sm:$0xff]  ;;  %v13591_v57 = vld [vmem:[%s9476_s18 + $0x58] sm:$0xff]  }
 0x441   : > { %v4091_v11 = vadd.f32 %v3992_v39, %v3827_v35  ;;  %v3830_v13 = vadd.f32 %v13471_v46, %v3829_v1  ;;  %7112 = vmatprep.mubr.bf16.mxu1 %v6812_v43  ;;  %v4633_v28 = vpop.f32.mrb[198].mxu0  ;;  %v6709_v35 = vld [vmem:[#allocation2 + $0xd8] sm:$0xff]  ;;  %v6712_v43 = vld [vmem:[#allocation2 + $0xf0] sm:$0xff]  ;;  %v8488_v1 = vunpack.c.h.bf16 %v8597_v7  ;;  %v4006_v7 = vsel %vm1840_vm7, %v4003_v22, %v13587_v6 }
 0x442   : > { %v6397_v15 = vpop.permute.xlu1 %6396  ;;  %v6399_v31 = vpop.permute.xlu0 %6398  ;;  %v4094_v2 = vadd.f32 %v3998_v61, %v3838_v21  ;;  %4167 = vst [vmem:[%s13511_s10 + $0x48] sm:$0xff] %v4129_v36  ;;  %v15403_v21 = vld [vmem:[#allocation32_spill] sm:$0xff]  ;;  %v6811_v36 = vpack.c.bf16 %v6712_v43, %v6709_v35  ;;  %v4009_v43 = vrot.slane %v8487_v50, 3 }
 0x443   : > { %6506 = vst.msk [vmem:[#allocation2 + $0x140] sm:$0xff] %vm1797_vm11, %v6397_v15  ;;  %6507 = vst.msk [vmem:[#allocation2 + $0x158] sm:$0xff] %vm1797_vm11, %v6399_v31  ;;  %v3999_v15 = vrot.slane %v8476_v10, 3  ;;  %v4127_v26 = vmax.f32 %v4091_v11, 0.0  ;;  %v4092_v39 = vadd.f32 %v3994_v47, %v3830_v13  ;;  %v6719_v31 = vld [vmem:[#allocation2 + $0x128] sm:$0xff]  ;;  %v8919_v10 = vpop.f32.mrb[88].mxu1 }
 0x444   : > { %4915 = vperm.xlu1 %9174, %v4716_v38   ;;  %4920 = vperm.xlu0 %9173, %v4717_v45   ;;  %v9040_v38 = vpop.f32.mrb[199].mxu0  ;;  %v4130_v25 = vmax.f32 %v4094_v2, 0.0  ;;  %v4004_v45 = vsel %vm1840_vm7, %v4001_v18, %v4003_v22  ;;  %v3851_v47 = vadd.f32 %v8919_v10, %v13471_v46  ;;  %v15404_v11 = vld [vmem:[#allocation34_spill] sm:$0xff]  ;;  %v3842_v13 = vpop.f32.mrb[89].mxu1  ;;  %v8484_v2 = vunpack.c.h.bf16 %v13553_v24 }
 0x445   : > { %4165 = vst [vmem:[%s13511_s10 + $0x3a] sm:$0x3f] %v4127_v26  ;;  %v4128_v61 = vmax.f32 %v4092_v39, 0.0  ;;  %v4000_v63 = vsel %vm1840_vm7, %v13547_v3, %v3999_v15  ;;  %v3843_v28 = vadd.f32 %v13471_v46, %v3842_v13  ;;  %v8920_v26 = vpop.f32.mrb[90].mxu1  ;;  %v6815_v39 = vpack.c.bf16 %v6719_v31, %v6716_v8  ;;  %v13614_v3 = vld [vmem:[%s14948_s3] ss:$0 sm:$0xff] }
 0x446   : > { %4168 = vst [vmem:[%s13511_s10 + $0x4e] sm:$0xfc] %v4130_v25  ;;  %v8491_v38 = vunpack.c.l.bf16 %v13591_v57  ;;  %v4097_v25 = vadd.f32 %v4004_v45, %v3851_v47  ;;  %v3854_v10 = vadd.f32 %v8920_v26, %v13471_v46  ;;  %v3845_v5 = vpop.f32.mrb[91].mxu1  ;;  %v4002_v42 = vsel %vm1840_vm7, %v3999_v15, %v4001_v18  ;;  %v6715_v47 = vld [vmem:[#allocation2 + $0x108] sm:$0xff]  ;;  %v15406_v26 = vld [vmem:[#allocation47_spill] sm:$0xff] }
 0x447   : > { %4166 = vst [vmem:[%s13511_s10 + $0x40] sm:$0xff] %v4128_v61  ;;  %7113 = vmatmul.mubr.bf16.gmra.mrb[120].mxu1 %v6811_v36  ;;  %v4594_v24 = vadd.f32 %v13614_v3, %v13283_v33  ;;  %v4095_v35 = vadd.f32 %v4000_v63, %v3843_v28  ;;  %v3846_v22 = vadd.f32 %v13471_v46, %v3845_v5  ;;  %v4011_v18 = vrot.slane %v8488_v1, 3  ;;  %v8923_v36 = vpop.f32.mrb[92].mxu1 }
 0x448   : > { %5585 = vrot.lane.b32.xlu1 %v15403_v21, %s9350_s20  ;;  %5587 = vrot.lane.b32.xlu0 %v15404_v11, %s9350_s20  ;;  %v4133_v15 = vmax.f32 %v4097_v25, 0.0  ;;  %v4098_v8 = vadd.f32 %v4006_v7, %v3854_v10  ;;  %v4599_v31 = vadd.f32 %v13614_v3, %v13288_v49  ;;  %v4007_v33 = vrot.slane %v8484_v2, 3  ;;  %v15405_v2 = vld [vmem:[#allocation33_spill] sm:$0xff]  ;;  %v3858_v7 = vpop.f32.mrb[93].mxu1 }
 0x449   : > { %7120 = vmatprep.mubr.bf16.mxu1 %v6815_v39  ;;  %v4131_v61 = vmax.f32 %v4095_v35, 0.0  ;;  %v4096_v5 = vadd.f32 %v4002_v42, %v3846_v22  ;;  %v13625_v45 = vrot.slane %v8491_v38, 3  ;;  %v4667_v63 = vmax.f32 %v4594_v24, 0.0  ;;  %v8924_v10 = vpop.f32.mrb[94].mxu1 }
 0x44a   : > { %4172 = vst [vmem:[%s13511_s10 + $0x64] sm:$0xff] %v4133_v15  ;;  %v4134_v50 = vmax.f32 %v4098_v8, 0.0  ;;  %v6722_v1 = vld [vmem:[#allocation2 + $0x140] sm:$0xff]  ;;  %v6725_v13 = vld [vmem:[#allocation2 + $0x158] sm:$0xff]  ;;  %v4012_v49 = vsel %vm1840_vm7, %v4009_v43, %v4011_v18  ;;  %v3867_v42 = vadd.f32 %v8923_v36, %v13471_v46  ;;  %v4668_v28 = vmax.f32 %v4599_v31, 0.0  ;;  %v3861_v8 = vpop.f32.mrb[95].mxu1 }
 0x44b   : > { %4169 = vst [vmem:[%s13511_s10 + $0x56] sm:$0xff] %v4131_v61  ;;  %v4008_v39 = vsel %vm1840_vm7, %v13587_v6, %v4007_v33  ;;  %v3859_v25 = vadd.f32 %v13471_v46, %v3858_v7  ;;  %v4014_v24 = vsel %vm1840_vm7, %v4011_v18, %v13625_v45  ;;  %v6818_v35 = vpack.c.bf16 %v6725_v13, %v6722_v1 }
 0x44c   : > { %6003 = vrot.lane.b32.xlu1 %v15399_v62, %s9348_s19  ;;  %6005 = vrot.lane.b32.xlu0 %v15400_v51, %s9348_s19  ;;  %v6718_v62 = vld [vmem:[#allocation2 + $0x120] sm:$0xff]  ;;  %v4132_v51 = vmax.f32 %v4096_v5, 0.0  ;;  %4173 = vst [vmem:[%s13511_s10 + $0x6c] sm:$0xf] %v4134_v50  ;;  %4174 = vst [vmem:[%s13511_s10 + $0x6a] sm:$0xc0] %v4134_v50  ;;  %v4101_v22 = vadd.f32 %v4012_v49, %v3867_v42  ;;  %v3870_v15 = vadd.f32 %v8924_v10, %v13471_v46 }
 0x44d   : > { %v6814_v38 = vpack.c.bf16 %v6718_v62, %v6715_v47  ;;  %v4010_v31 = vsel %vm1840_vm7, %v4007_v33, %v4009_v43  ;;  %v4099_v6 = vadd.f32 %v4008_v39, %v3859_v25  ;;  %v3862_v5 = vadd.f32 %v13471_v46, %v3861_v8  ;;  %v15407_v50 = vld [vmem:[#allocation46_spill] sm:$0xff] }
 0x44e   : > { %4170 = vst [vmem:[%s13511_s10 + $0x5e] sm:$0x3] %v4132_v51  ;;  %4171 = vst [vmem:[%s13511_s10 + $0x5c] sm:$0xf0] %v4132_v51  ;;  %v4137_v18 = vmax.f32 %v4101_v22, 0.0  ;;  %v4102_v1 = vadd.f32 %v4014_v24, %v3870_v15  ;;  %v15408_v51 = vld [vmem:[#allocation50_spill] sm:$0xff] }
 0x44f   : > { %7121 = vmatmul.mubr.bf16.gmra.mrb[124].mxu1 %v6814_v38  ;;  %v4135_v43 = vmax.f32 %v4099_v6, 0.0  ;;  %v4100_v33 = vadd.f32 %v4010_v31, %v3862_v5  ;;  %v15409_v39 = vrot.slane %v12814_v16, 6  ;;  %v15410_v10 = vrot.slane %v12814_v16, 4 }
 0x450   : > { %5168 = vrot.lane.b32.xlu1 %v15405_v2, %s9348_s19  ;;  %5170 = vrot.lane.b32.xlu0 %v15406_v26, %s9348_s19  ;;  %4177 = vst [vmem:[%s13511_s10 + $0x80] sm:$0xff] %v4137_v18  ;;  %v15411_v15 = vrot.slane %v12814_v16, 5 }
 0x451   : > { %7128 = vmatprep.mubr.bf16.mxu1 %v6818_v35  ;;  %4175 = vst [vmem:[%s13511_s10 + $0x72] sm:$0xff] %v4135_v43  ;;  %v4136_v7 = vmax.f32 %v4100_v33, 0.0 }
 0x453   : > { %v4876_v61 = vpop.permute.xlu1 %4875  ;;  %v4881_v62 = vpop.permute.xlu0 %4880  ;;  %4176 = vst [vmem:[%s13511_s10 + $0x7a] sm:$0x3f] %v4136_v7 }
 0x454   : > { %v4954_v47 = vmul.f32 %v4876_v61, %v4667_v63  ;;  %6171 = vrot.lane.b32.xlu1 %v15407_v50, %s9349_s22  ;;  %v13649_v13 = vmul.f32 %v4881_v62, %v4668_v28  ;;  %6173 = vrot.lane.b32.xlu0 %v15408_v51, %s9349_s22  ;;  %v4138_v63 = vmax.f32 %v4102_v1, 0.0  ;;  %v15412_v1 = vrot.slane %v12814_v16, 2 }
 0x456   : > { %v6595_v36 = vrot.slane %v4954_v47, 6  ;;  %4998 = vst.msk [vmem:[#allocation2 + $0x360] sm:$0xff] %vm1079_vm1, %v4954_v47  ;;  %v5941_v49 = vrot.slane %v4954_v47, 4  ;;  %v6597_v2 = vrot.slane %v13649_v13, 6  ;;  %4999 = vst.msk [vmem:[#allocation2 + $0x378] sm:$0xff] %vm1079_vm1, %v13649_v13  ;;  %v5943_v28 = vrot.slane %v13649_v13, 4 }
 0x457   : > { %v5570_v42 = vpop.permute.xlu1 %5569  ;;  %v6350_v26 = vrot.slane %v4954_v47, 5  ;;  %v5572_v25 = vpop.permute.xlu0 %5571  ;;  %v6352_v35 = vrot.slane %v13649_v13, 5  ;;  %4178 = vst [vmem:[%s13511_s10 + $0x88] sm:$0xff] %v4138_v63  ;;  %v5359_v61 = vrot.slane %v4954_v47, 2  ;;  %v5110_v5 = vrot.slane %v4954_v47, 1 }
 0x458   : > { %v6596_v38 = vsel %vm2668_vm2, %v15409_v39, %v6595_v36  ;;  %5684 = vst.msk [vmem:[#allocation2 + $0x138] sm:$0xff] %vm1797_vm11, %v5570_v42  ;;  %5417 = vrot.lane.b32.xlu1 %v15403_v21, %s9349_s22  ;;  %v13669_v24 = vsel %vm2008_vm5, %v15410_v10, %v5941_v49  ;;  %v6598_v22 = vsel %vm2668_vm2, %v6595_v36, %v6597_v2  ;;  %5685 = vst.msk [vmem:[#allocation2 + $0x150] sm:$0xff] %vm1797_vm11, %v5572_v25  ;;  %v15415_v25 = vld [vmem:[#allocation48_spill] sm:$0xff] }
 0x459   : > { %6687 = vst.msk [vmem:[#allocation2 + $0x2f8] sm:$0xff] %vm1079_vm1, %v6596_v38  ;;  %5419 = vrot.lane.b32.xlu0 %v15404_v11, %s9349_s22  ;;  %v13683_v21 = vsel %vm2008_vm5, %v5941_v49, %v5943_v28  ;;  %v13688_v8 = vsel %vm2420_vm6, %v15411_v15, %v6350_v26  ;;  %6688 = vst.msk [vmem:[#allocation2 + $0x310] sm:$0xff] %vm1079_vm1, %v6598_v22  ;;  %v13695_v31 = vsel %vm2420_vm6, %v6350_v26, %v6352_v35 }
 0x45a   : > { %v5361_v11 = vrot.slane %v13649_v13, 2  ;;  %v5112_v62 = vrot.slane %v13649_v13, 1  ;;  %v13705_v43 = vsel %vm1416_vm4, %v15412_v1, %v5359_v61  ;;  %v5776_v36 = vrot.slane %v4954_v47, 3 }
 0x45b   : > { %v5988_v6 = vpop.permute.xlu1 %5987  ;;  %v5990_v18 = vpop.permute.xlu0 %5989  ;;  %v15413_v49 = vrot.slane %v12814_v16, 1  ;;  %v5778_v42 = vrot.slane %v13649_v13, 3  ;;  %v15414_v26 = vrot.slane %v12814_v16, 3 }
 0x45c   : > { %6097 = vst.msk [vmem:[#allocation2 + $0x170] sm:$0xff] %vm1373_vm9, %v5988_v6  ;;  %6416 = vrot.lane.b32.xlu1 %v12996_v55, %s9350_s20  ;;  %v13710_v33 = vsel %vm1416_vm4, %v5359_v61, %v5361_v11  ;;  %6098 = vst.msk [vmem:[#allocation2 + $0x188] sm:$0xff] %vm1373_vm9, %v5990_v18  ;;  %v13723_v63 = vsel %vm1163_vm3, %v5110_v5, %v5112_v62 }
 0x45d   : > { %6418 = vrot.lane.b32.xlu0 %v12999_v60, %s9350_s20  ;;  %v13718_v55 = vsel %vm1163_vm3, %v15413_v49, %v5110_v5  ;;  %v5777_v47 = vsel %vm1840_vm7, %v15414_v26, %v5776_v36  ;;  %v5779_v60 = vsel %vm1840_vm7, %v5776_v36, %v5778_v42  ;;  %v4602_v5 = vadd.f32 %v13614_v3, %v13324_v30  ;;  %v15416_v36 = vld [vmem:[#allocation51_spill] sm:$0xff]  ;;  %v8599_v49 = vld [vmem:[%s9476_s18 + $0x60] sm:$0xff]  }
 0x45e   : > { %5869 = vst.msk [vmem:[#allocation2 + $0x320] sm:$0xff] %vm1079_vm1, %v5777_v47  ;;  %5870 = vst.msk [vmem:[#allocation2 + $0x338] sm:$0xff] %vm1079_vm1, %v5779_v60  ;;  %v15417_v30 = vld [vmem:[#allocation55_spill] sm:$0xff]  ;;  %v8492_v60 = vunpack.c.h.bf16 %v13591_v57 }
 0x45f   : > { %v5153_v7 = vpop.permute.xlu1 %5152  ;;  %v6721_v39 = vld [vmem:[#allocation2 + $0x138] sm:$0xff]  ;;  %v5155_v38 = vpop.permute.xlu0 %5154  ;;  %v6724_v10 = vld [vmem:[#allocation2 + $0x150] sm:$0xff]  ;;  %v4669_v18 = vmax.f32 %v4602_v5, 0.0 }
 0x460   : > { %5267 = vst.msk [vmem:[#allocation2 + $0x168] sm:$0xff] %vm1373_vm9, %v5153_v7  ;;  %5589 = vrot.lane.b32.xlu1 %v15415_v25, %s9350_s20  ;;  %5268 = vst.msk [vmem:[#allocation2 + $0x180] sm:$0xff] %vm1373_vm9, %v5155_v38  ;;  %v6817_v16 = vpack.c.bf16 %v6724_v10, %v6721_v39  ;;  %v8495_v7 = vunpack.c.l.bf16 %v8599_v49  ;;  %v8496_v39 = vunpack.c.h.bf16 %v8599_v49 }
 0x461   : > { %5591 = vrot.lane.b32.xlu0 %v13008_v41, %s9350_s20 }
 0x462   : > { %7129 = vmatmul.mubr.bf16.gmra.mrb[128].mxu1 %v6817_v16 }
 0x463   : > { %v6156_v22 = vpop.permute.xlu1 %6155  ;;  %v6158_v15 = vpop.permute.xlu0 %6157 }
 0x464   : > { %6263 = vst.msk [vmem:[#allocation2 + $0x170] sm:$0xff] %vm1626_vm10, %v6156_v22  ;;  %6007 = vrot.lane.b32.xlu1 %v15407_v50, %s9348_s19  ;;  %6264 = vst.msk [vmem:[#allocation2 + $0x188] sm:$0xff] %vm1626_vm10, %v6158_v15  ;;  %v4607_v50 = vadd.f32 %v13614_v3, %v13335_v37 }
 0x465   : > { %6009 = vrot.lane.b32.xlu0 %v15408_v51, %s9348_s19 }
 0x467   : > { %v5402_v61 = vpop.permute.xlu1 %5401  ;;  %v5404_v6 = vpop.permute.xlu0 %5403 }
 0x468   : > { %5516 = vst.msk [vmem:[#allocation2 + $0x168] sm:$0xff] %vm1626_vm10, %v5402_v61  ;;  %5172 = vrot.lane.b32.xlu1 %v13023_v0, %s9348_s19  ;;  %5517 = vst.msk [vmem:[#allocation2 + $0x180] sm:$0xff] %vm1626_vm10, %v5404_v6  ;;  %v4670_v0 = vmax.f32 %v4607_v50, 0.0 }
 0x469   : > { %5174 = vrot.lane.b32.xlu0 %v13029_v53, %s9348_s19 }
 0x46b   : > { %v6401_v51 = vpop.permute.xlu1 %6400  ;;  %v6403_v1 = vpop.permute.xlu0 %6402 }
 0x46c   : > { %6508 = vst.msk [vmem:[#allocation2 + $0x170] sm:$0xff] %vm1797_vm11, %v6401_v51  ;;  %6175 = vrot.lane.b32.xlu1 %v15416_v36, %s9349_s22  ;;  %6509 = vst.msk [vmem:[#allocation2 + $0x188] sm:$0xff] %vm1797_vm11, %v6403_v1 }
 0x46d   : > { %6177 = vrot.lane.b32.xlu0 %v15417_v30, %s9349_s22 }
 0x46f   : > { %v4886_v26 = vpop.permute.xlu1 %4885  ;;  %v4891_v47 = vpop.permute.xlu0 %4890 }
 0x470   : > { %v4956_v53 = vmul.f32 %v4886_v26, %v4669_v18  ;;  %5421 = vrot.lane.b32.xlu1 %v15415_v25, %s9349_s22  ;;  %v13765_v37 = vmul.f32 %v4891_v47, %v4670_v0  ;;  %v13784_v18 = vld [vmem:[%s9476_s18 + $0x68] sm:$0xff]  }
 0x471   : > { %5423 = vrot.lane.b32.xlu0 %v13008_v41, %s9349_s22 }
 0x472   : > { %v6599_v38 = vrot.slane %v4956_v53, 6  ;;  %5000 = vst.msk [vmem:[#allocation2 + $0x390] sm:$0xff] %vm1079_vm1, %v4956_v53  ;;  %v5945_v10 = vrot.slane %v4956_v53, 4  ;;  %v6354_v16 = vrot.slane %v4956_v53, 5  ;;  %v5363_v22 = vrot.slane %v4956_v53, 2  ;;  %5001 = vst.msk [vmem:[#allocation2 + $0x3a8] sm:$0xff] %vm1079_vm1, %v13765_v37 }
 0x473   : > { %v6601_v15 = vrot.slane %v13765_v37, 6  ;;  %v5574_v25 = vpop.permute.xlu1 %5573  ;;  %v6728_v61 = vld [vmem:[#allocation2 + $0x170] sm:$0xff]  ;;  %v5947_v41 = vrot.slane %v13765_v37, 4  ;;  %v6356_v6 = vrot.slane %v13765_v37, 5  ;;  %v5365_v57 = vrot.slane %v13765_v37, 2  ;;  %v5576_v50 = vpop.permute.xlu0 %5575  ;;  %v6731_v51 = vld [vmem:[#allocation2 + $0x188] sm:$0xff] }
 0x474   : > { %v6600_v5 = vsel %vm2668_vm2, %v6597_v2, %v6599_v38  ;;  %5686 = vst.msk [vmem:[#allocation2 + $0x168] sm:$0xff] %vm1797_vm11, %v5574_v25  ;;  %6420 = vrot.lane.b32.xlu1 %v13038_v54, %s9350_s20  ;;  %v13789_v1 = vsel %vm2008_vm5, %v5943_v28, %v5945_v10  ;;  %v13794_v0 = vsel %vm2420_vm6, %v6352_v35, %v6354_v16  ;;  %5687 = vst.msk [vmem:[#allocation2 + $0x180] sm:$0xff] %vm1797_vm11, %v5576_v50 }
 0x475   : > { %v13799_v2 = vsel %vm1416_vm4, %v5361_v11, %v5363_v22  ;;  %6689 = vst.msk [vmem:[#allocation2 + $0x328] sm:$0xff] %vm1079_vm1, %v6600_v5  ;;  %v6602_v54 = vsel %vm2668_vm2, %v6599_v38, %v6601_v15  ;;  %6422 = vrot.lane.b32.xlu0 %v13041_v27, %s9350_s20  ;;  %v6821_v28 = vpack.c.bf16 %v6731_v51, %v6728_v61  ;;  %v5114_v26 = vrot.slane %v4956_v53, 1 }
 0x476   : > { %v13811_v35 = vsel %vm2008_vm5, %v5945_v10, %v5947_v41  ;;  %v13816_v11 = vsel %vm2420_vm6, %v6354_v16, %v6356_v6  ;;  %6690 = vst.msk [vmem:[#allocation2 + $0x340] sm:$0xff] %vm1079_vm1, %v6602_v54  ;;  %v13822_v49 = vsel %vm1416_vm4, %v5363_v22, %v5365_v57  ;;  %v5116_v27 = vrot.slane %v13765_v37, 1 }
 0x477   : > { %v5780_v47 = vrot.slane %v4956_v53, 3  ;;  %7136 = vmatprep.mubr.bf16.mxu1 %v6821_v28  ;;  %v5992_v38 = vpop.permute.xlu1 %5991  ;;  %v8499_v10 = vunpack.c.l.bf16 %v13784_v18  ;;  %v5782_v25 = vrot.slane %v13765_v37, 3  ;;  %v5994_v16 = vpop.permute.xlu0 %5993  ;;  %v13833_v22 = vsel %vm1163_vm3, %v5112_v62, %v5114_v26 }
 0x478   : > { %6099 = vst.msk [vmem:[#allocation2 + $0x1a0] sm:$0xff] %vm1373_vm9, %v5992_v38  ;;  %5593 = vrot.lane.b32.xlu1 %v13060_v17, %s9350_s20  ;;  %v13838_v53 = vsel %vm1163_vm3, %v5114_v26, %v5116_v27  ;;  %6100 = vst.msk [vmem:[#allocation2 + $0x1b8] sm:$0xff] %vm1373_vm9, %v5994_v16  ;;  %v4017_v5 = vrot.slane %v8495_v7, 3  ;;  %v4019_v50 = vrot.slane %v8496_v39, 3  ;;  %v4015_v51 = vrot.slane %v8492_v60, 3 }
 0x479   : > { %v5781_v61 = vsel %vm1840_vm7, %v5778_v42, %v5780_v47  ;;  %5595 = vrot.lane.b32.xlu0 %v13063_v44, %s9350_s20  ;;  %v5783_v62 = vsel %vm1840_vm7, %v5780_v47, %v5782_v25  ;;  %v13851_v28 = vrot.slane %v8499_v10, 3 }
 0x47a   : > { %5871 = vst.msk [vmem:[#allocation2 + $0x350] sm:$0xff] %vm1079_vm1, %v5781_v61  ;;  %5872 = vst.msk [vmem:[#allocation2 + $0x368] sm:$0xff] %vm1079_vm1, %v5783_v62  ;;  %v4020_v60 = vsel %vm1840_vm7, %v4017_v5, %v4019_v50  ;;  %v4016_v10 = vsel %vm1840_vm7, %v13625_v45, %v4015_v51 }
 0x47b   : > { %v5157_v54 = vpop.permute.xlu1 %5156  ;;  %v6727_v13 = vld [vmem:[#allocation2 + $0x168] sm:$0xff]  ;;  %v5159_v42 = vpop.permute.xlu0 %5158  ;;  %v6730_v7 = vld [vmem:[#allocation2 + $0x180] sm:$0xff]  ;;  %v4022_v62 = vsel %vm1840_vm7, %v4019_v50, %v13851_v28  ;;  %v15418_v50 = vld [vmem:[#allocation19_spill] sm:$0xff] }
 0x47c   : > { %5269 = vst.msk [vmem:[#allocation2 + $0x198] sm:$0xff] %vm1373_vm9, %v5157_v54  ;;  %6011 = vrot.lane.b32.xlu1 %v15416_v36, %s9348_s19  ;;  %5270 = vst.msk [vmem:[#allocation2 + $0x1b0] sm:$0xff] %vm1373_vm9, %v5159_v42  ;;  %v8927_v39 = vpop.f32.mrb[96].mxu1  ;;  %v6820_v26 = vpack.c.bf16 %v6730_v7, %v6727_v13  ;;  %v4018_v42 = vsel %vm1840_vm7, %v4015_v51, %v4017_v5  ;;  %v15419_v51 = vld [vmem:[#allocation20_spill] sm:$0xff] }
 0x47d   : > { %6013 = vrot.lane.b32.xlu0 %v15417_v30, %s9348_s19  ;;  %v3883_v47 = vadd.f32 %v8927_v39, %v13471_v46  ;;  %v3874_v38 = vpop.f32.mrb[97].mxu1 }
 0x47e   : > { %v3875_v16 = vadd.f32 %v13471_v46, %v3874_v38  ;;  %7137 = vmatmul.mubr.bf16.gmra.mrb[132].mxu1 %v6820_v26  ;;  %v8928_v61 = vpop.f32.mrb[98].mxu1 }
 0x47f   : > { %v6160_v36 = vpop.permute.xlu1 %6159  ;;  %v4105_v54 = vadd.f32 %v4020_v60, %v3883_v47  ;;  %v6162_v30 = vpop.permute.xlu0 %6161  ;;  %v3886_v13 = vadd.f32 %v8928_v61, %v13471_v46 }
 0x480   : > { %6265 = vst.msk [vmem:[#allocation2 + $0x1a0] sm:$0xff] %vm1626_vm10, %v6160_v36  ;;  %5176 = vrot.lane.b32.xlu1 %v13066_v9, %s9348_s19  ;;  %v3877_v45 = vpop.f32.mrb[99].mxu1  ;;  %v4103_v7 = vadd.f32 %v4016_v10, %v3875_v16  ;;  %6266 = vst.msk [vmem:[#allocation2 + $0x1b8] sm:$0xff] %vm1626_vm10, %v6162_v30  ;;  %v4610_v10 = vadd.f32 %v13614_v3, %v13378_v19  ;;  %v4615_v16 = vadd.f32 %v13614_v3, %v13397_v4 }
 0x481   : > { %5178 = vrot.lane.b32.xlu0 %v15418_v50, %s9348_s19  ;;  %v3878_v39 = vadd.f32 %v13471_v46, %v3877_v45  ;;  %v4141_v60 = vmax.f32 %v4105_v54, 0.0  ;;  %v4106_v26 = vadd.f32 %v4022_v62, %v3886_v13 }
 0x482   : > { %v4139_v47 = vmax.f32 %v4103_v7, 0.0  ;;  %v4671_v62 = vmax.f32 %v4610_v10, 0.0  ;;  %v4672_v19 = vmax.f32 %v4615_v16, 0.0 }
 0x483   : > { %v4104_v38 = vadd.f32 %v4018_v42, %v3878_v39  ;;  %v5406_v36 = vpop.permute.xlu1 %5405  ;;  %4181 = vst [vmem:[%s13511_s10 + $0x9e] sm:$0x3] %v4141_v60  ;;  %4182 = vst [vmem:[%s13511_s10 + $0x9c] sm:$0xf0] %v4141_v60  ;;  %v4142_v9 = vmax.f32 %v4106_v26, 0.0  ;;  %v5408_v5 = vpop.permute.xlu0 %5407 }
 0x484   : > { %5518 = vst.msk [vmem:[#allocation2 + $0x198] sm:$0xff] %vm1626_vm10, %v5406_v36  ;;  %6179 = vrot.lane.b32.xlu1 %v15419_v51, %s9349_s22  ;;  %4179 = vst [vmem:[%s13511_s10 + $0x8e] sm:$0xfc] %v4139_v47 }
 0x485   : > { %v4140_v46 = vmax.f32 %v4104_v38, 0.0  ;;  %5519 = vst.msk [vmem:[#allocation2 + $0x1b0] sm:$0xff] %vm1626_vm10, %v5408_v5  ;;  %6181 = vrot.lane.b32.xlu0 %v13088_v12, %s9349_s22  ;;  %4183 = vst [vmem:[%s13511_s10 + $0xa4] sm:$0xff] %v4142_v9 }
 0x487   : > { %4180 = vst [vmem:[%s13511_s10 + $0x96] sm:$0xff] %v4140_v46  ;;  %v6405_v61 = vpop.permute.xlu1 %6404  ;;  %v6407_v54 = vpop.permute.xlu0 %6406 }
 0x488   : > { %6510 = vst.msk [vmem:[#allocation2 + $0x1a0] sm:$0xff] %vm1797_vm11, %v6405_v61  ;;  %5425 = vrot.lane.b32.xlu1 %v13060_v17, %s9349_s22  ;;  %6511 = vst.msk [vmem:[#allocation2 + $0x1b8] sm:$0xff] %vm1797_vm11, %v6407_v54  ;;  %v8601_v54 = vld [vmem:[%s9476_s18 + $0x70] sm:$0xff]  }
 0x489   : > { %5427 = vrot.lane.b32.xlu0 %v13063_v44, %s9349_s22 }
 0x48b   : > { %v4896_v30 = vpop.permute.xlu1 %4895  ;;  %v4901_v4 = vpop.permute.xlu0 %4900 }
 0x48c   : > { %v13896_v13 = vmul.f32 %v4896_v30, %v4671_v62  ;;  %6424 = vrot.lane.b32.xlu1 %v13091_v32, %s9350_s20  ;;  %v13900_v45 = vmul.f32 %v4901_v4, %v4672_v19  ;;  %v15421_v4 = vld [vmem:[#allocation87_spill] sm:$0xff] }
 0x48d   : > { %6426 = vrot.lane.b32.xlu0 %v13094_v20, %s9350_s20 }
 0x48e   : > { %v6603_v17 = vrot.slane %v13896_v13, 6  ;;  %5002 = vst.msk [vmem:[#allocation2 + $0x3c0] sm:$0xff] %vm1079_vm1, %v13896_v13  ;;  %v5949_v42 = vrot.slane %v13896_v13, 4  ;;  %v6358_v44 = vrot.slane %v13896_v13, 5  ;;  %v5367_v7 = vrot.slane %v13896_v13, 2 }
 0x48f   : > { %v6605_v50 = vrot.slane %v13900_v45, 6  ;;  %v5578_v39 = vpop.permute.xlu1 %5577  ;;  %v6734_v32 = vld [vmem:[#allocation2 + $0x1a0] sm:$0xff]  ;;  %v5580_v20 = vpop.permute.xlu0 %5579  ;;  %v6737_v26 = vld [vmem:[#allocation2 + $0x1b8] sm:$0xff]  ;;  %v5118_v9 = vrot.slane %v13896_v13, 1  ;;  %v5784_v5 = vrot.slane %v13896_v13, 3  ;;  %v5786_v46 = vrot.slane %v13900_v45, 3 }
 0x490   : > { %v6604_v60 = vsel %vm2668_vm2, %v6601_v15, %v6603_v17  ;;  %5688 = vst.msk [vmem:[#allocation2 + $0x198] sm:$0xff] %vm1797_vm11, %v5578_v39  ;;  %5597 = vrot.lane.b32.xlu1 %v13100_v23, %s9350_s20  ;;  %v13922_v47 = vsel %vm2008_vm5, %v5947_v41, %v5949_v42  ;;  %v13929_v15 = vsel %vm2420_vm6, %v6356_v6, %v6358_v44  ;;  %5689 = vst.msk [vmem:[#allocation2 + $0x1b0] sm:$0xff] %vm1797_vm11, %v5580_v20 }
 0x491   : > { %6691 = vst.msk [vmem:[#allocation2 + $0x358] sm:$0xff] %vm1079_vm1, %v6604_v60  ;;  %v6606_v38 = vsel %vm2668_vm2, %v6603_v17, %v6605_v50  ;;  %5599 = vrot.lane.b32.xlu0 %v13103_v40, %s9350_s20  ;;  %v6824_v41 = vpack.c.bf16 %v6737_v26, %v6734_v32  ;;  %v13944_v6 = vsel %vm1416_vm4, %v5365_v57, %v5367_v7  ;;  %v13981_v17 = vld [vmem:[%s9476_s18 + $0x78] sm:$0xff]   ;;  %v8503_v39 = vunpack.c.l.bf16 %v8601_v54 }
 0x492   : > { %6692 = vst.msk [vmem:[#allocation2 + $0x370] sm:$0xff] %vm1079_vm1, %v6606_v38  ;;  %v13960_v57 = vsel %vm1163_vm3, %v5116_v27, %v5118_v9  ;;  %v5785_v16 = vsel %vm1840_vm7, %v5782_v25, %v5784_v5  ;;  %v15420_v27 = vld [vmem:[#allocation86_spill] sm:$0xff]  ;;  %v8504_v32 = vunpack.c.h.bf16 %v8601_v54  ;;  %v8500_v60 = vunpack.c.h.bf16 %v13784_v18 }
 0x493   : > { %7144 = vmatprep.mubr.bf16.mxu1 %v6824_v41  ;;  %v5996_v36 = vpop.permute.xlu1 %5995  ;;  %v5998_v10 = vpop.permute.xlu0 %5997  ;;  %5873 = vst.msk [vmem:[#allocation2 + $0x380] sm:$0xff] %vm1079_vm1, %v5785_v16  ;;  %v8507_v26 = vunpack.c.l.bf16 %v13981_v17  ;;  %v4618_v41 = vadd.f32 %v13614_v3, %v13429_v29  ;;  %v4623_v18 = vadd.f32 %v13614_v3, %v13441_v52 }
 0x494   : > { %6101 = vst.msk [vmem:[#allocation2 + $0x1d0] sm:$0xff] %vm1373_vm9, %v5996_v36  ;;  %6015 = vrot.lane.b32.xlu1 %v15419_v51, %s9348_s19  ;;  %6102 = vst.msk [vmem:[#allocation2 + $0x1e8] sm:$0xff] %vm1373_vm9, %v5998_v10  ;;  %v5787_v51 = vsel %vm1840_vm7, %v5784_v5, %v5786_v46  ;;  %v4025_v36 = vrot.slane %v8503_v39, 3  ;;  %v4027_v5 = vrot.slane %v8504_v32, 3  ;;  %v9269_v10 = vld [vmem:[%s14949_s4 + $0x80] sm:$0xff]   ;;  %v4023_v16 = vrot.slane %v8500_v60, 3 }
 0x495   : > { %6017 = vrot.lane.b32.xlu0 %v13088_v12, %s9348_s19  ;;  %5874 = vst.msk [vmem:[#allocation2 + $0x398] sm:$0xff] %vm1079_vm1, %v5787_v51  ;;  %9041 = vmatprep.subr.bf16.mxu1 %v9269_v10  ;;  %v4673_v29 = vmax.f32 %v4618_v41, 0.0  ;;  %v4674_v52 = vmax.f32 %v4623_v18, 0.0  ;;  %v15425_v18 = vld [vmem:[#allocation91_spill] sm:$0xff] }
 0x496   : > { %9042 = vmatpush3.bf16.msra.mxu1 %v9269_v10 }
 0x497   : > { %v5161_v61 = vpop.permute.xlu1 %5160  ;;  %v6733_v12 = vld [vmem:[#allocation2 + $0x198] sm:$0xff]  ;;  %v5163_v62 = vpop.permute.xlu0 %5162  ;;  %v6736_v37 = vld [vmem:[#allocation2 + $0x1b0] sm:$0xff] }
 0x498   : > { %5271 = vst.msk [vmem:[#allocation2 + $0x1c8] sm:$0xff] %vm1373_vm9, %v5161_v61  ;;  %5180 = vrot.lane.b32.xlu1 %v13111_v56, %s9348_s19  ;;  %5272 = vst.msk [vmem:[#allocation2 + $0x1e0] sm:$0xff] %vm1373_vm9, %v5163_v62  ;;  %v6823_v25 = vpack.c.bf16 %v6736_v37, %v6733_v12  ;;  %v15422_v56 = vld [vmem:[#allocation88_spill] sm:$0xff]  ;;  %v15424_v12 = vld [vmem:[#allocation90_spill] sm:$0xff]  ;;  %v4028_v37 = vsel %vm1840_vm7, %v4025_v36, %v4027_v5 }
 0x499   : > { %5182 = vrot.lane.b32.xlu0 %v15420_v27, %s9348_s19  ;;  %v14013_v27 = vld [vmem:[%s14952_s7] ss:$0 sm:$0xff] }
 0x49a   : > { %7145 = vmatmul.mubr.bf16.gmra.mrb[136].mxu1 %v6823_v25 }
 0x49b   : > { %v6164_v19 = vpop.permute.xlu1 %6163  ;;  %v6166_v30 = vpop.permute.xlu0 %6165 }
 0x49c   : > { %6267 = vst.msk [vmem:[#allocation2 + $0x1d0] sm:$0xff] %vm1626_vm10, %v6164_v19  ;;  %6183 = vrot.lane.b32.xlu1 %v15421_v4, %s9349_s22  ;;  %6268 = vst.msk [vmem:[#allocation2 + $0x1e8] sm:$0xff] %vm1626_vm10, %v6166_v30  ;;  %v4024_v19 = vsel %vm1840_vm7, %v13851_v28, %v4023_v16  ;;  %v4026_v28 = vsel %vm1840_vm7, %v4023_v16, %v4025_v36 }
 0x49d   : > { %6185 = vrot.lane.b32.xlu0 %v15422_v56, %s9349_s22  ;;  %v8931_v62 = vpop.f32.mrb[100].mxu1 }
 0x49e   : > { %v3899_v25 = vadd.f32 %v14013_v27, %v8931_v62  ;;  %v3890_v54 = vpop.f32.mrb[101].mxu1 }
 0x49f   : > { %v5410_v20 = vpop.permute.xlu1 %5409  ;;  %v5412_v38 = vpop.permute.xlu0 %5411  ;;  %v3891_v30 = vadd.f32 %v14013_v27, %v3890_v54 }
 0x4a0   : > { %5520 = vst.msk [vmem:[#allocation2 + $0x1c8] sm:$0xff] %vm1626_vm10, %v5410_v20  ;;  %5429 = vrot.lane.b32.xlu1 %v13100_v23, %s9349_s22  ;;  %5521 = vst.msk [vmem:[#allocation2 + $0x1e0] sm:$0xff] %vm1626_vm10, %v5412_v38  ;;  %v14001_v23 = vrot.slane %v8507_v26, 3  ;;  %v8932_v32 = vpop.f32.mrb[102].mxu1  ;;  %v4109_v20 = vadd.f32 %v4028_v37, %v3899_v25 }
 0x4a1   : > { %5431 = vrot.lane.b32.xlu0 %v13103_v40, %s9349_s22  ;;  %v15423_v40 = vld [vmem:[#allocation89_spill] sm:$0xff]  ;;  %v3902_v41 = vadd.f32 %v14013_v27, %v8932_v32  ;;  %v3893_v10 = vpop.f32.mrb[103].mxu1 }
 0x4a2   : > { %v4030_v60 = vsel %vm1840_vm7, %v4027_v5, %v14001_v23  ;;  %v3894_v5 = vadd.f32 %v14013_v27, %v3893_v10 }
 0x4a3   : > { %v6409_v51 = vpop.permute.xlu1 %6408  ;;  %v6411_v61 = vpop.permute.xlu0 %6410  ;;  %v4110_v62 = vadd.f32 %v4030_v60, %v3902_v41 }
 0x4a4   : > { %6512 = vst.msk [vmem:[#allocation2 + $0x1d0] sm:$0xff] %vm1797_vm11, %v6409_v51  ;;  %6428 = vrot.lane.b32.xlu1 %v15423_v40, %s9350_s20  ;;  %6513 = vst.msk [vmem:[#allocation2 + $0x1e8] sm:$0xff] %vm1797_vm11, %v6411_v61  ;;  %v4107_v51 = vadd.f32 %v4024_v19, %v3891_v30  ;;  %v15426_v40 = vld [vmem:[#allocation92_spill] sm:$0xff]  ;;  %v4108_v54 = vadd.f32 %v4026_v28, %v3894_v5 }
 0x4a5   : > { %6430 = vrot.lane.b32.xlu0 %v15424_v12, %s9350_s20 }
 0x4a6   : > { %v4143_v37 = vmax.f32 %v4107_v51, 0.0  ;;  %v4144_v60 = vmax.f32 %v4108_v54, 0.0 }
 0x4a7   : > { %v4906_v39 = vpop.permute.xlu1 %4905  ;;  %v4911_v38 = vpop.permute.xlu0 %4910 }
 0x4a8   : > { %v14021_v26 = vmul.f32 %v4906_v39, %v4673_v29  ;;  %5601 = vrot.lane.b32.xlu1 %v15425_v18, %s9350_s20  ;;  %v14027_v61 = vmul.f32 %v4911_v38, %v4674_v52  ;;  %v4145_v29 = vmax.f32 %v4109_v20, 0.0  ;;  %v4146_v52 = vmax.f32 %v4110_v62, 0.0  ;;  %4184 = vst [vmem:[%s13511_s10 + $0xac] sm:$0xf] %v4143_v37  ;;  %4185 = vst [vmem:[%s13511_s10 + $0xaa] sm:$0xc0] %v4143_v37 }
 0x4a9   : > { %5603 = vrot.lane.b32.xlu0 %v15426_v40, %s9350_s20  ;;  %4186 = vst [vmem:[%s13511_s10 + $0xb2] sm:$0xff] %v4144_v60  ;;  %v4626_v37 = vadd.f32 %v13614_v3, %v13545_v14 }
 0x4aa   : > { %v6607_v12 = vrot.slane %v14021_v26, 6  ;;  %v6609_v25 = vrot.slane %v14027_v61, 6  ;;  %4187 = vst [vmem:[%s13511_s10 + $0xba] sm:$0x3f] %v4145_v29  ;;  %4188 = vst [vmem:[%s13511_s10 + $0xc0] sm:$0xff] %v4146_v52  ;;  %v5788_v20 = vrot.slane %v14021_v26, 3 }
 0x4ab   : > { %v5582_v39 = vpop.permute.xlu1 %5581  ;;  %v6740_v36 = vld [vmem:[#allocation2 + $0x1d0] sm:$0xff]  ;;  %v5584_v19 = vpop.permute.xlu0 %5583  ;;  %v6743_v30 = vld [vmem:[#allocation2 + $0x1e8] sm:$0xff]  ;;  %v5790_v38 = vrot.slane %v14027_v61, 3  ;;  %v4675_v54 = vmax.f32 %v4626_v37, 0.0 }
 0x4ac   : > { %v6608_v16 = vsel %vm2668_vm2, %v6605_v50, %v6607_v12  ;;  %5690 = vst.msk [vmem:[#allocation2 + $0x1c8] sm:$0xff] %vm1797_vm11, %v5582_v39  ;;  %6019 = vrot.lane.b32.xlu1 %v15421_v4, %s9348_s19  ;;  %v6610_v32 = vsel %vm2668_vm2, %v6607_v12, %v6609_v25  ;;  %5691 = vst.msk [vmem:[#allocation2 + $0x1e0] sm:$0xff] %vm1797_vm11, %v5584_v19  ;;  %v6827_v50 = vpack.c.bf16 %v6743_v30, %v6740_v36  ;;  %v14105_v52 = vld [vmem:[%s9476_s18 + $0x88] sm:$0xff]  }
 0x4ad   : > { %6693 = vst.msk [vmem:[#allocation2 + $0x388] sm:$0xff] %vm1079_vm1, %v6608_v16  ;;  %6021 = vrot.lane.b32.xlu0 %v15422_v56, %s9348_s19  ;;  %6694 = vst.msk [vmem:[#allocation2 + $0x3a0] sm:$0xff] %vm1079_vm1, %v6610_v32  ;;  %v5789_v56 = vsel %vm1840_vm7, %v5786_v46, %v5788_v20  ;;  %v5791_v10 = vsel %vm1840_vm7, %v5788_v20, %v5790_v38  ;;  %v8508_v20 = vunpack.c.h.bf16 %v13981_v17  ;;  %v15429_v17 = vld [vmem:[#allocation93_spill] sm:$0xff] }
 0x4ae   : > { %7152 = vmatprep.mubr.bf16.mxu1 %v6827_v50  ;;  %5875 = vst.msk [vmem:[#allocation2 + $0x3b0] sm:$0xff] %vm1079_vm1, %v5789_v56  ;;  %5876 = vst.msk [vmem:[#allocation2 + $0x3c8] sm:$0xff] %vm1079_vm1, %v5791_v10  ;;  %v8515_v56 = vunpack.c.l.bf16 %v14105_v52 }
 0x4af   : > { %v6000_v4 = vpop.permute.xlu1 %5999  ;;  %v6002_v41 = vpop.permute.xlu0 %6001 }
 0x4b0   : > { %6103 = vst.msk [vmem:[#allocation2 + $0x200] sm:$0xff] %vm1373_vm9, %v6000_v4  ;;  %5184 = vrot.lane.b32.xlu1 %v13173_v34, %s9348_s19  ;;  %6104 = vst.msk [vmem:[#allocation2 + $0x218] sm:$0xff] %vm1373_vm9, %v6002_v41 }
 0x4b1   : > { %5186 = vrot.lane.b32.xlu0 %v13176_v58, %s9348_s19 }
 0x4b3   : > { %v5165_v28 = vpop.permute.xlu1 %5164  ;;  %v6739_v51 = vld [vmem:[#allocation2 + $0x1c8] sm:$0xff]  ;;  %v5167_v34 = vpop.permute.xlu0 %5166  ;;  %v6742_v5 = vld [vmem:[#allocation2 + $0x1e0] sm:$0xff] }
 0x4b4   : > { %5273 = vst.msk [vmem:[#allocation2 + $0x1f8] sm:$0xff] %vm1373_vm9, %v5165_v28  ;;  %6187 = vrot.lane.b32.xlu1 %v13669_v24, %s9349_s22  ;;  %5274 = vst.msk [vmem:[#allocation2 + $0x210] sm:$0xff] %vm1373_vm9, %v5167_v34  ;;  %v6826_v58 = vpack.c.bf16 %v6742_v5, %v6739_v51  ;;  %v4031_v5 = vrot.slane %v8508_v20, 3 }
 0x4b5   : > { %6189 = vrot.lane.b32.xlu0 %v13683_v21, %s9349_s22 }
 0x4b6   : > { %7153 = vmatmul.mubr.bf16.gmra.mrb[140].mxu1 %v6826_v58 }
 0x4b7   : > { %v6168_v46 = vpop.permute.xlu1 %6167  ;;  %v6170_v29 = vpop.permute.xlu0 %6169 }
 0x4b8   : > { %6269 = vst.msk [vmem:[#allocation2 + $0x200] sm:$0xff] %vm1626_vm10, %v6168_v46  ;;  %5433 = vrot.lane.b32.xlu1 %v15425_v18, %s9349_s22  ;;  %6270 = vst.msk [vmem:[#allocation2 + $0x218] sm:$0xff] %vm1626_vm10, %v6170_v29  ;;  %v4631_v18 = vadd.f32 %v13614_v3, %v13571_v48  ;;  %v14126_v46 = vrot.slane %v8515_v56, 3 }
 0x4b9   : > { %5435 = vrot.lane.b32.xlu0 %v15426_v40, %s9349_s22 }
 0x4ba   : > { %v4676_v14 = vmax.f32 %v4631_v18, 0.0  ;;  %v4032_v18 = vsel %vm1840_vm7, %v14001_v23, %v4031_v5 }
 0x4bb   : > { %v5414_v12 = vpop.permute.xlu1 %5413  ;;  %v5416_v62 = vpop.permute.xlu0 %5415 }
 0x4bc   : > { %5522 = vst.msk [vmem:[#allocation2 + $0x1f8] sm:$0xff] %vm1626_vm10, %v5414_v12  ;;  %6432 = vrot.lane.b32.xlu1 %v13688_v8, %s9350_s20  ;;  %5523 = vst.msk [vmem:[#allocation2 + $0x210] sm:$0xff] %vm1626_vm10, %v5416_v62  ;;  %v15427_v8 = vld [vmem:[#allocation23_spill] sm:$0xff] }
 0x4bd   : > { %6434 = vrot.lane.b32.xlu0 %v13695_v31, %s9350_s20  ;;  %v8603_v31 = vld [vmem:[%s9476_s18 + $0x80] sm:$0xff]  }
 0x4be   : > { %v8511_v30 = vunpack.c.l.bf16 %v8603_v31  ;;  %v8512_v32 = vunpack.c.h.bf16 %v8603_v31 }
 0x4bf   : > { %v6413_v40 = vpop.permute.xlu1 %6412  ;;  %v6415_v39 = vpop.permute.xlu0 %6414 }
 0x4c0   : > { %6514 = vst.msk [vmem:[#allocation2 + $0x200] sm:$0xff] %vm1797_vm11, %v6413_v40  ;;  %5605 = vrot.lane.b32.xlu1 %v13182_v59, %s9350_s20  ;;  %6515 = vst.msk [vmem:[#allocation2 + $0x218] sm:$0xff] %vm1797_vm11, %v6415_v39  ;;  %v4035_v51 = vrot.slane %v8512_v32, 3 }
 0x4c1   : > { %5607 = vrot.lane.b32.xlu0 %v15427_v8, %s9350_s20 }
 0x4c2   : > { %v4038_v31 = vsel %vm1840_vm7, %v4035_v51, %v14126_v46 }
 0x4c3   : > { %v4916_v36 = vpop.permute.xlu1 %4915  ;;  %v4921_v48 = vpop.permute.xlu0 %4920 }
 0x4c4   : > { %v14096_v16 = vmul.f32 %v4916_v36, %v4675_v54  ;;  %6023 = vrot.lane.b32.xlu1 %v13669_v24, %s9348_s19  ;;  %v14100_v3 = vmul.f32 %v4921_v48, %v4676_v14 }
 0x4c5   : > { %6025 = vrot.lane.b32.xlu0 %v13683_v21, %s9348_s19  ;;  %v15428_v21 = vld [vmem:[#allocation25_spill] sm:$0xff] }
 0x4c6   : > { %v6611_v19 = vrot.slane %v14096_v16, 6  ;;  %v6613_v60 = vrot.slane %v14100_v3, 6 }
 0x4c7   : > { %v5586_v50 = vpop.permute.xlu1 %5585  ;;  %v6746_v4 = vld [vmem:[#allocation2 + $0x200] sm:$0xff]  ;;  %v5588_v38 = vpop.permute.xlu0 %5587  ;;  %v6749_v41 = vld [vmem:[#allocation2 + $0x218] sm:$0xff] }
 0x4c8   : > { %v6612_v24 = vsel %vm2668_vm2, %v6609_v25, %v6611_v19  ;;  %5692 = vst.msk [vmem:[#allocation2 + $0x1f8] sm:$0xff] %vm1797_vm11, %v5586_v50  ;;  %5188 = vrot.lane.b32.xlu1 %v15428_v21, %s9348_s19  ;;  %v6614_v10 = vsel %vm2668_vm2, %v6611_v19, %v6613_v60  ;;  %5693 = vst.msk [vmem:[#allocation2 + $0x210] sm:$0xff] %vm1797_vm11, %v5588_v38  ;;  %v6830_v28 = vpack.c.bf16 %v6749_v41, %v6746_v4 }
 0x4c9   : > { %6695 = vst.msk [vmem:[#allocation2 + $0x3b8] sm:$0xff] %vm1079_vm1, %v6612_v24  ;;  %5190 = vrot.lane.b32.xlu0 %v15429_v17, %s9348_s19  ;;  %v4033_v25 = vrot.slane %v8511_v30, 3 }
 0x4ca   : > { %6696 = vst.msk [vmem:[#allocation2 + $0x3d0] sm:$0x3f] %vm2832_vm12, %v6614_v10  ;;  %7160 = vmatprep.mubr.bf16.mxu1 %v6830_v28  ;;  %v8935_v29 = vpop.f32.mrb[104].mxu1 }
 0x4cb   : > { %v6004_v34 = vpop.permute.xlu1 %6003  ;;  %v6006_v58 = vpop.permute.xlu0 %6005  ;;  %v4036_v12 = vsel %vm1840_vm7, %v4033_v25, %v4035_v51  ;;  %v3915_v62 = vadd.f32 %v14013_v27, %v8935_v29  ;;  %v4034_v32 = vsel %vm1840_vm7, %v4031_v5, %v4033_v25  ;;  %v5951_v51 = vrot.slane %v13900_v45, 4 }
 0x4cc   : > { %6105 = vst.msk [vmem:[#allocation2 + $0x230] sm:$0xff] %vm1373_vm9, %v6004_v34  ;;  %6191 = vrot.lane.b32.xlu1 %v13789_v1, %s9349_s22  ;;  %6106 = vst.msk [vmem:[#allocation2 + $0x248] sm:$0xff] %vm1373_vm9, %v6006_v58  ;;  %v3906_v37 = vpop.f32.mrb[105].mxu1 }
 0x4cd   : > { %6193 = vrot.lane.b32.xlu0 %v13811_v35, %s9349_s22  ;;  %v3907_v39 = vadd.f32 %v14013_v27, %v3906_v37  ;;  %v8936_v36 = vpop.f32.mrb[106].mxu1  ;;  %v4113_v19 = vadd.f32 %v4036_v12, %v3915_v62  ;;  %v6360_v37 = vrot.slane %v13900_v45, 5 }
 0x4ce   : > { %v3918_v23 = vadd.f32 %v14013_v27, %v8936_v36  ;;  %v3909_v30 = vpop.f32.mrb[107].mxu1  ;;  %v5953_v36 = vrot.slane %v14021_v26, 4 }
 0x4cf   : > { %v5169_v40 = vpop.permute.xlu1 %5168  ;;  %v6745_v54 = vld [vmem:[#allocation2 + $0x1f8] sm:$0xff]  ;;  %v5171_v14 = vpop.permute.xlu0 %5170  ;;  %v6748_v48 = vld [vmem:[#allocation2 + $0x210] sm:$0xff]  ;;  %v4111_v50 = vadd.f32 %v4032_v18, %v3907_v39  ;;  %v3910_v4 = vadd.f32 %v14013_v27, %v3909_v30  ;;  %v9270_v18 = vld [vmem:[%s14949_s4 + $0x88] sm:$0xff]  }
 0x4d0   : > { %5275 = vst.msk [vmem:[#allocation2 + $0x228] sm:$0xff] %vm1373_vm9, %v5169_v40  ;;  %5437 = vrot.lane.b32.xlu1 %v13182_v59, %s9349_s22  ;;  %5276 = vst.msk [vmem:[#allocation2 + $0x240] sm:$0xff] %vm1373_vm9, %v5171_v14  ;;  %v6829_v60 = vpack.c.bf16 %v6748_v48, %v6745_v54  ;;  %v4149_v59 = vmax.f32 %v4113_v19, 0.0  ;;  %v4114_v20 = vadd.f32 %v4038_v31, %v3918_v23  ;;  %9043 = vmatprep.subr.bf16.mxu1 %v9270_v18  ;;  %v8605_v30 = vld [vmem:[%s9476_s18 + $0x90] sm:$0xff]  }
 0x4d1   : > { %5439 = vrot.lane.b32.xlu0 %v15427_v8, %s9349_s22  ;;  %v4147_v38 = vmax.f32 %v4111_v50, 0.0  ;;  %v4112_v21 = vadd.f32 %v4034_v32, %v3910_v4  ;;  %9044 = vmatpush3.bf16.msra.mxu1 %v9270_v18  ;;  %v5955_v48 = vrot.slane %v14027_v61, 4  ;;  %v14225_v19 = vsel %vm2008_vm5, %v5951_v51, %v5953_v36  ;;  %v3649_v50 = vld [vmem:[%s9476_s18 + $0x98] sm:$0x3] }
 0x4d2   : > { %7161 = vmatmul.mubr.bf16.gmra.mrb[144].mxu1 %v6829_v60  ;;  %4191 = vst [vmem:[%s13511_s10 + $0xd6] sm:$0xff] %v4149_v59  ;;  %v4150_v41 = vmax.f32 %v4114_v20, 0.0  ;;  %v8519_v4 = vunpack.c.l.bf16 %v8605_v30  ;;  %v8520_v59 = vunpack.c.h.bf16 %v8605_v30 }
 0x4d3   : > { %v6172_v24 = vpop.permute.xlu1 %6171  ;;  %v6174_v8 = vpop.permute.xlu0 %6173  ;;  %4189 = vst [vmem:[%s13511_s10 + $0xc8] sm:$0xff] %v4147_v38  ;;  %v4148_v56 = vmax.f32 %v4112_v21, 0.0  ;;  %v6362_v38 = vrot.slane %v14021_v26, 5  ;;  %v8516_v21 = vunpack.c.h.bf16 %v14105_v52 }
 0x4d4   : > { %6271 = vst.msk [vmem:[#allocation2 + $0x230] sm:$0xff] %vm1626_vm10, %v6172_v24  ;;  %6436 = vrot.lane.b32.xlu1 %v13794_v0, %s9350_s20  ;;  %6272 = vst.msk [vmem:[#allocation2 + $0x248] sm:$0xff] %vm1626_vm10, %v6174_v8 }
 0x4d5   : > { %6438 = vrot.lane.b32.xlu0 %v13816_v11, %s9350_s20  ;;  %4192 = vst [vmem:[%s13511_s10 + $0xde] sm:$0x3] %v4150_v41  ;;  %4193 = vst [vmem:[%s13511_s10 + $0xdc] sm:$0xf0] %v4150_v41 }
 0x4d6   : > { %4190 = vst [vmem:[%s13511_s10 + $0xce] sm:$0xfc] %v4148_v56  ;;  %v6364_v56 = vrot.slane %v14027_v61, 5 }
 0x4d7   : > { %v5418_v10 = vpop.permute.xlu1 %5417  ;;  %v5420_v17 = vpop.permute.xlu0 %5419 }
 0x4d8   : > { %5524 = vst.msk [vmem:[#allocation2 + $0x228] sm:$0xff] %vm1626_vm10, %v5418_v10  ;;  %5609 = vrot.lane.b32.xlu1 %v13705_v43, %s9350_s20  ;;  %5525 = vst.msk [vmem:[#allocation2 + $0x240] sm:$0xff] %vm1626_vm10, %v5420_v17  ;;  %v3686_v10 = vunpack.c.l.bf16 %v3649_v50  ;;  %v5959_v50 = vrot.slane %v14100_v3, 4 }
 0x4d9   : > { %5611 = vrot.lane.b32.xlu0 %v13710_v33, %s9350_s20 }
 0x4db   : > { %v6417_v0 = vpop.permute.xlu1 %6416  ;;  %v6419_v11 = vpop.permute.xlu0 %6418 }
 0x4dc   : > { %6516 = vst.msk [vmem:[#allocation2 + $0x230] sm:$0xff] %vm1797_vm11, %v6417_v0  ;;  %6027 = vrot.lane.b32.xlu1 %v13789_v1, %s9348_s19  ;;  %6517 = vst.msk [vmem:[#allocation2 + $0x248] sm:$0xff] %vm1797_vm11, %v6419_v11  ;;  %v4041_v0 = vrot.slane %v8519_v4, 3  ;;  %v4043_v11 = vrot.slane %v8520_v59, 3 }
 0x4dd   : > { %6029 = vrot.lane.b32.xlu0 %v13811_v35, %s9348_s19  ;;  %v5952_v35 = vsel %vm2008_vm5, %v5949_v42, %v5951_v51  ;;  %v6365_v51 = vsel %vm2420_vm6, %v6362_v38, %v6364_v56 }
 0x4df   : > { %v5590_v28 = vpop.permute.xlu1 %5589  ;;  %v5592_v25 = vpop.permute.xlu0 %5591 }
 0x4e0   : > { %5694 = vst.msk [vmem:[#allocation2 + $0x228] sm:$0xff] %vm1797_vm11, %v5590_v28  ;;  %5192 = vrot.lane.b32.xlu1 %v13718_v55, %s9348_s19  ;;  %5695 = vst.msk [vmem:[#allocation2 + $0x240] sm:$0xff] %vm1797_vm11, %v5592_v25  ;;  %v6363_v28 = vsel %vm2420_vm6, %v6360_v37, %v6362_v38  ;;  %v4039_v25 = vrot.slane %v8516_v21, 3 }
 0x4e1   : > { %5194 = vrot.lane.b32.xlu0 %v13723_v63, %s9348_s19 }
 0x4e3   : > { %v6008_v1 = vpop.permute.xlu1 %6007  ;;  %v6752_v34 = vld [vmem:[#allocation2 + $0x230] sm:$0xff]  ;;  %v6010_v5 = vpop.permute.xlu0 %6009  ;;  %v6755_v55 = vld [vmem:[#allocation2 + $0x248] sm:$0xff] }
 0x4e4   : > { %6107 = vst.msk [vmem:[#allocation2 + $0x260] sm:$0xff] %vm1373_vm9, %v6008_v1  ;;  %6195 = vrot.lane.b32.xlu1 %v13922_v47, %s9349_s22  ;;  %6108 = vst.msk [vmem:[#allocation2 + $0x278] sm:$0xff] %vm1373_vm9, %v6010_v5  ;;  %v6833_v58 = vpack.c.bf16 %v6755_v55, %v6752_v34  ;;  %v5369_v1 = vrot.slane %v13900_v45, 2  ;;  %v4044_v5 = vsel %vm1840_vm7, %v4041_v0, %v4043_v11 }
 0x4e5   : > { %6197 = vrot.lane.b32.xlu0 %v5952_v35, %s9349_s22 }
 0x4e6   : > { %7168 = vmatprep.mubr.bf16.mxu1 %v6833_v58  ;;  %v4040_v58 = vsel %vm1840_vm7, %v14126_v46, %v4039_v25 }
 0x4e7   : > { %v5173_v63 = vpop.permute.xlu1 %5172  ;;  %v6751_v29 = vld [vmem:[#allocation2 + $0x228] sm:$0xff]  ;;  %v5175_v12 = vpop.permute.xlu0 %5174  ;;  %v6754_v62 = vld [vmem:[#allocation2 + $0x240] sm:$0xff] }
 0x4e8   : > { %5277 = vst.msk [vmem:[#allocation2 + $0x258] sm:$0xff] %vm1373_vm9, %v5173_v63  ;;  %5441 = vrot.lane.b32.xlu1 %v13705_v43, %s9349_s22  ;;  %5278 = vst.msk [vmem:[#allocation2 + $0x270] sm:$0xff] %vm1373_vm9, %v5175_v12  ;;  %v6832_v42 = vpack.c.bf16 %v6754_v62, %v6751_v29  ;;  %v6361_v43 = vsel %vm2420_vm6, %v6358_v44, %v6360_v37 }
 0x4e9   : > { %5443 = vrot.lane.b32.xlu0 %v13710_v33, %s9349_s22 }
 0x4ea   : > { %7169 = vmatmul.mubr.bf16.gmra.mrb[148].mxu1 %v6832_v42  ;;  %v14274_v42 = vsel %vm1416_vm4, %v5367_v7, %v5369_v1 }
 0x4eb   : > { %v6176_v40 = vpop.permute.xlu1 %6175  ;;  %v6178_v54 = vpop.permute.xlu0 %6177 }
 0x4ec   : > { %6273 = vst.msk [vmem:[#allocation2 + $0x260] sm:$0xff] %vm1626_vm10, %v6176_v40  ;;  %6440 = vrot.lane.b32.xlu1 %v13929_v15, %s9350_s20  ;;  %6274 = vst.msk [vmem:[#allocation2 + $0x278] sm:$0xff] %vm1626_vm10, %v6178_v54  ;;  %v4042_v54 = vsel %vm1840_vm7, %v4039_v25, %v4041_v0 }
 0x4ed   : > { %6442 = vrot.lane.b32.xlu0 %v6361_v43, %s9350_s20 }
 0x4ef   : > { %v5422_v33 = vpop.permute.xlu1 %5421  ;;  %v5424_v39 = vpop.permute.xlu0 %5423 }
 0x4f0   : > { %5526 = vst.msk [vmem:[#allocation2 + $0x258] sm:$0xff] %vm1626_vm10, %v5422_v33  ;;  %5613 = vrot.lane.b32.xlu1 %v13799_v2, %s9350_s20  ;;  %5527 = vst.msk [vmem:[#allocation2 + $0x270] sm:$0xff] %vm1626_vm10, %v5424_v39 }
 0x4f1   : > { %5615 = vrot.lane.b32.xlu0 %v13822_v49, %s9350_s20 }
 0x4f3   : > { %v6421_v15 = vpop.permute.xlu1 %6420  ;;  %v6423_v44 = vpop.permute.xlu0 %6422 }
 0x4f4   : > { %6518 = vst.msk [vmem:[#allocation2 + $0x260] sm:$0xff] %vm1797_vm11, %v6421_v15  ;;  %6031 = vrot.lane.b32.xlu1 %v13922_v47, %s9348_s19  ;;  %6519 = vst.msk [vmem:[#allocation2 + $0x278] sm:$0xff] %vm1797_vm11, %v6423_v44 }
 0x4f5   : > { %6033 = vrot.lane.b32.xlu0 %v5952_v35, %s9348_s19 }
 0x4f7   : > { %v5594_v14 = vpop.permute.xlu1 %5593  ;;  %v5596_v31 = vpop.permute.xlu0 %5595 }
 0x4f8   : > { %5696 = vst.msk [vmem:[#allocation2 + $0x258] sm:$0xff] %vm1797_vm11, %v5594_v14  ;;  %5196 = vrot.lane.b32.xlu1 %v13833_v22, %s9348_s19  ;;  %5697 = vst.msk [vmem:[#allocation2 + $0x270] sm:$0xff] %vm1797_vm11, %v5596_v31  ;;  %v14234_v22 = vsel %vm2008_vm5, %v5953_v36, %v5955_v48  ;;  %v5120_v31 = vrot.slane %v13900_v45, 1 }
 0x4f9   : > { %5198 = vrot.lane.b32.xlu0 %v13838_v53, %s9348_s19 }
 0x4fb   : > { %v6012_v47 = vpop.permute.xlu1 %6011  ;;  %v6758_v23 = vld [vmem:[#allocation2 + $0x260] sm:$0xff]  ;;  %v6014_v32 = vpop.permute.xlu0 %6013  ;;  %v6761_v60 = vld [vmem:[#allocation2 + $0x278] sm:$0xff] }
 0x4fc   : > { %6109 = vst.msk [vmem:[#allocation2 + $0x290] sm:$0xff] %vm1373_vm9, %v6012_v47  ;;  %6199 = vrot.lane.b32.xlu1 %v14225_v19, %s9349_s22  ;;  %6110 = vst.msk [vmem:[#allocation2 + $0x2a8] sm:$0xff] %vm1373_vm9, %v6014_v32  ;;  %v6836_v53 = vpack.c.bf16 %v6761_v60, %v6758_v23  ;;  %v5957_v60 = vrot.slane %v14096_v16, 4 }
 0x4fd   : > { %6201 = vrot.lane.b32.xlu0 %v14234_v22, %s9349_s22 }
 0x4fe   : > { %7176 = vmatprep.mubr.bf16.mxu1 %v6836_v53  ;;  %v14319_v13 = vsel %vm2008_vm5, %v5957_v60, %v5959_v50 }
 0x4ff   : > { %v5177_v20 = vpop.permute.xlu1 %5176  ;;  %v6757_v24 = vld [vmem:[#allocation2 + $0x258] sm:$0xff]  ;;  %v5179_v8 = vpop.permute.xlu0 %5178  ;;  %v6760_v41 = vld [vmem:[#allocation2 + $0x270] sm:$0xff] }
 0x500   : > { %5279 = vst.msk [vmem:[#allocation2 + $0x288] sm:$0xff] %vm1373_vm9, %v5177_v20  ;;  %5445 = vrot.lane.b32.xlu1 %v13799_v2, %s9349_s22  ;;  %5280 = vst.msk [vmem:[#allocation2 + $0x2a0] sm:$0xff] %vm1373_vm9, %v5179_v8  ;;  %v6835_v17 = vpack.c.bf16 %v6760_v41, %v6757_v24  ;;  %v14313_v20 = vsel %vm2008_vm5, %v5955_v48, %v5957_v60 }
 0x501   : > { %5447 = vrot.lane.b32.xlu0 %v13822_v49, %s9349_s22  ;;  %v4045_v49 = vrot.slane %v3686_v10, 3  ;;  %v6366_v10 = vrot.slane %v14096_v16, 5 }
 0x502   : > { %7177 = vmatmul.mubr.bf16.gmra.mrb[152].mxu1 %v6835_v17  ;;  %v8939_v34 = vpop.f32.mrb[108].mxu1 }
 0x503   : > { %v6180_v52 = vpop.permute.xlu1 %6179  ;;  %v6182_v2 = vpop.permute.xlu0 %6181  ;;  %v3931_v35 = vadd.f32 %v14013_v27, %v8939_v34  ;;  %v4046_v37 = vsel %vm1840_vm7, %v4043_v11, %v4045_v49  ;;  %v5371_v49 = vrot.slane %v14021_v26, 2 }
 0x504   : > { %6275 = vst.msk [vmem:[#allocation2 + $0x290] sm:$0xff] %vm1626_vm10, %v6180_v52  ;;  %6444 = vrot.lane.b32.xlu1 %v6363_v28, %s9350_s20  ;;  %6276 = vst.msk [vmem:[#allocation2 + $0x2a8] sm:$0xff] %vm1626_vm10, %v6182_v2  ;;  %v3922_v55 = vpop.f32.mrb[109].mxu1  ;;  %v6368_v52 = vrot.slane %v14100_v3, 5 }
 0x505   : > { %6446 = vrot.lane.b32.xlu0 %v6365_v51, %s9350_s20  ;;  %v3923_v29 = vadd.f32 %v14013_v27, %v3922_v55  ;;  %v8940_v62 = vpop.f32.mrb[110].mxu1  ;;  %v4117_v46 = vadd.f32 %v4044_v5, %v3931_v35  ;;  %v6367_v51 = vsel %vm2420_vm6, %v6364_v56, %v6366_v10  ;;  %v5373_v5 = vrot.slane %v14027_v61, 2 }
 0x506   : > { %v3934_v18 = vadd.f32 %v14013_v27, %v8940_v62  ;;  %v3925_v40 = vpop.f32.mrb[111].mxu1  ;;  %v6369_v34 = vsel %vm2420_vm6, %v6366_v10, %v6368_v52  ;;  %v14351_v56 = vsel %vm1416_vm4, %v5369_v1, %v5371_v49 }
 0x507   : > { %v5426_v63 = vpop.permute.xlu1 %5425  ;;  %v5428_v12 = vpop.permute.xlu0 %5427  ;;  %v4115_v43 = vadd.f32 %v4040_v58, %v3923_v29  ;;  %v3926_v33 = vadd.f32 %v14013_v27, %v3925_v40  ;;  %v4153_v39 = vmax.f32 %v4117_v46, 0.0  ;;  %v15431_v46 = vld [vmem:[#allocation79_spill] sm:$0xff] }
 0x508   : > { %5528 = vst.msk [vmem:[#allocation2 + $0x288] sm:$0xff] %vm1626_vm10, %v5426_v63  ;;  %5617 = vrot.lane.b32.xlu1 %v13944_v6, %s9350_s20  ;;  %5529 = vst.msk [vmem:[#allocation2 + $0x2a0] sm:$0xff] %vm1626_vm10, %v5428_v12  ;;  %v4118_v7 = vadd.f32 %v4046_v37, %v3934_v18  ;;  %v14361_v12 = vsel %vm1416_vm4, %v5371_v49, %v5373_v5  ;;  %v15442_v49 = vld [vmem:[#allocation9_spill] sm:$0xff] }
 0x509   : > { %5619 = vrot.lane.b32.xlu0 %v14274_v42, %s9350_s20  ;;  %v4151_v44 = vmax.f32 %v4115_v43, 0.0  ;;  %v4116_v14 = vadd.f32 %v4042_v54, %v3926_v33  ;;  %4197 = vst [vmem:[%s13511_s10 + $0xf2] sm:$0xff] %v4153_v39  ;;  %v15432_v39 = vld [vmem:[#allocation80_spill] sm:$0xff] }
 0x50a   : > { %v4154_v47 = vmax.f32 %v4118_v7, 0.0  ;;  %v14291_v23 = vpop.f32.mrb[112].mxu1  ;;  %v15433_v7 = vld [vmem:[#allocation84_spill] sm:$0xff] }
 0x50b   : > { %v6425_v15 = vpop.permute.xlu1 %6424  ;;  %v6427_v36 = vpop.permute.xlu0 %6426  ;;  %4194 = vst [vmem:[%s13511_s10 + $0xe4] sm:$0xff] %v4151_v44  ;;  %v4152_v27 = vmax.f32 %v4116_v14, 0.0 }
 0x50c   : > { %6520 = vst.msk [vmem:[#allocation2 + $0x290] sm:$0xff] %vm1797_vm11, %v6425_v15  ;;  %6035 = vrot.lane.b32.xlu1 %v14225_v19, %s9348_s19  ;;  %6521 = vst.msk [vmem:[#allocation2 + $0x2a8] sm:$0xff] %vm1797_vm11, %v6427_v36  ;;  %v7100_v30 = vpop.f32.mrb[113].mxu1 }
 0x50d   : > { %6037 = vrot.lane.b32.xlu0 %v14234_v22, %s9348_s19  ;;  %4198 = vst [vmem:[%s13511_s10 + $0xfa] sm:$0x3f] %v4154_v47  ;;  %4195 = vst [vmem:[%s13511_s10 + $0xec] sm:$0xf] %v4152_v27  ;;  %v14298_v53 = vpop.f32.mrb[114].mxu1  ;;  %v5121_v22 = vsel %vm1163_vm3, %v5118_v9, %v5120_v31  ;;  %v15434_v47 = vld [vmem:[#allocation78_spill] sm:$0xff] }
 0x50e   : > { %4196 = vst [vmem:[%s13511_s10 + $0xea] sm:$0xc0] %v4152_v27  ;;  %v7103_v4 = vpop.f32.mrb[115].mxu1  ;;  %v15435_v27 = vrot.slane %v15434_v47, 1  ;;  %v15448_v47 = vld [vmem:[#allocation83_spill] sm:$0xff] }
 0x50f   : > { %v5598_v32 = vpop.permute.xlu1 %5597  ;;  %v5600_v19 = vpop.permute.xlu0 %5599  ;;  %v15437_v4 = vld [vmem:[#allocation74_spill] sm:$0xff] }
 0x510   : > { %5698 = vst.msk [vmem:[#allocation2 + $0x288] sm:$0xff] %vm1797_vm11, %v5598_v32  ;;  %5200 = vrot.lane.b32.xlu1 %v13960_v57, %s9348_s19  ;;  %5699 = vst.msk [vmem:[#allocation2 + $0x2a0] sm:$0xff] %vm1797_vm11, %v5600_v19  ;;  %v15436_v32 = vld [vmem:[#allocation7_spill] sm:$0xff] }
 0x511   : > { %5202 = vrot.lane.b32.xlu0 %v5121_v22, %s9348_s19 }
 0x512   : > { %v14324_v21 = vpop.f32.mrb[116].mxu1 }
 0x513   : > { %v6016_v59 = vpop.permute.xlu1 %6015  ;;  %v6764_v57 = vld [vmem:[#allocation2 + $0x290] sm:$0xff]  ;;  %v6018_v24 = vpop.permute.xlu0 %6017  ;;  %v6767_v9 = vld [vmem:[#allocation2 + $0x2a8] sm:$0xff] }
 0x514   : > { %6111 = vst.msk [vmem:[#allocation2 + $0x2c0] sm:$0xff] %vm1373_vm9, %v6016_v59  ;;  %6203 = vrot.lane.b32.xlu1 %v14313_v20, %s9349_s22  ;;  %6112 = vst.msk [vmem:[#allocation2 + $0x2d8] sm:$0xff] %vm1373_vm9, %v6018_v24  ;;  %v6839_v38 = vpack.c.bf16 %v6767_v9, %v6764_v57  ;;  %v7108_v48 = vpop.f32.mrb[117].mxu1  ;;  %v15438_v57 = vld [vmem:[#allocation75_spill] sm:$0xff] }
 0x515   : > { %6205 = vrot.lane.b32.xlu0 %v14319_v13, %s9349_s22  ;;  %v14328_v0 = vpop.f32.mrb[118].mxu1  ;;  %v15439_v48 = vld [vmem:[#allocation81_spill] sm:$0xff] }
 0x516   : > { %7184 = vmatprep.mubr.bf16.mxu1 %v6839_v38  ;;  %v7111_v28 = vpop.f32.mrb[119].mxu1 }
 0x517   : > { %v5181_v8 = vpop.permute.xlu1 %5180  ;;  %v6763_v41 = vld [vmem:[#allocation2 + $0x288] sm:$0xff]  ;;  %v5183_v17 = vpop.permute.xlu0 %5182  ;;  %v6766_v11 = vld [vmem:[#allocation2 + $0x2a0] sm:$0xff]  ;;  %v15441_v28 = vld [vmem:[#allocation82_spill] sm:$0xff] }
 0x518   : > { %5281 = vst.msk [vmem:[#allocation2 + $0x2b8] sm:$0xff] %vm1373_vm9, %v5181_v8  ;;  %5449 = vrot.lane.b32.xlu1 %v13944_v6, %s9349_s22  ;;  %5282 = vst.msk [vmem:[#allocation2 + $0x2d0] sm:$0xff] %vm1373_vm9, %v5183_v17  ;;  %v6838_v25 = vpack.c.bf16 %v6766_v11, %v6763_v41  ;;  %v15440_v8 = vld [vmem:[#allocation85_spill] sm:$0xff] }
 0x519   : > { %5451 = vrot.lane.b32.xlu0 %v14274_v42, %s9349_s22  ;;  %v15430_v42 = vld [vmem:[#allocation77_spill] sm:$0xff] }
 0x51a   : > { %7185 = vmatmul.mubr.bf16.gmra.mrb[156].mxu1 %v6838_v25  ;;  %v14346_v35 = vpop.f32.mrb[120].mxu1 }
 0x51b   : > { %v6184_v2 = vpop.permute.xlu1 %6183  ;;  %v6186_v6 = vpop.permute.xlu0 %6185 }
 0x51c   : > { %6277 = vst.msk [vmem:[#allocation2 + $0x2c0] sm:$0xff] %vm1626_vm10, %v6184_v2  ;;  %6448 = vrot.lane.b32.xlu1 %v6367_v51, %s9350_s20  ;;  %6278 = vst.msk [vmem:[#allocation2 + $0x2d8] sm:$0xff] %vm1626_vm10, %v6186_v6  ;;  %v7116_v55 = vpop.f32.mrb[121].mxu1  ;;  %v15443_v6 = vld [vmem:[#allocation12_spill] sm:$0xff] }
 0x51d   : > { %6450 = vrot.lane.b32.xlu0 %v6369_v34, %s9350_s20  ;;  %v14354_v29 = vpop.f32.mrb[122].mxu1 }
 0x51e   : > { %v7119_v1 = vpop.f32.mrb[123].mxu1 }
 0x51f   : > { %v5430_v58 = vpop.permute.xlu1 %5429  ;;  %v5432_v63 = vpop.permute.xlu0 %5431 }
 0x520   : > { %5530 = vst.msk [vmem:[#allocation2 + $0x2b8] sm:$0xff] %vm1626_vm10, %v5430_v58  ;;  %5621 = vrot.lane.b32.xlu1 %v14351_v56, %s9350_s20  ;;  %5531 = vst.msk [vmem:[#allocation2 + $0x2d0] sm:$0xff] %vm1626_vm10, %v5432_v63 }
 0x521   : > { %5623 = vrot.lane.b32.xlu0 %v14361_v12, %s9350_s20 }
 0x522   : > { %v14372_v18 = vpop.f32.mrb[124].mxu1 }
 0x523   : > { %v6429_v62 = vpop.permute.xlu1 %6428  ;;  %v6431_v37 = vpop.permute.xlu0 %6430 }
 0x524   : > { %6522 = vst.msk [vmem:[#allocation2 + $0x2c0] sm:$0xff] %vm1797_vm11, %v6429_v62  ;;  %1319 = vrot.lane.b32.xlu1 %v15430_v42, %s9348_s19  ;;  %6523 = vst.msk [vmem:[#allocation2 + $0x2d8] sm:$0xff] %vm1797_vm11, %v6431_v37  ;;  %v7124_v40 = vpop.f32.mrb[125].mxu1  ;;  %v15444_v37 = vld [vmem:[#allocation8_spill] sm:$0xff] }
 0x525   : > { %1321 = vrot.lane.b32.xlu0 %v15431_v46, %s9348_s19  ;;  %v14375_v33 = vpop.f32.mrb[126].mxu1 }
 0x526   : > { %v7127_v15 = vpop.f32.mrb[127].mxu1 }
 0x527   : > { %v5602_v54 = vpop.permute.xlu1 %5601  ;;  %v5604_v43 = vpop.permute.xlu0 %5603 }
 0x528   : > { %5700 = vst.msk [vmem:[#allocation2 + $0x2b8] sm:$0xff] %vm1797_vm11, %v5602_v54  ;;  %1323 = vrot.lane.b32.xlu1 %v15432_v39, %s9348_s19  ;;  %5701 = vst.msk [vmem:[#allocation2 + $0x2d0] sm:$0xff] %vm1797_vm11, %v5604_v43  ;;  %v15445_v43 = vld [vmem:[#allocation10_spill] sm:$0xff] }
 0x529   : > { %1325 = vrot.lane.b32.xlu0 %v15433_v7, %s9348_s19  ;;  %v15446_v7 = vld [vmem:[#allocation14_spill] sm:$0xff] }
 0x52b   : > { %v6020_v44 = vpop.permute.xlu1 %6019  ;;  %v6770_v14 = vld [vmem:[#allocation2 + $0x2c0] sm:$0xff]  ;;  %v6022_v36 = vpop.permute.xlu0 %6021  ;;  %v6773_v30 = vld [vmem:[#allocation2 + $0x2d8] sm:$0xff] }
 0x52c   : > { %6113 = vst.msk [vmem:[#allocation2 + $0x2f0] sm:$0xff] %vm1373_vm9, %v6020_v44  ;;  %1327 = vrot.lane.b32.xlu1 %v15435_v27, %s9348_s19  ;;  %6114 = vst.msk [vmem:[#allocation2 + $0x308] sm:$0xff] %vm1373_vm9, %v6022_v36  ;;  %v6842_v60 = vpack.c.bf16 %v6773_v30, %v6770_v14  ;;  %v15447_v36 = vld [vmem:[#allocation76_spill] sm:$0xff] }
 0x52d   : > { %1498 = vrot.lane.b32.xlu0 %v15436_v32, %s9349_s22 }
 0x52e   : > { %7192 = vmatprep.mubr.bf16.mxu1 %v6842_v60 }
 0x52f   : > { %v5185_v19 = vpop.permute.xlu1 %5184  ;;  %v6769_v22 = vld [vmem:[#allocation2 + $0x2b8] sm:$0xff]  ;;  %v5187_v50 = vpop.permute.xlu0 %5186  ;;  %v6772_v59 = vld [vmem:[#allocation2 + $0x2d0] sm:$0xff] }
 0x530   : > { %5283 = vst.msk [vmem:[#allocation2 + $0x2e8] sm:$0xff] %vm1373_vm9, %v5185_v19  ;;  %1572 = vrot.lane.b32.xlu1 %v15437_v4, %s9349_s22  ;;  %5284 = vst.msk [vmem:[#allocation2 + $0x300] sm:$0xff] %vm1373_vm9, %v5187_v50  ;;  %v6841_v24 = vpack.c.bf16 %v6772_v59, %v6769_v22  ;;  %v15449_v4 = vld [vmem:[#allocation13_spill] sm:$0xff] }
 0x531   : > { %1574 = vrot.lane.b32.xlu0 %v15438_v57, %s9349_s22 }
 0x532   : > { %7193 = vmatmul.mubr.bf16.gmra.mrb[160].mxu1 %v6841_v24 }
 0x533   : > { %v6188_v9 = vpop.permute.xlu1 %6187  ;;  %v6190_v38 = vpop.permute.xlu0 %6189 }
 0x534   : > { %6279 = vst.msk [vmem:[#allocation2 + $0x2f0] sm:$0xff] %vm1626_vm10, %v6188_v9  ;;  %1576 = vrot.lane.b32.xlu1 %v15439_v48, %s9349_s22  ;;  %6280 = vst.msk [vmem:[#allocation2 + $0x308] sm:$0xff] %vm1626_vm10, %v6190_v38  ;;  %v15450_v9 = vld [vmem:[#allocation17_spill] sm:$0xff]  ;;  %v15451_v38 = vld [vmem:[#allocation6_spill] sm:$0xff] }
 0x535   : > { %1578 = vrot.lane.b32.xlu0 %v15440_v8, %s9349_s22  ;;  %v14401_v41 = vpop.f32.mrb[128].mxu1 }
 0x536   : > { %v7132_v10 = vpop.f32.mrb[129].mxu1 }
 0x537   : > { %v5434_v17 = vpop.permute.xlu1 %5433  ;;  %v5436_v11 = vpop.permute.xlu0 %5435 }
 0x538   : > { %5532 = vst.msk [vmem:[#allocation2 + $0x2e8] sm:$0xff] %vm1626_vm10, %v5434_v17  ;;  %v14404_v52 = vpop.f32.mrb[130].mxu1  ;;  %1580 = vrot.lane.b32.xlu1 %v15441_v28, %s9349_s22  ;;  %5533 = vst.msk [vmem:[#allocation2 + $0x300] sm:$0xff] %vm1626_vm10, %v5436_v11  ;;  %v15453_v11 = vld [vmem:[#allocation11_spill] sm:$0xff] }
 0x539   : > { %1669 = vrot.lane.b32.xlu0 %v15436_v32, %s9350_s20  ;;  %v7135_v25 = vpop.f32.mrb[131].mxu1 }
 0x53a   : > { %v15454_v25 = vld [vmem:[#allocation15_spill] sm:$0xff] }
 0x53b   : > { %v6433_v2 = vpop.permute.xlu1 %6432  ;;  %v6435_v51 = vpop.permute.xlu0 %6434 }
 0x53c   : > { %6524 = vst.msk [vmem:[#allocation2 + $0x2f0] sm:$0xff] %vm1797_vm11, %v6433_v2  ;;  %1671 = vrot.lane.b32.xlu1 %v15442_v49, %s9350_s20  ;;  %6525 = vst.msk [vmem:[#allocation2 + $0x308] sm:$0xff] %vm1797_vm11, %v6435_v51 }
 0x53d   : > { %1673 = vrot.lane.b32.xlu0 %v15443_v6, %s9350_s20 }
 0x53f   : > { %v5606_v34 = vpop.permute.xlu1 %5605  ;;  %v5608_v55 = vpop.permute.xlu0 %5607 }
 0x540   : > { %5702 = vst.msk [vmem:[#allocation2 + $0x2e8] sm:$0xff] %vm1797_vm11, %v5606_v34  ;;  %1747 = vrot.lane.b32.xlu1 %v15439_v48, %s9350_s20  ;;  %5703 = vst.msk [vmem:[#allocation2 + $0x300] sm:$0xff] %vm1797_vm11, %v5608_v55  ;;  %v15452_v48 = vrot.slane %v15451_v38, 5  ;;  %v15455_v34 = vld [vmem:[#allocation16_spill] sm:$0xff] }
 0x541   : > { %1749 = vrot.lane.b32.xlu0 %v15440_v8, %s9350_s20 }
 0x543   : > { %v6024_v58 = vpop.permute.xlu1 %6023  ;;  %v6776_v63 = vld [vmem:[#allocation2 + $0x2f0] sm:$0xff]  ;;  %v6026_v1 = vpop.permute.xlu0 %6025  ;;  %v6779_v62 = vld [vmem:[#allocation2 + $0x308] sm:$0xff] }
 0x544   : > { %6115 = vst.msk [vmem:[#allocation2 + $0x320] sm:$0xff] %vm1373_vm9, %v6024_v58  ;;  %1751 = vrot.lane.b32.xlu1 %v15441_v28, %s9350_s20  ;;  %6116 = vst.msk [vmem:[#allocation2 + $0x338] sm:$0xff] %vm1373_vm9, %v6026_v1  ;;  %v6845_v42 = vpack.c.bf16 %v6779_v62, %v6776_v63  ;;  %v5122_v58 = vrot.slane %v14021_v26, 1  ;;  %v15456_v63 = vld [vmem:[#allocation18_spill] sm:$0xff] }
 0x545   : > { %2090 = vrot.lane.b32.xlu0 %v15444_v37, %s9348_s19 }
 0x546   : > { %7200 = vmatprep.mubr.bf16.mxu1 %v6845_v42  ;;  %v5123_v26 = vsel %vm1163_vm3, %v5120_v31, %v5122_v58  ;;  %v15459_v31 = vld [vmem:[#allocation43_spill] sm:$0xff] }
 0x547   : > { %v5189_v46 = vpop.permute.xlu1 %5188  ;;  %v6775_v40 = vld [vmem:[#allocation2 + $0x2e8] sm:$0xff]  ;;  %v5191_v54 = vpop.permute.xlu0 %5190  ;;  %v6778_v39 = vld [vmem:[#allocation2 + $0x300] sm:$0xff] }
 0x548   : > { %5285 = vst.msk [vmem:[#allocation2 + $0x318] sm:$0xff] %vm1373_vm9, %v5189_v46  ;;  %2092 = vrot.lane.b32.xlu1 %v15445_v43, %s9348_s19  ;;  %5286 = vst.msk [vmem:[#allocation2 + $0x330] sm:$0xff] %vm1373_vm9, %v5191_v54  ;;  %v6844_v15 = vpack.c.bf16 %v6778_v39, %v6775_v40  ;;  %v15457_v46 = vld [vmem:[#allocation38_spill] sm:$0xff]  ;;  %v5126_v54 = vrot.slane %v14096_v16, 1 }
 0x549   : > { %2094 = vrot.lane.b32.xlu0 %v15446_v7, %s9348_s19  ;;  %v15458_v40 = vrot.slane %v15457_v46, 1 }
 0x54a   : > { %7201 = vmatmul.mubr.bf16.gmra.mrb[164].mxu1 %v6844_v15 }
 0x54b   : > { %v6192_v44 = vpop.permute.xlu1 %6191  ;;  %v6194_v14 = vpop.permute.xlu0 %6193 }
 0x54c   : > { %6281 = vst.msk [vmem:[#allocation2 + $0x320] sm:$0xff] %vm1626_vm10, %v6192_v44  ;;  %2168 = vrot.lane.b32.xlu1 %v15447_v36, %s9348_s19  ;;  %6282 = vst.msk [vmem:[#allocation2 + $0x338] sm:$0xff] %vm1626_vm10, %v6194_v14  ;;  %v5881_v44 = vrot.slane %v15459_v31, 4  ;;  %v5880_v14 = vrot.slane %v15457_v46, 4 }
 0x54d   : > { %2170 = vrot.lane.b32.xlu0 %v15448_v47, %s9348_s19 }
 0x54f   : > { %v5438_v27 = vpop.permute.xlu1 %5437  ;;  %v5440_v30 = vpop.permute.xlu0 %5439 }
 0x550   : > { %5534 = vst.msk [vmem:[#allocation2 + $0x318] sm:$0xff] %vm1626_vm10, %v5438_v27  ;;  %2255 = vrot.lane.b32.xlu1 %v15444_v37, %s9349_s22  ;;  %5535 = vst.msk [vmem:[#allocation2 + $0x330] sm:$0xff] %vm1626_vm10, %v5440_v30  ;;  %v5124_v37 = vrot.slane %v14027_v61, 1  ;;  %v5882_v27 = vsel %vm2008_vm5, %v5880_v14, %v5881_v44  ;;  %v5128_v30 = vrot.slane %v14100_v3, 1 }
 0x551   : > { %2257 = vrot.lane.b32.xlu0 %v15445_v43, %s9349_s22  ;;  %v14447_v32 = vpop.f32.mrb[132].mxu1  ;;  %v9271_v43 = vld [vmem:[%s14951_s6] sm:$0xff]  }
 0x552   : > { %v7140_v60 = vpop.f32.mrb[133].mxu1  ;;  %9081 = vmatprep.subr.bf16.mxu0 %v9271_v43  ;;  %v5127_v45 = vsel %vm1163_vm3, %v5124_v37, %v5126_v54  ;;  %v5129_v38 = vsel %vm1163_vm3, %v5126_v54, %v5128_v30 }
 0x553   : > { %v6437_v19 = vpop.permute.xlu1 %6436  ;;  %v6439_v22 = vpop.permute.xlu0 %6438  ;;  %9082 = vmatpush3.bf16.msra.mxu0 %v9271_v43 }
 0x554   : > { %6526 = vst.msk [vmem:[#allocation2 + $0x320] sm:$0xff] %vm1797_vm11, %v6437_v19  ;;  %v14450_v50 = vpop.f32.mrb[134].mxu1  ;;  %2259 = vrot.lane.b32.xlu1 %v15446_v7, %s9349_s22  ;;  %6527 = vst.msk [vmem:[#allocation2 + $0x338] sm:$0xff] %vm1797_vm11, %v6439_v22  ;;  %v5125_v7 = vsel %vm1163_vm3, %v5122_v58, %v5124_v37  ;;  %v15464_v37 = vld [vmem:[#allocation41_spill] sm:$0xff] }
 0x555   : > { %2261 = vrot.lane.b32.xlu0 %v15449_v4, %s9349_s22  ;;  %v7143_v59 = vpop.f32.mrb[135].mxu1  ;;  %v15460_v4 = vld [vmem:[#allocation35_spill] sm:$0xff] }
 0x556   : > { %v15461_v59 = vrot.slane %v15460_v4, 4 }
 0x557   : > { %v5610_v57 = vpop.permute.xlu1 %5609  ;;  %v5612_v24 = vpop.permute.xlu0 %5611 }
 0x558   : > { %5704 = vst.msk [vmem:[#allocation2 + $0x318] sm:$0xff] %vm1797_vm11, %v5610_v57  ;;  %2263 = vrot.lane.b32.xlu1 %v15450_v9, %s9349_s22  ;;  %5705 = vst.msk [vmem:[#allocation2 + $0x330] sm:$0xff] %vm1797_vm11, %v5612_v24  ;;  %v5884_v57 = vsel %vm2008_vm5, %v5881_v44, %v15461_v59  ;;  %v15465_v44 = vld [vmem:[#allocation44_spill] sm:$0xff] }
 0x559   : > { %2502 = vrot.lane.b32.xlu0 %v15452_v48, %s9350_s20 }
 0x55b   : > { %v6028_v8 = vpop.permute.xlu1 %6027  ;;  %v6782_v10 = vld [vmem:[#allocation2 + $0x320] sm:$0xff]  ;;  %v6030_v17 = vpop.permute.xlu0 %6029  ;;  %v6785_v28 = vld [vmem:[#allocation2 + $0x338] sm:$0xff] }
 0x55c   : > { %6117 = vst.msk [vmem:[#allocation2 + $0x350] sm:$0xff] %vm1373_vm9, %v6028_v8  ;;  %2504 = vrot.lane.b32.xlu1 %v15453_v11, %s9350_s20  ;;  %6118 = vst.msk [vmem:[#allocation2 + $0x368] sm:$0xff] %vm1373_vm9, %v6030_v17  ;;  %v6848_v2 = vpack.c.bf16 %v6785_v28, %v6782_v10  ;;  %v15462_v28 = vld [vmem:[#allocation39_spill] sm:$0xff] }
 0x55d   : > { %2506 = vrot.lane.b32.xlu0 %v15454_v25, %s9350_s20 }
 0x55e   : > { %7208 = vmatprep.mubr.bf16.mxu1 %v6848_v2 }
 0x55f   : > { %v5193_v51 = vpop.permute.xlu1 %5192  ;;  %v6781_v49 = vld [vmem:[#allocation2 + $0x318] sm:$0xff]  ;;  %v5195_v6 = vpop.permute.xlu0 %5194  ;;  %v6784_v55 = vld [vmem:[#allocation2 + $0x330] sm:$0xff] }
 0x560   : > { %5287 = vst.msk [vmem:[#allocation2 + $0x348] sm:$0xff] %vm1373_vm9, %v5193_v51  ;;  %2508 = vrot.lane.b32.xlu1 %v15455_v34, %s9350_s20  ;;  %5288 = vst.msk [vmem:[#allocation2 + $0x360] sm:$0xff] %vm1373_vm9, %v5195_v6  ;;  %v6847_v1 = vpack.c.bf16 %v6784_v55, %v6781_v49  ;;  %v5375_v49 = vrot.slane %v14096_v16, 2 }
 0x561   : > { %2510 = vrot.lane.b32.xlu0 %v15456_v63, %s9350_s20 }
 0x562   : > { %7209 = vmatmul.mubr.bf16.gmra.mrb[168].mxu1 %v6847_v1  ;;  %v5376_v63 = vsel %vm1416_vm4, %v5373_v5, %v5375_v49  ;;  %v5377_v5 = vrot.slane %v14100_v3, 2 }
 0x563   : > { %v6196_v62 = vpop.permute.xlu1 %6195  ;;  %v6198_v42 = vpop.permute.xlu0 %6197 }
 0x564   : > { %6283 = vst.msk [vmem:[#allocation2 + $0x350] sm:$0xff] %vm1626_vm10, %v6196_v62  ;;  %5130 = vrot.lane.b32.xlu1 %v15458_v40, %s9348_s19  ;;  %6284 = vst.msk [vmem:[#allocation2 + $0x368] sm:$0xff] %vm1626_vm10, %v6198_v42  ;;  %v15463_v62 = vld [vmem:[#allocation40_spill] sm:$0xff]  ;;  %v5378_v40 = vsel %vm1416_vm4, %v5375_v49, %v5377_v5  ;;  %v15468_v49 = vld [vmem:[#allocation37_spill] sm:$0xff] }
 0x565   : > { %5204 = vrot.lane.b32.xlu0 %v5123_v26, %s9348_s19 }
 0x567   : > { %v5442_v39 = vpop.permute.xlu1 %5441  ;;  %v5444_v15 = vpop.permute.xlu0 %5443 }
 0x568   : > { %5536 = vst.msk [vmem:[#allocation2 + $0x348] sm:$0xff] %vm1626_vm10, %v5442_v39  ;;  %5206 = vrot.lane.b32.xlu1 %v5125_v7, %s9348_s19  ;;  %5537 = vst.msk [vmem:[#allocation2 + $0x360] sm:$0xff] %vm1626_vm10, %v5444_v15 }
 0x569   : > { %5208 = vrot.lane.b32.xlu0 %v5127_v45, %s9348_s19 }
 0x56b   : > { %v6441_v36 = vpop.permute.xlu1 %6440  ;;  %v6443_v47 = vpop.permute.xlu0 %6442 }
 0x56c   : > { %6528 = vst.msk [vmem:[#allocation2 + $0x350] sm:$0xff] %vm1797_vm11, %v6441_v36  ;;  %5961 = vrot.lane.b32.xlu1 %v5880_v14, %s9348_s19  ;;  %6529 = vst.msk [vmem:[#allocation2 + $0x368] sm:$0xff] %vm1797_vm11, %v6443_v47 }
 0x56d   : > { %5963 = vrot.lane.b32.xlu0 %v5882_v27, %s9348_s19  ;;  %v14505_v60 = vpop.f32.mrb[136].mxu1 }
 0x56e   : > { %v7148_v19 = vpop.f32.mrb[137].mxu1 }
 0x56f   : > { %v5614_v22 = vpop.permute.xlu1 %5613  ;;  %v5616_v24 = vpop.permute.xlu0 %5615  ;;  %v15466_v19 = vld [vmem:[#allocation45_spill] sm:$0xff] }
 0x570   : > { %5706 = vst.msk [vmem:[#allocation2 + $0x348] sm:$0xff] %vm1797_vm11, %v5614_v22  ;;  %v14511_v9 = vpop.f32.mrb[138].mxu1  ;;  %5965 = vrot.lane.b32.xlu1 %v5884_v57, %s9348_s19  ;;  %5707 = vst.msk [vmem:[#allocation2 + $0x360] sm:$0xff] %vm1797_vm11, %v5616_v24 }
 0x571   : > { %5210 = vrot.lane.b32.xlu0 %v5129_v38, %s9348_s19  ;;  %v7151_v48 = vpop.f32.mrb[139].mxu1 }
 0x573   : > { %v6032_v8 = vpop.permute.xlu1 %6031  ;;  %v6788_v10 = vld [vmem:[#allocation2 + $0x350] sm:$0xff]  ;;  %v6034_v17 = vpop.permute.xlu0 %6033  ;;  %v6791_v11 = vld [vmem:[#allocation2 + $0x368] sm:$0xff] }
 0x574   : > { %6119 = vst.msk [vmem:[#allocation2 + $0x380] sm:$0xff] %vm1373_vm9, %v6032_v8  ;;  %5212 = vrot.lane.b32.xlu1 %v5128_v30, %s9348_s19  ;;  %6120 = vst.msk [vmem:[#allocation2 + $0x398] sm:$0xff] %vm1373_vm9, %v6034_v17  ;;  %v6851_v25 = vpack.c.bf16 %v6791_v11, %v6788_v10  ;;  %v6290_v8 = vrot.slane %v15459_v31, 5  ;;  %v6289_v10 = vrot.slane %v15457_v46, 5 }
 0x575   : > { %5379 = vrot.lane.b32.xlu0 %v15462_v28, %s9349_s22 }
 0x576   : > { %7216 = vmatprep.mubr.bf16.mxu1 %v6851_v25  ;;  %v6292_v25 = vrot.slane %v15460_v4, 5 }
 0x577   : > { %v5197_v2 = vpop.permute.xlu1 %5196  ;;  %v6787_v51 = vld [vmem:[#allocation2 + $0x348] sm:$0xff]  ;;  %v5199_v6 = vpop.permute.xlu0 %5198  ;;  %v6790_v34 = vld [vmem:[#allocation2 + $0x360] sm:$0xff] }
 0x578   : > { %5289 = vst.msk [vmem:[#allocation2 + $0x378] sm:$0xff] %vm1373_vm9, %v5197_v2  ;;  %5453 = vrot.lane.b32.xlu1 %v14351_v56, %s9349_s22  ;;  %5290 = vst.msk [vmem:[#allocation2 + $0x390] sm:$0xff] %vm1373_vm9, %v5199_v6  ;;  %v6850_v55 = vpack.c.bf16 %v6790_v34, %v6787_v51  ;;  %v15469_v6 = vrot.slane %v15468_v49, 5 }
 0x579   : > { %5455 = vrot.lane.b32.xlu0 %v14361_v12, %s9349_s22 }
 0x57a   : > { %7217 = vmatmul.mubr.bf16.gmra.mrb[172].mxu1 %v6850_v55 }
 0x57b   : > { %v6200_v58 = vpop.permute.xlu1 %6199  ;;  %v6202_v16 = vpop.permute.xlu0 %6201 }
 0x57c   : > { %6285 = vst.msk [vmem:[#allocation2 + $0x380] sm:$0xff] %vm1626_vm10, %v6200_v58  ;;  %5457 = vrot.lane.b32.xlu1 %v5376_v63, %s9349_s22  ;;  %6286 = vst.msk [vmem:[#allocation2 + $0x398] sm:$0xff] %vm1626_vm10, %v6202_v16 }
 0x57d   : > { %6125 = vrot.lane.b32.xlu0 %v5880_v14, %s9349_s22 }
 0x57f   : > { %v5446_v56 = vpop.permute.xlu1 %5445  ;;  %v5448_v12 = vpop.permute.xlu0 %5447 }
 0x580   : > { %5538 = vst.msk [vmem:[#allocation2 + $0x378] sm:$0xff] %vm1626_vm10, %v5446_v56  ;;  %6127 = vrot.lane.b32.xlu1 %v5882_v27, %s9349_s22  ;;  %5539 = vst.msk [vmem:[#allocation2 + $0x390] sm:$0xff] %vm1626_vm10, %v5448_v12 }
 0x581   : > { %6129 = vrot.lane.b32.xlu0 %v5884_v57, %s9349_s22 }
 0x583   : > { %v6445_v61 = vpop.permute.xlu1 %6444  ;;  %v6447_v1 = vpop.permute.xlu0 %6446 }
 0x584   : > { %6530 = vst.msk [vmem:[#allocation2 + $0x380] sm:$0xff] %vm1797_vm11, %v6445_v61  ;;  %6131 = vrot.lane.b32.xlu1 %v15463_v62, %s9349_s22  ;;  %6531 = vst.msk [vmem:[#allocation2 + $0x398] sm:$0xff] %vm1797_vm11, %v6447_v1  ;;  %v6702_v1 = vld [vmem:[#allocation2 + $0xa0] sm:$0xff] }
 0x585   : > { %6133 = vrot.lane.b32.xlu0 %v15464_v37, %s9349_s22 }
 0x587   : > { %v5618_v42 = vpop.permute.xlu1 %5617  ;;  %v5620_v26 = vpop.permute.xlu0 %5619 }
 0x588   : > { %5708 = vst.msk [vmem:[#allocation2 + $0x378] sm:$0xff] %vm1797_vm11, %v5618_v42  ;;  %5459 = vrot.lane.b32.xlu1 %v5378_v40, %s9349_s22  ;;  %5709 = vst.msk [vmem:[#allocation2 + $0x390] sm:$0xff] %vm1797_vm11, %v5620_v26 }
 0x589   : > { %5461 = vrot.lane.b32.xlu0 %v5377_v5, %s9349_s22  ;;  %v14552_v3 = vpop.f32.mrb[140].mxu1  ;;  %s9351_s22 = smov [#allocation3]  }
 0x58a   : > { %v7156_v54 = vpop.f32.mrb[141].mxu1 }
 0x58b   : > { %v6036_v43 = vpop.permute.xlu1 %6035  ;;  %v6794_v39 = vld [vmem:[#allocation2 + $0x380] sm:$0xff]  ;;  %v6038_v7 = vpop.permute.xlu0 %6037  ;;  %v6797_v45 = vld [vmem:[#allocation2 + $0x398] sm:$0xff]  ;;  %v6699_v54 = vld [vmem:[#allocation2 + $0x88] sm:$0xff] }
 0x58c   : > { %6121 = vst.msk [vmem:[#allocation2 + $0x3b0] sm:$0xff] %vm1373_vm9, %v6036_v43  ;;  %v14555_v15 = vpop.f32.mrb[142].mxu1  ;;  %5547 = vrot.lane.b32.xlu1 %v15462_v28, %s9350_s20  ;;  %6122 = vst.msk [vmem:[#allocation2 + $0x3c8] sm:$0xff] %vm1373_vm9, %v6038_v7  ;;  %v6854_v36 = vpack.c.bf16 %v6797_v45, %v6794_v39  ;;  %v6291_v28 = vsel %vm2420_vm6, %v6289_v10, %v6290_v8  ;;  %v6807_v43 = vpack.c.bf16 %v6702_v1, %v6699_v54  ;;  %v6708_v45 = vld [vmem:[#allocation2 + $0xd0] sm:$0xff]  ;;  %v6750_v1 = vld [vmem:[#allocation2 + $0x220] sm:$0xff] }
 0x58d   : > { %5549 = vrot.lane.b32.xlu0 %v15465_v44, %s9350_s20  ;;  %v7159_v14 = vpop.f32.mrb[143].mxu1 }
 0x58e   : > { %7224 = vmatprep.mubr.bf16.mxu1 %v6854_v36  ;;  %v6714_v14 = vld [vmem:[#allocation2 + $0x100] sm:$0xff] }
 0x58f   : > { %v5201_v47 = vpop.permute.xlu1 %5200  ;;  %v6793_v27 = vld [vmem:[#allocation2 + $0x378] sm:$0xff]  ;;  %v5203_v30 = vpop.permute.xlu0 %5202  ;;  %v6796_v22 = vld [vmem:[#allocation2 + $0x390] sm:$0xff] }
 0x590   : > { %5291 = vst.msk [vmem:[#allocation2 + $0x3a8] sm:$0xff] %vm1373_vm9, %v5201_v47  ;;  %5551 = vrot.lane.b32.xlu1 %v15466_v19, %s9350_s20  ;;  %5292 = vst.msk [vmem:[#allocation2 + $0x3c0] sm:$0xff] %vm1373_vm9, %v5203_v30  ;;  %v6853_v59 = vpack.c.bf16 %v6796_v22, %v6793_v27  ;;  %v6705_v47 = vld [vmem:[#allocation2 + $0xb8] sm:$0xff]  ;;  %v6711_v30 = vld [vmem:[#allocation2 + $0xe8] sm:$0xff] }
 0x591   : > { %5625 = vrot.lane.b32.xlu0 %v5376_v63, %s9350_s20  ;;  %v6810_v27 = vpack.c.bf16 %v6708_v45, %v6705_v47  ;;  %v6813_v19 = vpack.c.bf16 %v6714_v14, %v6711_v30 }
 0x592   : > { %7225 = vmatmul.mubr.bf16.gmra.mrb[176].mxu1 %v6853_v59 }
 0x593   : > { %v6204_v57 = vpop.permute.xlu1 %6203  ;;  %v6206_v24 = vpop.permute.xlu0 %6205 }
 0x594   : > { %6287 = vst.msk [vmem:[#allocation2 + $0x3b0] sm:$0xff] %vm1626_vm10, %v6204_v57  ;;  %5627 = vrot.lane.b32.xlu1 %v5378_v40, %s9350_s20  ;;  %6288 = vst.msk [vmem:[#allocation2 + $0x3c8] sm:$0xff] %vm1626_vm10, %v6206_v24  ;;  %v6720_v57 = vld [vmem:[#allocation2 + $0x130] sm:$0xff] }
 0x595   : > { %5629 = vrot.lane.b32.xlu0 %v5377_v5, %s9350_s20 }
 0x597   : > { %v5450_v38 = vpop.permute.xlu1 %5449  ;;  %v5452_v48 = vpop.permute.xlu0 %5451 }
 0x598   : > { %5540 = vst.msk [vmem:[#allocation2 + $0x3a8] sm:$0xff] %vm1626_vm10, %v5450_v38  ;;  %6039 = vrot.lane.b32.xlu1 %v14313_v20, %s9348_s19  ;;  %5541 = vst.msk [vmem:[#allocation2 + $0x3c0] sm:$0xff] %vm1626_vm10, %v5452_v48  ;;  %v15467_v20 = vld [vmem:[#allocation36_spill] sm:$0xff] }
 0x599   : > { %6041 = vrot.lane.b32.xlu0 %v14319_v13, %s9348_s19  ;;  %v6294_v2 = vrot.slane %v15467_v20, 5  ;;  %v6293_v13 = vsel %vm2420_vm6, %v6290_v8, %v6292_v25  ;;  %v6726_v38 = vld [vmem:[#allocation2 + $0x160] sm:$0xff]  ;;  %v6717_v8 = vld [vmem:[#allocation2 + $0x118] sm:$0xff]  ;;  %s9281_s19 = scalar_lea.vmem %s14896_s21, 8192 }
 0x59a   : > { %p9282_p11 = scmp.ne.s32.totalorder %s14896_s21, %s9281_s19 }
 0x59b   : > { %v6449_v17 = vpop.permute.xlu1 %6448  ;;  %v6451_v11 = vpop.permute.xlu0 %6450  ;;  %v6295_v51 = vsel %vm2420_vm6, %v6292_v25, %v6294_v2  ;;  %v6297_v34 = vsel %vm2420_vm6, %v6294_v2, %v15469_v6  ;;  %v6729_v6 = vld [vmem:[#allocation2 + $0x178] sm:$0xff] }
 0x59c   : > { %6532 = vst.msk [vmem:[#allocation2 + $0x3b0] sm:$0xff] %vm1797_vm11, %v6449_v17  ;;  %6370 = vrot.lane.b32.xlu1 %v6289_v10, %s9350_s20  ;;  %v6816_v10 = vpack.c.bf16 %v6720_v57, %v6717_v8  ;;  %v6723_v17 = vld [vmem:[#allocation2 + $0x148] sm:$0xff]  ;;  %v6768_v57 = vld [vmem:[#allocation2 + $0x2b0] sm:$0xff]  ;;  %p9283_p12 = pnand %p9282_p11, %p9437_p5 }
 0x59d   : > { %6533 = vst.msk [vmem:[#allocation2 + $0x3c8] sm:$0x7f] %vm2666_vm13, %v6451_v11  ;;  %6372 = vrot.lane.b32.xlu0 %v6291_v28, %s9350_s20  ;;  %v9272_v11 = vld [vmem:[%s14951_s6 + $0x8] sm:$0xff]   ;;  %v6819_v28 = vpack.c.bf16 %v6726_v38, %v6723_v17  ;;  %v6765_v17 = vld [vmem:[#allocation2 + $0x298] sm:$0xff] }
 0x59e   : > { %9083 = vmatprep.subr.bf16.mxu0 %v9272_v11  ;;  %p9284_p13 = pneg %p9283_p12 }
 0x59f   : > { %v5622_v31 = vpop.permute.xlu1 %5621  ;;  %v5624_v46 = vpop.permute.xlu0 %5623  ;;  %9084 = vmatpush3.bf16.msra.mxu0 %v9272_v11 }
 0x5a0   : > { %5710 = vst.msk [vmem:[#allocation2 + $0x3a8] sm:$0xff] %vm1797_vm11, %v5622_v31  ;;  %6374 = vrot.lane.b32.xlu1 %v6293_v13, %s9350_s20  ;;  %5711 = vst.msk [vmem:[#allocation2 + $0x3c0] sm:$0xff] %vm1797_vm11, %v5624_v46  ;;  %v6732_v31 = vld [vmem:[#allocation2 + $0x190] sm:$0xff] }
 0x5a1   : > { %6376 = vrot.lane.b32.xlu0 %v6295_v51, %s9350_s20  ;;  %v6738_v51 = vld [vmem:[#allocation2 + $0x1c0] sm:$0xff] }
 0x5a3   : > { %v1320_v4 = vpop.permute.xlu1 %1319  ;;  %v6800_v55 = vld [vmem:[#allocation2 + $0x3b0] sm:$0xff]  ;;  %v1322_v58 = vpop.permute.xlu0 %1321 }
 0x5a4   : > { %6378 = vrot.lane.b32.xlu1 %v6297_v34, %s9350_s20  ;;  %v6803_v63 = vld [vmem:[#allocation2 + $0x3c8] sm:$0xff]  ;;  %s9285_s20 = sshll.u32 %s9351_s22, 4  ;;  %s9286_s20 = int_to_ptr.vmem [resolvable:$false] %s9285_s20 }
 0x5a5   : > { %v6857_v16 = vpack.c.bf16 %v6803_v63, %v6800_v55  ;;  %v14596_v56 = vpop.f32.mrb[144].mxu1  ;;  %v6822_v55 = vpack.c.bf16 %v6732_v31, %v6729_v6  ;;  %v6735_v58 = vld [vmem:[#allocation2 + $0x1a8] sm:$0xff]  ;;  %s9287_s12 = scalar_lea.vmem %s9286_s20, 16384  ;;  %p9288_p0 = scmp.lt.s32.totalorder %s14896_s21, %s9286_s20 }
 0x5a6   : > { %v7164_v12 = vpop.f32.mrb[145].mxu1  ;;  %v6825_v63 = vpack.c.bf16 %v6738_v51, %v6735_v58  ;;  %v6780_v51 = vld [vmem:[#allocation2 + $0x310] sm:$0xff]  ;;  %v6783_v6 = vld [vmem:[#allocation2 + $0x328] sm:$0xff]  ;;  %p9289_p1 = scmp.lt.s32.totalorder %s9287_s12, %s9281_s19 }
 0x5a7   : > { %7232 = vmatprep.mubr.bf16.mxu1 %v6857_v16  ;;  %v1324_v61 = vpop.permute.xlu1 %1323  ;;  %v6799_v5 = vld [vmem:[#allocation2 + $0x3a8] sm:$0xff]  ;;  %v1326_v62 = vpop.permute.xlu0 %1325  ;;  %v6802_v42 = vld [vmem:[#allocation2 + $0x3c0] sm:$0xff] }
 0x5a8   : > { %v14598_v37 = vpop.f32.mrb[146].mxu1  ;;  %v6856_v26 = vpack.c.bf16 %v6802_v42, %v6799_v5  ;;  %v6744_v61 = vld [vmem:[#allocation2 + $0x1f0] sm:$0xff]  ;;  %v6741_v42 = vld [vmem:[#allocation2 + $0x1d8] sm:$0xff]  ;;  %p9290_p2 = por %p9289_p1, %p9288_p0 }
 0x5a9   : > { %v7167_v40 = vpop.f32.mrb[147].mxu1 }
 0x5aa   : > { %7233 = vmatmul.mubr.bf16.gmra.mrb[180].mxu1 %v6856_v26  ;;  %v6828_v40 = vpack.c.bf16 %v6744_v61, %v6741_v42  ;;  %v6747_v26 = vld [vmem:[#allocation2 + $0x208] sm:$0xff]  ;;  %v6789_v61 = vld [vmem:[#allocation2 + $0x358] sm:$0xff]  ;;  %v6798_v42 = vld [vmem:[#allocation2 + $0x3a0] sm:$0xff]  ;;  %p9291_p3 = pnand %p9290_p2, %p9284_p13 }
 0x5ab   : > { %v1328_v39 = vpop.permute.xlu1 %1327  ;;  %v1499_v7 = vpop.permute.xlu0 %1498  ;;  %9045 = vmatprep.mubr.msk.bf16.mxu1 %vm1079_vm1, %v6807_v43  ;;  %v6831_v54 = vpack.c.bf16 %v6750_v1, %v6747_v26 }
 0x5ac   : > { %v6756_v7 = vld [vmem:[#allocation2 + $0x250] sm:$0xff] }
 0x5af   : > { %v1573_v44 = vpop.permute.xlu1 %1572  ;;  %v1575_v36 = vpop.permute.xlu0 %1574 }
 0x5b0   : > { %v6762_v44 = vld [vmem:[#allocation2 + $0x280] sm:$0xff]  ;;  %v6753_v36 = vld [vmem:[#allocation2 + $0x238] sm:$0xff] }
 0x5b1   : > { %v6834_v47 = vpack.c.bf16 %v6756_v7, %v6753_v36 }
 0x5b2   : > { %9046 = vmatmul.mubr.msk.bf16.vlgmr.msra.gmra.mrb[184].mxu1 %vm1079_vm1, %v6810_v27  ;;  %v6759_v27 = vld [vmem:[#allocation2 + $0x268] sm:$0xff] }
 0x5b3   : > { %v1577_v22 = vpop.permute.xlu1 %1576  ;;  %v1579_v59 = vpop.permute.xlu0 %1578  ;;  %9049 = vmatprep.mubr.msk.bf16.mxu1 %vm1079_vm1, %v6813_v19  ;;  %v6837_v30 = vpack.c.bf16 %v6762_v44, %v6759_v27  ;;  %v6804_v44 = vld [vmem:[#allocation2 + $0x3d0] sm:$0xff] }
 0x5b7   : > { %v1581_v24 = vpop.permute.xlu1 %1580  ;;  %v1670_v48 = vpop.permute.xlu0 %1669 }
 0x5b8   : > { %v6774_v48 = vld [vmem:[#allocation2 + $0x2e0] sm:$0xff] }
 0x5ba   : > { %9050 = vmatmul.mubr.msk.bf16.gmra.mrb[188].mxu1 %vm1079_vm1, %v6816_v10 }
 0x5bb   : > { %v1672_v25 = vpop.permute.xlu1 %1671  ;;  %v1674_v20 = vpop.permute.xlu0 %1673  ;;  %9053 = vmatprep.mubr.msk.bf16.mxu1 %vm1079_vm1, %v6819_v28  ;;  %v6840_v28 = vpack.c.bf16 %v6768_v57, %v6765_v17 }
 0x5bc   : > { %v6771_v25 = vld [vmem:[#allocation2 + $0x2c8] sm:$0xff] }
 0x5bd   : > { %v14608_v2 = vpop.f32.mrb[148].mxu1  ;;  %v6843_v20 = vpack.c.bf16 %v6774_v48, %v6771_v25 }
 0x5be   : > { %v7172_v13 = vpop.f32.mrb[149].mxu1 }
 0x5bf   : > { %v1748_v46 = vpop.permute.xlu1 %1747  ;;  %v1750_v4 = vpop.permute.xlu0 %1749 }
 0x5c0   : > { %v14610_v49 = vpop.f32.mrb[150].mxu1  ;;  %v6777_v46 = vld [vmem:[#allocation2 + $0x2f8] sm:$0xff] }
 0x5c1   : > { %v7175_v34 = vpop.f32.mrb[151].mxu1  ;;  %v6846_v58 = vpack.c.bf16 %v6780_v51, %v6777_v46 }
 0x5c2   : > { %9054 = vmatmul.mubr.msk.bf16.gmra.mrb[192].mxu1 %vm1079_vm1, %v6822_v55  ;;  %v6786_v34 = vld [vmem:[#allocation2 + $0x340] sm:$0xff] }
 0x5c3   : > { %v1752_v16 = vpop.permute.xlu1 %1751  ;;  %v2091_v12 = vpop.permute.xlu0 %2090  ;;  %9057 = vmatprep.mubr.msk.bf16.mxu1 %vm1079_vm1, %v6825_v63  ;;  %v6849_v63 = vpack.c.bf16 %v6786_v34, %v6783_v6 }
 0x5c7   : > { %v2093_v5 = vpop.permute.xlu1 %2092  ;;  %v2095_v62 = vpop.permute.xlu0 %2094 }
 0x5c8   : > { %v6792_v5 = vld [vmem:[#allocation2 + $0x370] sm:$0xff]  ;;  %v6795_v62 = vld [vmem:[#allocation2 + $0x388] sm:$0xff] }
 0x5c9   : > { %v6852_v26 = vpack.c.bf16 %v6792_v5, %v6789_v61 }
 0x5ca   : > { %9058 = vmatmul.mubr.msk.bf16.gmra.mrb[196].mxu1 %vm1079_vm1, %v6828_v40 }
 0x5cb   : > { %v2169_v43 = vpop.permute.xlu1 %2168  ;;  %v2171_v39 = vpop.permute.xlu0 %2170  ;;  %9061 = vmatprep.mubr.msk.bf16.mxu1 %vm1079_vm1, %v6831_v54  ;;  %v6855_v54 = vpack.c.bf16 %v6798_v42, %v6795_v62 }
 0x5cf   : > { %v2256_v45 = vpop.permute.xlu1 %2255  ;;  %v2258_v14 = vpop.permute.xlu0 %2257 }
 0x5d0   : > { %v6801_v45 = vld [vmem:[#allocation2 + $0x3b8] sm:$0xff] }
 0x5d2   : > { %9062 = vmatmul.mubr.msk.bf16.gmra.mrb[200].mxu1 %vm1079_vm1, %v6834_v47 }
 0x5d3   : > { %v2260_v19 = vpop.permute.xlu1 %2259  ;;  %v2262_v22 = vpop.permute.xlu0 %2261  ;;  %9065 = vmatprep.mubr.msk.bf16.mxu1 %vm1079_vm1, %v6837_v30 }
 0x5d4   : > { %v6858_v19 = vpack.c.bf16 %v6804_v44, %v6801_v45 }
 0x5d5   : > { %v14618_v59 = vpop.f32.mrb[152].mxu1 }
 0x5d6   : > { %v7180_v24 = vpop.f32.mrb[153].mxu1 }
 0x5d7   : > { %v2264_v38 = vpop.permute.xlu1 %2263  ;;  %v2503_v8 = vpop.permute.xlu0 %2502 }
 0x5d8   : > { %v14620_v10 = vpop.f32.mrb[154].mxu1 }
 0x5d9   : > { %v7183_v11 = vpop.f32.mrb[155].mxu1 }
 0x5da   : > { %9066 = vmatmul.mubr.msk.bf16.gmra.mrb[204].mxu1 %vm1079_vm1, %v6840_v28 }
 0x5db   : > { %v2505_v31 = vpop.permute.xlu1 %2504  ;;  %v2507_v13 = vpop.permute.xlu0 %2506  ;;  %9069 = vmatprep.mubr.msk.bf16.mxu1 %vm1079_vm1, %v6843_v20 }
 0x5df   : > { %v2509_v4 = vpop.permute.xlu1 %2508  ;;  %v2511_v55 = vpop.permute.xlu0 %2510 }
 0x5e2   : > { %9070 = vmatmul.mubr.msk.bf16.gmra.mrb[208].mxu1 %vm1079_vm1, %v6846_v58 }
 0x5e3   : > { %v5131_v16 = vpop.permute.xlu1 %5130  ;;  %v5205_v12 = vpop.permute.xlu0 %5204  ;;  %9073 = vmatprep.mubr.msk.bf16.mxu1 %vm1079_vm1, %v6849_v63 }
 0x5e7   : > { %v5207_v1 = vpop.permute.xlu1 %5206  ;;  %v5209_v40 = vpop.permute.xlu0 %5208 }
 0x5ea   : > { %9074 = vmatmul.mubr.msk.bf16.gmra.mrb[212].mxu1 %vm1079_vm1, %v6852_v26 }
 0x5eb   : > { %v5962_v43 = vpop.permute.xlu1 %5961  ;;  %v5964_v39 = vpop.permute.xlu0 %5963  ;;  %9077 = vmatprep.mubr.msk.bf16.mxu1 %vm1079_vm1, %v6855_v54 }
 0x5ed   : > { %v14628_v7 = vpop.f32.mrb[156].mxu1 }
 0x5ee   : > { %v7188_v14 = vpop.f32.mrb[157].mxu1 }
 0x5ef   : > { %v5966_v36 = vpop.permute.xlu1 %5965  ;;  %v5211_v47 = vpop.permute.xlu0 %5210 }
 0x5f0   : > { %v14630_v27 = vpop.f32.mrb[158].mxu1 }
 0x5f1   : > { %v7191_v30 = vpop.f32.mrb[159].mxu1 }
 0x5f2   : > { %9078 = vmatmul.mubr.msk.bf16.gmra.mrb[216].mxu1 %vm1079_vm1, %v6858_v19 }
 0x5f3   : > { %v5213_v22 = vpop.permute.xlu1 %5212  ;;  %v5380_v57 = vpop.permute.xlu0 %5379 }
 0x5f7   : > { %v5454_v24 = vpop.permute.xlu1 %5453  ;;  %v5456_v38 = vpop.permute.xlu0 %5455 }
 0x5fb   : > { %v5458_v48 = vpop.permute.xlu1 %5457  ;;  %v6126_v8 = vpop.permute.xlu0 %6125 }
 0x5ff   : > { %v6128_v17 = vpop.permute.xlu1 %6127  ;;  %v6130_v11 = vpop.permute.xlu0 %6129 }
 0x603   : > { %v6132_v28 = vpop.permute.xlu1 %6131  ;;  %v6134_v25 = vpop.permute.xlu0 %6133 }
 0x604   : > { %v14660_v25 = vld [vmem:[%s14950_s5] ss:$0 sm:$0xff] }
 0x605   : > { %v14633_v20 = vpop.f32.mrb[160].mxu1 }
 0x606   : > { %v7196_v31 = vpop.f32.mrb[161].mxu1 }
 0x607   : > { %v5460_v13 = vpop.permute.xlu1 %5459  ;;  %v5462_v46 = vpop.permute.xlu0 %5461  ;;  %v7107_v31 = vadd.f32 %v14660_v25, %v14324_v21 }
 0x608   : > { %v14635_v51 = vpop.f32.mrb[162].mxu1  ;;  %v7099_v13 = vadd.f32 %v14660_v25, %v14291_v23  ;;  %v7123_v23 = vadd.f32 %v14660_v25, %v14372_v18 }
 0x609   : > { %v7199_v4 = vpop.f32.mrb[163].mxu1 }
 0x60a   : > { %v7110_v4 = vadd.f32 %v14660_v25, %v14328_v0  ;;  %v7115_v0 = vadd.f32 %v14660_v25, %v14346_v35 }
 0x60b   : > { %v5548_v6 = vpop.permute.xlu1 %5547  ;;  %v5550_v34 = vpop.permute.xlu0 %5549 }
 0x60f   : > { %v5552_v55 = vpop.permute.xlu1 %5551  ;;  %v5626_v58 = vpop.permute.xlu0 %5625 }
 0x610   : > { %v7102_v55 = vadd.f32 %v14660_v25, %v14298_v53  ;;  %v7126_v53 = vadd.f32 %v14660_v25, %v14375_v33  ;;  %v7139_v33 = vadd.f32 %v14660_v25, %v14447_v32 }
 0x613   : > { %v5628_v63 = vpop.permute.xlu1 %5627  ;;  %v5630_v16 = vpop.permute.xlu0 %5629 }
 0x617   : > { %v6040_v12 = vpop.permute.xlu1 %6039  ;;  %v6042_v61 = vpop.permute.xlu0 %6041 }
 0x61b   : > { %v6371_v5 = vpop.permute.xlu1 %6370  ;;  %v6373_v1 = vpop.permute.xlu0 %6372 }
 0x61d   : > { %v14637_v62 = vpop.f32.mrb[164].mxu1 }
 0x61e   : > { %v7204_v42 = vpop.f32.mrb[165].mxu1 }
 0x61f   : > { %v6375_v40 = vpop.permute.xlu1 %6374  ;;  %v6377_v26 = vpop.permute.xlu0 %6376 }
 0x620   : > { %v14639_v54 = vpop.f32.mrb[166].mxu1 }
 0x621   : > { %v7207_v43 = vpop.f32.mrb[167].mxu1 }
 0x623   : > { %v6379_v39 = vpop.permute.xlu1 %6378 }
 0x635   : > { %v14641_v45 = vpop.f32.mrb[168].mxu1 }
 0x636   : > { %v7212_v44 = vpop.f32.mrb[169].mxu1 }
 0x637   : > { %v14643_v14 = vpop.f32.mrb[170].mxu1 }
 0x638   : > { %v7215_v36 = vpop.f32.mrb[171].mxu1 }
 0x639   : > { %v7118_v36 = vadd.f32 %v14660_v25, %v14354_v29  ;;  %v7131_v29 = vadd.f32 %v14660_v25, %v14401_v41 }
 0x64d   : > { %v14645_v47 = vpop.f32.mrb[172].mxu1 }
 0x64e   : > { %v7220_v30 = vpop.f32.mrb[173].mxu1 }
 0x64f   : > { %v14647_v19 = vpop.f32.mrb[174].mxu1 }
 0x650   : > { %v7223_v22 = vpop.f32.mrb[175].mxu1 }
 0x665   : > { %v14649_v57 = vpop.f32.mrb[176].mxu1 }
 0x666   : > { %v7228_v24 = vpop.f32.mrb[177].mxu1 }
 0x667   : > { %v14651_v38 = vpop.f32.mrb[178].mxu1 }
 0x668   : > { %v7231_v48 = vpop.f32.mrb[179].mxu1 }
 0x67d   : > { %v14653_v8 = vpop.f32.mrb[180].mxu1 }
 0x67e   : > { %v7236_v17 = vpop.f32.mrb[181].mxu1 }
 0x67f   : > { %v14655_v11 = vpop.f32.mrb[182].mxu1 }
 0x680   : > { %v7239_v28 = vpop.f32.mrb[183].mxu1 }
 0x685   : > { %v9047_v46 = vpop.f32.mrb[184].mxu1 }
 0x686   : > { %v7284_v6 = vadd.f32 %v9047_v46, %v7107_v31  ;;  %v7275_v34 = vpop.f32.mrb[185].mxu1 }
 0x687   : > { %v7276_v58 = vadd.f32 %v7275_v34, %v7099_v13  ;;  %v9048_v63 = vpop.f32.mrb[186].mxu1 }
 0x688   : > { %v7287_v16 = vadd.f32 %v9048_v63, %v7110_v4  ;;  %v7278_v12 = vpop.f32.mrb[187].mxu1  ;;  %v7420_v5 = vmax.f32 %v7284_v6, 0.0  ;;  %v7142_v6 = vadd.f32 %v14660_v25, %v14450_v50  ;;  %v7155_v50 = vadd.f32 %v14660_v25, %v14552_v3 }
 0x689   : > { %v7279_v61 = vadd.f32 %v7278_v12, %v7102_v55  ;;  %v7418_v21 = vmax.f32 %v7276_v58, 0.0  ;;  %v7134_v58 = vadd.f32 %v14660_v25, %v14404_v52  ;;  %v7147_v52 = vadd.f32 %v14660_v25, %v14505_v60 }
 0x68a   : > { %v7421_v1 = vmax.f32 %v7287_v16, 0.0 }
 0x68b   : > { %v7419_v42 = vmax.f32 %v7279_v61, 0.0 }
 0x68c   : > { %v7455_v40 = vpack.c.bf16 %v7421_v1, %v7420_v5 }
 0x68d   : > { %v7454_v26 = vpack.c.bf16 %v7419_v42, %v7418_v21  ;;  %v9051_v43 = vpop.f32.mrb[188].mxu1 }
 0x68e   : > { %v7300_v39 = vadd.f32 %v9051_v43, %v7123_v23  ;;  %v7291_v44 = vpop.f32.mrb[189].mxu1 }
 0x68f   : > { %v7292_v30 = vadd.f32 %v7291_v44, %v7115_v0  ;;  %v9052_v22 = vpop.f32.mrb[190].mxu1  ;;  %9085 = vmatprep.mubr.msk.bf16.mxu0 %vm1079_vm1, %v7454_v26  ;;  %v7158_v0 = vadd.f32 %v14660_v25, %v14555_v15  ;;  %v7171_v15 = vadd.f32 %v14660_v25, %v14608_v2 }
 0x690   : > { %v7303_v24 = vadd.f32 %v9052_v22, %v7126_v53  ;;  %v7294_v18 = vpop.f32.mrb[191].mxu1  ;;  %9086 = vmatmul.mubr.msk.bf16.vlgmr.msra.gmra.mrb[200].mxu0 %vm1079_vm1, %v7455_v40  ;;  %v7424_v35 = vmax.f32 %v7300_v39, 0.0  ;;  %v7150_v53 = vadd.f32 %v14660_v25, %v14511_v9  ;;  %v7163_v9 = vadd.f32 %v14660_v25, %v14596_v56 }
 0x691   : > { %v7295_v48 = vadd.f32 %v7294_v18, %v7118_v36  ;;  %v7422_v28 = vmax.f32 %v7292_v30, 0.0 }
 0x692   : > { %v7425_v17 = vmax.f32 %v7303_v24, 0.0 }
 0x693   : > { %v7423_v31 = vmax.f32 %v7295_v48, 0.0 }
 0x694   : > { %v7457_v13 = vpack.c.bf16 %v7425_v17, %v7424_v35 }
 0x695   : > { %v7456_v46 = vpack.c.bf16 %v7423_v31, %v7422_v28  ;;  %v9055_v4 = vpop.f32.mrb[192].mxu1  ;;  %v7174_v28 = vadd.f32 %v14660_v25, %v14610_v49  ;;  %v7187_v49 = vadd.f32 %v14660_v25, %v14628_v7 }
 0x696   : > { %v7316_v34 = vadd.f32 %v9055_v4, %v7139_v33  ;;  %v7307_v55 = vpop.f32.mrb[193].mxu1 }
 0x697   : > { %v7308_v63 = vadd.f32 %v7307_v55, %v7131_v29  ;;  %v9056_v16 = vpop.f32.mrb[194].mxu1  ;;  %9089 = vmatprep.mubr.msk.bf16.mxu0 %vm1079_vm1, %v7456_v46 }
 0x698   : > { %v7319_v12 = vadd.f32 %v9056_v16, %v7142_v6  ;;  %v7310_v32 = vpop.f32.mrb[195].mxu1  ;;  %9090 = vmatmul.mubr.msk.bf16.gmra.mrb[204].mxu0 %vm1079_vm1, %v7457_v13  ;;  %v7428_v41 = vmax.f32 %v7316_v34, 0.0  ;;  %v7166_v13 = vadd.f32 %v14660_v25, %v14598_v37  ;;  %v7179_v37 = vadd.f32 %v14660_v25, %v14618_v59 }
 0x699   : > { %v7311_v61 = vadd.f32 %v7310_v32, %v7134_v58  ;;  %v7426_v1 = vmax.f32 %v7308_v63, 0.0  ;;  %v7190_v32 = vadd.f32 %v14660_v25, %v14630_v27  ;;  %v7203_v27 = vadd.f32 %v14660_v25, %v14637_v62 }
 0x69a   : > { %v7429_v5 = vmax.f32 %v7319_v12, 0.0 }
 0x69b   : > { %v7427_v21 = vmax.f32 %v7311_v61, 0.0 }
 0x69c   : > { %v7459_v42 = vpack.c.bf16 %v7429_v5, %v7428_v41  ;;  %v7182_v5 = vadd.f32 %v14660_v25, %v14620_v10  ;;  %v7195_v10 = vadd.f32 %v14660_v25, %v14633_v20 }
 0x69d   : > { %v7458_v23 = vpack.c.bf16 %v7427_v21, %v7426_v1  ;;  %v9059_v40 = vpop.f32.mrb[196].mxu1 }
 0x69e   : > { %v7332_v26 = vadd.f32 %v9059_v40, %v7155_v50  ;;  %v7323_v43 = vpop.f32.mrb[197].mxu1 }
 0x69f   : > { %v7324_v39 = vadd.f32 %v7323_v43, %v7147_v52  ;;  %v9060_v44 = vpop.f32.mrb[198].mxu1  ;;  %9093 = vmatprep.mubr.msk.bf16.mxu0 %vm1079_vm1, %v7458_v23 }
 0x6a0   : > { %v7335_v36 = vadd.f32 %v9060_v44, %v7158_v0  ;;  %v7326_v3 = vpop.f32.mrb[199].mxu1  ;;  %9094 = vmatmul.mubr.msk.bf16.gmra.mrb[208].mxu0 %vm1079_vm1, %v7459_v42  ;;  %v7432_v60 = vmax.f32 %v7332_v26, 0.0 }
 0x6a1   : > { %v7327_v30 = vadd.f32 %v7326_v3, %v7150_v53  ;;  %v7430_v24 = vmax.f32 %v7324_v39, 0.0  ;;  %v7206_v53 = vadd.f32 %v14660_v25, %v14639_v54  ;;  %v7219_v54 = vadd.f32 %v14660_v25, %v14645_v47 }
 0x6a2   : > { %v7433_v22 = vmax.f32 %v7335_v36, 0.0  ;;  %v7198_v36 = vadd.f32 %v14660_v25, %v14635_v51  ;;  %v7211_v51 = vadd.f32 %v14660_v25, %v14641_v45 }
 0x6a3   : > { %v7431_v18 = vmax.f32 %v7327_v30, 0.0 }
 0x6a4   : > { %v7461_v48 = vpack.c.bf16 %v7433_v22, %v7432_v60 }
 0x6a5   : > { %v7460_v35 = vpack.c.bf16 %v7431_v18, %v7430_v24  ;;  %v9063_v17 = vpop.f32.mrb[200].mxu1 }
 0x6a6   : > { %v7348_v31 = vadd.f32 %v9063_v17, %v7171_v15  ;;  %v7339_v33 = vpop.f32.mrb[201].mxu1  ;;  %v7222_v17 = vadd.f32 %v14660_v25, %v14647_v19  ;;  %v7235_v19 = vadd.f32 %v14660_v25, %v14653_v8 }
 0x6a7   : > { %v7340_v29 = vadd.f32 %v7339_v33, %v7163_v9  ;;  %v9064_v46 = vpop.f32.mrb[202].mxu1  ;;  %9097 = vmatprep.mubr.msk.bf16.mxu0 %vm1079_vm1, %v7460_v35  ;;  %v7214_v33 = vadd.f32 %v14660_v25, %v14643_v14  ;;  %v7227_v14 = vadd.f32 %v14660_v25, %v14649_v57 }
 0x6a8   : > { %v7351_v4 = vadd.f32 %v9064_v46, %v7174_v28  ;;  %v7342_v2 = vpop.f32.mrb[203].mxu1  ;;  %9098 = vmatmul.mubr.msk.bf16.gmra.mrb[212].mxu0 %vm1079_vm1, %v7461_v48  ;;  %v7436_v56 = vmax.f32 %v7348_v31, 0.0 }
 0x6a9   : > { %v7343_v6 = vadd.f32 %v7342_v2, %v7166_v13  ;;  %v7434_v55 = vmax.f32 %v7340_v29, 0.0 }
 0x6aa   : > { %v7437_v34 = vmax.f32 %v7351_v4, 0.0 }
 0x6ab   : > { %v7435_v58 = vmax.f32 %v7343_v6, 0.0 }
 0x6ac   : > { %v7463_v63 = vpack.c.bf16 %v7437_v34, %v7436_v56 }
 0x6ad   : > { %v7462_v16 = vpack.c.bf16 %v7435_v58, %v7434_v55  ;;  %v9067_v12 = vpop.f32.mrb[204].mxu1 }
 0x6ae   : > { %v7364_v61 = vadd.f32 %v9067_v12, %v7187_v49  ;;  %v7355_v41 = vpop.f32.mrb[205].mxu1  ;;  %v7238_v49 = vadd.f32 %v14660_v25, %v14655_v11 }
 0x6af   : > { %v7356_v1 = vadd.f32 %v7355_v41, %v7179_v37  ;;  %v9068_v21 = vpop.f32.mrb[206].mxu1  ;;  %9101 = vmatprep.mubr.msk.bf16.mxu0 %vm1079_vm1, %v7462_v16  ;;  %v7230_v16 = vadd.f32 %v14660_v25, %v14651_v38  ;;  %v8606_v38 = vld [vmem:[%s9476_s18 + $0xb0] sm:$0xff]   ;;  %v8607_v25 = vld [vmem:[%s9476_s18 + $0xb8] sm:$0xff]  }
 0x6b0   : > { %v7367_v50 = vadd.f32 %v9068_v21, %v7190_v32  ;;  %v7358_v7 = vpop.f32.mrb[207].mxu1  ;;  %9102 = vmatmul.mubr.msk.bf16.gmra.mrb[216].mxu0 %vm1079_vm1, %v7463_v63  ;;  %v7440_v59 = vmax.f32 %v7364_v61, 0.0 }
 0x6b1   : > { %v7359_v42 = vadd.f32 %v7358_v7, %v7182_v5  ;;  %v7438_v23 = vmax.f32 %v7356_v1, 0.0  ;;  %v8343_v7 = vld [vmem:[%s9476_s18 + $0xac] sm:$0xe] }
 0x6b2   : > { %v7441_v52 = vmax.f32 %v7367_v50, 0.0 }
 0x6b3   : > { %v7439_v40 = vmax.f32 %v7359_v42, 0.0  ;;  %v8524_v42 = vunpack.c.h.bf16 %v8606_v38 }
 0x6b4   : > { %v7465_v0 = vpack.c.bf16 %v7441_v52, %v7440_v59  ;;  %v8527_v59 = vunpack.c.l.bf16 %v8607_v25  ;;  %v8523_v52 = vunpack.c.l.bf16 %v8606_v38 }
 0x6b5   : > { %v7464_v26 = vpack.c.bf16 %v7439_v40, %v7438_v23  ;;  %v9071_v43 = vpop.f32.mrb[208].mxu1  ;;  %v7513_v23 = vunpack.c.l.bf16 %v8343_v7  ;;  %v8528_v40 = vunpack.c.h.bf16 %v8607_v25 }
 0x6b6   : > { %v7380_v39 = vadd.f32 %v9071_v43, %v7203_v27  ;;  %v7371_v44 = vpop.f32.mrb[209].mxu1  ;;  %v7840_v27 = vrot.slane %v8524_v42, 3  ;;  %v8608_v43 = vld [vmem:[%s9476_s18 + $0xc0] sm:$0xff]  }
 0x6b7   : > { %v7372_v3 = vadd.f32 %v7371_v44, %v7195_v10  ;;  %v9072_v30 = vpop.f32.mrb[210].mxu1  ;;  %9105 = vmatprep.mubr.msk.bf16.mxu0 %vm1079_vm1, %v7464_v26  ;;  %v7837_v10 = vrot.slane %v7513_v23, 3  ;;  %v7838_v26 = vrot.slane %v8523_v52, 3  ;;  %v7844_v44 = vrot.slane %v8528_v40, 3  ;;  %v8612_v52 = vld [vmem:[%s9476_s18 + $0xe0] sm:$0xff]   ;;  %v8613_v23 = vld [vmem:[%s9476_s18 + $0xe8] sm:$0xff]  }
 0x6b8   : > { %v7383_v60 = vadd.f32 %v9072_v30, %v7206_v53  ;;  %v7374_v62 = vpop.f32.mrb[211].mxu1  ;;  %9106 = vmatmul.mubr.msk.bf16.gmra.mrb[220].mxu0 %vm1079_vm1, %v7465_v0  ;;  %v7444_v20 = vmax.f32 %v7380_v39, 0.0  ;;  %v7842_v0 = vrot.slane %v8527_v59, 3  ;;  %v8609_v53 = vld [vmem:[%s9476_s18 + $0xc8] sm:$0xff]   ;;  %v14760_v39 = vld [vmem:[%s14952_s7] ss:$0 sm:$0xff]  ;;  %v8532_v30 = vunpack.c.h.bf16 %v8608_v43 }
 0x6b9   : > { %v7375_v22 = vadd.f32 %v7374_v62, %v7198_v36  ;;  %v7442_v18 = vmax.f32 %v7372_v3, 0.0 }
 0x6ba   : > { %v7445_v24 = vmax.f32 %v7383_v60, 0.0  ;;  %v7843_v3 = vsel %vm1840_vm7, %v7840_v27, %v7842_v0  ;;  %v8535_v60 = vunpack.c.l.bf16 %v8609_v53 }
 0x6bb   : > { %v7443_v15 = vmax.f32 %v7375_v22, 0.0 }
 0x6bc   : > { %v7467_v48 = vpack.c.bf16 %v7445_v24, %v7444_v20  ;;  %v7839_v20 = vsel %vm1840_vm7, %v7837_v10, %v7838_v26  ;;  %v8531_v24 = vunpack.c.l.bf16 %v8608_v43 }
 0x6bd   : > { %v7466_v9 = vpack.c.bf16 %v7443_v15, %v7442_v18  ;;  %v9075_v35 = vpop.f32.mrb[212].mxu1 }
 0x6be   : > { %v7396_v28 = vadd.f32 %v9075_v35, %v7219_v54  ;;  %v7387_v31 = vpop.f32.mrb[213].mxu1  ;;  %v7845_v54 = vsel %vm1840_vm7, %v7842_v0, %v7844_v44 }
 0x6bf   : > { %v7388_v13 = vadd.f32 %v7387_v31, %v7211_v51  ;;  %v9076_v29 = vpop.f32.mrb[214].mxu1  ;;  %9109 = vmatprep.mubr.msk.bf16.mxu0 %vm1079_vm1, %v7466_v9 }
 0x6c0   : > { %v7399_v46 = vadd.f32 %v9076_v29, %v7222_v17  ;;  %v7390_v47 = vpop.f32.mrb[215].mxu1  ;;  %9110 = vmatmul.mubr.msk.bf16.gmra.mrb[224].mxu0 %vm1079_vm1, %v7467_v48  ;;  %v7448_v45 = vmax.f32 %v7396_v28, 0.0  ;;  %v8536_v48 = vunpack.c.h.bf16 %v8609_v53  ;;  %v7841_v17 = vsel %vm1840_vm7, %v7838_v26, %v7840_v27 }
 0x6c1   : > { %v7391_v4 = vadd.f32 %v7390_v47, %v7214_v33  ;;  %v7446_v6 = vmax.f32 %v7388_v13, 0.0  ;;  %v7848_v33 = vrot.slane %v8532_v30, 3  ;;  %v7850_v13 = vrot.slane %v8535_v60, 3 }
 0x6c2   : > { %v7449_v2 = vmax.f32 %v7399_v46, 0.0  ;;  %v7846_v47 = vrot.slane %v8531_v24, 3 }
 0x6c3   : > { %v7447_v56 = vmax.f32 %v7391_v4, 0.0  ;;  %v8610_v4 = vld [vmem:[%s9476_s18 + $0xd0] sm:$0xff]  }
 0x6c4   : > { %v7469_v34 = vpack.c.bf16 %v7449_v2, %v7448_v45  ;;  %v8611_v45 = vld [vmem:[%s9476_s18 + $0xd8] sm:$0xff]  }
 0x6c5   : > { %v7468_v55 = vpack.c.bf16 %v7447_v56, %v7446_v6  ;;  %v9079_v58 = vpop.f32.mrb[216].mxu1  ;;  %v7852_v56 = vrot.slane %v8536_v48, 3 }
 0x6c6   : > { %v7412_v63 = vadd.f32 %v9079_v58, %v7235_v19  ;;  %v7403_v37 = vpop.f32.mrb[217].mxu1  ;;  %v8540_v58 = vunpack.c.h.bf16 %v8610_v4 }
 0x6c7   : > { %v7404_v12 = vadd.f32 %v7403_v37, %v7227_v14  ;;  %v9080_v32 = vpop.f32.mrb[218].mxu1  ;;  %9113 = vmatprep.mubr.msk.bf16.mxu0 %vm1079_vm1, %v7468_v55  ;;  %v7851_v55 = vsel %vm1840_vm7, %v7848_v33, %v7850_v13 }
 0x6c8   : > { %v7415_v8 = vadd.f32 %v9080_v32, %v7238_v49  ;;  %v7406_v61 = vpop.f32.mrb[219].mxu1  ;;  %9114 = vmatmul.mubr.msk.bf16.gmra.mrb[228].mxu0 %vm1079_vm1, %v7469_v34  ;;  %v7452_v41 = vmax.f32 %v7412_v63, 0.0  ;;  %v8543_v49 = vunpack.c.l.bf16 %v8611_v45  ;;  %v7856_v38 = vrot.slane %v8540_v58, 3 }
 0x6c9   : > { %v7407_v57 = vadd.f32 %v7406_v61, %v7230_v16  ;;  %v7450_v11 = vmax.f32 %v7404_v12, 0.0  ;;  %v7847_v16 = vsel %vm1840_vm7, %v7844_v44, %v7846_v47  ;;  %v8539_v12 = vunpack.c.l.bf16 %v8610_v4 }
 0x6ca   : > { %v7453_v5 = vmax.f32 %v7415_v8, 0.0  ;;  %v7853_v61 = vsel %vm1840_vm7, %v7850_v13, %v7852_v56  ;;  %v7858_v25 = vrot.slane %v8543_v49, 3  ;;  %v8548_v44 = vunpack.c.h.bf16 %v8612_v52 }
 0x6cb   : > { %v7451_v1 = vmax.f32 %v7407_v57, 0.0  ;;  %v8544_v57 = vunpack.c.h.bf16 %v8611_v45  ;;  %v7854_v59 = vrot.slane %v8539_v12, 3 }
 0x6cc   : > { %v7471_v21 = vpack.c.bf16 %v7453_v5, %v7452_v41  ;;  %v7859_v53 = vsel %vm1840_vm7, %v7856_v38, %v7858_v25 }
 0x6cd   : > { %v7470_v50 = vpack.c.bf16 %v7451_v1, %v7450_v11  ;;  %v7849_v1 = vsel %vm1840_vm7, %v7846_v47, %v7848_v33  ;;  %v7860_v0 = vrot.slane %v8544_v57, 3  ;;  %v7855_v60 = vsel %vm1840_vm7, %v7852_v56, %v7854_v59 }
 0x6cf   : > { %9117 = vmatprep.mubr.msk.bf16.mxu0 %vm1079_vm1, %v7470_v50  ;;  %v7861_v24 = vsel %vm1840_vm7, %v7858_v25, %v7860_v0 }
 0x6d0   : > { %9118 = vmatmul.mubr.msk.bf16.gmra.mrb[232].mxu0 %vm1079_vm1, %v7471_v21 }
 0x763   : > { %v9087_v36 = vpop.f32.mrb[200].mxu0 }
 0x764   : > { %v7666_v62 = vadd.f32 %v9087_v36, %v14760_v39  ;;  %v7657_v22 = vpop.f32.mrb[201].mxu0  ;;  %v8551_v36 = vunpack.c.l.bf16 %v8613_v23 }
 0x765   : > { %v7658_v18 = vadd.f32 %v14760_v39, %v7657_v22  ;;  %v9088_v15 = vpop.f32.mrb[202].mxu0 }
 0x766   : > { %v7948_v51 = vadd.f32 %v7843_v3, %v7666_v62  ;;  %v7669_v9 = vadd.f32 %v9088_v15, %v14760_v39  ;;  %v7660_v35 = vpop.f32.mrb[203].mxu0  ;;  %v8547_v62 = vunpack.c.l.bf16 %v8612_v52 }
 0x767   : > { %v7946_v28 = vadd.f32 %v7839_v20, %v7658_v18  ;;  %v7661_v31 = vadd.f32 %v14760_v39, %v7660_v35  ;;  %v8552_v18 = vunpack.c.h.bf16 %v8613_v23 }
 0x768   : > { %v7984_v29 = vmax.f32 %v7948_v51, 0.0  ;;  %v7949_v46 = vadd.f32 %v7845_v54, %v7669_v9  ;;  %v7857_v51 = vsel %vm1840_vm7, %v7854_v59, %v7856_v38  ;;  %v7862_v13 = vrot.slane %v8547_v62, 3 }
 0x769   : > { %v7982_v2 = vmax.f32 %v7946_v28, 0.0  ;;  %v7947_v6 = vadd.f32 %v7841_v17, %v7661_v31  ;;  %v7864_v17 = vrot.slane %v8548_v44, 3  ;;  %v7866_v28 = vrot.slane %v8551_v36, 3 }
 0x76a   : > { %8403 = vst [vmem:[%s13511_s10 + $0x10e] sm:$0xfc] %v7984_v29  ;;  %v7985_v19 = vmax.f32 %v7949_v46, 0.0  ;;  %v8614_v29 = vld [vmem:[%s9476_s18 + $0xf0] sm:$0xff]   ;;  %v8615_v46 = vld [vmem:[%s9476_s18 + $0xf8] sm:$0xff]   ;;  %v7868_v45 = vrot.slane %v8552_v18, 3  ;;  %v7863_v49 = vsel %vm1840_vm7, %v7860_v0, %v7862_v13 }
 0x76b   : > { %8401 = vst [vmem:[%s13511_s10 + $0x100] sm:$0xff] %v7982_v2  ;;  %v7983_v34 = vmax.f32 %v7947_v6, 0.0  ;;  %v9091_v14 = vpop.f32.mrb[204].mxu0 }
 0x76c   : > { %8404 = vst [vmem:[%s13511_s10 + $0x116] sm:$0xff] %v7985_v19  ;;  %v7682_v63 = vadd.f32 %v9091_v14, %v14760_v39  ;;  %v7673_v37 = vpop.f32.mrb[205].mxu0  ;;  %v7867_v19 = vsel %vm1840_vm7, %v7864_v17, %v7866_v28  ;;  %v8559_v14 = vunpack.c.l.bf16 %v8615_v46  ;;  %v7869_v12 = vsel %vm1840_vm7, %v7866_v28, %v7868_v45 }
 0x76d   : > { %8402 = vst [vmem:[%s13511_s10 + $0x108] sm:$0xff] %v7983_v34  ;;  %v7674_v32 = vadd.f32 %v14760_v39, %v7673_v37  ;;  %v9092_v8 = vpop.f32.mrb[206].mxu0  ;;  %v8556_v34 = vunpack.c.h.bf16 %v8614_v29 }
 0x76e   : > { %v7952_v41 = vadd.f32 %v7851_v55, %v7682_v63  ;;  %v7685_v5 = vadd.f32 %v9092_v8, %v14760_v39  ;;  %v7676_v11 = vpop.f32.mrb[207].mxu0  ;;  %v8555_v63 = vunpack.c.l.bf16 %v8614_v29 }
 0x76f   : > { %v7950_v21 = vadd.f32 %v7847_v16, %v7674_v32  ;;  %v7677_v50 = vadd.f32 %v14760_v39, %v7676_v11  ;;  %v8560_v32 = vunpack.c.h.bf16 %v8615_v46 }
 0x770   : > { %v7988_v7 = vmax.f32 %v7952_v41, 0.0  ;;  %v7953_v42 = vadd.f32 %v7853_v61, %v7685_v5  ;;  %v7865_v41 = vsel %vm1840_vm7, %v7862_v13, %v7864_v17  ;;  %v7870_v25 = vrot.slane %v8555_v63, 3 }
 0x771   : > { %v7986_v40 = vmax.f32 %v7950_v21, 0.0  ;;  %v7951_v27 = vadd.f32 %v7849_v1, %v7677_v50  ;;  %v7872_v1 = vrot.slane %v8556_v34, 3  ;;  %v7874_v21 = vrot.slane %v8559_v14, 3 }
 0x772   : > { %8408 = vst [vmem:[%s13511_s10 + $0x12c] sm:$0xf] %v7988_v7  ;;  %8409 = vst [vmem:[%s13511_s10 + $0x12a] sm:$0xc0] %v7988_v7  ;;  %v7989_v10 = vmax.f32 %v7953_v42, 0.0  ;;  %v8616_v7 = vld [vmem:[%s9476_s18 + $0x100] sm:$0xff]   ;;  %v7871_v36 = vsel %vm1840_vm7, %v7868_v45, %v7870_v25 }
 0x773   : > { %8405 = vst [vmem:[%s13511_s10 + $0x11e] sm:$0x3] %v7986_v40  ;;  %8406 = vst [vmem:[%s13511_s10 + $0x11c] sm:$0xf0] %v7986_v40  ;;  %v7987_v26 = vmax.f32 %v7951_v27, 0.0  ;;  %v9095_v43 = vpop.f32.mrb[208].mxu0 }
 0x774   : > { %8410 = vst [vmem:[%s13511_s10 + $0x132] sm:$0xff] %v7989_v10  ;;  %v7698_v3 = vadd.f32 %v9095_v43, %v14760_v39  ;;  %v7689_v30 = vpop.f32.mrb[209].mxu0  ;;  %v8617_v42 = vld [vmem:[%s9476_s18 + $0x108] sm:$0xff]   ;;  %v7876_v23 = vrot.slane %v8560_v32, 3  ;;  %v7875_v10 = vsel %vm1840_vm7, %v7872_v1, %v7874_v21 }
 0x775   : > { %8407 = vst [vmem:[%s13511_s10 + $0x124] sm:$0xff] %v7987_v26  ;;  %v7690_v22 = vadd.f32 %v14760_v39, %v7689_v30  ;;  %v9096_v20 = vpop.f32.mrb[210].mxu0  ;;  %v8564_v26 = vunpack.c.h.bf16 %v8616_v7  ;;  %v8567_v43 = vunpack.c.l.bf16 %v8617_v42 }
 0x776   : > { %v7956_v15 = vadd.f32 %v7859_v53, %v7698_v3  ;;  %v7701_v54 = vadd.f32 %v9096_v20, %v14760_v39  ;;  %v7692_v48 = vpop.f32.mrb[211].mxu0  ;;  %v8563_v3 = vunpack.c.l.bf16 %v8616_v7  ;;  %v7877_v62 = vsel %vm1840_vm7, %v7874_v21, %v7876_v23 }
 0x777   : > { %v7954_v9 = vadd.f32 %v7855_v60, %v7690_v22  ;;  %v7693_v35 = vadd.f32 %v14760_v39, %v7692_v48  ;;  %v8568_v22 = vunpack.c.h.bf16 %v8617_v42 }
 0x778   : > { %v7992_v31 = vmax.f32 %v7956_v15, 0.0  ;;  %v7957_v33 = vadd.f32 %v7861_v24, %v7701_v54  ;;  %v7873_v15 = vsel %vm1840_vm7, %v7870_v25, %v7872_v1  ;;  %v7878_v28 = vrot.slane %v8563_v3, 3 }
 0x779   : > { %v7990_v47 = vmax.f32 %v7954_v9, 0.0  ;;  %v7955_v4 = vadd.f32 %v7857_v51, %v7693_v35  ;;  %v7880_v51 = vrot.slane %v8564_v26, 3  ;;  %v7882_v9 = vrot.slane %v8567_v43, 3 }
 0x77a   : > { %8413 = vst [vmem:[%s13511_s10 + $0x148] sm:$0xff] %v7992_v31  ;;  %v7993_v2 = vmax.f32 %v7957_v33, 0.0  ;;  %v8618_v31 = vld [vmem:[%s9476_s18 + $0x110] sm:$0xff]   ;;  %v8619_v33 = vld [vmem:[%s9476_s18 + $0x118] sm:$0xff]   ;;  %v7884_v46 = vrot.slane %v8568_v22, 3  ;;  %v7879_v14 = vsel %vm1840_vm7, %v7876_v23, %v7878_v28 }
 0x77b   : > { %8411 = vst [vmem:[%s13511_s10 + $0x13a] sm:$0x3f] %v7990_v47  ;;  %v7991_v6 = vmax.f32 %v7955_v4, 0.0  ;;  %v9099_v56 = vpop.f32.mrb[212].mxu0 }
 0x77c   : > { %8414 = vst [vmem:[%s13511_s10 + $0x14e] sm:$0xfc] %v7993_v2  ;;  %v7714_v55 = vadd.f32 %v9099_v56, %v14760_v39  ;;  %v7705_v58 = vpop.f32.mrb[213].mxu0  ;;  %v7883_v2 = vsel %vm1840_vm7, %v7880_v51, %v7882_v9  ;;  %v8575_v56 = vunpack.c.l.bf16 %v8619_v33  ;;  %v7885_v63 = vsel %vm1840_vm7, %v7882_v9, %v7884_v46 }
 0x77d   : > { %8412 = vst [vmem:[%s13511_s10 + $0x140] sm:$0xff] %v7991_v6  ;;  %v7706_v37 = vadd.f32 %v14760_v39, %v7705_v58  ;;  %v9100_v16 = vpop.f32.mrb[214].mxu0  ;;  %v8572_v6 = vunpack.c.h.bf16 %v8618_v31 }
 0x77e   : > { %v7960_v8 = vadd.f32 %v7867_v19, %v7714_v55  ;;  %v7717_v61 = vadd.f32 %v9100_v16, %v14760_v39  ;;  %v7708_v57 = vpop.f32.mrb[215].mxu0  ;;  %v8571_v55 = vunpack.c.l.bf16 %v8618_v31 }
 0x77f   : > { %v7958_v5 = vadd.f32 %v7863_v49, %v7706_v37  ;;  %v7709_v11 = vadd.f32 %v14760_v39, %v7708_v57  ;;  %v8576_v37 = vunpack.c.h.bf16 %v8619_v33 }
 0x780   : > { %v7996_v50 = vmax.f32 %v7960_v8, 0.0  ;;  %v7961_v38 = vadd.f32 %v7869_v12, %v7717_v61  ;;  %v7881_v8 = vsel %vm1840_vm7, %v7878_v28, %v7880_v51  ;;  %v7886_v21 = vrot.slane %v8571_v55, 3 }
 0x781   : > { %v7994_v59 = vmax.f32 %v7958_v5, 0.0  ;;  %v7959_v52 = vadd.f32 %v7865_v41, %v7709_v11  ;;  %v7888_v41 = vrot.slane %v8572_v6, 3  ;;  %v7890_v5 = vrot.slane %v8575_v56, 3 }
 0x782   : > { %8418 = vst [vmem:[%s13511_s10 + $0x164] sm:$0xff] %v7996_v50  ;;  %v7997_v40 = vmax.f32 %v7961_v38, 0.0  ;;  %v8620_v50 = vld [vmem:[%s9476_s18 + $0x120] sm:$0xff]   ;;  %v8621_v38 = vld [vmem:[%s9476_s18 + $0x128] sm:$0xff]   ;;  %v7892_v42 = vrot.slane %v8576_v37, 3  ;;  %v7887_v43 = vsel %vm1840_vm7, %v7884_v46, %v7886_v21 }
 0x783   : > { %8415 = vst [vmem:[%s13511_s10 + $0x156] sm:$0xff] %v7994_v59  ;;  %v7995_v27 = vmax.f32 %v7959_v52, 0.0  ;;  %v9103_v0 = vpop.f32.mrb[216].mxu0 }
 0x784   : > { %8419 = vst [vmem:[%s13511_s10 + $0x16c] sm:$0xf] %v7997_v40  ;;  %8420 = vst [vmem:[%s13511_s10 + $0x16a] sm:$0xc0] %v7997_v40  ;;  %v7730_v53 = vadd.f32 %v9103_v0, %v14760_v39  ;;  %v7721_v44 = vpop.f32.mrb[217].mxu0  ;;  %v7891_v40 = vsel %vm1840_vm7, %v7888_v41, %v7890_v5  ;;  %v8583_v0 = vunpack.c.l.bf16 %v8621_v38  ;;  %v7893_v3 = vsel %vm1840_vm7, %v7890_v5, %v7892_v42 }
 0x785   : > { %8416 = vst [vmem:[%s13511_s10 + $0x15e] sm:$0x3] %v7995_v27  ;;  %8417 = vst [vmem:[%s13511_s10 + $0x15c] sm:$0xf0] %v7995_v27  ;;  %v7722_v30 = vadd.f32 %v14760_v39, %v7721_v44  ;;  %v9104_v60 = vpop.f32.mrb[218].mxu0  ;;  %v8580_v27 = vunpack.c.h.bf16 %v8620_v50 }
 0x786   : > { %v7964_v20 = vadd.f32 %v7875_v10, %v7730_v53  ;;  %v7733_v24 = vadd.f32 %v9104_v60, %v14760_v39  ;;  %v7724_v18 = vpop.f32.mrb[219].mxu0  ;;  %v8579_v53 = vunpack.c.l.bf16 %v8620_v50 }
 0x787   : > { %v7962_v54 = vadd.f32 %v7871_v36, %v7722_v30  ;;  %v7725_v48 = vadd.f32 %v14760_v39, %v7724_v18  ;;  %v8584_v30 = vunpack.c.h.bf16 %v8621_v38 }
 0x788   : > { %v8000_v35 = vmax.f32 %v7964_v20, 0.0  ;;  %v7965_v17 = vadd.f32 %v7877_v62, %v7733_v24  ;;  %v7889_v20 = vsel %vm1840_vm7, %v7886_v21, %v7888_v41  ;;  %v7894_v9 = vrot.slane %v8579_v53, 3 }
 0x789   : > { %v7998_v13 = vmax.f32 %v7962_v54, 0.0  ;;  %v7963_v29 = vadd.f32 %v7873_v15, %v7725_v48  ;;  %v7896_v15 = vrot.slane %v8580_v27, 3  ;;  %v7898_v54 = vrot.slane %v8583_v0, 3 }
 0x78a   : > { %8423 = vst [vmem:[%s13511_s10 + $0x180] sm:$0xff] %v8000_v35  ;;  %v8001_v47 = vmax.f32 %v7965_v17, 0.0  ;;  %v8622_v35 = vld [vmem:[%s9476_s18 + $0x130] sm:$0xff]   ;;  %v8378_v17 = vld [vmem:[%s9476_s18 + $0x138] sm:$0xf]  ;;  %v7900_v33 = vrot.slane %v8584_v30, 3 }
 0x78b   : > { %8421 = vst [vmem:[%s13511_s10 + $0x172] sm:$0xff] %v7998_v13  ;;  %v7999_v4 = vmax.f32 %v7963_v29, 0.0  ;;  %v9107_v45 = vpop.f32.mrb[220].mxu0  ;;  %v8379_v29 = vld [vmem:[%s9476_s18 + $0x13c] sm:$0x3]  ;;  %s8452_s18 = sshll.u32 %s9420_s9, 13 }
 0x78c   : > { %8424 = vst [vmem:[%s13511_s10 + $0x188] sm:$0xff] %v8001_v47  ;;  %v7746_v19 = vadd.f32 %v9107_v45, %v14760_v39  ;;  %v7737_v34 = vpop.f32.mrb[221].mxu0  ;;  %v8588_v45 = vunpack.c.h.bf16 %v8622_v35  ;;  %s14894_s26 = scalar_lea.hbm %s14953_s8, %s8452_s18  ;;  %s14904_s9 = scalar_lea.sflag [#allocation4], %s299_s23 }
 0x78d   : > { %8422 = vst [vmem:[%s13511_s10 + $0x17a] sm:$0x3f] %v7999_v4  ;;  %v7738_v58 = vadd.f32 %v14760_v39, %v7737_v34  ;;  %v9108_v49 = vpop.f32.mrb[222].mxu0  ;;  %v7899_v4 = vsel %vm1840_vm7, %v7896_v15, %v7898_v54  ;;  %v8587_v34 = vunpack.c.l.bf16 %v8622_v35 }
 0x78e   : > { %v7968_v16 = vadd.f32 %v7883_v2, %v7746_v19  ;;  %v7749_v12 = vadd.f32 %v9108_v49, %v14760_v39  ;;  %v7740_v32 = vpop.f32.mrb[223].mxu0  ;;  %v7548_v2 = vunpack.c.l.bf16 %v8378_v17  ;;  %v7895_v19 = vsel %vm1840_vm7, %v7892_v42, %v7894_v9 }
 0x78f   : > { %v7966_v61 = vadd.f32 %v7879_v14, %v7738_v58  ;;  %v7741_v57 = vadd.f32 %v14760_v39, %v7740_v32  ;;  %v7901_v58 = vsel %vm1840_vm7, %v7898_v54, %v7900_v33  ;;  %v7549_v49 = vunpack.c.l.bf16 %v8379_v29 }
 0x790   : > { %v8004_v11 = vmax.f32 %v7968_v16, 0.0  ;;  %v7969_v1 = vadd.f32 %v7885_v63, %v7749_v12  ;;  %v7897_v12 = vsel %vm1840_vm7, %v7894_v9, %v7896_v15 }
 0x791   : > { %v8002_v25 = vmax.f32 %v7966_v61, 0.0  ;;  %v7967_v7 = vadd.f32 %v7881_v8, %v7741_v57  ;;  %v7904_v61 = vrot.slane %v8588_v45, 3  ;;  %v7906_v57 = vrot.slane %v7548_v2, 3 }
 0x792   : > { %8427 = vst [vmem:[%s13511_s10 + $0x19e] sm:$0x3] %v8004_v11  ;;  %8428 = vst [vmem:[%s13511_s10 + $0x19c] sm:$0xf0] %v8004_v11  ;;  %v8005_v59 = vmax.f32 %v7969_v1, 0.0  ;;  %v7902_v11 = vrot.slane %v8587_v34, 3 }
 0x793   : > { %8425 = vst [vmem:[%s13511_s10 + $0x18e] sm:$0xfc] %v8002_v25  ;;  %v8003_v52 = vmax.f32 %v7967_v7, 0.0  ;;  %v9111_v23 = vpop.f32.mrb[224].mxu0  ;;  %v7908_v50 = vrot.slane %v7549_v49, 3  ;;  %v7907_v42 = vsel %vm1840_vm7, %v7904_v61, %v7906_v57 }
 0x794   : > { %8429 = vst [vmem:[%s13511_s10 + $0x1a4] sm:$0xff] %v8005_v59  ;;  %v7762_v10 = vadd.f32 %v9111_v23, %v14760_v39  ;;  %v7753_v26 = vpop.f32.mrb[225].mxu0  ;;  %v7903_v23 = vsel %vm1840_vm7, %v7900_v33, %v7902_v11  ;;  %v7905_v53 = vsel %vm1840_vm7, %v7902_v11, %v7904_v61 }
 0x795   : > { %8426 = vst [vmem:[%s13511_s10 + $0x196] sm:$0xff] %v8003_v52  ;;  %v7754_v44 = vadd.f32 %v14760_v39, %v7753_v26  ;;  %v9112_v36 = vpop.f32.mrb[226].mxu0  ;;  %v7909_v0 = vsel %vm1840_vm7, %v7906_v57, %v7908_v50 }
 0x796   : > { %v7972_v60 = vadd.f32 %v7891_v40, %v7762_v10  ;;  %v7765_v62 = vadd.f32 %v9112_v36, %v14760_v39  ;;  %v7756_v22 = vpop.f32.mrb[227].mxu0 }
 0x797   : > { %v7970_v24 = vadd.f32 %v7887_v43, %v7754_v44  ;;  %v7757_v18 = vadd.f32 %v14760_v39, %v7756_v22 }
 0x798   : > { %v8008_v48 = vmax.f32 %v7972_v60, 0.0  ;;  %v7973_v51 = vadd.f32 %v7893_v3, %v7765_v62 }
 0x799   : > { %v8006_v28 = vmax.f32 %v7970_v24, 0.0  ;;  %v7971_v31 = vadd.f32 %v7889_v20, %v7757_v18 }
 0x79a   : > { %8433 = vst [vmem:[%s13511_s10 + $0x1ba] sm:$0x3f] %v8008_v48  ;;  %v8009_v13 = vmax.f32 %v7973_v51, 0.0 }
 0x79b   : > { %8430 = vst [vmem:[%s13511_s10 + $0x1ac] sm:$0xf] %v8006_v28  ;;  %8431 = vst [vmem:[%s13511_s10 + $0x1aa] sm:$0xc0] %v8006_v28  ;;  %v8007_v46 = vmax.f32 %v7971_v31, 0.0  ;;  %v9115_v47 = vpop.f32.mrb[228].mxu0 }
 0x79c   : > { %8434 = vst [vmem:[%s13511_s10 + $0x1c0] sm:$0xff] %v8009_v13  ;;  %v7778_v6 = vadd.f32 %v9115_v47, %v14760_v39  ;;  %v7769_v56 = vpop.f32.mrb[229].mxu0 }
 0x79d   : > { %8432 = vst [vmem:[%s13511_s10 + $0x1b2] sm:$0xff] %v8007_v46  ;;  %v7770_v14 = vadd.f32 %v14760_v39, %v7769_v56  ;;  %v9116_v55 = vpop.f32.mrb[230].mxu0 }
 0x79e   : > { %v7976_v63 = vadd.f32 %v7899_v4, %v7778_v6  ;;  %v7781_v37 = vadd.f32 %v9116_v55, %v14760_v39  ;;  %v7772_v16 = vpop.f32.mrb[231].mxu0 }
 0x79f   : > { %v7974_v32 = vadd.f32 %v7895_v19, %v7770_v14  ;;  %v7773_v8 = vadd.f32 %v14760_v39, %v7772_v16 }
 0x7a0   : > { %v8012_v41 = vmax.f32 %v7976_v63, 0.0  ;;  %v7977_v5 = vadd.f32 %v7901_v58, %v7781_v37 }
 0x7a1   : > { %v8010_v1 = vmax.f32 %v7974_v32, 0.0  ;;  %v7975_v21 = vadd.f32 %v7897_v12, %v7773_v8 }
 0x7a2   : > { %8437 = vst [vmem:[%s13511_s10 + $0x1d6] sm:$0xff] %v8012_v41  ;;  %v8013_v38 = vmax.f32 %v7977_v5, 0.0 }
 0x7a3   : > { %8435 = vst [vmem:[%s13511_s10 + $0x1c8] sm:$0xff] %v8010_v1  ;;  %v8011_v25 = vmax.f32 %v7975_v21, 0.0  ;;  %v9119_v7 = vpop.f32.mrb[232].mxu0 }
 0x7a4   : > { %8438 = vst [vmem:[%s13511_s10 + $0x1de] sm:$0x3] %v8013_v38  ;;  %8439 = vst [vmem:[%s13511_s10 + $0x1dc] sm:$0xf0] %v8013_v38  ;;  %v7794_v59 = vadd.f32 %v9119_v7, %v14760_v39  ;;  %v7785_v52 = vpop.f32.mrb[233].mxu0 }
 0x7a5   : > { %8436 = vst [vmem:[%s13511_s10 + $0x1ce] sm:$0xfc] %v8011_v25  ;;  %v7786_v40 = vadd.f32 %v14760_v39, %v7785_v52  ;;  %v9120_v27 = vpop.f32.mrb[234].mxu0 }
 0x7a6   : > { %v7980_v10 = vadd.f32 %v7907_v42, %v7794_v59  ;;  %v7797_v26 = vadd.f32 %v9120_v27, %v14760_v39  ;;  %v7788_v43 = vpop.f32.mrb[235].mxu0 }
 0x7a7   : > { %v7978_v44 = vadd.f32 %v7903_v23, %v7786_v40  ;;  %v7789_v36 = vadd.f32 %v14760_v39, %v7788_v43 }
 0x7a8   : > { %v8016_v3 = vmax.f32 %v7980_v10, 0.0  ;;  %v7981_v30 = vadd.f32 %v7909_v0, %v7797_v26 }
 0x7a9   : > { %v8014_v60 = vmax.f32 %v7978_v44, 0.0  ;;  %v7979_v62 = vadd.f32 %v7905_v53, %v7789_v36 }
 0x7aa   : > { %8443 = vst [vmem:[%s13511_s10 + $0x1f2] sm:$0xff] %v8016_v3  ;;  %v8017_v22 = vmax.f32 %v7981_v30, 0.0 }
 0x7ab   : > { %8440 = vst [vmem:[%s13511_s10 + $0x1e4] sm:$0xff] %v8014_v60  ;;  %v8015_v39 = vmax.f32 %v7979_v62, 0.0 }
 0x7ac   : > { %8444 = vst [vmem:[%s13511_s10 + $0x1fa] sm:$0x3f] %v8017_v22 }
 0x7ad   : > { %8441 = vst [vmem:[%s13511_s10 + $0x1ec] sm:$0xf] %v8015_v39  ;;  %8442 = vst [vmem:[%s13511_s10 + $0x1ea] sm:$0xc0] %v8015_v39 }
 0x7ae   : > { %9294 = shalt.err (!%p9291_p3)
}
 0x7af   : > { %s9295_s23 = scalar_lea.hbm %s14894_s26, 8192  ;;  %s9299_s17 = scalar_lea.hbm %s14953_s8, 32768 }
 0x7b0   : > { %p9296_p4 = scmp.ne.s32.totalorder %s14894_s26, %s9295_s23  ;;  %p9300_p9 = scmp.lt.u32.totalorder %s14894_s26, %s14953_s8 }
 0x7b1   : > { %p9301_p10 = scmp.lt.u32.totalorder %s9299_s17, %s9295_s23  ;;  %p9303_p12 = scmp.lt.u32.totalorder %s9295_s23, %s14894_s26 }
 0x7b2   : > { %p9297_p7 = pnand %p9296_p4, %p9437_p5 }
 0x7b3   : > { %p9302_p11 = por %p9301_p10, %p9300_p9 }
 0x7b4   : > { %p9298_p8 = pneg %p9297_p7 }
 0x7b5   : > { %p9304_p13 = por %p9303_p12, %p9302_p11 }
 0x7b7   : > { %p9305_p0 = pnand %p9304_p13, %p9298_p8 }
 0x7b9   : > { %9308 = shalt.err (!%p9305_p0)
}
 0x7ba   : > { %s9352_s24 = smov 128   ;;  %s9353_s19 = smov 8  }
 0x7bb   : > { %9126 = dma.vmem_to_hbm [thread:$0]  (%p9437_p5), %s14896_s21, 8192, %s14894_s26, %s14904_s9, %s9352_s24, %s9352_s24, %s9353_s19  }
 0x7bc PF: > { %p9132_p1 = scmp.ge.s32.totalorder %s9343_s30, 2  ;;  %s8093_s22 = sand.u32 1, %s9331_s27  }
 0x7bd   : > { %s8094_s20 = scalar_lea.sflag [#allocation4], %s8093_s22 }
 0x7be   : > { %p9129_p2 = pnand %p9132_p1, %p9441_p6 }
 0x7c0   : > { %9326 = dma.done.wait (!%p9129_p2), %s8094_s20, 8192  }
 0x7c1   : > { %9328 = vsyncadd (!%p9129_p2), %s8094_s20, 4294959104  ;;  %p18_p3 = scmp.ge.s32.totalorder %s9424_s11, 6   ;;  %s15470_s27 = smov %s9335_s28 }
 0x7c2   : > { %s15471_s28 = smov %s9339_s29  ;;  %s15472_s29 = smov %s9435_s14 }
 0x7c3   : > { %s15473_s30 = smov %s9424_s11  ;;  %20 = sbr.rel (!%p18_p3) target bundleno = 3 (0x3), region = 89 }
 0x7ca   :  { %8099 = vsyncpa [#allocation4], 1 }
 0x7cb   :  { %8101 = vsyncpa [#allocation4 + $0x1], 1 }

</bundles_post_ra>
